<compile_context>
chip_gen: v6e
topology: v6e:2x2x1
jax: 0.10.0
libtpu: 0.0.40
codegen_flags: <defaults>
</compile_context>

<pallas_src>
import functools

import jax
import jax.numpy as jnp
from jax.experimental import pallas as pl
from jax.experimental.pallas import tpu as pltpu

# ------------------------- configuration -------------------------
D = 32            # hidden size
NH = 4            # attention heads
DH = D // NH      # head dim
MLP = 4 * D       # mlp_ratio = 4
VIT_DEPTH = 2
TXT_LAYERS = 1
FUS_LAYERS = 1
IMG = 32
PATCH = 16
CIN = 3
VOCAB = 64
MAX_POS = 16
LN_EPS_VIT = 1e-6
LN_EPS_BERT = 1e-12

# bf16 operands for the MXU (f32 accumulation).  All elementwise math stays f32.
MXU_DTYPE = jnp.bfloat16


# ------------------------- in-kernel helpers (traced inside kernels) -------------------------

def _dot(a, b):
    """MXU matmul, bf16 operands, f32 accumulation."""
    return jnp.dot(a.astype(MXU_DTYPE), b.astype(MXU_DTYPE),
                   preferred_element_type=jnp.float32)


def _dot_nt(a, b):
    """A @ B^T (contract last dims of both), bf16 operands, f32 accumulation."""
    return jax.lax.dot_general(a.astype(MXU_DTYPE), b.astype(MXU_DTYPE),
                               (((1,), (1,)), ((), ())),
                               preferred_element_type=jnp.float32)


def _ln(x, g, b, eps):
    mu = jnp.mean(x, axis=-1, keepdims=True)
    var = jnp.mean((x - mu) ** 2, axis=-1, keepdims=True)
    return (x - mu) * jax.lax.rsqrt(var + eps) * g + b


def _mha(x_q, x_kv, mask_add,
         wq_ref, bq_ref, wk_ref, bk_ref, wv_ref, bv_ref, wo_ref, bo_ref):
    """Multi-head attention on VMEM-resident activations.

    Weights are per-head stacked refs: wq/wk/wv (NH, D, DH), bq/bk/bv (NH, 1, DH),
    wo (NH, DH, D), bo (1, D).  The head merge is folded into the output
    projection: out = sum_h softmax(q_h k_h^T) v_h @ wo[h] + bo, which avoids
    any lane concatenation / in-kernel head transposes.
    mask_add: additive mask of shape (1, Tk) or None.
    """
    scale = 1.0 / float(DH) ** 0.5
    acc = None
    for h in range(NH):                       # NH is small & static -> unrolled
        qh = _dot(x_q, wq_ref[h]) + bq_ref[h]     # (Tq, DH)
        kh = _dot(x_kv, wk_ref[h]) + bk_ref[h]    # (Tk, DH)
        vh = _dot(x_kv, wv_ref[h]) + bv_ref[h]    # (Tk, DH)
        s = _dot_nt(qh, kh) * scale               # (Tq, Tk)
        if mask_add is not None:
            s = s + mask_add
        s = s - jnp.max(s, axis=-1, keepdims=True)
        p = jnp.exp(s)
        # approx reciprocal runs on the EUP slot; ~1e-3 rel. error vs exact divide
        # (acceptable for inference vs the PyTorch reference).
        p = p * pl.reciprocal(jnp.sum(p, axis=-1, keepdims=True), approx=True)
        ctx = _dot(p, vh)                         # (Tq, DH)
        contrib = _dot(ctx, wo_ref[h])            # (Tq, D)
        acc = contrib if acc is None else acc + contrib
    return acc + bo_ref[...]


def _gelu(x):
    # TODO(synk): PyTorch nn.GELU / HF "gelu" is exact erf-GELU; using the tanh
    # approximation for guaranteed Mosaic lowering of transcendentals.
    return jax.nn.gelu(x, approximate=True)


# ------------------------- Pallas kernels (one per fused block) -------------------------

def _patch_embed_kernel(p_ref, w_ref, b_ref, pos_ref, o_ref):
    # im2col'd patches @ W + b + pos_embed[1:]  (one batch element per grid step)
    o_ref[0] = _dot(p_ref[0], w_ref[...]) + b_ref[...] + pos_ref[...]


def _vit_block_kernel(x_ref,
                      wq_ref, bq_ref, wk_ref, bk_ref, wv_ref, bv_ref, wo_ref, bo_ref,
                      g1_ref, b1_ref, g2_ref, b2_ref,
                      fc1_w_ref, fc1_b_ref, fc2_w_ref, fc2_b_ref,
                      gf_ref, bf_ref,
                      o_ref, *, final_ln):
    x = x_ref[0]                                                    # (T, D)
    # pre-LN attention sub-block (+ residual)
    h = _ln(x, g1_ref[...], b1_ref[...], LN_EPS_VIT)
    a = _mha(h, h, None, wq_ref, bq_ref, wk_ref, bk_ref, wv_ref, bv_ref, wo_ref, bo_ref)
    x = x + a
    # pre-LN MLP sub-block (+ residual)
    h = _ln(x, g2_ref[...], b2_ref[...], LN_EPS_VIT)
    h = _dot(h, fc1_w_ref[...]) + fc1_b_ref[...]
    h = _gelu(h)
    h = _dot(h, fc2_w_ref[...]) + fc2_b_ref[...]
    x = x + h
    if final_ln:                                                    # final ViT LN folded in
        x = _ln(x, gf_ref[...], bf_ref[...], LN_EPS_VIT)
    o_ref[0] = x


def _bert_embed_kernel(we_ref, pos_ref, type_ref, g_ref, b_ref, o_ref):
    x = we_ref[0] + pos_ref[...] + type_ref[...]
    o_ref[0] = _ln(x, g_ref[...], b_ref[...], LN_EPS_BERT)


def _bert_text_layer_kernel(x_ref, m_ref,
                            wq_ref, bq_ref, wk_ref, bk_ref, wv_ref, bv_ref, wo_ref, bo_ref,
                            ga_ref, ba_ref,
                            wi_ref, bi_ref, wo2_ref, bo2_ref, go_ref, boo_ref,
                            o_ref):
    x = x_ref[0]                                                    # (T, D)
    addm = (1.0 - m_ref[0]) * -10000.0                              # (1, T), built in-kernel
    # self-attention -> +residual -> LN (post-LN)
    a = _mha(x, x, addm, wq_ref, bq_ref, wk_ref, bk_ref, wv_ref, bv_ref, wo_ref, bo_ref)
    x = _ln(a + x, ga_ref[...], ba_ref[...], LN_EPS_BERT)
    # FFN -> +residual -> LN
    h = _dot(x, wi_ref[...]) + bi_ref[...]
    h = _gelu(h)
    h = _dot(h, wo2_ref[...]) + bo2_ref[...]
    x = _ln(h + x, go_ref[...], boo_ref[...], LN_EPS_BERT)
    o_ref[0] = x


def _bert_fusion_layer_kernel(x_ref, m_ref, enc_ref,
                              wq_ref, bq_ref, wk_ref, bk_ref, wv_ref, bv_ref, wo_ref, bo_ref,
                              ga_ref, ba_ref,
                              xwq_ref, xbq_ref, xwk_ref, xbk_ref, xwv_ref, xbv_ref,
                              xwo_ref, xbo_ref, gx_ref, bx_ref,
                              wi_ref, bi_ref, wo2_ref, bo2_ref, go_ref, boo_ref,
                              o_ref):
    x = x_ref[0]                                                    # (Tt, D)
    enc = enc_ref[0]                                                # (Ti, D)
    addm = (1.0 - m_ref[0]) * -10000.0                              # (1, Tt)
    # self-attention -> +residual -> LN
    a = _mha(x, x, addm, wq_ref, bq_ref, wk_ref, bk_ref, wv_ref, bv_ref, wo_ref, bo_ref)
    x = _ln(a + x, ga_ref[...], ba_ref[...], LN_EPS_BERT)
    # cross-attention to image tokens (image_atts == ones -> no mask at all)
    a = _mha(x, enc, None, xwq_ref, xbq_ref, xwk_ref, xbk_ref, xwv_ref, xbv_ref,
             xwo_ref, xbo_ref)
    x = _ln(a + x, gx_ref[...], bx_ref[...], LN_EPS_BERT)
    # FFN -> +residual -> LN
    h = _dot(x, wi_ref[...]) + bi_ref[...]
    h = _gelu(h)
    h = _dot(h, wo2_ref[...]) + bo2_ref[...]
    x = _ln(h + x, go_ref[...], boo_ref[...], LN_EPS_BERT)
    o_ref[0] = x


def _itm_kernel(x_ref, w_ref, b_ref, o_ref):
    o_ref[...] = _dot(x_ref[...], w_ref[...]) + b_ref[...]


# ------------------------- pallas_call wrappers -------------------------

def _batched_imap(nd):
    tail = (0,) * (nd - 1)
    def imap(b):
        return (b,) + tail
    return imap


def _const_imap(nd):
    zeros = (0,) * nd
    def imap(b):
        return zeros
    return imap


def _block_call(kernel, batch, out_shape, args, batched_flags):
    """Grid over the batch dim; batched args get (1, *rest) blocks, weights get
    full-array blocks with a constant index map (fetched once, kept in VMEM)."""
    in_specs = []
    for a, batched in zip(args, batched_flags):
        if batched:
            in_specs.append(pl.BlockSpec((1,) + a.shape[1:], _batched_imap(a.ndim)))
        else:
            in_specs.append(pl.BlockSpec(a.shape, _const_imap(a.ndim)))
    out_spec = pl.BlockSpec((1,) + out_shape.shape[1:], _batched_imap(len(out_shape.shape)))
    return pl.pallas_call(
        kernel,
        out_shape=out_shape,
        grid=(batch,),
        in_specs=in_specs,
        out_specs=out_spec,
        compiler_params=pltpu.CompilerParams(dimension_semantics=("parallel",)),
    )(*args)


def _single_call(kernel, out_shape, args):
    in_specs = [pl.BlockSpec(a.shape, _const_imap(a.ndim)) for a in args]
    out_spec = pl.BlockSpec(out_shape.shape, _const_imap(len(out_shape.shape)))
    return pl.pallas_call(
        kernel, out_shape=out_shape, grid=(1,),
        in_specs=in_specs, out_specs=out_spec,
    )(*args)


# ------------------------- model forward -------------------------

def vit_forward(image, p):
    """timm VisionTransformer forward_features (pre-LN blocks, final LN)."""
    B = image.shape[0]
    nH = nW = IMG // PATCH
    N = nH * nW
    # non-overlapping conv == im2col (c, ph, pw ordering) + matmul (matmul fused below)
    patches = image.reshape(B, CIN, nH, PATCH, nW, PATCH)
    patches = patches.transpose(0, 2, 4, 1, 3, 5).reshape(B, N, CIN * PATCH * PATCH)

    # fused patch matmul + bias + pos_embed add (one grid step per batch element)
    emb = _block_call(
        _patch_embed_kernel, B,
        jax.ShapeDtypeStruct((B, N, D), jnp.float32),
        (patches, p["patch_w"], p["patch_b"], p["pos_embed"][1:]),
        (True, False, False, False))

    # cls token (+ its pos embedding) prepended with cheap XLA glue
    cls_row = jnp.broadcast_to((p["cls_token"] + p["pos_embed"][0:1])[None, :, :], (B, 1, D))
    x = jnp.concatenate([cls_row, emb], axis=1)                     # (B, N+1, D)
    T = N + 1

    nblocks = len(p["blocks"])
    for li, blk in enumerate(p["blocks"]):
        kern = functools.partial(_vit_block_kernel, final_ln=(li == nblocks - 1))
        args = (x,
                blk["wq"], blk["bq"], blk["wk"], blk["bk"], blk["wv"], blk["bv"],
                blk["wo"], blk["bo"],
                blk["ln1_g"], blk["ln1_b"], blk["ln2_g"], blk["ln2_b"],
                blk["fc1_w"], blk["fc1_b"], blk["fc2_w"], blk["fc2_b"],
                p["lnf_g"], p["lnf_b"])
        flags = (True,) + (False,) * (len(args) - 1)
        x = _block_call(kern, B, jax.ShapeDtypeStruct((B, T, D), jnp.float32), args, flags)
    return x


def vl_transformer_itm_forward(image, input_ids, attention_mask, params):
    # 1) visual encoder (final ViT LN folded into its last block kernel)
    image_embeds = vit_forward(image, params["vit"])                # (B, Ti, D)
    B, Tt = input_ids.shape

    # raw text mask; the additive -10000 mask is built inside the kernels.
    mask3 = attention_mask.astype(jnp.float32).reshape(B, 1, Tt)

    bp = params["bert"]
    # 2) BERT embeddings: gather in XLA, (add + LN) fused in one kernel.
    we = jnp.take(bp["word_emb"], input_ids, axis=0)                # (B, Tt, D)
    x = _block_call(
        _bert_embed_kernel, B,
        jax.ShapeDtypeStruct((B, Tt, D), jnp.float32),
        (we, bp["pos_emb"][:Tt], bp["type_emb"][0:1], bp["emb_ln_g"], bp["emb_ln_b"]),
        (True, False, False, False, False))

    # 3) text encoder, mode='text'  (one fused kernel per layer)
    for lp in bp["text_layers"]:
        args = (x, mask3,
                lp["wq"], lp["bq"], lp["wk"], lp["bk"], lp["wv"], lp["bv"], lp["wo"], lp["bo"],
                lp["ln_att_g"], lp["ln_att_b"],
                lp["wi"], lp["bi"], lp["wo2"], lp["bo2"], lp["ln_out_g"], lp["ln_out_b"])
        flags = (True, True) + (False,) * (len(args) - 2)
        x = _block_call(_bert_text_layer_kernel, B,
                        jax.ShapeDtypeStruct((B, Tt, D), jnp.float32), args, flags)

    # 4) text encoder, mode='fusion' (self-attn + cross-attn to image + FFN, fused per layer)
    for lp in bp["fusion_layers"]:
        args = (x, mask3, image_embeds,
                lp["wq"], lp["bq"], lp["wk"], lp["bk"], lp["wv"], lp["bv"], lp["wo"], lp["bo"],
                lp["ln_att_g"], lp["ln_att_b"],
                lp["xwq"], lp["xbq"], lp["xwk"], lp["xbk"], lp["xwv"], lp["xbv"],
                lp["xwo"], lp["xbo"], lp["ln_x_g"], lp["ln_x_b"],
                lp["wi"], lp["bi"], lp["wo2"], lp["bo2"], lp["ln_out_g"], lp["ln_out_b"])
        flags = (True, True, True) + (False,) * (len(args) - 3)
        x = _block_call(_bert_fusion_layer_kernel, B,
                        jax.ShapeDtypeStruct((B, Tt, D), jnp.float32), args, flags)

    # 5) ITM head on [CLS]
    cls = x[:, 0, :]                                                # (B, D)
    return _single_call(_itm_kernel, jax.ShapeDtypeStruct((B, 2), jnp.float32),
                        (cls, params["itm_w"], params["itm_b"]))


# ------------------------- deterministic parameter init -------------------------

def _stack_proj_in(w, b):
    """(D, D) -> (NH, D, DH); (1, D) -> (NH, 1, DH): output features split per head."""
    return w.reshape(D, NH, DH).transpose(1, 0, 2), b.reshape(1, NH, DH).transpose(1, 0, 2)


def _stack_proj_out(w):
    """(D, D) -> (NH, DH, D): input rows of the output projection split per head."""
    return w.reshape(NH, DH, D)


def init_params(key):
    keys = iter(jax.random.split(key, 512))

    def rnd(*shape, s=0.02):
        return jax.random.normal(next(keys), shape, dtype=jnp.float32) * s

    def ln_pair():
        return jnp.ones((1, D), jnp.float32), jnp.zeros((1, D), jnp.float32)

    def attn_params(prefix=""):
        wq, bq = _stack_proj_in(rnd(D, D), rnd(1, D))
        wk, bk = _stack_proj_in(rnd(D, D), rnd(1, D))
        wv, bv = _stack_proj_in(rnd(D, D), rnd(1, D))
        return {prefix + "wq": wq, prefix + "bq": bq,
                prefix + "wk": wk, prefix + "bk": bk,
                prefix + "wv": wv, prefix + "bv": bv,
                prefix + "wo": _stack_proj_out(rnd(D, D)),
                prefix + "bo": rnd(1, D)}

    # --- ViT ---
    n_patches = (IMG // PATCH) ** 2
    vit = {
        "patch_w": rnd(CIN * PATCH * PATCH, D),
        "patch_b": rnd(1, D),
        "cls_token": rnd(1, D),
        "pos_embed": rnd(n_patches + 1, D),
        "blocks": [],
    }
    for _ in range(VIT_DEPTH):
        blk = attn_params()
        blk["ln1_g"], blk["ln1_b"] = ln_pair()
        blk["ln2_g"], blk["ln2_b"] = ln_pair()
        blk["fc1_w"] = rnd(D, MLP); blk["fc1_b"] = rnd(1, MLP)
        blk["fc2_w"] = rnd(MLP, D); blk["fc2_b"] = rnd(1, D)
        vit["blocks"].append(blk)
    vit["lnf_g"], vit["lnf_b"] = ln_pair()

    # --- BERT ---
    bert = {
        "word_emb": rnd(VOCAB, D),
        "pos_emb": rnd(MAX_POS, D),
        "type_emb": rnd(2, D),
        "text_layers": [],
        "fusion_layers": [],
    }
    bert["emb_ln_g"], bert["emb_ln_b"] = ln_pair()

    def bert_layer(cross):
        lp = attn_params()
        lp["ln_att_g"], lp["ln_att_b"] = ln_pair()
        lp["wi"] = rnd(D, MLP); lp["bi"] = rnd(1, MLP)
        lp["wo2"] = rnd(MLP, D); lp["bo2"] = rnd(1, D)
        lp["ln_out_g"], lp["ln_out_b"] = ln_pair()
        if cross:
            lp.update(attn_params("x"))
            lp["ln_x_g"], lp["ln_x_b"] = ln_pair()
        return lp

    for _ in range(TXT_LAYERS):
        bert["text_layers"].append(bert_layer(False))
    for _ in range(FUS_LAYERS):
        bert["fusion_layers"].append(bert_layer(True))

    return {"vit": vit, "bert": bert, "itm_w": rnd(D, 2), "itm_b": rnd(1, 2)}


# ------------------------- main -------------------------

if __name__ == "__main__":
    key = jax.random.PRNGKey(0)
    pkey, ikey, tkey = jax.random.split(key, 3)

    params = init_params(pkey)

    B, Tt = 2, 8
    image = jax.random.normal(ikey, (B, CIN, IMG, IMG), dtype=jnp.float32)   # NCHW
    input_ids = jax.random.randint(tkey, (B, Tt), 0, VOCAB, dtype=jnp.int32)
    attention_mask = jnp.ones((B, Tt), jnp.int32).at[1, -1].set(0)

    fwd = jax.jit(vl_transformer_itm_forward)
    out = jax.block_until_ready(fwd(image, input_ids, attention_mask, params))

    assert out.shape == (B, 2), out.shape
    assert jnp.all(jnp.isfinite(out))
    print("KERNEL_OK")
</pallas_src>

<mosaic_0001>
module attributes {stable_mosaic.version = 11 : i64} {
  func.func @_bert_embed_kernel(%arg0: i32, %arg1: memref<1x8x32xf32, #tpu.memory_space<vmem>>, %arg2: memref<8x32xf32, #tpu.memory_space<vmem>>, %arg3: memref<1x32xf32, #tpu.memory_space<vmem>>, %arg4: memref<1x32xf32, #tpu.memory_space<vmem>>, %arg5: memref<1x32xf32, #tpu.memory_space<vmem>>, %arg6: memref<1x8x32xf32, #tpu.memory_space<vmem>>) attributes {dimension_semantics = [#tpu.dimension_semantics<parallel>], iteration_bounds = array<i64: 2>, scalar_prefetch = 0 : i64, scratch_operands = 0 : i64, tpu.core_type = #tpu.core_type<tc>, window_params = [{transform_indices = @transform_0, window_bounds = array<i64: 1, 8, 32>}, {pipeline_mode = #tpu.pipeline_mode<synchronous>, transform_indices = @transform_1, window_bounds = array<i64: 8, 32>}, {pipeline_mode = #tpu.pipeline_mode<synchronous>, transform_indices = @transform_2, window_bounds = array<i64: 1, 32>}, {pipeline_mode = #tpu.pipeline_mode<synchronous>, transform_indices = @transform_3, window_bounds = array<i64: 1, 32>}, {pipeline_mode = #tpu.pipeline_mode<synchronous>, transform_indices = @transform_4, window_bounds = array<i64: 1, 32>}, {transform_indices = @transform_5, window_bounds = array<i64: 1, 8, 32>}]} {
    %c0 = arith.constant 0 : index
    %c0_0 = arith.constant 0 : index
    %c0_1 = arith.constant 0 : index
    %0 = vector.load %arg1[%c0, %c0_0, %c0_1] : memref<1x8x32xf32, #tpu.memory_space<vmem>>, vector<1x8x32xf32>
    %1 = vector.shape_cast %0 : vector<1x8x32xf32> to vector<8x32xf32>
    %c0_2 = arith.constant 0 : index
    %c0_3 = arith.constant 0 : index
    %2 = vector.load %arg2[%c0_2, %c0_3] : memref<8x32xf32, #tpu.memory_space<vmem>>, vector<8x32xf32>
    %3 = arith.addf %1, %2 : vector<8x32xf32>
    %c0_4 = arith.constant 0 : index
    %c0_5 = arith.constant 0 : index
    %4 = vector.load %arg3[%c0_4, %c0_5] : memref<1x32xf32, #tpu.memory_space<vmem>>, vector<1x32xf32>
    %5 = vector.broadcast %4 : vector<1x32xf32> to vector<8x32xf32>
    %6 = arith.addf %3, %5 : vector<8x32xf32>
    %c0_6 = arith.constant 0 : index
    %c0_7 = arith.constant 0 : index
    %7 = vector.load %arg4[%c0_6, %c0_7] : memref<1x32xf32, #tpu.memory_space<vmem>>, vector<1x32xf32>
    %c0_8 = arith.constant 0 : index
    %c0_9 = arith.constant 0 : index
    %8 = vector.load %arg5[%c0_8, %c0_9] : memref<1x32xf32, #tpu.memory_space<vmem>>, vector<1x32xf32>
    %cst = arith.constant dense<0.000000e+00> : vector<8xf32>
    %9 = vector.multi_reduction <add>, %6, %cst [1] : vector<8x32xf32> to vector<8xf32>
    %10 = vector.shape_cast %9 : vector<8xf32> to vector<8x1xf32>
    %cst_10 = arith.constant 3.200000e+01 : f32
    %11 = vector.broadcast %cst_10 : f32 to vector<8x1xf32>
    %12 = arith.divf %10, %11 : vector<8x1xf32>
    %13 = vector.broadcast %12 : vector<8x1xf32> to vector<8x32xf32>
    %14 = arith.subf %6, %13 : vector<8x32xf32>
    %15 = arith.mulf %14, %14 : vector<8x32xf32>
    %cst_11 = arith.constant dense<0.000000e+00> : vector<8xf32>
    %16 = vector.multi_reduction <add>, %15, %cst_11 [1] : vector<8x32xf32> to vector<8xf32>
    %17 = vector.shape_cast %16 : vector<8xf32> to vector<8x1xf32>
    %cst_12 = arith.constant 3.200000e+01 : f32
    %18 = vector.broadcast %cst_12 : f32 to vector<8x1xf32>
    %19 = arith.divf %17, %18 : vector<8x1xf32>
    %20 = vector.broadcast %12 : vector<8x1xf32> to vector<8x32xf32>
    %21 = arith.subf %6, %20 : vector<8x32xf32>
    %cst_13 = arith.constant 9.99999996E-13 : f32
    %22 = vector.broadcast %cst_13 : f32 to vector<8x1xf32>
    %23 = arith.addf %19, %22 : vector<8x1xf32>
    %24 = math.rsqrt %23 : vector<8x1xf32>
    %25 = vector.broadcast %24 : vector<8x1xf32> to vector<8x32xf32>
    %26 = arith.mulf %21, %25 : vector<8x32xf32>
    %27 = vector.broadcast %7 : vector<1x32xf32> to vector<8x32xf32>
    %28 = arith.mulf %26, %27 : vector<8x32xf32>
    %29 = vector.broadcast %8 : vector<1x32xf32> to vector<8x32xf32>
    %30 = arith.addf %28, %29 : vector<8x32xf32>
    %c0_14 = arith.constant 0 : index
    %c0_15 = arith.constant 0 : index
    %c0_16 = arith.constant 0 : index
    %31 = vector.load %arg6[%c0_14, %c0_15, %c0_16] : memref<1x8x32xf32, #tpu.memory_space<vmem>>, vector<1x8x32xf32>
    %32 = vector.shape_cast %31 : vector<1x8x32xf32> to vector<8x32xf32>
    %33 = vector.shape_cast %30 : vector<8x32xf32> to vector<1x8x32xf32>
    tpu.vector_store %arg6[%c0_14, %c0_15, %c0_16], %33 {strides = array<i32>} : memref<1x8x32xf32, #tpu.memory_space<vmem>>, vector<1x8x32xf32>,
    return
  }
  func.func @transform_0(%arg0: i32) -> (i32, i32, i32) {
    %c0_i32 = arith.constant 0 : i32
    %c0_i32_0 = arith.constant 0 : i32
    %c0_i32_1 = arith.constant 0 : i32
    return %arg0, %c0_i32, %c0_i32_0 : i32, i32, i32
  }
  func.func @transform_1(%arg0: i32) -> (i32, i32) {
    %c0_i32 = arith.constant 0 : i32
    %c0_i32_0 = arith.constant 0 : i32
    %c0_i32_1 = arith.constant 0 : i32
    return %c0_i32, %c0_i32_0 : i32, i32
  }
  func.func @transform_2(%arg0: i32) -> (i32, i32) {
    %c0_i32 = arith.constant 0 : i32
    %c0_i32_0 = arith.constant 0 : i32
    %c0_i32_1 = arith.constant 0 : i32
    return %c0_i32, %c0_i32_0 : i32, i32
  }
  func.func @transform_3(%arg0: i32) -> (i32, i32) {
    %c0_i32 = arith.constant 0 : i32
    %c0_i32_0 = arith.constant 0 : i32
    %c0_i32_1 = arith.constant 0 : i32
    return %c0_i32, %c0_i32_0 : i32, i32
  }
  func.func @transform_4(%arg0: i32) -> (i32, i32) {
    %c0_i32 = arith.constant 0 : i32
    %c0_i32_0 = arith.constant 0 : i32
    %c0_i32_1 = arith.constant 0 : i32
    return %c0_i32, %c0_i32_0 : i32, i32
  }
  func.func @transform_5(%arg0: i32) -> (i32, i32, i32) {
    %c0_i32 = arith.constant 0 : i32
    %c0_i32_0 = arith.constant 0 : i32
    %c0_i32_1 = arith.constant 0 : i32
    return %arg0, %c0_i32, %c0_i32_0 : i32, i32, i32
  }
}

module attributes {stable_mosaic.version = 11 : i64} {
  func.func @_bert_text_layer_kernel(%arg0: i32, %arg1: memref<1x8x32xf32, #tpu.memory_space<vmem>>, %arg2: memref<1x1x8xf32, #tpu.memory_space<vmem>>, %arg3: memref<4x32x8xf32, #tpu.memory_space<vmem>>, %arg4: memref<4x1x8xf32, #tpu.memory_space<vmem>>, %arg5: memref<4x32x8xf32, #tpu.memory_space<vmem>>, %arg6: memref<4x1x8xf32, #tpu.memory_space<vmem>>, %arg7: memref<4x32x8xf32, #tpu.memory_space<vmem>>, %arg8: memref<4x1x8xf32, #tpu.memory_space<vmem>>, %arg9: memref<4x8x32xf32, #tpu.memory_space<vmem>>, %arg10: memref<1x32xf32, #tpu.memory_space<vmem>>, %arg11: memref<1x32xf32, #tpu.memory_space<vmem>>, %arg12: memref<1x32xf32, #tpu.memory_space<vmem>>, %arg13: memref<32x128xf32, #tpu.memory_space<vmem>>, %arg14: memref<1x128xf32, #tpu.memory_space<vmem>>, %arg15: memref<128x32xf32, #tpu.memory_space<vmem>>, %arg16: memref<1x32xf32, #tpu.memory_space<vmem>>, %arg17: memref<1x32xf32, #tpu.memory_space<vmem>>, %arg18: memref<1x32xf32, #tpu.memory_space<vmem>>, %arg19: memref<1x8x32xf32, #tpu.memory_space<vmem>>) attributes {dimension_semantics = [#tpu.dimension_semantics<parallel>], iteration_bounds = array<i64: 2>, scalar_prefetch = 0 : i64, scratch_operands = 0 : i64, tpu.core_type = #tpu.core_type<tc>, window_params = [{transform_indices = @transform_0, window_bounds = array<i64: 1, 8, 32>}, {transform_indices = @transform_1, window_bounds = array<i64: 1, 1, 8>}, {pipeline_mode = #tpu.pipeline_mode<synchronous>, transform_indices = @transform_2, window_bounds = array<i64: 4, 32, 8>}, {pipeline_mode = #tpu.pipeline_mode<synchronous>, transform_indices = @transform_3, window_bounds = array<i64: 4, 1, 8>}, {pipeline_mode = #tpu.pipeline_mode<synchronous>, transform_indices = @transform_4, window_bounds = array<i64: 4, 32, 8>}, {pipeline_mode = #tpu.pipeline_mode<synchronous>, transform_indices = @transform_5, window_bounds = array<i64: 4, 1, 8>}, {pipeline_mode = #tpu.pipeline_mode<synchronous>, transform_indices = @transform_6, window_bounds = array<i64: 4, 32, 8>}, {pipeline_mode = #tpu.pipeline_mode<synchronous>, transform_indices = @transform_7, window_bounds = array<i64: 4, 1, 8>}, {pipeline_mode = #tpu.pipeline_mode<synchronous>, transform_indices = @transform_8, window_bounds = array<i64: 4, 8, 32>}, {pipeline_mode = #tpu.pipeline_mode<synchronous>, transform_indices = @transform_9, window_bounds = array<i64: 1, 32>}, {pipeline_mode = #tpu.pipeline_mode<synchronous>, transform_indices = @transform_10, window_bounds = array<i64: 1, 32>}, {pipeline_mode = #tpu.pipeline_mode<synchronous>, transform_indices = @transform_11, window_bounds = array<i64: 1, 32>}, {pipeline_mode = #tpu.pipeline_mode<synchronous>, transform_indices = @transform_12, window_bounds = array<i64: 32, 128>}, {pipeline_mode = #tpu.pipeline_mode<synchronous>, transform_indices = @transform_13, window_bounds = array<i64: 1, 128>}, {pipeline_mode = #tpu.pipeline_mode<synchronous>, transform_indices = @transform_14, window_bounds = array<i64: 128, 32>}, {pipeline_mode = #tpu.pipeline_mode<synchronous>, transform_indices = @transform_15, window_bounds = array<i64: 1, 32>}, {pipeline_mode = #tpu.pipeline_mode<synchronous>, transform_indices = @transform_16, window_bounds = array<i64: 1, 32>}, {pipeline_mode = #tpu.pipeline_mode<synchronous>, transform_indices = @transform_17, window_bounds = array<i64: 1, 32>}, {transform_indices = @transform_18, window_bounds = array<i64: 1, 8, 32>}]} {
    %c0 = arith.constant 0 : index
    %c0_0 = arith.constant 0 : index
    %c0_1 = arith.constant 0 : index
    %0 = vector.load %arg1[%c0, %c0_0, %c0_1] : memref<1x8x32xf32, #tpu.memory_space<vmem>>, vector<1x8x32xf32>
    %1 = vector.shape_cast %0 : vector<1x8x32xf32> to vector<8x32xf32>
    %c0_2 = arith.constant 0 : index
    %c0_3 = arith.constant 0 : index
    %c0_4 = arith.constant 0 : index
    %2 = vector.load %arg2[%c0_2, %c0_3, %c0_4] : memref<1x1x8xf32, #tpu.memory_space<vmem>>, vector<1x1x8xf32>
    %3 = vector.shape_cast %2 : vector<1x1x8xf32> to vector<1x8xf32>
    %cst = arith.constant 1.000000e+00 : f32
    %4 = vector.broadcast %cst : f32 to vector<1x8xf32>
    %5 = arith.subf %4, %3 : vector<1x8xf32>
    %cst_5 = arith.constant -1.000000e+04 : f32
    %6 = vector.broadcast %cst_5 : f32 to vector<1x8xf32>
    %7 = arith.mulf %5, %6 : vector<1x8xf32>
    %c0_6 = arith.constant 0 : index
    %c0_7 = arith.constant 0 : index
    %c0_8 = arith.constant 0 : index
    %8 = vector.load %arg3[%c0_6, %c0_7, %c0_8] : memref<4x32x8xf32, #tpu.memory_space<vmem>>, vector<1x32x8xf32>
    %9 = vector.shape_cast %8 : vector<1x32x8xf32> to vector<32x8xf32>
    %10 = arith.truncf %1 : vector<8x32xf32> to vector<8x32xbf16>
    %11 = arith.truncf %9 : vector<32x8xf32> to vector<32x8xbf16>
    %cst_9 = arith.constant dense<0.000000e+00> : vector<8x8xf32>
    %12 = tpu.matmul %10, %11, %cst_9 {dimension_numbers = #tpu.dot_dimension_numbers<[1], [0], [0], [1], [0, 0, 1, 1], [], []>} : vector<8x32xbf16>, vector<32x8xbf16>, vector<8x8xf32> -> vector<8x8xf32>
    %c0_10 = arith.constant 0 : index
    %c0_11 = arith.constant 0 : index
    %c0_12 = arith.constant 0 : index
    %13 = vector.load %arg4[%c0_10, %c0_11, %c0_12] : memref<4x1x8xf32, #tpu.memory_space<vmem>>, vector<1x1x8xf32>
    %14 = vector.shape_cast %13 : vector<1x1x8xf32> to vector<1x8xf32>
    %15 = vector.broadcast %14 : vector<1x8xf32> to vector<8x8xf32>
    %16 = arith.addf %12, %15 : vector<8x8xf32>
    %c0_13 = arith.constant 0 : index
    %c0_14 = arith.constant 0 : index
    %c0_15 = arith.constant 0 : index
    %17 = vector.load %arg5[%c0_13, %c0_14, %c0_15] : memref<4x32x8xf32, #tpu.memory_space<vmem>>, vector<1x32x8xf32>
    %18 = vector.shape_cast %17 : vector<1x32x8xf32> to vector<32x8xf32>
    %19 = arith.truncf %1 : vector<8x32xf32> to vector<8x32xbf16>
    %20 = arith.truncf %18 : vector<32x8xf32> to vector<32x8xbf16>
    %cst_16 = arith.constant dense<0.000000e+00> : vector<8x8xf32>
    %21 = tpu.matmul %19, %20, %cst_16 {dimension_numbers = #tpu.dot_dimension_numbers<[1], [0], [0], [1], [0, 0, 1, 1], [], []>} : vector<8x32xbf16>, vector<32x8xbf16>, vector<8x8xf32> -> vector<8x8xf32>
    %c0_17 = arith.constant 0 : index
    %c0_18 = arith.constant 0 : index
    %c0_19 = arith.constant 0 : index
    %22 = vector.load %arg6[%c0_17, %c0_18, %c0_19] : memref<4x1x8xf32, #tpu.memory_space<vmem>>, vector<1x1x8xf32>
    %23 = vector.shape_cast %22 : vector<1x1x8xf32> to vector<1x8xf32>
    %24 = vector.broadcast %23 : vector<1x8xf32> to vector<8x8xf32>
    %25 = arith.addf %21, %24 : vector<8x8xf32>
    %c0_20 = arith.constant 0 : index
    %c0_21 = arith.constant 0 : index
    %c0_22 = arith.constant 0 : index
    %26 = vector.load %arg7[%c0_20, %c0_21, %c0_22] : memref<4x32x8xf32, #tpu.memory_space<vmem>>, vector<1x32x8xf32>
    %27 = vector.shape_cast %26 : vector<1x32x8xf32> to vector<32x8xf32>
    %28 = arith.truncf %1 : vector<8x32xf32> to vector<8x32xbf16>
    %29 = arith.truncf %27 : vector<32x8xf32> to vector<32x8xbf16>
    %cst_23 = arith.constant dense<0.000000e+00> : vector<8x8xf32>
    %30 = tpu.matmul %28, %29, %cst_23 {dimension_numbers = #tpu.dot_dimension_numbers<[1], [0], [0], [1], [0, 0, 1, 1], [], []>} : vector<8x32xbf16>, vector<32x8xbf16>, vector<8x8xf32> -> vector<8x8xf32>
    %c0_24 = arith.constant 0 : index
    %c0_25 = arith.constant 0 : index
    %c0_26 = arith.constant 0 : index
    %31 = vector.load %arg8[%c0_24, %c0_25, %c0_26] : memref<4x1x8xf32, #tpu.memory_space<vmem>>, vector<1x1x8xf32>
    %32 = vector.shape_cast %31 : vector<1x1x8xf32> to vector<1x8xf32>
    %33 = vector.broadcast %32 : vector<1x8xf32> to vector<8x8xf32>
    %34 = arith.addf %30, %33 : vector<8x8xf32>
    %35 = arith.truncf %16 : vector<8x8xf32> to vector<8x8xbf16>
    %36 = arith.truncf %25 : vector<8x8xf32> to vector<8x8xbf16>
    %cst_27 = arith.constant dense<0.000000e+00> : vector<8x8xf32>
    %37 = tpu.matmul %35, %36, %cst_27 {dimension_numbers = #tpu.dot_dimension_numbers<[1], [1], [0], [0], [0, 0, 1, 0], [], []>} : vector<8x8xbf16>, vector<8x8xbf16>, vector<8x8xf32> -> vector<8x8xf32>
    %cst_28 = arith.constant 0.353553385 : f32
    %38 = vector.broadcast %cst_28 : f32 to vector<8x8xf32>
    %39 = arith.mulf %37, %38 : vector<8x8xf32>
    %40 = vector.broadcast %7 : vector<1x8xf32> to vector<8x8xf32>
    %41 = arith.addf %39, %40 : vector<8x8xf32>
    %cst_29 = arith.constant dense<0xFF800000> : vector<8xf32>
    %42 = vector.multi_reduction <maximumf>, %41, %cst_29 [1] : vector<8x8xf32> to vector<8xf32>
    %43 = vector.shape_cast %42 : vector<8xf32> to vector<8x1xf32>
    %44 = vector.broadcast %43 : vector<8x1xf32> to vector<8x8xf32>
    %45 = arith.subf %41, %44 : vector<8x8xf32>
    %46 = math.exp %45 : vector<8x8xf32>
    %cst_30 = arith.constant dense<0.000000e+00> : vector<8xf32>
    %47 = vector.multi_reduction <add>, %46, %cst_30 [1] : vector<8x8xf32> to vector<8xf32>
    %48 = vector.shape_cast %47 : vector<8xf32> to vector<8x1xf32>
    %49 = tpu.reciprocal %48 {approx = true} : vector<8x1xf32> -> vector<8x1xf32>
    %50 = vector.broadcast %49 : vector<8x1xf32> to vector<8x8xf32>
    %51 = arith.mulf %46, %50 : vector<8x8xf32>
    %52 = arith.truncf %51 : vector<8x8xf32> to vector<8x8xbf16>
    %53 = arith.truncf %34 : vector<8x8xf32> to vector<8x8xbf16>
    %cst_31 = arith.constant dense<0.000000e+00> : vector<8x8xf32>
    %54 = tpu.matmul %52, %53, %cst_31 {dimension_numbers = #tpu.dot_dimension_numbers<[1], [0], [0], [1], [0, 0, 1, 1], [], []>} : vector<8x8xbf16>, vector<8x8xbf16>, vector<8x8xf32> -> vector<8x8xf32>
    %c0_32 = arith.constant 0 : index
    %c0_33 = arith.constant 0 : index
    %c0_34 = arith.constant 0 : index
    %55 = vector.load %arg9[%c0_32, %c0_33, %c0_34] : memref<4x8x32xf32, #tpu.memory_space<vmem>>, vector<1x8x32xf32>
    %56 = vector.shape_cast %55 : vector<1x8x32xf32> to vector<8x32xf32>
    %57 = arith.truncf %54 : vector<8x8xf32> to vector<8x8xbf16>
    %58 = arith.truncf %56 : vector<8x32xf32> to vector<8x32xbf16>
    %cst_35 = arith.constant dense<0.000000e+00> : vector<8x32xf32>
    %59 = tpu.matmul %57, %58, %cst_35 {dimension_numbers = #tpu.dot_dimension_numbers<[1], [0], [0], [1], [0, 0, 1, 1], [], []>} : vector<8x8xbf16>, vector<8x32xbf16>, vector<8x32xf32> -> vector<8x32xf32>
    %c1 = arith.constant 1 : index
    %c0_36 = arith.constant 0 : index
    %c0_37 = arith.constant 0 : index
    %60 = vector.load %arg3[%c1, %c0_36, %c0_37] : memref<4x32x8xf32, #tpu.memory_space<vmem>>, vector<1x32x8xf32>
    %61 = vector.shape_cast %60 : vector<1x32x8xf32> to vector<32x8xf32>
    %62 = arith.truncf %1 : vector<8x32xf32> to vector<8x32xbf16>
    %63 = arith.truncf %61 : vector<32x8xf32> to vector<32x8xbf16>
    %cst_38 = arith.constant dense<0.000000e+00> : vector<8x8xf32>
    %64 = tpu.matmul %62, %63, %cst_38 {dimension_numbers = #tpu.dot_dimension_numbers<[1], [0], [0], [1], [0, 0, 1, 1], [], []>} : vector<8x32xbf16>, vector<32x8xbf16>, vector<8x8xf32> -> vector<8x8xf32>
    %c1_39 = arith.constant 1 : index
    %c0_40 = arith.constant 0 : index
    %c0_41 = arith.constant 0 : index
    %65 = vector.load %arg4[%c1_39, %c0_40, %c0_41] : memref<4x1x8xf32, #tpu.memory_space<vmem>>, vector<1x1x8xf32>
    %66 = vector.shape_cast %65 : vector<1x1x8xf32> to vector<1x8xf32>
    %67 = vector.broadcast %66 : vector<1x8xf32> to vector<8x8xf32>
    %68 = arith.addf %64, %67 : vector<8x8xf32>
    %c1_42 = arith.constant 1 : index
    %c0_43 = arith.constant 0 : index
    %c0_44 = arith.constant 0 : index
    %69 = vector.load %arg5[%c1_42, %c0_43, %c0_44] : memref<4x32x8xf32, #tpu.memory_space<vmem>>, vector<1x32x8xf32>
    %70 = vector.shape_cast %69 : vector<1x32x8xf32> to vector<32x8xf32>
    %71 = arith.truncf %1 : vector<8x32xf32> to vector<8x32xbf16>
    %72 = arith.truncf %70 : vector<32x8xf32> to vector<32x8xbf16>
    %cst_45 = arith.constant dense<0.000000e+00> : vector<8x8xf32>
    %73 = tpu.matmul %71, %72, %cst_45 {dimension_numbers = #tpu.dot_dimension_numbers<[1], [0], [0], [1], [0, 0, 1, 1], [], []>} : vector<8x32xbf16>, vector<32x8xbf16>, vector<8x8xf32> -> vector<8x8xf32>
    %c1_46 = arith.constant 1 : index
    %c0_47 = arith.constant 0 : index
    %c0_48 = arith.constant 0 : index
    %74 = vector.load %arg6[%c1_46, %c0_47, %c0_48] : memref<4x1x8xf32, #tpu.memory_space<vmem>>, vector<1x1x8xf32>
    %75 = vector.shape_cast %74 : vector<1x1x8xf32> to vector<1x8xf32>
    %76 = vector.broadcast %75 : vector<1x8xf32> to vector<8x8xf32>
    %77 = arith.addf %73, %76 : vector<8x8xf32>
    %c1_49 = arith.constant 1 : index
    %c0_50 = arith.constant 0 : index
    %c0_51 = arith.constant 0 : index
    %78 = vector.load %arg7[%c1_49, %c0_50, %c0_51] : memref<4x32x8xf32, #tpu.memory_space<vmem>>, vector<1x32x8xf32>
    %79 = vector.shape_cast %78 : vector<1x32x8xf32> to vector<32x8xf32>
    %80 = arith.truncf %1 : vector<8x32xf32> to vector<8x32xbf16>
    %81 = arith.truncf %79 : vector<32x8xf32> to vector<32x8xbf16>
    %cst_52 = arith.constant dense<0.000000e+00> : vector<8x8xf32>
    %82 = tpu.matmul %80, %81, %cst_52 {dimension_numbers = #tpu.dot_dimension_numbers<[1], [0], [0], [1], [0, 0, 1, 1], [], []>} : vector<8x32xbf16>, vector<32x8xbf16>, vector<8x8xf32> -> vector<8x8xf32>
    %c1_53 = arith.constant 1 : index
    %c0_54 = arith.constant 0 : index
    %c0_55 = arith.constant 0 : index
    %83 = vector.load %arg8[%c1_53, %c0_54, %c0_55] : memref<4x1x8xf32, #tpu.memory_space<vmem>>, vector<1x1x8xf32>
    %84 = vector.shape_cast %83 : vector<1x1x8xf32> to vector<1x8xf32>
    %85 = vector.broadcast %84 : vector<1x8xf32> to vector<8x8xf32>
    %86 = arith.addf %82, %85 : vector<8x8xf32>
    %87 = arith.truncf %68 : vector<8x8xf32> to vector<8x8xbf16>
    %88 = arith.truncf %77 : vector<8x8xf32> to vector<8x8xbf16>
    %cst_56 = arith.constant dense<0.000000e+00> : vector<8x8xf32>
    %89 = tpu.matmul %87, %88, %cst_56 {dimension_numbers = #tpu.dot_dimension_numbers<[1], [1], [0], [0], [0, 0, 1, 0], [], []>} : vector<8x8xbf16>, vector<8x8xbf16>, vector<8x8xf32> -> vector<8x8xf32>
    %cst_57 = arith.constant 0.353553385 : f32
    %90 = vector.broadcast %cst_57 : f32 to vector<8x8xf32>
    %91 = arith.mulf %89, %90 : vector<8x8xf32>
    %92 = vector.broadcast %7 : vector<1x8xf32> to vector<8x8xf32>
    %93 = arith.addf %91, %92 : vector<8x8xf32>
    %cst_58 = arith.constant dense<0xFF800000> : vector<8xf32>
    %94 = vector.multi_reduction <maximumf>, %93, %cst_58 [1] : vector<8x8xf32> to vector<8xf32>
    %95 = vector.shape_cast %94 : vector<8xf32> to vector<8x1xf32>
    %96 = vector.broadcast %95 : vector<8x1xf32> to vector<8x8xf32>
    %97 = arith.subf %93, %96 : vector<8x8xf32>
    %98 = math.exp %97 : vector<8x8xf32>
    %cst_59 = arith.constant dense<0.000000e+00> : vector<8xf32>
    %99 = vector.multi_reduction <add>, %98, %cst_59 [1] : vector<8x8xf32> to vector<8xf32>
    %100 = vector.shape_cast %99 : vector<8xf32> to vector<8x1xf32>
    %101 = tpu.reciprocal %100 {approx = true} : vector<8x1xf32> -> vector<8x1xf32>
    %102 = vector.broadcast %101 : vector<8x1xf32> to vector<8x8xf32>
    %103 = arith.mulf %98, %102 : vector<8x8xf32>
    %104 = arith.truncf %103 : vector<8x8xf32> to vector<8x8xbf16>
    %105 = arith.truncf %86 : vector<8x8xf32> to vector<8x8xbf16>
    %cst_60 = arith.constant dense<0.000000e+00> : vector<8x8xf32>
    %106 = tpu.matmul %104, %105, %cst_60 {dimension_numbers = #tpu.dot_dimension_numbers<[1], [0], [0], [1], [0, 0, 1, 1], [], []>} : vector<8x8xbf16>, vector<8x8xbf16>, vector<8x8xf32> -> vector<8x8xf32>
    %c1_61 = arith.constant 1 : index
    %c0_62 = arith.constant 0 : index
    %c0_63 = arith.constant 0 : index
    %107 = vector.load %arg9[%c1_61, %c0_62, %c0_63] : memref<4x8x32xf32, #tpu.memory_space<vmem>>, vector<1x8x32xf32>
    %108 = vector.shape_cast %107 : vector<1x8x32xf32> to vector<8x32xf32>
    %109 = arith.truncf %106 : vector<8x8xf32> to vector<8x8xbf16>
    %110 = arith.truncf %108 : vector<8x32xf32> to vector<8x32xbf16>
    %cst_64 = arith.constant dense<0.000000e+00> : vector<8x32xf32>
    %111 = tpu.matmul %109, %110, %cst_64 {dimension_numbers = #tpu.dot_dimension_numbers<[1], [0], [0], [1], [0, 0, 1, 1], [], []>} : vector<8x8xbf16>, vector<8x32xbf16>, vector<8x32xf32> -> vector<8x32xf32>
    %112 = arith.addf %59, %111 : vector<8x32xf32>
    %c2 = arith.constant 2 : index
    %c0_65 = arith.constant 0 : index
    %c0_66 = arith.constant 0 : index
    %113 = vector.load %arg3[%c2, %c0_65, %c0_66] : memref<4x32x8xf32, #tpu.memory_space<vmem>>, vector<1x32x8xf32>
    %114 = vector.shape_cast %113 : vector<1x32x8xf32> to vector<32x8xf32>
    %115 = arith.truncf %1 : vector<8x32xf32> to vector<8x32xbf16>
    %116 = arith.truncf %114 : vector<32x8xf32> to vector<32x8xbf16>
    %cst_67 = arith.constant dense<0.000000e+00> : vector<8x8xf32>
    %117 = tpu.matmul %115, %116, %cst_67 {dimension_numbers = #tpu.dot_dimension_numbers<[1], [0], [0], [1], [0, 0, 1, 1], [], []>} : vector<8x32xbf16>, vector<32x8xbf16>, vector<8x8xf32> -> vector<8x8xf32>
    %c2_68 = arith.constant 2 : index
    %c0_69 = arith.constant 0 : index
    %c0_70 = arith.constant 0 : index
    %118 = vector.load %arg4[%c2_68, %c0_69, %c0_70] : memref<4x1x8xf32, #tpu.memory_space<vmem>>, vector<1x1x8xf32>
    %119 = vector.shape_cast %118 : vector<1x1x8xf32> to vector<1x8xf32>
    %120 = vector.broadcast %119 : vector<1x8xf32> to vector<8x8xf32>
    %121 = arith.addf %117, %120 : vector<8x8xf32>
    %c2_71 = arith.constant 2 : index
    %c0_72 = arith.constant 0 : index
    %c0_73 = arith.constant 0 : index
    %122 = vector.load %arg5[%c2_71, %c0_72, %c0_73] : memref<4x32x8xf32, #tpu.memory_space<vmem>>, vector<1x32x8xf32>
    %123 = vector.shape_cast %122 : vector<1x32x8xf32> to vector<32x8xf32>
    %124 = arith.truncf %1 : vector<8x32xf32> to vector<8x32xbf16>
    %125 = arith.truncf %123 : vector<32x8xf32> to vector<32x8xbf16>
    %cst_74 = arith.constant dense<0.000000e+00> : vector<8x8xf32>
    %126 = tpu.matmul %124, %125, %cst_74 {dimension_numbers = #tpu.dot_dimension_numbers<[1], [0], [0], [1], [0, 0, 1, 1], [], []>} : vector<8x32xbf16>, vector<32x8xbf16>, vector<8x8xf32> -> vector<8x8xf32>
    %c2_75 = arith.constant 2 : index
    %c0_76 = arith.constant 0 : index
    %c0_77 = arith.constant 0 : index
    %127 = vector.load %arg6[%c2_75, %c0_76, %c0_77] : memref<4x1x8xf32, #tpu.memory_space<vmem>>, vector<1x1x8xf32>
    %128 = vector.shape_cast %127 : vector<1x1x8xf32> to vector<1x8xf32>
    %129 = vector.broadcast %128 : vector<1x8xf32> to vector<8x8xf32>
    %130 = arith.addf %126, %129 : vector<8x8xf32>
    %c2_78 = arith.constant 2 : index
    %c0_79 = arith.constant 0 : index
    %c0_80 = arith.constant 0 : index
    %131 = vector.load %arg7[%c2_78, %c0_79, %c0_80] : memref<4x32x8xf32, #tpu.memory_space<vmem>>, vector<1x32x8xf32>
    %132 = vector.shape_cast %131 : vector<1x32x8xf32> to vector<32x8xf32>
    %133 = arith.truncf %1 : vector<8x32xf32> to vector<8x32xbf16>
    %134 = arith.truncf %132 : vector<32x8xf32> to vector<32x8xbf16>
    %cst_81 = arith.constant dense<0.000000e+00> : vector<8x8xf32>
    %135 = tpu.matmul %133, %134, %cst_81 {dimension_numbers = #tpu.dot_dimension_numbers<[1], [0], [0], [1], [0, 0, 1, 1], [], []>} : vector<8x32xbf16>, vector<32x8xbf16>, vector<8x8xf32> -> vector<8x8xf32>
    %c2_82 = arith.constant 2 : index
    %c0_83 = arith.constant 0 : index
    %c0_84 = arith.constant 0 : index
    %136 = vector.load %arg8[%c2_82, %c0_83, %c0_84] : memref<4x1x8xf32, #tpu.memory_space<vmem>>, vector<1x1x8xf32>
    %137 = vector.shape_cast %136 : vector<1x1x8xf32> to vector<1x8xf32>
    %138 = vector.broadcast %137 : vector<1x8xf32> to vector<8x8xf32>
    %139 = arith.addf %135, %138 : vector<8x8xf32>
    %140 = arith.truncf %121 : vector<8x8xf32> to vector<8x8xbf16>
    %141 = arith.truncf %130 : vector<8x8xf32> to vector<8x8xbf16>
    %cst_85 = arith.constant dense<0.000000e+00> : vector<8x8xf32>
    %142 = tpu.matmul %140, %141, %cst_85 {dimension_numbers = #tpu.dot_dimension_numbers<[1], [1], [0], [0], [0, 0, 1, 0], [], []>} : vector<8x8xbf16>, vector<8x8xbf16>, vector<8x8xf32> -> vector<8x8xf32>
    %cst_86 = arith.constant 0.353553385 : f32
    %143 = vector.broadcast %cst_86 : f32 to vector<8x8xf32>
    %144 = arith.mulf %142, %143 : vector<8x8xf32>
    %145 = vector.broadcast %7 : vector<1x8xf32> to vector<8x8xf32>
    %146 = arith.addf %144, %145 : vector<8x8xf32>
    %cst_87 = arith.constant dense<0xFF800000> : vector<8xf32>
    %147 = vector.multi_reduction <maximumf>, %146, %cst_87 [1] : vector<8x8xf32> to vector<8xf32>
    %148 = vector.shape_cast %147 : vector<8xf32> to vector<8x1xf32>
    %149 = vector.broadcast %148 : vector<8x1xf32> to vector<8x8xf32>
    %150 = arith.subf %146, %149 : vector<8x8xf32>
    %151 = math.exp %150 : vector<8x8xf32>
    %cst_88 = arith.constant dense<0.000000e+00> : vector<8xf32>
    %152 = vector.multi_reduction <add>, %151, %cst_88 [1] : vector<8x8xf32> to vector<8xf32>
    %153 = vector.shape_cast %152 : vector<8xf32> to vector<8x1xf32>
    %154 = tpu.reciprocal %153 {approx = true} : vector<8x1xf32> -> vector<8x1xf32>
    %155 = vector.broadcast %154 : vector<8x1xf32> to vector<8x8xf32>
    %156 = arith.mulf %151, %155 : vector<8x8xf32>
    %157 = arith.truncf %156 : vector<8x8xf32> to vector<8x8xbf16>
    %158 = arith.truncf %139 : vector<8x8xf32> to vector<8x8xbf16>
    %cst_89 = arith.constant dense<0.000000e+00> : vector<8x8xf32>
    %159 = tpu.matmul %157, %158, %cst_89 {dimension_numbers = #tpu.dot_dimension_numbers<[1], [0], [0], [1], [0, 0, 1, 1], [], []>} : vector<8x8xbf16>, vector<8x8xbf16>, vector<8x8xf32> -> vector<8x8xf32>
    %c2_90 = arith.constant 2 : index
    %c0_91 = arith.constant 0 : index
    %c0_92 = arith.constant 0 : index
    %160 = vector.load %arg9[%c2_90, %c0_91, %c0_92] : memref<4x8x32xf32, #tpu.memory_space<vmem>>, vector<1x8x32xf32>
    %161 = vector.shape_cast %160 : vector<1x8x32xf32> to vector<8x32xf32>
    %162 = arith.truncf %159 : vector<8x8xf32> to vector<8x8xbf16>
    %163 = arith.truncf %161 : vector<8x32xf32> to vector<8x32xbf16>
    %cst_93 = arith.constant dense<0.000000e+00> : vector<8x32xf32>
    %164 = tpu.matmul %162, %163, %cst_93 {dimension_numbers = #tpu.dot_dimension_numbers<[1], [0], [0], [1], [0, 0, 1, 1], [], []>} : vector<8x8xbf16>, vector<8x32xbf16>, vector<8x32xf32> -> vector<8x32xf32>
    %165 = arith.addf %112, %164 : vector<8x32xf32>
    %c3 = arith.constant 3 : index
    %c0_94 = arith.constant 0 : index
    %c0_95 = arith.constant 0 : index
    %166 = vector.load %arg3[%c3, %c0_94, %c0_95] : memref<4x32x8xf32, #tpu.memory_space<vmem>>, vector<1x32x8xf32>
    %167 = vector.shape_cast %166 : vector<1x32x8xf32> to vector<32x8xf32>
    %168 = arith.truncf %1 : vector<8x32xf32> to vector<8x32xbf16>
    %169 = arith.truncf %167 : vector<32x8xf32> to vector<32x8xbf16>
    %cst_96 = arith.constant dense<0.000000e+00> : vector<8x8xf32>
    %170 = tpu.matmul %168, %169, %cst_96 {dimension_numbers = #tpu.dot_dimension_numbers<[1], [0], [0], [1], [0, 0, 1, 1], [], []>} : vector<8x32xbf16>, vector<32x8xbf16>, vector<8x8xf32> -> vector<8x8xf32>
    %c3_97 = arith.constant 3 : index
    %c0_98 = arith.constant 0 : index
    %c0_99 = arith.constant 0 : index
    %171 = vector.load %arg4[%c3_97, %c0_98, %c0_99] : memref<4x1x8xf32, #tpu.memory_space<vmem>>, vector<1x1x8xf32>
    %172 = vector.shape_cast %171 : vector<1x1x8xf32> to vector<1x8xf32>
    %173 = vector.broadcast %172 : vector<1x8xf32> to vector<8x8xf32>
    %174 = arith.addf %170, %173 : vector<8x8xf32>
    %c3_100 = arith.constant 3 : index
    %c0_101 = arith.constant 0 : index
    %c0_102 = arith.constant 0 : index
    %175 = vector.load %arg5[%c3_100, %c0_101, %c0_102] : memref<4x32x8xf32, #tpu.memory_space<vmem>>, vector<1x32x8xf32>
    %176 = vector.shape_cast %175 : vector<1x32x8xf32> to vector<32x8xf32>
    %177 = arith.truncf %1 : vector<8x32xf32> to vector<8x32xbf16>
    %178 = arith.truncf %176 : vector<32x8xf32> to vector<32x8xbf16>
    %cst_103 = arith.constant dense<0.000000e+00> : vector<8x8xf32>
    %179 = tpu.matmul %177, %178, %cst_103 {dimension_numbers = #tpu.dot_dimension_numbers<[1], [0], [0], [1], [0, 0, 1, 1], [], []>} : vector<8x32xbf16>, vector<32x8xbf16>, vector<8x8xf32> -> vector<8x8xf32>
    %c3_104 = arith.constant 3 : index
    %c0_105 = arith.constant 0 : index
    %c0_106 = arith.constant 0 : index
    %180 = vector.load %arg6[%c3_104, %c0_105, %c0_106] : memref<4x1x8xf32, #tpu.memory_space<vmem>>, vector<1x1x8xf32>
    %181 = vector.shape_cast %180 : vector<1x1x8xf32> to vector<1x8xf32>
    %182 = vector.broadcast %181 : vector<1x8xf32> to vector<8x8xf32>
    %183 = arith.addf %179, %182 : vector<8x8xf32>
    %c3_107 = arith.constant 3 : index
    %c0_108 = arith.constant 0 : index
    %c0_109 = arith.constant 0 : index
    %184 = vector.load %arg7[%c3_107, %c0_108, %c0_109] : memref<4x32x8xf32, #tpu.memory_space<vmem>>, vector<1x32x8xf32>
    %185 = vector.shape_cast %184 : vector<1x32x8xf32> to vector<32x8xf32>
    %186 = arith.truncf %1 : vector<8x32xf32> to vector<8x32xbf16>
    %187 = arith.truncf %185 : vector<32x8xf32> to vector<32x8xbf16>
    %cst_110 = arith.constant dense<0.000000e+00> : vector<8x8xf32>
    %188 = tpu.matmul %186, %187, %cst_110 {dimension_numbers = #tpu.dot_dimension_numbers<[1], [0], [0], [1], [0, 0, 1, 1], [], []>} : vector<8x32xbf16>, vector<32x8xbf16>, vector<8x8xf32> -> vector<8x8xf32>
    %c3_111 = arith.constant 3 : index
    %c0_112 = arith.constant 0 : index
    %c0_113 = arith.constant 0 : index
    %189 = vector.load %arg8[%c3_111, %c0_112, %c0_113] : memref<4x1x8xf32, #tpu.memory_space<vmem>>, vector<1x1x8xf32>
    %190 = vector.shape_cast %189 : vector<1x1x8xf32> to vector<1x8xf32>
    %191 = vector.broadcast %190 : vector<1x8xf32> to vector<8x8xf32>
    %192 = arith.addf %188, %191 : vector<8x8xf32>
    %193 = arith.truncf %174 : vector<8x8xf32> to vector<8x8xbf16>
    %194 = arith.truncf %183 : vector<8x8xf32> to vector<8x8xbf16>
    %cst_114 = arith.constant dense<0.000000e+00> : vector<8x8xf32>
    %195 = tpu.matmul %193, %194, %cst_114 {dimension_numbers = #tpu.dot_dimension_numbers<[1], [1], [0], [0], [0, 0, 1, 0], [], []>} : vector<8x8xbf16>, vector<8x8xbf16>, vector<8x8xf32> -> vector<8x8xf32>
    %cst_115 = arith.constant 0.353553385 : f32
    %196 = vector.broadcast %cst_115 : f32 to vector<8x8xf32>
    %197 = arith.mulf %195, %196 : vector<8x8xf32>
    %198 = vector.broadcast %7 : vector<1x8xf32> to vector<8x8xf32>
    %199 = arith.addf %197, %198 : vector<8x8xf32>
    %cst_116 = arith.constant dense<0xFF800000> : vector<8xf32>
    %200 = vector.multi_reduction <maximumf>, %199, %cst_116 [1] : vector<8x8xf32> to vector<8xf32>
    %201 = vector.shape_cast %200 : vector<8xf32> to vector<8x1xf32>
    %202 = vector.broadcast %201 : vector<8x1xf32> to vector<8x8xf32>
    %203 = arith.subf %199, %202 : vector<8x8xf32>
    %204 = math.exp %203 : vector<8x8xf32>
    %cst_117 = arith.constant dense<0.000000e+00> : vector<8xf32>
    %205 = vector.multi_reduction <add>, %204, %cst_117 [1] : vector<8x8xf32> to vector<8xf32>
    %206 = vector.shape_cast %205 : vector<8xf32> to vector<8x1xf32>
    %207 = tpu.reciprocal %206 {approx = true} : vector<8x1xf32> -> vector<8x1xf32>
    %208 = vector.broadcast %207 : vector<8x1xf32> to vector<8x8xf32>
    %209 = arith.mulf %204, %208 : vector<8x8xf32>
    %210 = arith.truncf %209 : vector<8x8xf32> to vector<8x8xbf16>
    %211 = arith.truncf %192 : vector<8x8xf32> to vector<8x8xbf16>
    %cst_118 = arith.constant dense<0.000000e+00> : vector<8x8xf32>
    %212 = tpu.matmul %210, %211, %cst_118 {dimension_numbers = #tpu.dot_dimension_numbers<[1], [0], [0], [1], [0, 0, 1, 1], [], []>} : vector<8x8xbf16>, vector<8x8xbf16>, vector<8x8xf32> -> vector<8x8xf32>
    %c3_119 = arith.constant 3 : index
    %c0_120 = arith.constant 0 : index
    %c0_121 = arith.constant 0 : index
    %213 = vector.load %arg9[%c3_119, %c0_120, %c0_121] : memref<4x8x32xf32, #tpu.memory_space<vmem>>, vector<1x8x32xf32>
    %214 = vector.shape_cast %213 : vector<1x8x32xf32> to vector<8x32xf32>
    %215 = arith.truncf %212 : vector<8x8xf32> to vector<8x8xbf16>
    %216 = arith.truncf %214 : vector<8x32xf32> to vector<8x32xbf16>
    %cst_122 = arith.constant dense<0.000000e+00> : vector<8x32xf32>
    %217 = tpu.matmul %215, %216, %cst_122 {dimension_numbers = #tpu.dot_dimension_numbers<[1], [0], [0], [1], [0, 0, 1, 1], [], []>} : vector<8x8xbf16>, vector<8x32xbf16>, vector<8x32xf32> -> vector<8x32xf32>
    %218 = arith.addf %165, %217 : vector<8x32xf32>
    %c0_123 = arith.constant 0 : index
    %c0_124 = arith.constant 0 : index
    %219 = vector.load %arg10[%c0_123, %c0_124] : memref<1x32xf32, #tpu.memory_space<vmem>>, vector<1x32xf32>
    %220 = vector.broadcast %219 : vector<1x32xf32> to vector<8x32xf32>
    %221 = arith.addf %218, %220 : vector<8x32xf32>
    %222 = arith.addf %221, %1 : vector<8x32xf32>
    %c0_125 = arith.constant 0 : index
    %c0_126 = arith.constant 0 : index
    %223 = vector.load %arg11[%c0_125, %c0_126] : memref<1x32xf32, #tpu.memory_space<vmem>>, vector<1x32xf32>
    %c0_127 = arith.constant 0 : index
    %c0_128 = arith.constant 0 : index
    %224 = vector.load %arg12[%c0_127, %c0_128] : memref<1x32xf32, #tpu.memory_space<vmem>>, vector<1x32xf32>
    %cst_129 = arith.constant dense<0.000000e+00> : vector<8xf32>
    %225 = vector.multi_reduction <add>, %222, %cst_129 [1] : vector<8x32xf32> to vector<8xf32>
    %226 = vector.shape_cast %225 : vector<8xf32> to vector<8x1xf32>
    %cst_130 = arith.constant 3.200000e+01 : f32
    %227 = vector.broadcast %cst_130 : f32 to vector<8x1xf32>
    %228 = arith.divf %226, %227 : vector<8x1xf32>
    %229 = vector.broadcast %228 : vector<8x1xf32> to vector<8x32xf32>
    %230 = arith.subf %222, %229 : vector<8x32xf32>
    %231 = arith.mulf %230, %230 : vector<8x32xf32>
    %cst_131 = arith.constant dense<0.000000e+00> : vector<8xf32>
    %232 = vector.multi_reduction <add>, %231, %cst_131 [1] : vector<8x32xf32> to vector<8xf32>
    %233 = vector.shape_cast %232 : vector<8xf32> to vector<8x1xf32>
    %cst_132 = arith.constant 3.200000e+01 : f32
    %234 = vector.broadcast %cst_132 : f32 to vector<8x1xf32>
    %235 = arith.divf %233, %234 : vector<8x1xf32>
    %236 = vector.broadcast %228 : vector<8x1xf32> to vector<8x32xf32>
    %237 = arith.subf %222, %236 : vector<8x32xf32>
    %cst_133 = arith.constant 9.99999996E-13 : f32
    %238 = vector.broadcast %cst_133 : f32 to vector<8x1xf32>
    %239 = arith.addf %235, %238 : vector<8x1xf32>
    %240 = math.rsqrt %239 : vector<8x1xf32>
    %241 = vector.broadcast %240 : vector<8x1xf32> to vector<8x32xf32>
    %242 = arith.mulf %237, %241 : vector<8x32xf32>
    %243 = vector.broadcast %223 : vector<1x32xf32> to vector<8x32xf32>
    %244 = arith.mulf %242, %243 : vector<8x32xf32>
    %245 = vector.broadcast %224 : vector<1x32xf32> to vector<8x32xf32>
    %246 = arith.addf %244, %245 : vector<8x32xf32>
    %c0_134 = arith.constant 0 : index
    %c0_135 = arith.constant 0 : index
    %247 = vector.load %arg13[%c0_134, %c0_135] : memref<32x128xf32, #tpu.memory_space<vmem>>, vector<32x128xf32>
    %248 = arith.truncf %246 : vector<8x32xf32> to vector<8x32xbf16>
    %249 = arith.truncf %247 : vector<32x128xf32> to vector<32x128xbf16>
    %cst_136 = arith.constant dense<0.000000e+00> : vector<8x128xf32>
    %250 = tpu.matmul %248, %249, %cst_136 {dimension_numbers = #tpu.dot_dimension_numbers<[1], [0], [0], [1], [0, 0, 1, 1], [], []>} : vector<8x32xbf16>, vector<32x128xbf16>, vector<8x128xf32> -> vector<8x128xf32>
    %c0_137 = arith.constant 0 : index
    %c0_138 = arith.constant 0 : index
    %251 = vector.load %arg14[%c0_137, %c0_138] : memref<1x128xf32, #tpu.memory_space<vmem>>, vector<1x128xf32>
    %252 = vector.broadcast %251 : vector<1x128xf32> to vector<8x128xf32>
    %253 = arith.addf %250, %252 : vector<8x128xf32>
    %254 = arith.mulf %253, %253 : vector<8x128xf32>
    %255 = arith.mulf %253, %254 : vector<8x128xf32>
    %cst_139 = arith.constant 4.471500e-02 : f32
    %256 = vector.broadcast %cst_139 : f32 to vector<8x128xf32>
    %257 = arith.mulf %256, %255 : vector<8x128xf32>
    %258 = arith.addf %253, %257 : vector<8x128xf32>
    %cst_140 = arith.constant 0.797884583 : f32
    %259 = vector.broadcast %cst_140 : f32 to vector<8x128xf32>
    %260 = arith.mulf %259, %258 : vector<8x128xf32>
    %261 = math.tanh %260 : vector<8x128xf32>
    %cst_141 = arith.constant 1.000000e+00 : f32
    %262 = vector.broadcast %cst_141 : f32 to vector<8x128xf32>
    %263 = arith.addf %262, %261 : vector<8x128xf32>
    %cst_142 = arith.constant 5.000000e-01 : f32
    %264 = vector.broadcast %cst_142 : f32 to vector<8x128xf32>
    %265 = arith.mulf %264, %263 : vector<8x128xf32>
    %266 = arith.mulf %253, %265 : vector<8x128xf32>
    %c0_143 = arith.constant 0 : index
    %c0_144 = arith.constant 0 : index
    %267 = vector.load %arg15[%c0_143, %c0_144] : memref<128x32xf32, #tpu.memory_space<vmem>>, vector<128x32xf32>
    %268 = arith.truncf %266 : vector<8x128xf32> to vector<8x128xbf16>
    %269 = arith.truncf %267 : vector<128x32xf32> to vector<128x32xbf16>
    %cst_145 = arith.constant dense<0.000000e+00> : vector<8x32xf32>
    %270 = tpu.matmul %268, %269, %cst_145 {dimension_numbers = #tpu.dot_dimension_numbers<[1], [0], [0], [1], [0, 0, 1, 1], [], []>} : vector<8x128xbf16>, vector<128x32xbf16>, vector<8x32xf32> -> vector<8x32xf32>
    %c0_146 = arith.constant 0 : index
    %c0_147 = arith.constant 0 : index
    %271 = vector.load %arg16[%c0_146, %c0_147] : memref<1x32xf32, #tpu.memory_space<vmem>>, vector<1x32xf32>
    %272 = vector.broadcast %271 : vector<1x32xf32> to vector<8x32xf32>
    %273 = arith.addf %270, %272 : vector<8x32xf32>
    %274 = arith.addf %273, %246 : vector<8x32xf32>
    %c0_148 = arith.constant 0 : index
    %c0_149 = arith.constant 0 : index
    %275 = vector.load %arg17[%c0_148, %c0_149] : memref<1x32xf32, #tpu.memory_space<vmem>>, vector<1x32xf32>
    %c0_150 = arith.constant 0 : index
    %c0_151 = arith.constant 0 : index
    %276 = vector.load %arg18[%c0_150, %c0_151] : memref<1x32xf32, #tpu.memory_space<vmem>>, vector<1x32xf32>
    %cst_152 = arith.constant dense<0.000000e+00> : vector<8xf32>
    %277 = vector.multi_reduction <add>, %274, %cst_152 [1] : vector<8x32xf32> to vector<8xf32>
    %278 = vector.shape_cast %277 : vector<8xf32> to vector<8x1xf32>
    %cst_153 = arith.constant 3.200000e+01 : f32
    %279 = vector.broadcast %cst_153 : f32 to vector<8x1xf32>
    %280 = arith.divf %278, %279 : vector<8x1xf32>
    %281 = vector.broadcast %280 : vector<8x1xf32> to vector<8x32xf32>
    %282 = arith.subf %274, %281 : vector<8x32xf32>
    %283 = arith.mulf %282, %282 : vector<8x32xf32>
    %cst_154 = arith.constant dense<0.000000e+00> : vector<8xf32>
    %284 = vector.multi_reduction <add>, %283, %cst_154 [1] : vector<8x32xf32> to vector<8xf32>
    %285 = vector.shape_cast %284 : vector<8xf32> to vector<8x1xf32>
    %cst_155 = arith.constant 3.200000e+01 : f32
    %286 = vector.broadcast %cst_155 : f32 to vector<8x1xf32>
    %287 = arith.divf %285, %286 : vector<8x1xf32>
    %288 = vector.broadcast %280 : vector<8x1xf32> to vector<8x32xf32>
    %289 = arith.subf %274, %288 : vector<8x32xf32>
    %cst_156 = arith.constant 9.99999996E-13 : f32
    %290 = vector.broadcast %cst_156 : f32 to vector<8x1xf32>
    %291 = arith.addf %287, %290 : vector<8x1xf32>
    %292 = math.rsqrt %291 : vector<8x1xf32>
    %293 = vector.broadcast %292 : vector<8x1xf32> to vector<8x32xf32>
    %294 = arith.mulf %289, %293 : vector<8x32xf32>
    %295 = vector.broadcast %275 : vector<1x32xf32> to vector<8x32xf32>
    %296 = arith.mulf %294, %295 : vector<8x32xf32>
    %297 = vector.broadcast %276 : vector<1x32xf32> to vector<8x32xf32>
    %298 = arith.addf %296, %297 : vector<8x32xf32>
    %c0_157 = arith.constant 0 : index
    %c0_158 = arith.constant 0 : index
    %c0_159 = arith.constant 0 : index
    %299 = vector.load %arg19[%c0_157, %c0_158, %c0_159] : memref<1x8x32xf32, #tpu.memory_space<vmem>>, vector<1x8x32xf32>
    %300 = vector.shape_cast %299 : vector<1x8x32xf32> to vector<8x32xf32>
    %301 = vector.shape_cast %298 : vector<8x32xf32> to vector<1x8x32xf32>
    tpu.vector_store %arg19[%c0_157, %c0_158, %c0_159], %301 {strides = array<i32>} : memref<1x8x32xf32, #tpu.memory_space<vmem>>, vector<1x8x32xf32>,
    return
  }
  func.func @transform_0(%arg0: i32) -> (i32, i32, i32) {
    %c0_i32 = arith.constant 0 : i32
    %c0_i32_0 = arith.constant 0 : i32
    %c0_i32_1 = arith.constant 0 : i32
    return %arg0, %c0_i32, %c0_i32_0 : i32, i32, i32
  }
  func.func @transform_1(%arg0: i32) -> (i32, i32, i32) {
    %c0_i32 = arith.constant 0 : i32
    %c0_i32_0 = arith.constant 0 : i32
    %c0_i32_1 = arith.constant 0 : i32
    return %arg0, %c0_i32, %c0_i32_0 : i32, i32, i32
  }
  func.func @transform_2(%arg0: i32) -> (i32, i32, i32) {
    %c0_i32 = arith.constant 0 : i32
    %c0_i32_0 = arith.constant 0 : i32
    %c0_i32_1 = arith.constant 0 : i32
    %c0_i32_2 = arith.constant 0 : i32
    return %c0_i32, %c0_i32_0, %c0_i32_1 : i32, i32, i32
  }
  func.func @transform_3(%arg0: i32) -> (i32, i32, i32) {
    %c0_i32 = arith.constant 0 : i32
    %c0_i32_0 = arith.constant 0 : i32
    %c0_i32_1 = arith.constant 0 : i32
    %c0_i32_2 = arith.constant 0 : i32
    return %c0_i32, %c0_i32_0, %c0_i32_1 : i32, i32, i32
  }
  func.func @transform_4(%arg0: i32) -> (i32, i32, i32) {
    %c0_i32 = arith.constant 0 : i32
    %c0_i32_0 = arith.constant 0 : i32
    %c0_i32_1 = arith.constant 0 : i32
    %c0_i32_2 = arith.constant 0 : i32
    return %c0_i32, %c0_i32_0, %c0_i32_1 : i32, i32, i32
  }
  func.func @transform_5(%arg0: i32) -> (i32, i32, i32) {
    %c0_i32 = arith.constant 0 : i32
    %c0_i32_0 = arith.constant 0 : i32
    %c0_i32_1 = arith.constant 0 : i32
    %c0_i32_2 = arith.constant 0 : i32
    return %c0_i32, %c0_i32_0, %c0_i32_1 : i32, i32, i32
  }
  func.func @transform_6(%arg0: i32) -> (i32, i32, i32) {
    %c0_i32 = arith.constant 0 : i32
    %c0_i32_0 = arith.constant 0 : i32
    %c0_i32_1 = arith.constant 0 : i32
    %c0_i32_2 = arith.constant 0 : i32
    return %c0_i32, %c0_i32_0, %c0_i32_1 : i32, i32, i32
  }
  func.func @transform_7(%arg0: i32) -> (i32, i32, i32) {
    %c0_i32 = arith.constant 0 : i32
    %c0_i32_0 = arith.constant 0 : i32
    %c0_i32_1 = arith.constant 0 : i32
    %c0_i32_2 = arith.constant 0 : i32
    return %c0_i32, %c0_i32_0, %c0_i32_1 : i32, i32, i32
  }
  func.func @transform_8(%arg0: i32) -> (i32, i32, i32) {
    %c0_i32 = arith.constant 0 : i32
    %c0_i32_0 = arith.constant 0 : i32
    %c0_i32_1 = arith.constant 0 : i32
    %c0_i32_2 = arith.constant 0 : i32
    return %c0_i32, %c0_i32_0, %c0_i32_1 : i32, i32, i32
  }
  func.func @transform_9(%arg0: i32) -> (i32, i32) {
    %c0_i32 = arith.constant 0 : i32
    %c0_i32_0 = arith.constant 0 : i32
    %c0_i32_1 = arith.constant 0 : i32
    return %c0_i32, %c0_i32_0 : i32, i32
  }
  func.func @transform_10(%arg0: i32) -> (i32, i32) {
    %c0_i32 = arith.constant 0 : i32
    %c0_i32_0 = arith.constant 0 : i32
    %c0_i32_1 = arith.constant 0 : i32
    return %c0_i32, %c0_i32_0 : i32, i32
  }
  func.func @transform_11(%arg0: i32) -> (i32, i32) {
    %c0_i32 = arith.constant 0 : i32
    %c0_i32_0 = arith.constant 0 : i32
    %c0_i32_1 = arith.constant 0 : i32
    return %c0_i32, %c0_i32_0 : i32, i32
  }
  func.func @transform_12(%arg0: i32) -> (i32, i32) {
    %c0_i32 = arith.constant 0 : i32
    %c0_i32_0 = arith.constant 0 : i32
    %c0_i32_1 = arith.constant 0 : i32
    return %c0_i32, %c0_i32_0 : i32, i32
  }
  func.func @transform_13(%arg0: i32) -> (i32, i32) {
    %c0_i32 = arith.constant 0 : i32
    %c0_i32_0 = arith.constant 0 : i32
    %c0_i32_1 = arith.constant 0 : i32
    return %c0_i32, %c0_i32_0 : i32, i32
  }
  func.func @transform_14(%arg0: i32) -> (i32, i32) {
    %c0_i32 = arith.constant 0 : i32
    %c0_i32_0 = arith.constant 0 : i32
    %c0_i32_1 = arith.constant 0 : i32
    return %c0_i32, %c0_i32_0 : i32, i32
  }
  func.func @transform_15(%arg0: i32) -> (i32, i32) {
    %c0_i32 = arith.constant 0 : i32
    %c0_i32_0 = arith.constant 0 : i32
    %c0_i32_1 = arith.constant 0 : i32
    return %c0_i32, %c0_i32_0 : i32, i32
  }
  func.func @transform_16(%arg0: i32) -> (i32, i32) {
    %c0_i32 = arith.constant 0 : i32
    %c0_i32_0 = arith.constant 0 : i32
    %c0_i32_1 = arith.constant 0 : i32
    return %c0_i32, %c0_i32_0 : i32, i32
  }
  func.func @transform_17(%arg0: i32) -> (i32, i32) {
    %c0_i32 = arith.constant 0 : i32
    %c0_i32_0 = arith.constant 0 : i32
    %c0_i32_1 = arith.constant 0 : i32
    return %c0_i32, %c0_i32_0 : i32, i32
  }
  func.func @transform_18(%arg0: i32) -> (i32, i32, i32) {
    %c0_i32 = arith.constant 0 : i32
    %c0_i32_0 = arith.constant 0 : i32
    %c0_i32_1 = arith.constant 0 : i32
    return %arg0, %c0_i32, %c0_i32_0 : i32, i32, i32
  }
}

module attributes {stable_mosaic.version = 11 : i64} {
  func.func @_vit_block_kernel(%arg0: i32, %arg1: memref<1x5x32xf32, #tpu.memory_space<vmem>>, %arg2: memref<4x32x8xf32, #tpu.memory_space<vmem>>, %arg3: memref<4x1x8xf32, #tpu.memory_space<vmem>>, %arg4: memref<4x32x8xf32, #tpu.memory_space<vmem>>, %arg5: memref<4x1x8xf32, #tpu.memory_space<vmem>>, %arg6: memref<4x32x8xf32, #tpu.memory_space<vmem>>, %arg7: memref<4x1x8xf32, #tpu.memory_space<vmem>>, %arg8: memref<4x8x32xf32, #tpu.memory_space<vmem>>, %arg9: memref<1x32xf32, #tpu.memory_space<vmem>>, %arg10: memref<1x32xf32, #tpu.memory_space<vmem>>, %arg11: memref<1x32xf32, #tpu.memory_space<vmem>>, %arg12: memref<1x32xf32, #tpu.memory_space<vmem>>, %arg13: memref<1x32xf32, #tpu.memory_space<vmem>>, %arg14: memref<32x128xf32, #tpu.memory_space<vmem>>, %arg15: memref<1x128xf32, #tpu.memory_space<vmem>>, %arg16: memref<128x32xf32, #tpu.memory_space<vmem>>, %arg17: memref<1x32xf32, #tpu.memory_space<vmem>>, %arg18: memref<1x32xf32, #tpu.memory_space<vmem>>, %arg19: memref<1x32xf32, #tpu.memory_space<vmem>>, %arg20: memref<1x5x32xf32, #tpu.memory_space<vmem>>) attributes {dimension_semantics = [#tpu.dimension_semantics<parallel>], iteration_bounds = array<i64: 2>, scalar_prefetch = 0 : i64, scratch_operands = 0 : i64, tpu.core_type = #tpu.core_type<tc>, window_params = [{transform_indices = @transform_0, window_bounds = array<i64: 1, 5, 32>}, {pipeline_mode = #tpu.pipeline_mode<synchronous>, transform_indices = @transform_1, window_bounds = array<i64: 4, 32, 8>}, {pipeline_mode = #tpu.pipeline_mode<synchronous>, transform_indices = @transform_2, window_bounds = array<i64: 4, 1, 8>}, {pipeline_mode = #tpu.pipeline_mode<synchronous>, transform_indices = @transform_3, window_bounds = array<i64: 4, 32, 8>}, {pipeline_mode = #tpu.pipeline_mode<synchronous>, transform_indices = @transform_4, window_bounds = array<i64: 4, 1, 8>}, {pipeline_mode = #tpu.pipeline_mode<synchronous>, transform_indices = @transform_5, window_bounds = array<i64: 4, 32, 8>}, {pipeline_mode = #tpu.pipeline_mode<synchronous>, transform_indices = @transform_6, window_bounds = array<i64: 4, 1, 8>}, {pipeline_mode = #tpu.pipeline_mode<synchronous>, transform_indices = @transform_7, window_bounds = array<i64: 4, 8, 32>}, {pipeline_mode = #tpu.pipeline_mode<synchronous>, transform_indices = @transform_8, window_bounds = array<i64: 1, 32>}, {pipeline_mode = #tpu.pipeline_mode<synchronous>, transform_indices = @transform_9, window_bounds = array<i64: 1, 32>}, {pipeline_mode = #tpu.pipeline_mode<synchronous>, transform_indices = @transform_10, window_bounds = array<i64: 1, 32>}, {pipeline_mode = #tpu.pipeline_mode<synchronous>, transform_indices = @transform_11, window_bounds = array<i64: 1, 32>}, {pipeline_mode = #tpu.pipeline_mode<synchronous>, transform_indices = @transform_12, window_bounds = array<i64: 1, 32>}, {pipeline_mode = #tpu.pipeline_mode<synchronous>, transform_indices = @transform_13, window_bounds = array<i64: 32, 128>}, {pipeline_mode = #tpu.pipeline_mode<synchronous>, transform_indices = @transform_14, window_bounds = array<i64: 1, 128>}, {pipeline_mode = #tpu.pipeline_mode<synchronous>, transform_indices = @transform_15, window_bounds = array<i64: 128, 32>}, {pipeline_mode = #tpu.pipeline_mode<synchronous>, transform_indices = @transform_16, window_bounds = array<i64: 1, 32>}, {pipeline_mode = #tpu.pipeline_mode<synchronous>, transform_indices = @transform_17, window_bounds = array<i64: 1, 32>}, {pipeline_mode = #tpu.pipeline_mode<synchronous>, transform_indices = @transform_18, window_bounds = array<i64: 1, 32>}, {transform_indices = @transform_19, window_bounds = array<i64: 1, 5, 32>}]} {
    %c0 = arith.constant 0 : index
    %c0_0 = arith.constant 0 : index
    %c0_1 = arith.constant 0 : index
    %0 = vector.load %arg1[%c0, %c0_0, %c0_1] : memref<1x5x32xf32, #tpu.memory_space<vmem>>, vector<1x5x32xf32>
    %1 = vector.shape_cast %0 : vector<1x5x32xf32> to vector<5x32xf32>
    %c0_2 = arith.constant 0 : index
    %c0_3 = arith.constant 0 : index
    %2 = vector.load %arg10[%c0_2, %c0_3] : memref<1x32xf32, #tpu.memory_space<vmem>>, vector<1x32xf32>
    %c0_4 = arith.constant 0 : index
    %c0_5 = arith.constant 0 : index
    %3 = vector.load %arg11[%c0_4, %c0_5] : memref<1x32xf32, #tpu.memory_space<vmem>>, vector<1x32xf32>
    %cst = arith.constant dense<0.000000e+00> : vector<5xf32>
    %4 = vector.multi_reduction <add>, %1, %cst [1] : vector<5x32xf32> to vector<5xf32>
    %5 = vector.shape_cast %4 : vector<5xf32> to vector<5x1xf32>
    %cst_6 = arith.constant 3.200000e+01 : f32
    %6 = vector.broadcast %cst_6 : f32 to vector<5x1xf32>
    %7 = arith.divf %5, %6 : vector<5x1xf32>
    %8 = vector.broadcast %7 : vector<5x1xf32> to vector<5x32xf32>
    %9 = arith.subf %1, %8 : vector<5x32xf32>
    %10 = arith.mulf %9, %9 : vector<5x32xf32>
    %cst_7 = arith.constant dense<0.000000e+00> : vector<5xf32>
    %11 = vector.multi_reduction <add>, %10, %cst_7 [1] : vector<5x32xf32> to vector<5xf32>
    %12 = vector.shape_cast %11 : vector<5xf32> to vector<5x1xf32>
    %cst_8 = arith.constant 3.200000e+01 : f32
    %13 = vector.broadcast %cst_8 : f32 to vector<5x1xf32>
    %14 = arith.divf %12, %13 : vector<5x1xf32>
    %15 = vector.broadcast %7 : vector<5x1xf32> to vector<5x32xf32>
    %16 = arith.subf %1, %15 : vector<5x32xf32>
    %cst_9 = arith.constant 9.99999997E-7 : f32
    %17 = vector.broadcast %cst_9 : f32 to vector<5x1xf32>
    %18 = arith.addf %14, %17 : vector<5x1xf32>
    %19 = math.rsqrt %18 : vector<5x1xf32>
    %20 = vector.broadcast %19 : vector<5x1xf32> to vector<5x32xf32>
    %21 = arith.mulf %16, %20 : vector<5x32xf32>
    %22 = vector.broadcast %2 : vector<1x32xf32> to vector<5x32xf32>
    %23 = arith.mulf %21, %22 : vector<5x32xf32>
    %24 = vector.broadcast %3 : vector<1x32xf32> to vector<5x32xf32>
    %25 = arith.addf %23, %24 : vector<5x32xf32>
    %c0_10 = arith.constant 0 : index
    %c0_11 = arith.constant 0 : index
    %c0_12 = arith.constant 0 : index
    %26 = vector.load %arg2[%c0_10, %c0_11, %c0_12] : memref<4x32x8xf32, #tpu.memory_space<vmem>>, vector<1x32x8xf32>
    %27 = vector.shape_cast %26 : vector<1x32x8xf32> to vector<32x8xf32>
    %28 = arith.truncf %25 : vector<5x32xf32> to vector<5x32xbf16>
    %29 = arith.truncf %27 : vector<32x8xf32> to vector<32x8xbf16>
    %cst_13 = arith.constant dense<0.000000e+00> : vector<5x8xf32>
    %30 = tpu.matmul %28, %29, %cst_13 {dimension_numbers = #tpu.dot_dimension_numbers<[1], [0], [0], [1], [0, 0, 1, 1], [], []>} : vector<5x32xbf16>, vector<32x8xbf16>, vector<5x8xf32> -> vector<5x8xf32>
    %c0_14 = arith.constant 0 : index
    %c0_15 = arith.constant 0 : index
    %c0_16 = arith.constant 0 : index
    %31 = vector.load %arg3[%c0_14, %c0_15, %c0_16] : memref<4x1x8xf32, #tpu.memory_space<vmem>>, vector<1x1x8xf32>
    %32 = vector.shape_cast %31 : vector<1x1x8xf32> to vector<1x8xf32>
    %33 = vector.broadcast %32 : vector<1x8xf32> to vector<5x8xf32>
    %34 = arith.addf %30, %33 : vector<5x8xf32>
    %c0_17 = arith.constant 0 : index
    %c0_18 = arith.constant 0 : index
    %c0_19 = arith.constant 0 : index
    %35 = vector.load %arg4[%c0_17, %c0_18, %c0_19] : memref<4x32x8xf32, #tpu.memory_space<vmem>>, vector<1x32x8xf32>
    %36 = vector.shape_cast %35 : vector<1x32x8xf32> to vector<32x8xf32>
    %37 = arith.truncf %25 : vector<5x32xf32> to vector<5x32xbf16>
    %38 = arith.truncf %36 : vector<32x8xf32> to vector<32x8xbf16>
    %cst_20 = arith.constant dense<0.000000e+00> : vector<5x8xf32>
    %39 = tpu.matmul %37, %38, %cst_20 {dimension_numbers = #tpu.dot_dimension_numbers<[1], [0], [0], [1], [0, 0, 1, 1], [], []>} : vector<5x32xbf16>, vector<32x8xbf16>, vector<5x8xf32> -> vector<5x8xf32>
    %c0_21 = arith.constant 0 : index
    %c0_22 = arith.constant 0 : index
    %c0_23 = arith.constant 0 : index
    %40 = vector.load %arg5[%c0_21, %c0_22, %c0_23] : memref<4x1x8xf32, #tpu.memory_space<vmem>>, vector<1x1x8xf32>
    %41 = vector.shape_cast %40 : vector<1x1x8xf32> to vector<1x8xf32>
    %42 = vector.broadcast %41 : vector<1x8xf32> to vector<5x8xf32>
    %43 = arith.addf %39, %42 : vector<5x8xf32>
    %c0_24 = arith.constant 0 : index
    %c0_25 = arith.constant 0 : index
    %c0_26 = arith.constant 0 : index
    %44 = vector.load %arg6[%c0_24, %c0_25, %c0_26] : memref<4x32x8xf32, #tpu.memory_space<vmem>>, vector<1x32x8xf32>
    %45 = vector.shape_cast %44 : vector<1x32x8xf32> to vector<32x8xf32>
    %46 = arith.truncf %25 : vector<5x32xf32> to vector<5x32xbf16>
    %47 = arith.truncf %45 : vector<32x8xf32> to vector<32x8xbf16>
    %cst_27 = arith.constant dense<0.000000e+00> : vector<5x8xf32>
    %48 = tpu.matmul %46, %47, %cst_27 {dimension_numbers = #tpu.dot_dimension_numbers<[1], [0], [0], [1], [0, 0, 1, 1], [], []>} : vector<5x32xbf16>, vector<32x8xbf16>, vector<5x8xf32> -> vector<5x8xf32>
    %c0_28 = arith.constant 0 : index
    %c0_29 = arith.constant 0 : index
    %c0_30 = arith.constant 0 : index
    %49 = vector.load %arg7[%c0_28, %c0_29, %c0_30] : memref<4x1x8xf32, #tpu.memory_space<vmem>>, vector<1x1x8xf32>
    %50 = vector.shape_cast %49 : vector<1x1x8xf32> to vector<1x8xf32>
    %51 = vector.broadcast %50 : vector<1x8xf32> to vector<5x8xf32>
    %52 = arith.addf %48, %51 : vector<5x8xf32>
    %53 = arith.truncf %34 : vector<5x8xf32> to vector<5x8xbf16>
    %54 = arith.truncf %43 : vector<5x8xf32> to vector<5x8xbf16>
    %cst_31 = arith.constant dense<0.000000e+00> : vector<5x5xf32>
    %55 = tpu.matmul %53, %54, %cst_31 {dimension_numbers = #tpu.dot_dimension_numbers<[1], [1], [0], [0], [0, 0, 1, 0], [], []>} : vector<5x8xbf16>, vector<5x8xbf16>, vector<5x5xf32> -> vector<5x5xf32>
    %cst_32 = arith.constant 0.353553385 : f32
    %56 = vector.broadcast %cst_32 : f32 to vector<5x5xf32>
    %57 = arith.mulf %55, %56 : vector<5x5xf32>
    %cst_33 = arith.constant dense<0xFF800000> : vector<5xf32>
    %58 = vector.multi_reduction <maximumf>, %57, %cst_33 [1] : vector<5x5xf32> to vector<5xf32>
    %59 = vector.shape_cast %58 : vector<5xf32> to vector<5x1xf32>
    %60 = vector.broadcast %59 : vector<5x1xf32> to vector<5x5xf32>
    %61 = arith.subf %57, %60 : vector<5x5xf32>
    %62 = math.exp %61 : vector<5x5xf32>
    %cst_34 = arith.constant dense<0.000000e+00> : vector<5xf32>
    %63 = vector.multi_reduction <add>, %62, %cst_34 [1] : vector<5x5xf32> to vector<5xf32>
    %64 = vector.shape_cast %63 : vector<5xf32> to vector<5x1xf32>
    %65 = tpu.reciprocal %64 {approx = true} : vector<5x1xf32> -> vector<5x1xf32>
    %66 = vector.broadcast %65 : vector<5x1xf32> to vector<5x5xf32>
    %67 = arith.mulf %62, %66 : vector<5x5xf32>
    %68 = arith.truncf %67 : vector<5x5xf32> to vector<5x5xbf16>
    %69 = arith.truncf %52 : vector<5x8xf32> to vector<5x8xbf16>
    %cst_35 = arith.constant dense<0.000000e+00> : vector<5x8xf32>
    %70 = tpu.matmul %68, %69, %cst_35 {dimension_numbers = #tpu.dot_dimension_numbers<[1], [0], [0], [1], [0, 0, 1, 1], [], []>} : vector<5x5xbf16>, vector<5x8xbf16>, vector<5x8xf32> -> vector<5x8xf32>
    %c0_36 = arith.constant 0 : index
    %c0_37 = arith.constant 0 : index
    %c0_38 = arith.constant 0 : index
    %71 = vector.load %arg8[%c0_36, %c0_37, %c0_38] : memref<4x8x32xf32, #tpu.memory_space<vmem>>, vector<1x8x32xf32>
    %72 = vector.shape_cast %71 : vector<1x8x32xf32> to vector<8x32xf32>
    %73 = arith.truncf %70 : vector<5x8xf32> to vector<5x8xbf16>
    %74 = arith.truncf %72 : vector<8x32xf32> to vector<8x32xbf16>
    %cst_39 = arith.constant dense<0.000000e+00> : vector<5x32xf32>
    %75 = tpu.matmul %73, %74, %cst_39 {dimension_numbers = #tpu.dot_dimension_numbers<[1], [0], [0], [1], [0, 0, 1, 1], [], []>} : vector<5x8xbf16>, vector<8x32xbf16>, vector<5x32xf32> -> vector<5x32xf32>
    %c1 = arith.constant 1 : index
    %c0_40 = arith.constant 0 : index
    %c0_41 = arith.constant 0 : index
    %76 = vector.load %arg2[%c1, %c0_40, %c0_41] : memref<4x32x8xf32, #tpu.memory_space<vmem>>, vector<1x32x8xf32>
    %77 = vector.shape_cast %76 : vector<1x32x8xf32> to vector<32x8xf32>
    %78 = arith.truncf %25 : vector<5x32xf32> to vector<5x32xbf16>
    %79 = arith.truncf %77 : vector<32x8xf32> to vector<32x8xbf16>
    %cst_42 = arith.constant dense<0.000000e+00> : vector<5x8xf32>
    %80 = tpu.matmul %78, %79, %cst_42 {dimension_numbers = #tpu.dot_dimension_numbers<[1], [0], [0], [1], [0, 0, 1, 1], [], []>} : vector<5x32xbf16>, vector<32x8xbf16>, vector<5x8xf32> -> vector<5x8xf32>
    %c1_43 = arith.constant 1 : index
    %c0_44 = arith.constant 0 : index
    %c0_45 = arith.constant 0 : index
    %81 = vector.load %arg3[%c1_43, %c0_44, %c0_45] : memref<4x1x8xf32, #tpu.memory_space<vmem>>, vector<1x1x8xf32>
    %82 = vector.shape_cast %81 : vector<1x1x8xf32> to vector<1x8xf32>
    %83 = vector.broadcast %82 : vector<1x8xf32> to vector<5x8xf32>
    %84 = arith.addf %80, %83 : vector<5x8xf32>
    %c1_46 = arith.constant 1 : index
    %c0_47 = arith.constant 0 : index
    %c0_48 = arith.constant 0 : index
    %85 = vector.load %arg4[%c1_46, %c0_47, %c0_48] : memref<4x32x8xf32, #tpu.memory_space<vmem>>, vector<1x32x8xf32>
    %86 = vector.shape_cast %85 : vector<1x32x8xf32> to vector<32x8xf32>
    %87 = arith.truncf %25 : vector<5x32xf32> to vector<5x32xbf16>
    %88 = arith.truncf %86 : vector<32x8xf32> to vector<32x8xbf16>
    %cst_49 = arith.constant dense<0.000000e+00> : vector<5x8xf32>
    %89 = tpu.matmul %87, %88, %cst_49 {dimension_numbers = #tpu.dot_dimension_numbers<[1], [0], [0], [1], [0, 0, 1, 1], [], []>} : vector<5x32xbf16>, vector<32x8xbf16>, vector<5x8xf32> -> vector<5x8xf32>
    %c1_50 = arith.constant 1 : index
    %c0_51 = arith.constant 0 : index
    %c0_52 = arith.constant 0 : index
    %90 = vector.load %arg5[%c1_50, %c0_51, %c0_52] : memref<4x1x8xf32, #tpu.memory_space<vmem>>, vector<1x1x8xf32>
    %91 = vector.shape_cast %90 : vector<1x1x8xf32> to vector<1x8xf32>
    %92 = vector.broadcast %91 : vector<1x8xf32> to vector<5x8xf32>
    %93 = arith.addf %89, %92 : vector<5x8xf32>
    %c1_53 = arith.constant 1 : index
    %c0_54 = arith.constant 0 : index
    %c0_55 = arith.constant 0 : index
    %94 = vector.load %arg6[%c1_53, %c0_54, %c0_55] : memref<4x32x8xf32, #tpu.memory_space<vmem>>, vector<1x32x8xf32>
    %95 = vector.shape_cast %94 : vector<1x32x8xf32> to vector<32x8xf32>
    %96 = arith.truncf %25 : vector<5x32xf32> to vector<5x32xbf16>
    %97 = arith.truncf %95 : vector<32x8xf32> to vector<32x8xbf16>
    %cst_56 = arith.constant dense<0.000000e+00> : vector<5x8xf32>
    %98 = tpu.matmul %96, %97, %cst_56 {dimension_numbers = #tpu.dot_dimension_numbers<[1], [0], [0], [1], [0, 0, 1, 1], [], []>} : vector<5x32xbf16>, vector<32x8xbf16>, vector<5x8xf32> -> vector<5x8xf32>
    %c1_57 = arith.constant 1 : index
    %c0_58 = arith.constant 0 : index
    %c0_59 = arith.constant 0 : index
    %99 = vector.load %arg7[%c1_57, %c0_58, %c0_59] : memref<4x1x8xf32, #tpu.memory_space<vmem>>, vector<1x1x8xf32>
    %100 = vector.shape_cast %99 : vector<1x1x8xf32> to vector<1x8xf32>
    %101 = vector.broadcast %100 : vector<1x8xf32> to vector<5x8xf32>
    %102 = arith.addf %98, %101 : vector<5x8xf32>
    %103 = arith.truncf %84 : vector<5x8xf32> to vector<5x8xbf16>
    %104 = arith.truncf %93 : vector<5x8xf32> to vector<5x8xbf16>
    %cst_60 = arith.constant dense<0.000000e+00> : vector<5x5xf32>
    %105 = tpu.matmul %103, %104, %cst_60 {dimension_numbers = #tpu.dot_dimension_numbers<[1], [1], [0], [0], [0, 0, 1, 0], [], []>} : vector<5x8xbf16>, vector<5x8xbf16>, vector<5x5xf32> -> vector<5x5xf32>
    %cst_61 = arith.constant 0.353553385 : f32
    %106 = vector.broadcast %cst_61 : f32 to vector<5x5xf32>
    %107 = arith.mulf %105, %106 : vector<5x5xf32>
    %cst_62 = arith.constant dense<0xFF800000> : vector<5xf32>
    %108 = vector.multi_reduction <maximumf>, %107, %cst_62 [1] : vector<5x5xf32> to vector<5xf32>
    %109 = vector.shape_cast %108 : vector<5xf32> to vector<5x1xf32>
    %110 = vector.broadcast %109 : vector<5x1xf32> to vector<5x5xf32>
    %111 = arith.subf %107, %110 : vector<5x5xf32>
    %112 = math.exp %111 : vector<5x5xf32>
    %cst_63 = arith.constant dense<0.000000e+00> : vector<5xf32>
    %113 = vector.multi_reduction <add>, %112, %cst_63 [1] : vector<5x5xf32> to vector<5xf32>
    %114 = vector.shape_cast %113 : vector<5xf32> to vector<5x1xf32>
    %115 = tpu.reciprocal %114 {approx = true} : vector<5x1xf32> -> vector<5x1xf32>
    %116 = vector.broadcast %115 : vector<5x1xf32> to vector<5x5xf32>
    %117 = arith.mulf %112, %116 : vector<5x5xf32>
    %118 = arith.truncf %117 : vector<5x5xf32> to vector<5x5xbf16>
    %119 = arith.truncf %102 : vector<5x8xf32> to vector<5x8xbf16>
    %cst_64 = arith.constant dense<0.000000e+00> : vector<5x8xf32>
    %120 = tpu.matmul %118, %119, %cst_64 {dimension_numbers = #tpu.dot_dimension_numbers<[1], [0], [0], [1], [0, 0, 1, 1], [], []>} : vector<5x5xbf16>, vector<5x8xbf16>, vector<5x8xf32> -> vector<5x8xf32>
    %c1_65 = arith.constant 1 : index
    %c0_66 = arith.constant 0 : index
    %c0_67 = arith.constant 0 : index
    %121 = vector.load %arg8[%c1_65, %c0_66, %c0_67] : memref<4x8x32xf32, #tpu.memory_space<vmem>>, vector<1x8x32xf32>
    %122 = vector.shape_cast %121 : vector<1x8x32xf32> to vector<8x32xf32>
    %123 = arith.truncf %120 : vector<5x8xf32> to vector<5x8xbf16>
    %124 = arith.truncf %122 : vector<8x32xf32> to vector<8x32xbf16>
    %cst_68 = arith.constant dense<0.000000e+00> : vector<5x32xf32>
    %125 = tpu.matmul %123, %124, %cst_68 {dimension_numbers = #tpu.dot_dimension_numbers<[1], [0], [0], [1], [0, 0, 1, 1], [], []>} : vector<5x8xbf16>, vector<8x32xbf16>, vector<5x32xf32> -> vector<5x32xf32>
    %126 = arith.addf %75, %125 : vector<5x32xf32>
    %c2 = arith.constant 2 : index
    %c0_69 = arith.constant 0 : index
    %c0_70 = arith.constant 0 : index
    %127 = vector.load %arg2[%c2, %c0_69, %c0_70] : memref<4x32x8xf32, #tpu.memory_space<vmem>>, vector<1x32x8xf32>
    %128 = vector.shape_cast %127 : vector<1x32x8xf32> to vector<32x8xf32>
    %129 = arith.truncf %25 : vector<5x32xf32> to vector<5x32xbf16>
    %130 = arith.truncf %128 : vector<32x8xf32> to vector<32x8xbf16>
    %cst_71 = arith.constant dense<0.000000e+00> : vector<5x8xf32>
    %131 = tpu.matmul %129, %130, %cst_71 {dimension_numbers = #tpu.dot_dimension_numbers<[1], [0], [0], [1], [0, 0, 1, 1], [], []>} : vector<5x32xbf16>, vector<32x8xbf16>, vector<5x8xf32> -> vector<5x8xf32>
    %c2_72 = arith.constant 2 : index
    %c0_73 = arith.constant 0 : index
    %c0_74 = arith.constant 0 : index
    %132 = vector.load %arg3[%c2_72, %c0_73, %c0_74] : memref<4x1x8xf32, #tpu.memory_space<vmem>>, vector<1x1x8xf32>
    %133 = vector.shape_cast %132 : vector<1x1x8xf32> to vector<1x8xf32>
    %134 = vector.broadcast %133 : vector<1x8xf32> to vector<5x8xf32>
    %135 = arith.addf %131, %134 : vector<5x8xf32>
    %c2_75 = arith.constant 2 : index
    %c0_76 = arith.constant 0 : index
    %c0_77 = arith.constant 0 : index
    %136 = vector.load %arg4[%c2_75, %c0_76, %c0_77] : memref<4x32x8xf32, #tpu.memory_space<vmem>>, vector<1x32x8xf32>
    %137 = vector.shape_cast %136 : vector<1x32x8xf32> to vector<32x8xf32>
    %138 = arith.truncf %25 : vector<5x32xf32> to vector<5x32xbf16>
    %139 = arith.truncf %137 : vector<32x8xf32> to vector<32x8xbf16>
    %cst_78 = arith.constant dense<0.000000e+00> : vector<5x8xf32>
    %140 = tpu.matmul %138, %139, %cst_78 {dimension_numbers = #tpu.dot_dimension_numbers<[1], [0], [0], [1], [0, 0, 1, 1], [], []>} : vector<5x32xbf16>, vector<32x8xbf16>, vector<5x8xf32> -> vector<5x8xf32>
    %c2_79 = arith.constant 2 : index
    %c0_80 = arith.constant 0 : index
    %c0_81 = arith.constant 0 : index
    %141 = vector.load %arg5[%c2_79, %c0_80, %c0_81] : memref<4x1x8xf32, #tpu.memory_space<vmem>>, vector<1x1x8xf32>
    %142 = vector.shape_cast %141 : vector<1x1x8xf32> to vector<1x8xf32>
    %143 = vector.broadcast %142 : vector<1x8xf32> to vector<5x8xf32>
    %144 = arith.addf %140, %143 : vector<5x8xf32>
    %c2_82 = arith.constant 2 : index
    %c0_83 = arith.constant 0 : index
    %c0_84 = arith.constant 0 : index
    %145 = vector.load %arg6[%c2_82, %c0_83, %c0_84] : memref<4x32x8xf32, #tpu.memory_space<vmem>>, vector<1x32x8xf32>
    %146 = vector.shape_cast %145 : vector<1x32x8xf32> to vector<32x8xf32>
    %147 = arith.truncf %25 : vector<5x32xf32> to vector<5x32xbf16>
    %148 = arith.truncf %146 : vector<32x8xf32> to vector<32x8xbf16>
    %cst_85 = arith.constant dense<0.000000e+00> : vector<5x8xf32>
    %149 = tpu.matmul %147, %148, %cst_85 {dimension_numbers = #tpu.dot_dimension_numbers<[1], [0], [0], [1], [0, 0, 1, 1], [], []>} : vector<5x32xbf16>, vector<32x8xbf16>, vector<5x8xf32> -> vector<5x8xf32>
    %c2_86 = arith.constant 2 : index
    %c0_87 = arith.constant 0 : index
    %c0_88 = arith.constant 0 : index
    %150 = vector.load %arg7[%c2_86, %c0_87, %c0_88] : memref<4x1x8xf32, #tpu.memory_space<vmem>>, vector<1x1x8xf32>
    %151 = vector.shape_cast %150 : vector<1x1x8xf32> to vector<1x8xf32>
    %152 = vector.broadcast %151 : vector<1x8xf32> to vector<5x8xf32>
    %153 = arith.addf %149, %152 : vector<5x8xf32>
    %154 = arith.truncf %135 : vector<5x8xf32> to vector<5x8xbf16>
    %155 = arith.truncf %144 : vector<5x8xf32> to vector<5x8xbf16>
    %cst_89 = arith.constant dense<0.000000e+00> : vector<5x5xf32>
    %156 = tpu.matmul %154, %155, %cst_89 {dimension_numbers = #tpu.dot_dimension_numbers<[1], [1], [0], [0], [0, 0, 1, 0], [], []>} : vector<5x8xbf16>, vector<5x8xbf16>, vector<5x5xf32> -> vector<5x5xf32>
    %cst_90 = arith.constant 0.353553385 : f32
    %157 = vector.broadcast %cst_90 : f32 to vector<5x5xf32>
    %158 = arith.mulf %156, %157 : vector<5x5xf32>
    %cst_91 = arith.constant dense<0xFF800000> : vector<5xf32>
    %159 = vector.multi_reduction <maximumf>, %158, %cst_91 [1] : vector<5x5xf32> to vector<5xf32>
    %160 = vector.shape_cast %159 : vector<5xf32> to vector<5x1xf32>
    %161 = vector.broadcast %160 : vector<5x1xf32> to vector<5x5xf32>
    %162 = arith.subf %158, %161 : vector<5x5xf32>
    %163 = math.exp %162 : vector<5x5xf32>
    %cst_92 = arith.constant dense<0.000000e+00> : vector<5xf32>
    %164 = vector.multi_reduction <add>, %163, %cst_92 [1] : vector<5x5xf32> to vector<5xf32>
    %165 = vector.shape_cast %164 : vector<5xf32> to vector<5x1xf32>
    %166 = tpu.reciprocal %165 {approx = true} : vector<5x1xf32> -> vector<5x1xf32>
    %167 = vector.broadcast %166 : vector<5x1xf32> to vector<5x5xf32>
    %168 = arith.mulf %163, %167 : vector<5x5xf32>
    %169 = arith.truncf %168 : vector<5x5xf32> to vector<5x5xbf16>
    %170 = arith.truncf %153 : vector<5x8xf32> to vector<5x8xbf16>
    %cst_93 = arith.constant dense<0.000000e+00> : vector<5x8xf32>
    %171 = tpu.matmul %169, %170, %cst_93 {dimension_numbers = #tpu.dot_dimension_numbers<[1], [0], [0], [1], [0, 0, 1, 1], [], []>} : vector<5x5xbf16>, vector<5x8xbf16>, vector<5x8xf32> -> vector<5x8xf32>
    %c2_94 = arith.constant 2 : index
    %c0_95 = arith.constant 0 : index
    %c0_96 = arith.constant 0 : index
    %172 = vector.load %arg8[%c2_94, %c0_95, %c0_96] : memref<4x8x32xf32, #tpu.memory_space<vmem>>, vector<1x8x32xf32>
    %173 = vector.shape_cast %172 : vector<1x8x32xf32> to vector<8x32xf32>
    %174 = arith.truncf %171 : vector<5x8xf32> to vector<5x8xbf16>
    %175 = arith.truncf %173 : vector<8x32xf32> to vector<8x32xbf16>
    %cst_97 = arith.constant dense<0.000000e+00> : vector<5x32xf32>
    %176 = tpu.matmul %174, %175, %cst_97 {dimension_numbers = #tpu.dot_dimension_numbers<[1], [0], [0], [1], [0, 0, 1, 1], [], []>} : vector<5x8xbf16>, vector<8x32xbf16>, vector<5x32xf32> -> vector<5x32xf32>
    %177 = arith.addf %126, %176 : vector<5x32xf32>
    %c3 = arith.constant 3 : index
    %c0_98 = arith.constant 0 : index
    %c0_99 = arith.constant 0 : index
    %178 = vector.load %arg2[%c3, %c0_98, %c0_99] : memref<4x32x8xf32, #tpu.memory_space<vmem>>, vector<1x32x8xf32>
    %179 = vector.shape_cast %178 : vector<1x32x8xf32> to vector<32x8xf32>
    %180 = arith.truncf %25 : vector<5x32xf32> to vector<5x32xbf16>
    %181 = arith.truncf %179 : vector<32x8xf32> to vector<32x8xbf16>
    %cst_100 = arith.constant dense<0.000000e+00> : vector<5x8xf32>
    %182 = tpu.matmul %180, %181, %cst_100 {dimension_numbers = #tpu.dot_dimension_numbers<[1], [0], [0], [1], [0, 0, 1, 1], [], []>} : vector<5x32xbf16>, vector<32x8xbf16>, vector<5x8xf32> -> vector<5x8xf32>
    %c3_101 = arith.constant 3 : index
    %c0_102 = arith.constant 0 : index
    %c0_103 = arith.constant 0 : index
    %183 = vector.load %arg3[%c3_101, %c0_102, %c0_103] : memref<4x1x8xf32, #tpu.memory_space<vmem>>, vector<1x1x8xf32>
    %184 = vector.shape_cast %183 : vector<1x1x8xf32> to vector<1x8xf32>
    %185 = vector.broadcast %184 : vector<1x8xf32> to vector<5x8xf32>
    %186 = arith.addf %182, %185 : vector<5x8xf32>
    %c3_104 = arith.constant 3 : index
    %c0_105 = arith.constant 0 : index
    %c0_106 = arith.constant 0 : index
    %187 = vector.load %arg4[%c3_104, %c0_105, %c0_106] : memref<4x32x8xf32, #tpu.memory_space<vmem>>, vector<1x32x8xf32>
    %188 = vector.shape_cast %187 : vector<1x32x8xf32> to vector<32x8xf32>
    %189 = arith.truncf %25 : vector<5x32xf32> to vector<5x32xbf16>
    %190 = arith.truncf %188 : vector<32x8xf32> to vector<32x8xbf16>
    %cst_107 = arith.constant dense<0.000000e+00> : vector<5x8xf32>
    %191 = tpu.matmul %189, %190, %cst_107 {dimension_numbers = #tpu.dot_dimension_numbers<[1], [0], [0], [1], [0, 0, 1, 1], [], []>} : vector<5x32xbf16>, vector<32x8xbf16>, vector<5x8xf32> -> vector<5x8xf32>
    %c3_108 = arith.constant 3 : index
    %c0_109 = arith.constant 0 : index
    %c0_110 = arith.constant 0 : index
    %192 = vector.load %arg5[%c3_108, %c0_109, %c0_110] : memref<4x1x8xf32, #tpu.memory_space<vmem>>, vector<1x1x8xf32>
    %193 = vector.shape_cast %192 : vector<1x1x8xf32> to vector<1x8xf32>
    %194 = vector.broadcast %193 : vector<1x8xf32> to vector<5x8xf32>
    %195 = arith.addf %191, %194 : vector<5x8xf32>
    %c3_111 = arith.constant 3 : index
    %c0_112 = arith.constant 0 : index
    %c0_113 = arith.constant 0 : index
    %196 = vector.load %arg6[%c3_111, %c0_112, %c0_113] : memref<4x32x8xf32, #tpu.memory_space<vmem>>, vector<1x32x8xf32>
    %197 = vector.shape_cast %196 : vector<1x32x8xf32> to vector<32x8xf32>
    %198 = arith.truncf %25 : vector<5x32xf32> to vector<5x32xbf16>
    %199 = arith.truncf %197 : vector<32x8xf32> to vector<32x8xbf16>
    %cst_114 = arith.constant dense<0.000000e+00> : vector<5x8xf32>
    %200 = tpu.matmul %198, %199, %cst_114 {dimension_numbers = #tpu.dot_dimension_numbers<[1], [0], [0], [1], [0, 0, 1, 1], [], []>} : vector<5x32xbf16>, vector<32x8xbf16>, vector<5x8xf32> -> vector<5x8xf32>
    %c3_115 = arith.constant 3 : index
    %c0_116 = arith.constant 0 : index
    %c0_117 = arith.constant 0 : index
    %201 = vector.load %arg7[%c3_115, %c0_116, %c0_117] : memref<4x1x8xf32, #tpu.memory_space<vmem>>, vector<1x1x8xf32>
    %202 = vector.shape_cast %201 : vector<1x1x8xf32> to vector<1x8xf32>
    %203 = vector.broadcast %202 : vector<1x8xf32> to vector<5x8xf32>
    %204 = arith.addf %200, %203 : vector<5x8xf32>
    %205 = arith.truncf %186 : vector<5x8xf32> to vector<5x8xbf16>
    %206 = arith.truncf %195 : vector<5x8xf32> to vector<5x8xbf16>
    %cst_118 = arith.constant dense<0.000000e+00> : vector<5x5xf32>
    %207 = tpu.matmul %205, %206, %cst_118 {dimension_numbers = #tpu.dot_dimension_numbers<[1], [1], [0], [0], [0, 0, 1, 0], [], []>} : vector<5x8xbf16>, vector<5x8xbf16>, vector<5x5xf32> -> vector<5x5xf32>
    %cst_119 = arith.constant 0.353553385 : f32
    %208 = vector.broadcast %cst_119 : f32 to vector<5x5xf32>
    %209 = arith.mulf %207, %208 : vector<5x5xf32>
    %cst_120 = arith.constant dense<0xFF800000> : vector<5xf32>
    %210 = vector.multi_reduction <maximumf>, %209, %cst_120 [1] : vector<5x5xf32> to vector<5xf32>
    %211 = vector.shape_cast %210 : vector<5xf32> to vector<5x1xf32>
    %212 = vector.broadcast %211 : vector<5x1xf32> to vector<5x5xf32>
    %213 = arith.subf %209, %212 : vector<5x5xf32>
    %214 = math.exp %213 : vector<5x5xf32>
    %cst_121 = arith.constant dense<0.000000e+00> : vector<5xf32>
    %215 = vector.multi_reduction <add>, %214, %cst_121 [1] : vector<5x5xf32> to vector<5xf32>
    %216 = vector.shape_cast %215 : vector<5xf32> to vector<5x1xf32>
    %217 = tpu.reciprocal %216 {approx = true} : vector<5x1xf32> -> vector<5x1xf32>
    %218 = vector.broadcast %217 : vector<5x1xf32> to vector<5x5xf32>
    %219 = arith.mulf %214, %218 : vector<5x5xf32>
    %220 = arith.truncf %219 : vector<5x5xf32> to vector<5x5xbf16>
    %221 = arith.truncf %204 : vector<5x8xf32> to vector<5x8xbf16>
    %cst_122 = arith.constant dense<0.000000e+00> : vector<5x8xf32>
    %222 = tpu.matmul %220, %221, %cst_122 {dimension_numbers = #tpu.dot_dimension_numbers<[1], [0], [0], [1], [0, 0, 1, 1], [], []>} : vector<5x5xbf16>, vector<5x8xbf16>, vector<5x8xf32> -> vector<5x8xf32>
    %c3_123 = arith.constant 3 : index
    %c0_124 = arith.constant 0 : index
    %c0_125 = arith.constant 0 : index
    %223 = vector.load %arg8[%c3_123, %c0_124, %c0_125] : memref<4x8x32xf32, #tpu.memory_space<vmem>>, vector<1x8x32xf32>
    %224 = vector.shape_cast %223 : vector<1x8x32xf32> to vector<8x32xf32>
    %225 = arith.truncf %222 : vector<5x8xf32> to vector<5x8xbf16>
    %226 = arith.truncf %224 : vector<8x32xf32> to vector<8x32xbf16>
    %cst_126 = arith.constant dense<0.000000e+00> : vector<5x32xf32>
    %227 = tpu.matmul %225, %226, %cst_126 {dimension_numbers = #tpu.dot_dimension_numbers<[1], [0], [0], [1], [0, 0, 1, 1], [], []>} : vector<5x8xbf16>, vector<8x32xbf16>, vector<5x32xf32> -> vector<5x32xf32>
    %228 = arith.addf %177, %227 : vector<5x32xf32>
    %c0_127 = arith.constant 0 : index
    %c0_128 = arith.constant 0 : index
    %229 = vector.load %arg9[%c0_127, %c0_128] : memref<1x32xf32, #tpu.memory_space<vmem>>, vector<1x32xf32>
    %230 = vector.broadcast %229 : vector<1x32xf32> to vector<5x32xf32>
    %231 = arith.addf %228, %230 : vector<5x32xf32>
    %232 = arith.addf %1, %231 : vector<5x32xf32>
    %c0_129 = arith.constant 0 : index
    %c0_130 = arith.constant 0 : index
    %233 = vector.load %arg12[%c0_129, %c0_130] : memref<1x32xf32, #tpu.memory_space<vmem>>, vector<1x32xf32>
    %c0_131 = arith.constant 0 : index
    %c0_132 = arith.constant 0 : index
    %234 = vector.load %arg13[%c0_131, %c0_132] : memref<1x32xf32, #tpu.memory_space<vmem>>, vector<1x32xf32>
    %cst_133 = arith.constant dense<0.000000e+00> : vector<5xf32>
    %235 = vector.multi_reduction <add>, %232, %cst_133 [1] : vector<5x32xf32> to vector<5xf32>
    %236 = vector.shape_cast %235 : vector<5xf32> to vector<5x1xf32>
    %cst_134 = arith.constant 3.200000e+01 : f32
    %237 = vector.broadcast %cst_134 : f32 to vector<5x1xf32>
    %238 = arith.divf %236, %237 : vector<5x1xf32>
    %239 = vector.broadcast %238 : vector<5x1xf32> to vector<5x32xf32>
    %240 = arith.subf %232, %239 : vector<5x32xf32>
    %241 = arith.mulf %240, %240 : vector<5x32xf32>
    %cst_135 = arith.constant dense<0.000000e+00> : vector<5xf32>
    %242 = vector.multi_reduction <add>, %241, %cst_135 [1] : vector<5x32xf32> to vector<5xf32>
    %243 = vector.shape_cast %242 : vector<5xf32> to vector<5x1xf32>
    %cst_136 = arith.constant 3.200000e+01 : f32
    %244 = vector.broadcast %cst_136 : f32 to vector<5x1xf32>
    %245 = arith.divf %243, %244 : vector<5x1xf32>
    %246 = vector.broadcast %238 : vector<5x1xf32> to vector<5x32xf32>
    %247 = arith.subf %232, %246 : vector<5x32xf32>
    %cst_137 = arith.constant 9.99999997E-7 : f32
    %248 = vector.broadcast %cst_137 : f32 to vector<5x1xf32>
    %249 = arith.addf %245, %248 : vector<5x1xf32>
    %250 = math.rsqrt %249 : vector<5x1xf32>
    %251 = vector.broadcast %250 : vector<5x1xf32> to vector<5x32xf32>
    %252 = arith.mulf %247, %251 : vector<5x32xf32>
    %253 = vector.broadcast %233 : vector<1x32xf32> to vector<5x32xf32>
    %254 = arith.mulf %252, %253 : vector<5x32xf32>
    %255 = vector.broadcast %234 : vector<1x32xf32> to vector<5x32xf32>
    %256 = arith.addf %254, %255 : vector<5x32xf32>
    %c0_138 = arith.constant 0 : index
    %c0_139 = arith.constant 0 : index
    %257 = vector.load %arg14[%c0_138, %c0_139] : memref<32x128xf32, #tpu.memory_space<vmem>>, vector<32x128xf32>
    %258 = arith.truncf %256 : vector<5x32xf32> to vector<5x32xbf16>
    %259 = arith.truncf %257 : vector<32x128xf32> to vector<32x128xbf16>
    %cst_140 = arith.constant dense<0.000000e+00> : vector<5x128xf32>
    %260 = tpu.matmul %258, %259, %cst_140 {dimension_numbers = #tpu.dot_dimension_numbers<[1], [0], [0], [1], [0, 0, 1, 1], [], []>} : vector<5x32xbf16>, vector<32x128xbf16>, vector<5x128xf32> -> vector<5x128xf32>
    %c0_141 = arith.constant 0 : index
    %c0_142 = arith.constant 0 : index
    %261 = vector.load %arg15[%c0_141, %c0_142] : memref<1x128xf32, #tpu.memory_space<vmem>>, vector<1x128xf32>
    %262 = vector.broadcast %261 : vector<1x128xf32> to vector<5x128xf32>
    %263 = arith.addf %260, %262 : vector<5x128xf32>
    %264 = arith.mulf %263, %263 : vector<5x128xf32>
    %265 = arith.mulf %263, %264 : vector<5x128xf32>
    %cst_143 = arith.constant 4.471500e-02 : f32
    %266 = vector.broadcast %cst_143 : f32 to vector<5x128xf32>
    %267 = arith.mulf %266, %265 : vector<5x128xf32>
    %268 = arith.addf %263, %267 : vector<5x128xf32>
    %cst_144 = arith.constant 0.797884583 : f32
    %269 = vector.broadcast %cst_144 : f32 to vector<5x128xf32>
    %270 = arith.mulf %269, %268 : vector<5x128xf32>
    %271 = math.tanh %270 : vector<5x128xf32>
    %cst_145 = arith.constant 1.000000e+00 : f32
    %272 = vector.broadcast %cst_145 : f32 to vector<5x128xf32>
    %273 = arith.addf %272, %271 : vector<5x128xf32>
    %cst_146 = arith.constant 5.000000e-01 : f32
    %274 = vector.broadcast %cst_146 : f32 to vector<5x128xf32>
    %275 = arith.mulf %274, %273 : vector<5x128xf32>
    %276 = arith.mulf %263, %275 : vector<5x128xf32>
    %c0_147 = arith.constant 0 : index
    %c0_148 = arith.constant 0 : index
    %277 = vector.load %arg16[%c0_147, %c0_148] : memref<128x32xf32, #tpu.memory_space<vmem>>, vector<128x32xf32>
    %278 = arith.truncf %276 : vector<5x128xf32> to vector<5x128xbf16>
    %279 = arith.truncf %277 : vector<128x32xf32> to vector<128x32xbf16>
    %cst_149 = arith.constant dense<0.000000e+00> : vector<5x32xf32>
    %280 = tpu.matmul %278, %279, %cst_149 {dimension_numbers = #tpu.dot_dimension_numbers<[1], [0], [0], [1], [0, 0, 1, 1], [], []>} : vector<5x128xbf16>, vector<128x32xbf16>, vector<5x32xf32> -> vector<5x32xf32>
    %c0_150 = arith.constant 0 : index
    %c0_151 = arith.constant 0 : index
    %281 = vector.load %arg17[%c0_150, %c0_151] : memref<1x32xf32, #tpu.memory_space<vmem>>, vector<1x32xf32>
    %282 = vector.broadcast %281 : vector<1x32xf32> to vector<5x32xf32>
    %283 = arith.addf %280, %282 : vector<5x32xf32>
    %284 = arith.addf %232, %283 : vector<5x32xf32>
    %c0_152 = arith.constant 0 : index
    %c0_153 = arith.constant 0 : index
    %c0_154 = arith.constant 0 : index
    %285 = vector.load %arg20[%c0_152, %c0_153, %c0_154] : memref<1x5x32xf32, #tpu.memory_space<vmem>>, vector<1x5x32xf32>
    %286 = vector.shape_cast %285 : vector<1x5x32xf32> to vector<5x32xf32>
    %287 = vector.shape_cast %284 : vector<5x32xf32> to vector<1x5x32xf32>
    tpu.vector_store %arg20[%c0_152, %c0_153, %c0_154], %287 {strides = array<i32>} : memref<1x5x32xf32, #tpu.memory_space<vmem>>, vector<1x5x32xf32>,
    return
  }
  func.func @transform_0(%arg0: i32) -> (i32, i32, i32) {
    %c0_i32 = arith.constant 0 : i32
    %c0_i32_0 = arith.constant 0 : i32
    %c0_i32_1 = arith.constant 0 : i32
    return %arg0, %c0_i32, %c0_i32_0 : i32, i32, i32
  }
  func.func @transform_1(%arg0: i32) -> (i32, i32, i32) {
    %c0_i32 = arith.constant 0 : i32
    %c0_i32_0 = arith.constant 0 : i32
    %c0_i32_1 = arith.constant 0 : i32
    %c0_i32_2 = arith.constant 0 : i32
    return %c0_i32, %c0_i32_0, %c0_i32_1 : i32, i32, i32
  }
  func.func @transform_2(%arg0: i32) -> (i32, i32, i32) {
    %c0_i32 = arith.constant 0 : i32
    %c0_i32_0 = arith.constant 0 : i32
    %c0_i32_1 = arith.constant 0 : i32
    %c0_i32_2 = arith.constant 0 : i32
    return %c0_i32, %c0_i32_0, %c0_i32_1 : i32, i32, i32
  }
  func.func @transform_3(%arg0: i32) -> (i32, i32, i32) {
    %c0_i32 = arith.constant 0 : i32
    %c0_i32_0 = arith.constant 0 : i32
    %c0_i32_1 = arith.constant 0 : i32
    %c0_i32_2 = arith.constant 0 : i32
    return %c0_i32, %c0_i32_0, %c0_i32_1 : i32, i32, i32
  }
  func.func @transform_4(%arg0: i32) -> (i32, i32, i32) {
    %c0_i32 = arith.constant 0 : i32
    %c0_i32_0 = arith.constant 0 : i32
    %c0_i32_1 = arith.constant 0 : i32
    %c0_i32_2 = arith.constant 0 : i32
    return %c0_i32, %c0_i32_0, %c0_i32_1 : i32, i32, i32
  }
  func.func @transform_5(%arg0: i32) -> (i32, i32, i32) {
    %c0_i32 = arith.constant 0 : i32
    %c0_i32_0 = arith.constant 0 : i32
    %c0_i32_1 = arith.constant 0 : i32
    %c0_i32_2 = arith.constant 0 : i32
    return %c0_i32, %c0_i32_0, %c0_i32_1 : i32, i32, i32
  }
  func.func @transform_6(%arg0: i32) -> (i32, i32, i32) {
    %c0_i32 = arith.constant 0 : i32
    %c0_i32_0 = arith.constant 0 : i32
    %c0_i32_1 = arith.constant 0 : i32
    %c0_i32_2 = arith.constant 0 : i32
    return %c0_i32, %c0_i32_0, %c0_i32_1 : i32, i32, i32
  }
  func.func @transform_7(%arg0: i32) -> (i32, i32, i32) {
    %c0_i32 = arith.constant 0 : i32
    %c0_i32_0 = arith.constant 0 : i32
    %c0_i32_1 = arith.constant 0 : i32
    %c0_i32_2 = arith.constant 0 : i32
    return %c0_i32, %c0_i32_0, %c0_i32_1 : i32, i32, i32
  }
  func.func @transform_8(%arg0: i32) -> (i32, i32) {
    %c0_i32 = arith.constant 0 : i32
    %c0_i32_0 = arith.constant 0 : i32
    %c0_i32_1 = arith.constant 0 : i32
    return %c0_i32, %c0_i32_0 : i32, i32
  }
  func.func @transform_9(%arg0: i32) -> (i32, i32) {
    %c0_i32 = arith.constant 0 : i32
    %c0_i32_0 = arith.constant 0 : i32
    %c0_i32_1 = arith.constant 0 : i32
    return %c0_i32, %c0_i32_0 : i32, i32
  }
  func.func @transform_10(%arg0: i32) -> (i32, i32) {
    %c0_i32 = arith.constant 0 : i32
    %c0_i32_0 = arith.constant 0 : i32
    %c0_i32_1 = arith.constant 0 : i32
    return %c0_i32, %c0_i32_0 : i32, i32
  }
  func.func @transform_11(%arg0: i32) -> (i32, i32) {
    %c0_i32 = arith.constant 0 : i32
    %c0_i32_0 = arith.constant 0 : i32
    %c0_i32_1 = arith.constant 0 : i32
    return %c0_i32, %c0_i32_0 : i32, i32
  }
  func.func @transform_12(%arg0: i32) -> (i32, i32) {
    %c0_i32 = arith.constant 0 : i32
    %c0_i32_0 = arith.constant 0 : i32
    %c0_i32_1 = arith.constant 0 : i32
    return %c0_i32, %c0_i32_0 : i32, i32
  }
  func.func @transform_13(%arg0: i32) -> (i32, i32) {
    %c0_i32 = arith.constant 0 : i32
    %c0_i32_0 = arith.constant 0 : i32
    %c0_i32_1 = arith.constant 0 : i32
    return %c0_i32, %c0_i32_0 : i32, i32
  }
  func.func @transform_14(%arg0: i32) -> (i32, i32) {
    %c0_i32 = arith.constant 0 : i32
    %c0_i32_0 = arith.constant 0 : i32
    %c0_i32_1 = arith.constant 0 : i32
    return %c0_i32, %c0_i32_0 : i32, i32
  }
  func.func @transform_15(%arg0: i32) -> (i32, i32) {
    %c0_i32 = arith.constant 0 : i32
    %c0_i32_0 = arith.constant 0 : i32
    %c0_i32_1 = arith.constant 0 : i32
    return %c0_i32, %c0_i32_0 : i32, i32
  }
  func.func @transform_16(%arg0: i32) -> (i32, i32) {
    %c0_i32 = arith.constant 0 : i32
    %c0_i32_0 = arith.constant 0 : i32
    %c0_i32_1 = arith.constant 0 : i32
    return %c0_i32, %c0_i32_0 : i32, i32
  }
  func.func @transform_17(%arg0: i32) -> (i32, i32) {
    %c0_i32 = arith.constant 0 : i32
    %c0_i32_0 = arith.constant 0 : i32
    %c0_i32_1 = arith.constant 0 : i32
    return %c0_i32, %c0_i32_0 : i32, i32
  }
  func.func @transform_18(%arg0: i32) -> (i32, i32) {
    %c0_i32 = arith.constant 0 : i32
    %c0_i32_0 = arith.constant 0 : i32
    %c0_i32_1 = arith.constant 0 : i32
    return %c0_i32, %c0_i32_0 : i32, i32
  }
  func.func @transform_19(%arg0: i32) -> (i32, i32, i32) {
    %c0_i32 = arith.constant 0 : i32
    %c0_i32_0 = arith.constant 0 : i32
    %c0_i32_1 = arith.constant 0 : i32
    return %arg0, %c0_i32, %c0_i32_0 : i32, i32, i32
  }
}

module attributes {stable_mosaic.version = 11 : i64} {
  func.func @_patch_embed_kernel(%arg0: i32, %arg1: memref<1x4x768xf32, #tpu.memory_space<vmem>>, %arg2: memref<768x32xf32, #tpu.memory_space<vmem>>, %arg3: memref<1x32xf32, #tpu.memory_space<vmem>>, %arg4: memref<4x32xf32, #tpu.memory_space<vmem>>, %arg5: memref<1x4x32xf32, #tpu.memory_space<vmem>>) attributes {dimension_semantics = [#tpu.dimension_semantics<parallel>], iteration_bounds = array<i64: 2>, scalar_prefetch = 0 : i64, scratch_operands = 0 : i64, tpu.core_type = #tpu.core_type<tc>, window_params = [{transform_indices = @transform_0, window_bounds = array<i64: 1, 4, 768>}, {pipeline_mode = #tpu.pipeline_mode<synchronous>, transform_indices = @transform_1, window_bounds = array<i64: 768, 32>}, {pipeline_mode = #tpu.pipeline_mode<synchronous>, transform_indices = @transform_2, window_bounds = array<i64: 1, 32>}, {pipeline_mode = #tpu.pipeline_mode<synchronous>, transform_indices = @transform_3, window_bounds = array<i64: 4, 32>}, {transform_indices = @transform_4, window_bounds = array<i64: 1, 4, 32>}]} {
    %c0 = arith.constant 0 : index
    %c0_0 = arith.constant 0 : index
    %c0_1 = arith.constant 0 : index
    %0 = vector.load %arg1[%c0, %c0_0, %c0_1] : memref<1x4x768xf32, #tpu.memory_space<vmem>>, vector<1x4x768xf32>
    %1 = vector.shape_cast %0 : vector<1x4x768xf32> to vector<4x768xf32>
    %c0_2 = arith.constant 0 : index
    %c0_3 = arith.constant 0 : index
    %2 = vector.load %arg2[%c0_2, %c0_3] : memref<768x32xf32, #tpu.memory_space<vmem>>, vector<768x32xf32>
    %3 = arith.truncf %1 : vector<4x768xf32> to vector<4x768xbf16>
    %4 = arith.truncf %2 : vector<768x32xf32> to vector<768x32xbf16>
    %cst = arith.constant dense<0.000000e+00> : vector<4x32xf32>
    %5 = tpu.matmul %3, %4, %cst {dimension_numbers = #tpu.dot_dimension_numbers<[1], [0], [0], [1], [0, 0, 1, 1], [], []>} : vector<4x768xbf16>, vector<768x32xbf16>, vector<4x32xf32> -> vector<4x32xf32>
    %c0_4 = arith.constant 0 : index
    %c0_5 = arith.constant 0 : index
    %6 = vector.load %arg3[%c0_4, %c0_5] : memref<1x32xf32, #tpu.memory_space<vmem>>, vector<1x32xf32>
    %7 = vector.broadcast %6 : vector<1x32xf32> to vector<4x32xf32>
    %8 = arith.addf %5, %7 : vector<4x32xf32>
    %c0_6 = arith.constant 0 : index
    %c0_7 = arith.constant 0 : index
    %9 = vector.load %arg4[%c0_6, %c0_7] : memref<4x32xf32, #tpu.memory_space<vmem>>, vector<4x32xf32>
    %10 = arith.addf %8, %9 : vector<4x32xf32>
    %c0_8 = arith.constant 0 : index
    %c0_9 = arith.constant 0 : index
    %c0_10 = arith.constant 0 : index
    %11 = vector.load %arg5[%c0_8, %c0_9, %c0_10] : memref<1x4x32xf32, #tpu.memory_space<vmem>>, vector<1x4x32xf32>
    %12 = vector.shape_cast %11 : vector<1x4x32xf32> to vector<4x32xf32>
    %13 = vector.shape_cast %10 : vector<4x32xf32> to vector<1x4x32xf32>
    tpu.vector_store %arg5[%c0_8, %c0_9, %c0_10], %13 {strides = array<i32>} : memref<1x4x32xf32, #tpu.memory_space<vmem>>, vector<1x4x32xf32>,
    return
  }
  func.func @transform_0(%arg0: i32) -> (i32, i32, i32) {
    %c0_i32 = arith.constant 0 : i32
    %c0_i32_0 = arith.constant 0 : i32
    %c0_i32_1 = arith.constant 0 : i32
    return %arg0, %c0_i32, %c0_i32_0 : i32, i32, i32
  }
  func.func @transform_1(%arg0: i32) -> (i32, i32) {
    %c0_i32 = arith.constant 0 : i32
    %c0_i32_0 = arith.constant 0 : i32
    %c0_i32_1 = arith.constant 0 : i32
    return %c0_i32, %c0_i32_0 : i32, i32
  }
  func.func @transform_2(%arg0: i32) -> (i32, i32) {
    %c0_i32 = arith.constant 0 : i32
    %c0_i32_0 = arith.constant 0 : i32
    %c0_i32_1 = arith.constant 0 : i32
    return %c0_i32, %c0_i32_0 : i32, i32
  }
  func.func @transform_3(%arg0: i32) -> (i32, i32) {
    %c0_i32 = arith.constant 0 : i32
    %c0_i32_0 = arith.constant 0 : i32
    %c0_i32_1 = arith.constant 0 : i32
    return %c0_i32, %c0_i32_0 : i32, i32
  }
  func.func @transform_4(%arg0: i32) -> (i32, i32, i32) {
    %c0_i32 = arith.constant 0 : i32
    %c0_i32_0 = arith.constant 0 : i32
    %c0_i32_1 = arith.constant 0 : i32
    return %arg0, %c0_i32, %c0_i32_0 : i32, i32, i32
  }
}

module attributes {stable_mosaic.version = 11 : i64} {
  func.func @_vit_block_kernel(%arg0: i32, %arg1: memref<1x5x32xf32, #tpu.memory_space<vmem>>, %arg2: memref<4x32x8xf32, #tpu.memory_space<vmem>>, %arg3: memref<4x1x8xf32, #tpu.memory_space<vmem>>, %arg4: memref<4x32x8xf32, #tpu.memory_space<vmem>>, %arg5: memref<4x1x8xf32, #tpu.memory_space<vmem>>, %arg6: memref<4x32x8xf32, #tpu.memory_space<vmem>>, %arg7: memref<4x1x8xf32, #tpu.memory_space<vmem>>, %arg8: memref<4x8x32xf32, #tpu.memory_space<vmem>>, %arg9: memref<1x32xf32, #tpu.memory_space<vmem>>, %arg10: memref<1x32xf32, #tpu.memory_space<vmem>>, %arg11: memref<1x32xf32, #tpu.memory_space<vmem>>, %arg12: memref<1x32xf32, #tpu.memory_space<vmem>>, %arg13: memref<1x32xf32, #tpu.memory_space<vmem>>, %arg14: memref<32x128xf32, #tpu.memory_space<vmem>>, %arg15: memref<1x128xf32, #tpu.memory_space<vmem>>, %arg16: memref<128x32xf32, #tpu.memory_space<vmem>>, %arg17: memref<1x32xf32, #tpu.memory_space<vmem>>, %arg18: memref<1x32xf32, #tpu.memory_space<vmem>>, %arg19: memref<1x32xf32, #tpu.memory_space<vmem>>, %arg20: memref<1x5x32xf32, #tpu.memory_space<vmem>>) attributes {dimension_semantics = [#tpu.dimension_semantics<parallel>], iteration_bounds = array<i64: 2>, scalar_prefetch = 0 : i64, scratch_operands = 0 : i64, tpu.core_type = #tpu.core_type<tc>, window_params = [{transform_indices = @transform_0, window_bounds = array<i64: 1, 5, 32>}, {pipeline_mode = #tpu.pipeline_mode<synchronous>, transform_indices = @transform_1, window_bounds = array<i64: 4, 32, 8>}, {pipeline_mode = #tpu.pipeline_mode<synchronous>, transform_indices = @transform_2, window_bounds = array<i64: 4, 1, 8>}, {pipeline_mode = #tpu.pipeline_mode<synchronous>, transform_indices = @transform_3, window_bounds = array<i64: 4, 32, 8>}, {pipeline_mode = #tpu.pipeline_mode<synchronous>, transform_indices = @transform_4, window_bounds = array<i64: 4, 1, 8>}, {pipeline_mode = #tpu.pipeline_mode<synchronous>, transform_indices = @transform_5, window_bounds = array<i64: 4, 32, 8>}, {pipeline_mode = #tpu.pipeline_mode<synchronous>, transform_indices = @transform_6, window_bounds = array<i64: 4, 1, 8>}, {pipeline_mode = #tpu.pipeline_mode<synchronous>, transform_indices = @transform_7, window_bounds = array<i64: 4, 8, 32>}, {pipeline_mode = #tpu.pipeline_mode<synchronous>, transform_indices = @transform_8, window_bounds = array<i64: 1, 32>}, {pipeline_mode = #tpu.pipeline_mode<synchronous>, transform_indices = @transform_9, window_bounds = array<i64: 1, 32>}, {pipeline_mode = #tpu.pipeline_mode<synchronous>, transform_indices = @transform_10, window_bounds = array<i64: 1, 32>}, {pipeline_mode = #tpu.pipeline_mode<synchronous>, transform_indices = @transform_11, window_bounds = array<i64: 1, 32>}, {pipeline_mode = #tpu.pipeline_mode<synchronous>, transform_indices = @transform_12, window_bounds = array<i64: 1, 32>}, {pipeline_mode = #tpu.pipeline_mode<synchronous>, transform_indices = @transform_13, window_bounds = array<i64: 32, 128>}, {pipeline_mode = #tpu.pipeline_mode<synchronous>, transform_indices = @transform_14, window_bounds = array<i64: 1, 128>}, {pipeline_mode = #tpu.pipeline_mode<synchronous>, transform_indices = @transform_15, window_bounds = array<i64: 128, 32>}, {pipeline_mode = #tpu.pipeline_mode<synchronous>, transform_indices = @transform_16, window_bounds = array<i64: 1, 32>}, {pipeline_mode = #tpu.pipeline_mode<synchronous>, transform_indices = @transform_17, window_bounds = array<i64: 1, 32>}, {pipeline_mode = #tpu.pipeline_mode<synchronous>, transform_indices = @transform_18, window_bounds = array<i64: 1, 32>}, {transform_indices = @transform_19, window_bounds = array<i64: 1, 5, 32>}]} {
    %c0 = arith.constant 0 : index
    %c0_0 = arith.constant 0 : index
    %c0_1 = arith.constant 0 : index
    %0 = vector.load %arg1[%c0, %c0_0, %c0_1] : memref<1x5x32xf32, #tpu.memory_space<vmem>>, vector<1x5x32xf32>
    %1 = vector.shape_cast %0 : vector<1x5x32xf32> to vector<5x32xf32>
    %c0_2 = arith.constant 0 : index
    %c0_3 = arith.constant 0 : index
    %2 = vector.load %arg10[%c0_2, %c0_3] : memref<1x32xf32, #tpu.memory_space<vmem>>, vector<1x32xf32>
    %c0_4 = arith.constant 0 : index
    %c0_5 = arith.constant 0 : index
    %3 = vector.load %arg11[%c0_4, %c0_5] : memref<1x32xf32, #tpu.memory_space<vmem>>, vector<1x32xf32>
    %cst = arith.constant dense<0.000000e+00> : vector<5xf32>
    %4 = vector.multi_reduction <add>, %1, %cst [1] : vector<5x32xf32> to vector<5xf32>
    %5 = vector.shape_cast %4 : vector<5xf32> to vector<5x1xf32>
    %cst_6 = arith.constant 3.200000e+01 : f32
    %6 = vector.broadcast %cst_6 : f32 to vector<5x1xf32>
    %7 = arith.divf %5, %6 : vector<5x1xf32>
    %8 = vector.broadcast %7 : vector<5x1xf32> to vector<5x32xf32>
    %9 = arith.subf %1, %8 : vector<5x32xf32>
    %10 = arith.mulf %9, %9 : vector<5x32xf32>
    %cst_7 = arith.constant dense<0.000000e+00> : vector<5xf32>
    %11 = vector.multi_reduction <add>, %10, %cst_7 [1] : vector<5x32xf32> to vector<5xf32>
    %12 = vector.shape_cast %11 : vector<5xf32> to vector<5x1xf32>
    %cst_8 = arith.constant 3.200000e+01 : f32
    %13 = vector.broadcast %cst_8 : f32 to vector<5x1xf32>
    %14 = arith.divf %12, %13 : vector<5x1xf32>
    %15 = vector.broadcast %7 : vector<5x1xf32> to vector<5x32xf32>
    %16 = arith.subf %1, %15 : vector<5x32xf32>
    %cst_9 = arith.constant 9.99999997E-7 : f32
    %17 = vector.broadcast %cst_9 : f32 to vector<5x1xf32>
    %18 = arith.addf %14, %17 : vector<5x1xf32>
    %19 = math.rsqrt %18 : vector<5x1xf32>
    %20 = vector.broadcast %19 : vector<5x1xf32> to vector<5x32xf32>
    %21 = arith.mulf %16, %20 : vector<5x32xf32>
    %22 = vector.broadcast %2 : vector<1x32xf32> to vector<5x32xf32>
    %23 = arith.mulf %21, %22 : vector<5x32xf32>
    %24 = vector.broadcast %3 : vector<1x32xf32> to vector<5x32xf32>
    %25 = arith.addf %23, %24 : vector<5x32xf32>
    %c0_10 = arith.constant 0 : index
    %c0_11 = arith.constant 0 : index
    %c0_12 = arith.constant 0 : index
    %26 = vector.load %arg2[%c0_10, %c0_11, %c0_12] : memref<4x32x8xf32, #tpu.memory_space<vmem>>, vector<1x32x8xf32>
    %27 = vector.shape_cast %26 : vector<1x32x8xf32> to vector<32x8xf32>
    %28 = arith.truncf %25 : vector<5x32xf32> to vector<5x32xbf16>
    %29 = arith.truncf %27 : vector<32x8xf32> to vector<32x8xbf16>
    %cst_13 = arith.constant dense<0.000000e+00> : vector<5x8xf32>
    %30 = tpu.matmul %28, %29, %cst_13 {dimension_numbers = #tpu.dot_dimension_numbers<[1], [0], [0], [1], [0, 0, 1, 1], [], []>} : vector<5x32xbf16>, vector<32x8xbf16>, vector<5x8xf32> -> vector<5x8xf32>
    %c0_14 = arith.constant 0 : index
    %c0_15 = arith.constant 0 : index
    %c0_16 = arith.constant 0 : index
    %31 = vector.load %arg3[%c0_14, %c0_15, %c0_16] : memref<4x1x8xf32, #tpu.memory_space<vmem>>, vector<1x1x8xf32>
    %32 = vector.shape_cast %31 : vector<1x1x8xf32> to vector<1x8xf32>
    %33 = vector.broadcast %32 : vector<1x8xf32> to vector<5x8xf32>
    %34 = arith.addf %30, %33 : vector<5x8xf32>
    %c0_17 = arith.constant 0 : index
    %c0_18 = arith.constant 0 : index
    %c0_19 = arith.constant 0 : index
    %35 = vector.load %arg4[%c0_17, %c0_18, %c0_19] : memref<4x32x8xf32, #tpu.memory_space<vmem>>, vector<1x32x8xf32>
    %36 = vector.shape_cast %35 : vector<1x32x8xf32> to vector<32x8xf32>
    %37 = arith.truncf %25 : vector<5x32xf32> to vector<5x32xbf16>
    %38 = arith.truncf %36 : vector<32x8xf32> to vector<32x8xbf16>
    %cst_20 = arith.constant dense<0.000000e+00> : vector<5x8xf32>
    %39 = tpu.matmul %37, %38, %cst_20 {dimension_numbers = #tpu.dot_dimension_numbers<[1], [0], [0], [1], [0, 0, 1, 1], [], []>} : vector<5x32xbf16>, vector<32x8xbf16>, vector<5x8xf32> -> vector<5x8xf32>
    %c0_21 = arith.constant 0 : index
    %c0_22 = arith.constant 0 : index
    %c0_23 = arith.constant 0 : index
    %40 = vector.load %arg5[%c0_21, %c0_22, %c0_23] : memref<4x1x8xf32, #tpu.memory_space<vmem>>, vector<1x1x8xf32>
    %41 = vector.shape_cast %40 : vector<1x1x8xf32> to vector<1x8xf32>
    %42 = vector.broadcast %41 : vector<1x8xf32> to vector<5x8xf32>
    %43 = arith.addf %39, %42 : vector<5x8xf32>
    %c0_24 = arith.constant 0 : index
    %c0_25 = arith.constant 0 : index
    %c0_26 = arith.constant 0 : index
    %44 = vector.load %arg6[%c0_24, %c0_25, %c0_26] : memref<4x32x8xf32, #tpu.memory_space<vmem>>, vector<1x32x8xf32>
    %45 = vector.shape_cast %44 : vector<1x32x8xf32> to vector<32x8xf32>
    %46 = arith.truncf %25 : vector<5x32xf32> to vector<5x32xbf16>
    %47 = arith.truncf %45 : vector<32x8xf32> to vector<32x8xbf16>
    %cst_27 = arith.constant dense<0.000000e+00> : vector<5x8xf32>
    %48 = tpu.matmul %46, %47, %cst_27 {dimension_numbers = #tpu.dot_dimension_numbers<[1], [0], [0], [1], [0, 0, 1, 1], [], []>} : vector<5x32xbf16>, vector<32x8xbf16>, vector<5x8xf32> -> vector<5x8xf32>
    %c0_28 = arith.constant 0 : index
    %c0_29 = arith.constant 0 : index
    %c0_30 = arith.constant 0 : index
    %49 = vector.load %arg7[%c0_28, %c0_29, %c0_30] : memref<4x1x8xf32, #tpu.memory_space<vmem>>, vector<1x1x8xf32>
    %50 = vector.shape_cast %49 : vector<1x1x8xf32> to vector<1x8xf32>
    %51 = vector.broadcast %50 : vector<1x8xf32> to vector<5x8xf32>
    %52 = arith.addf %48, %51 : vector<5x8xf32>
    %53 = arith.truncf %34 : vector<5x8xf32> to vector<5x8xbf16>
    %54 = arith.truncf %43 : vector<5x8xf32> to vector<5x8xbf16>
    %cst_31 = arith.constant dense<0.000000e+00> : vector<5x5xf32>
    %55 = tpu.matmul %53, %54, %cst_31 {dimension_numbers = #tpu.dot_dimension_numbers<[1], [1], [0], [0], [0, 0, 1, 0], [], []>} : vector<5x8xbf16>, vector<5x8xbf16>, vector<5x5xf32> -> vector<5x5xf32>
    %cst_32 = arith.constant 0.353553385 : f32
    %56 = vector.broadcast %cst_32 : f32 to vector<5x5xf32>
    %57 = arith.mulf %55, %56 : vector<5x5xf32>
    %cst_33 = arith.constant dense<0xFF800000> : vector<5xf32>
    %58 = vector.multi_reduction <maximumf>, %57, %cst_33 [1] : vector<5x5xf32> to vector<5xf32>
    %59 = vector.shape_cast %58 : vector<5xf32> to vector<5x1xf32>
    %60 = vector.broadcast %59 : vector<5x1xf32> to vector<5x5xf32>
    %61 = arith.subf %57, %60 : vector<5x5xf32>
    %62 = math.exp %61 : vector<5x5xf32>
    %cst_34 = arith.constant dense<0.000000e+00> : vector<5xf32>
    %63 = vector.multi_reduction <add>, %62, %cst_34 [1] : vector<5x5xf32> to vector<5xf32>
    %64 = vector.shape_cast %63 : vector<5xf32> to vector<5x1xf32>
    %65 = tpu.reciprocal %64 {approx = true} : vector<5x1xf32> -> vector<5x1xf32>
    %66 = vector.broadcast %65 : vector<5x1xf32> to vector<5x5xf32>
    %67 = arith.mulf %62, %66 : vector<5x5xf32>
    %68 = arith.truncf %67 : vector<5x5xf32> to vector<5x5xbf16>
    %69 = arith.truncf %52 : vector<5x8xf32> to vector<5x8xbf16>
    %cst_35 = arith.constant dense<0.000000e+00> : vector<5x8xf32>
    %70 = tpu.matmul %68, %69, %cst_35 {dimension_numbers = #tpu.dot_dimension_numbers<[1], [0], [0], [1], [0, 0, 1, 1], [], []>} : vector<5x5xbf16>, vector<5x8xbf16>, vector<5x8xf32> -> vector<5x8xf32>
    %c0_36 = arith.constant 0 : index
    %c0_37 = arith.constant 0 : index
    %c0_38 = arith.constant 0 : index
    %71 = vector.load %arg8[%c0_36, %c0_37, %c0_38] : memref<4x8x32xf32, #tpu.memory_space<vmem>>, vector<1x8x32xf32>
    %72 = vector.shape_cast %71 : vector<1x8x32xf32> to vector<8x32xf32>
    %73 = arith.truncf %70 : vector<5x8xf32> to vector<5x8xbf16>
    %74 = arith.truncf %72 : vector<8x32xf32> to vector<8x32xbf16>
    %cst_39 = arith.constant dense<0.000000e+00> : vector<5x32xf32>
    %75 = tpu.matmul %73, %74, %cst_39 {dimension_numbers = #tpu.dot_dimension_numbers<[1], [0], [0], [1], [0, 0, 1, 1], [], []>} : vector<5x8xbf16>, vector<8x32xbf16>, vector<5x32xf32> -> vector<5x32xf32>
    %c1 = arith.constant 1 : index
    %c0_40 = arith.constant 0 : index
    %c0_41 = arith.constant 0 : index
    %76 = vector.load %arg2[%c1, %c0_40, %c0_41] : memref<4x32x8xf32, #tpu.memory_space<vmem>>, vector<1x32x8xf32>
    %77 = vector.shape_cast %76 : vector<1x32x8xf32> to vector<32x8xf32>
    %78 = arith.truncf %25 : vector<5x32xf32> to vector<5x32xbf16>
    %79 = arith.truncf %77 : vector<32x8xf32> to vector<32x8xbf16>
    %cst_42 = arith.constant dense<0.000000e+00> : vector<5x8xf32>
    %80 = tpu.matmul %78, %79, %cst_42 {dimension_numbers = #tpu.dot_dimension_numbers<[1], [0], [0], [1], [0, 0, 1, 1], [], []>} : vector<5x32xbf16>, vector<32x8xbf16>, vector<5x8xf32> -> vector<5x8xf32>
    %c1_43 = arith.constant 1 : index
    %c0_44 = arith.constant 0 : index
    %c0_45 = arith.constant 0 : index
    %81 = vector.load %arg3[%c1_43, %c0_44, %c0_45] : memref<4x1x8xf32, #tpu.memory_space<vmem>>, vector<1x1x8xf32>
    %82 = vector.shape_cast %81 : vector<1x1x8xf32> to vector<1x8xf32>
    %83 = vector.broadcast %82 : vector<1x8xf32> to vector<5x8xf32>
    %84 = arith.addf %80, %83 : vector<5x8xf32>
    %c1_46 = arith.constant 1 : index
    %c0_47 = arith.constant 0 : index
    %c0_48 = arith.constant 0 : index
    %85 = vector.load %arg4[%c1_46, %c0_47, %c0_48] : memref<4x32x8xf32, #tpu.memory_space<vmem>>, vector<1x32x8xf32>
    %86 = vector.shape_cast %85 : vector<1x32x8xf32> to vector<32x8xf32>
    %87 = arith.truncf %25 : vector<5x32xf32> to vector<5x32xbf16>
    %88 = arith.truncf %86 : vector<32x8xf32> to vector<32x8xbf16>
    %cst_49 = arith.constant dense<0.000000e+00> : vector<5x8xf32>
    %89 = tpu.matmul %87, %88, %cst_49 {dimension_numbers = #tpu.dot_dimension_numbers<[1], [0], [0], [1], [0, 0, 1, 1], [], []>} : vector<5x32xbf16>, vector<32x8xbf16>, vector<5x8xf32> -> vector<5x8xf32>
    %c1_50 = arith.constant 1 : index
    %c0_51 = arith.constant 0 : index
    %c0_52 = arith.constant 0 : index
    %90 = vector.load %arg5[%c1_50, %c0_51, %c0_52] : memref<4x1x8xf32, #tpu.memory_space<vmem>>, vector<1x1x8xf32>
    %91 = vector.shape_cast %90 : vector<1x1x8xf32> to vector<1x8xf32>
    %92 = vector.broadcast %91 : vector<1x8xf32> to vector<5x8xf32>
    %93 = arith.addf %89, %92 : vector<5x8xf32>
    %c1_53 = arith.constant 1 : index
    %c0_54 = arith.constant 0 : index
    %c0_55 = arith.constant 0 : index
    %94 = vector.load %arg6[%c1_53, %c0_54, %c0_55] : memref<4x32x8xf32, #tpu.memory_space<vmem>>, vector<1x32x8xf32>
    %95 = vector.shape_cast %94 : vector<1x32x8xf32> to vector<32x8xf32>
    %96 = arith.truncf %25 : vector<5x32xf32> to vector<5x32xbf16>
    %97 = arith.truncf %95 : vector<32x8xf32> to vector<32x8xbf16>
    %cst_56 = arith.constant dense<0.000000e+00> : vector<5x8xf32>
    %98 = tpu.matmul %96, %97, %cst_56 {dimension_numbers = #tpu.dot_dimension_numbers<[1], [0], [0], [1], [0, 0, 1, 1], [], []>} : vector<5x32xbf16>, vector<32x8xbf16>, vector<5x8xf32> -> vector<5x8xf32>
    %c1_57 = arith.constant 1 : index
    %c0_58 = arith.constant 0 : index
    %c0_59 = arith.constant 0 : index
    %99 = vector.load %arg7[%c1_57, %c0_58, %c0_59] : memref<4x1x8xf32, #tpu.memory_space<vmem>>, vector<1x1x8xf32>
    %100 = vector.shape_cast %99 : vector<1x1x8xf32> to vector<1x8xf32>
    %101 = vector.broadcast %100 : vector<1x8xf32> to vector<5x8xf32>
    %102 = arith.addf %98, %101 : vector<5x8xf32>
    %103 = arith.truncf %84 : vector<5x8xf32> to vector<5x8xbf16>
    %104 = arith.truncf %93 : vector<5x8xf32> to vector<5x8xbf16>
    %cst_60 = arith.constant dense<0.000000e+00> : vector<5x5xf32>
    %105 = tpu.matmul %103, %104, %cst_60 {dimension_numbers = #tpu.dot_dimension_numbers<[1], [1], [0], [0], [0, 0, 1, 0], [], []>} : vector<5x8xbf16>, vector<5x8xbf16>, vector<5x5xf32> -> vector<5x5xf32>
    %cst_61 = arith.constant 0.353553385 : f32
    %106 = vector.broadcast %cst_61 : f32 to vector<5x5xf32>
    %107 = arith.mulf %105, %106 : vector<5x5xf32>
    %cst_62 = arith.constant dense<0xFF800000> : vector<5xf32>
    %108 = vector.multi_reduction <maximumf>, %107, %cst_62 [1] : vector<5x5xf32> to vector<5xf32>
    %109 = vector.shape_cast %108 : vector<5xf32> to vector<5x1xf32>
    %110 = vector.broadcast %109 : vector<5x1xf32> to vector<5x5xf32>
    %111 = arith.subf %107, %110 : vector<5x5xf32>
    %112 = math.exp %111 : vector<5x5xf32>
    %cst_63 = arith.constant dense<0.000000e+00> : vector<5xf32>
    %113 = vector.multi_reduction <add>, %112, %cst_63 [1] : vector<5x5xf32> to vector<5xf32>
    %114 = vector.shape_cast %113 : vector<5xf32> to vector<5x1xf32>
    %115 = tpu.reciprocal %114 {approx = true} : vector<5x1xf32> -> vector<5x1xf32>
    %116 = vector.broadcast %115 : vector<5x1xf32> to vector<5x5xf32>
    %117 = arith.mulf %112, %116 : vector<5x5xf32>
    %118 = arith.truncf %117 : vector<5x5xf32> to vector<5x5xbf16>
    %119 = arith.truncf %102 : vector<5x8xf32> to vector<5x8xbf16>
    %cst_64 = arith.constant dense<0.000000e+00> : vector<5x8xf32>
    %120 = tpu.matmul %118, %119, %cst_64 {dimension_numbers = #tpu.dot_dimension_numbers<[1], [0], [0], [1], [0, 0, 1, 1], [], []>} : vector<5x5xbf16>, vector<5x8xbf16>, vector<5x8xf32> -> vector<5x8xf32>
    %c1_65 = arith.constant 1 : index
    %c0_66 = arith.constant 0 : index
    %c0_67 = arith.constant 0 : index
    %121 = vector.load %arg8[%c1_65, %c0_66, %c0_67] : memref<4x8x32xf32, #tpu.memory_space<vmem>>, vector<1x8x32xf32>
    %122 = vector.shape_cast %121 : vector<1x8x32xf32> to vector<8x32xf32>
    %123 = arith.truncf %120 : vector<5x8xf32> to vector<5x8xbf16>
    %124 = arith.truncf %122 : vector<8x32xf32> to vector<8x32xbf16>
    %cst_68 = arith.constant dense<0.000000e+00> : vector<5x32xf32>
    %125 = tpu.matmul %123, %124, %cst_68 {dimension_numbers = #tpu.dot_dimension_numbers<[1], [0], [0], [1], [0, 0, 1, 1], [], []>} : vector<5x8xbf16>, vector<8x32xbf16>, vector<5x32xf32> -> vector<5x32xf32>
    %126 = arith.addf %75, %125 : vector<5x32xf32>
    %c2 = arith.constant 2 : index
    %c0_69 = arith.constant 0 : index
    %c0_70 = arith.constant 0 : index
    %127 = vector.load %arg2[%c2, %c0_69, %c0_70] : memref<4x32x8xf32, #tpu.memory_space<vmem>>, vector<1x32x8xf32>
    %128 = vector.shape_cast %127 : vector<1x32x8xf32> to vector<32x8xf32>
    %129 = arith.truncf %25 : vector<5x32xf32> to vector<5x32xbf16>
    %130 = arith.truncf %128 : vector<32x8xf32> to vector<32x8xbf16>
    %cst_71 = arith.constant dense<0.000000e+00> : vector<5x8xf32>
    %131 = tpu.matmul %129, %130, %cst_71 {dimension_numbers = #tpu.dot_dimension_numbers<[1], [0], [0], [1], [0, 0, 1, 1], [], []>} : vector<5x32xbf16>, vector<32x8xbf16>, vector<5x8xf32> -> vector<5x8xf32>
    %c2_72 = arith.constant 2 : index
    %c0_73 = arith.constant 0 : index
    %c0_74 = arith.constant 0 : index
    %132 = vector.load %arg3[%c2_72, %c0_73, %c0_74] : memref<4x1x8xf32, #tpu.memory_space<vmem>>, vector<1x1x8xf32>
    %133 = vector.shape_cast %132 : vector<1x1x8xf32> to vector<1x8xf32>
    %134 = vector.broadcast %133 : vector<1x8xf32> to vector<5x8xf32>
    %135 = arith.addf %131, %134 : vector<5x8xf32>
    %c2_75 = arith.constant 2 : index
    %c0_76 = arith.constant 0 : index
    %c0_77 = arith.constant 0 : index
    %136 = vector.load %arg4[%c2_75, %c0_76, %c0_77] : memref<4x32x8xf32, #tpu.memory_space<vmem>>, vector<1x32x8xf32>
    %137 = vector.shape_cast %136 : vector<1x32x8xf32> to vector<32x8xf32>
    %138 = arith.truncf %25 : vector<5x32xf32> to vector<5x32xbf16>
    %139 = arith.truncf %137 : vector<32x8xf32> to vector<32x8xbf16>
    %cst_78 = arith.constant dense<0.000000e+00> : vector<5x8xf32>
    %140 = tpu.matmul %138, %139, %cst_78 {dimension_numbers = #tpu.dot_dimension_numbers<[1], [0], [0], [1], [0, 0, 1, 1], [], []>} : vector<5x32xbf16>, vector<32x8xbf16>, vector<5x8xf32> -> vector<5x8xf32>
    %c2_79 = arith.constant 2 : index
    %c0_80 = arith.constant 0 : index
    %c0_81 = arith.constant 0 : index
    %141 = vector.load %arg5[%c2_79, %c0_80, %c0_81] : memref<4x1x8xf32, #tpu.memory_space<vmem>>, vector<1x1x8xf32>
    %142 = vector.shape_cast %141 : vector<1x1x8xf32> to vector<1x8xf32>
    %143 = vector.broadcast %142 : vector<1x8xf32> to vector<5x8xf32>
    %144 = arith.addf %140, %143 : vector<5x8xf32>
    %c2_82 = arith.constant 2 : index
    %c0_83 = arith.constant 0 : index
    %c0_84 = arith.constant 0 : index
    %145 = vector.load %arg6[%c2_82, %c0_83, %c0_84] : memref<4x32x8xf32, #tpu.memory_space<vmem>>, vector<1x32x8xf32>
    %146 = vector.shape_cast %145 : vector<1x32x8xf32> to vector<32x8xf32>
    %147 = arith.truncf %25 : vector<5x32xf32> to vector<5x32xbf16>
    %148 = arith.truncf %146 : vector<32x8xf32> to vector<32x8xbf16>
    %cst_85 = arith.constant dense<0.000000e+00> : vector<5x8xf32>
    %149 = tpu.matmul %147, %148, %cst_85 {dimension_numbers = #tpu.dot_dimension_numbers<[1], [0], [0], [1], [0, 0, 1, 1], [], []>} : vector<5x32xbf16>, vector<32x8xbf16>, vector<5x8xf32> -> vector<5x8xf32>
    %c2_86 = arith.constant 2 : index
    %c0_87 = arith.constant 0 : index
    %c0_88 = arith.constant 0 : index
    %150 = vector.load %arg7[%c2_86, %c0_87, %c0_88] : memref<4x1x8xf32, #tpu.memory_space<vmem>>, vector<1x1x8xf32>
    %151 = vector.shape_cast %150 : vector<1x1x8xf32> to vector<1x8xf32>
    %152 = vector.broadcast %151 : vector<1x8xf32> to vector<5x8xf32>
    %153 = arith.addf %149, %152 : vector<5x8xf32>
    %154 = arith.truncf %135 : vector<5x8xf32> to vector<5x8xbf16>
    %155 = arith.truncf %144 : vector<5x8xf32> to vector<5x8xbf16>
    %cst_89 = arith.constant dense<0.000000e+00> : vector<5x5xf32>
    %156 = tpu.matmul %154, %155, %cst_89 {dimension_numbers = #tpu.dot_dimension_numbers<[1], [1], [0], [0], [0, 0, 1, 0], [], []>} : vector<5x8xbf16>, vector<5x8xbf16>, vector<5x5xf32> -> vector<5x5xf32>
    %cst_90 = arith.constant 0.353553385 : f32
    %157 = vector.broadcast %cst_90 : f32 to vector<5x5xf32>
    %158 = arith.mulf %156, %157 : vector<5x5xf32>
    %cst_91 = arith.constant dense<0xFF800000> : vector<5xf32>
    %159 = vector.multi_reduction <maximumf>, %158, %cst_91 [1] : vector<5x5xf32> to vector<5xf32>
    %160 = vector.shape_cast %159 : vector<5xf32> to vector<5x1xf32>
    %161 = vector.broadcast %160 : vector<5x1xf32> to vector<5x5xf32>
    %162 = arith.subf %158, %161 : vector<5x5xf32>
    %163 = math.exp %162 : vector<5x5xf32>
    %cst_92 = arith.constant dense<0.000000e+00> : vector<5xf32>
    %164 = vector.multi_reduction <add>, %163, %cst_92 [1] : vector<5x5xf32> to vector<5xf32>
    %165 = vector.shape_cast %164 : vector<5xf32> to vector<5x1xf32>
    %166 = tpu.reciprocal %165 {approx = true} : vector<5x1xf32> -> vector<5x1xf32>
    %167 = vector.broadcast %166 : vector<5x1xf32> to vector<5x5xf32>
    %168 = arith.mulf %163, %167 : vector<5x5xf32>
    %169 = arith.truncf %168 : vector<5x5xf32> to vector<5x5xbf16>
    %170 = arith.truncf %153 : vector<5x8xf32> to vector<5x8xbf16>
    %cst_93 = arith.constant dense<0.000000e+00> : vector<5x8xf32>
    %171 = tpu.matmul %169, %170, %cst_93 {dimension_numbers = #tpu.dot_dimension_numbers<[1], [0], [0], [1], [0, 0, 1, 1], [], []>} : vector<5x5xbf16>, vector<5x8xbf16>, vector<5x8xf32> -> vector<5x8xf32>
    %c2_94 = arith.constant 2 : index
    %c0_95 = arith.constant 0 : index
    %c0_96 = arith.constant 0 : index
    %172 = vector.load %arg8[%c2_94, %c0_95, %c0_96] : memref<4x8x32xf32, #tpu.memory_space<vmem>>, vector<1x8x32xf32>
    %173 = vector.shape_cast %172 : vector<1x8x32xf32> to vector<8x32xf32>
    %174 = arith.truncf %171 : vector<5x8xf32> to vector<5x8xbf16>
    %175 = arith.truncf %173 : vector<8x32xf32> to vector<8x32xbf16>
    %cst_97 = arith.constant dense<0.000000e+00> : vector<5x32xf32>
    %176 = tpu.matmul %174, %175, %cst_97 {dimension_numbers = #tpu.dot_dimension_numbers<[1], [0], [0], [1], [0, 0, 1, 1], [], []>} : vector<5x8xbf16>, vector<8x32xbf16>, vector<5x32xf32> -> vector<5x32xf32>
    %177 = arith.addf %126, %176 : vector<5x32xf32>
    %c3 = arith.constant 3 : index
    %c0_98 = arith.constant 0 : index
    %c0_99 = arith.constant 0 : index
    %178 = vector.load %arg2[%c3, %c0_98, %c0_99] : memref<4x32x8xf32, #tpu.memory_space<vmem>>, vector<1x32x8xf32>
    %179 = vector.shape_cast %178 : vector<1x32x8xf32> to vector<32x8xf32>
    %180 = arith.truncf %25 : vector<5x32xf32> to vector<5x32xbf16>
    %181 = arith.truncf %179 : vector<32x8xf32> to vector<32x8xbf16>
    %cst_100 = arith.constant dense<0.000000e+00> : vector<5x8xf32>
    %182 = tpu.matmul %180, %181, %cst_100 {dimension_numbers = #tpu.dot_dimension_numbers<[1], [0], [0], [1], [0, 0, 1, 1], [], []>} : vector<5x32xbf16>, vector<32x8xbf16>, vector<5x8xf32> -> vector<5x8xf32>
    %c3_101 = arith.constant 3 : index
    %c0_102 = arith.constant 0 : index
    %c0_103 = arith.constant 0 : index
    %183 = vector.load %arg3[%c3_101, %c0_102, %c0_103] : memref<4x1x8xf32, #tpu.memory_space<vmem>>, vector<1x1x8xf32>
    %184 = vector.shape_cast %183 : vector<1x1x8xf32> to vector<1x8xf32>
    %185 = vector.broadcast %184 : vector<1x8xf32> to vector<5x8xf32>
    %186 = arith.addf %182, %185 : vector<5x8xf32>
    %c3_104 = arith.constant 3 : index
    %c0_105 = arith.constant 0 : index
    %c0_106 = arith.constant 0 : index
    %187 = vector.load %arg4[%c3_104, %c0_105, %c0_106] : memref<4x32x8xf32, #tpu.memory_space<vmem>>, vector<1x32x8xf32>
    %188 = vector.shape_cast %187 : vector<1x32x8xf32> to vector<32x8xf32>
    %189 = arith.truncf %25 : vector<5x32xf32> to vector<5x32xbf16>
    %190 = arith.truncf %188 : vector<32x8xf32> to vector<32x8xbf16>
    %cst_107 = arith.constant dense<0.000000e+00> : vector<5x8xf32>
    %191 = tpu.matmul %189, %190, %cst_107 {dimension_numbers = #tpu.dot_dimension_numbers<[1], [0], [0], [1], [0, 0, 1, 1], [], []>} : vector<5x32xbf16>, vector<32x8xbf16>, vector<5x8xf32> -> vector<5x8xf32>
    %c3_108 = arith.constant 3 : index
    %c0_109 = arith.constant 0 : index
    %c0_110 = arith.constant 0 : index
    %192 = vector.load %arg5[%c3_108, %c0_109, %c0_110] : memref<4x1x8xf32, #tpu.memory_space<vmem>>, vector<1x1x8xf32>
    %193 = vector.shape_cast %192 : vector<1x1x8xf32> to vector<1x8xf32>
    %194 = vector.broadcast %193 : vector<1x8xf32> to vector<5x8xf32>
    %195 = arith.addf %191, %194 : vector<5x8xf32>
    %c3_111 = arith.constant 3 : index
    %c0_112 = arith.constant 0 : index
    %c0_113 = arith.constant 0 : index
    %196 = vector.load %arg6[%c3_111, %c0_112, %c0_113] : memref<4x32x8xf32, #tpu.memory_space<vmem>>, vector<1x32x8xf32>
    %197 = vector.shape_cast %196 : vector<1x32x8xf32> to vector<32x8xf32>
    %198 = arith.truncf %25 : vector<5x32xf32> to vector<5x32xbf16>
    %199 = arith.truncf %197 : vector<32x8xf32> to vector<32x8xbf16>
    %cst_114 = arith.constant dense<0.000000e+00> : vector<5x8xf32>
    %200 = tpu.matmul %198, %199, %cst_114 {dimension_numbers = #tpu.dot_dimension_numbers<[1], [0], [0], [1], [0, 0, 1, 1], [], []>} : vector<5x32xbf16>, vector<32x8xbf16>, vector<5x8xf32> -> vector<5x8xf32>
    %c3_115 = arith.constant 3 : index
    %c0_116 = arith.constant 0 : index
    %c0_117 = arith.constant 0 : index
    %201 = vector.load %arg7[%c3_115, %c0_116, %c0_117] : memref<4x1x8xf32, #tpu.memory_space<vmem>>, vector<1x1x8xf32>
    %202 = vector.shape_cast %201 : vector<1x1x8xf32> to vector<1x8xf32>
    %203 = vector.broadcast %202 : vector<1x8xf32> to vector<5x8xf32>
    %204 = arith.addf %200, %203 : vector<5x8xf32>
    %205 = arith.truncf %186 : vector<5x8xf32> to vector<5x8xbf16>
    %206 = arith.truncf %195 : vector<5x8xf32> to vector<5x8xbf16>
    %cst_118 = arith.constant dense<0.000000e+00> : vector<5x5xf32>
    %207 = tpu.matmul %205, %206, %cst_118 {dimension_numbers = #tpu.dot_dimension_numbers<[1], [1], [0], [0], [0, 0, 1, 0], [], []>} : vector<5x8xbf16>, vector<5x8xbf16>, vector<5x5xf32> -> vector<5x5xf32>
    %cst_119 = arith.constant 0.353553385 : f32
    %208 = vector.broadcast %cst_119 : f32 to vector<5x5xf32>
    %209 = arith.mulf %207, %208 : vector<5x5xf32>
    %cst_120 = arith.constant dense<0xFF800000> : vector<5xf32>
    %210 = vector.multi_reduction <maximumf>, %209, %cst_120 [1] : vector<5x5xf32> to vector<5xf32>
    %211 = vector.shape_cast %210 : vector<5xf32> to vector<5x1xf32>
    %212 = vector.broadcast %211 : vector<5x1xf32> to vector<5x5xf32>
    %213 = arith.subf %209, %212 : vector<5x5xf32>
    %214 = math.exp %213 : vector<5x5xf32>
    %cst_121 = arith.constant dense<0.000000e+00> : vector<5xf32>
    %215 = vector.multi_reduction <add>, %214, %cst_121 [1] : vector<5x5xf32> to vector<5xf32>
    %216 = vector.shape_cast %215 : vector<5xf32> to vector<5x1xf32>
    %217 = tpu.reciprocal %216 {approx = true} : vector<5x1xf32> -> vector<5x1xf32>
    %218 = vector.broadcast %217 : vector<5x1xf32> to vector<5x5xf32>
    %219 = arith.mulf %214, %218 : vector<5x5xf32>
    %220 = arith.truncf %219 : vector<5x5xf32> to vector<5x5xbf16>
    %221 = arith.truncf %204 : vector<5x8xf32> to vector<5x8xbf16>
    %cst_122 = arith.constant dense<0.000000e+00> : vector<5x8xf32>
    %222 = tpu.matmul %220, %221, %cst_122 {dimension_numbers = #tpu.dot_dimension_numbers<[1], [0], [0], [1], [0, 0, 1, 1], [], []>} : vector<5x5xbf16>, vector<5x8xbf16>, vector<5x8xf32> -> vector<5x8xf32>
    %c3_123 = arith.constant 3 : index
    %c0_124 = arith.constant 0 : index
    %c0_125 = arith.constant 0 : index
    %223 = vector.load %arg8[%c3_123, %c0_124, %c0_125] : memref<4x8x32xf32, #tpu.memory_space<vmem>>, vector<1x8x32xf32>
    %224 = vector.shape_cast %223 : vector<1x8x32xf32> to vector<8x32xf32>
    %225 = arith.truncf %222 : vector<5x8xf32> to vector<5x8xbf16>
    %226 = arith.truncf %224 : vector<8x32xf32> to vector<8x32xbf16>
    %cst_126 = arith.constant dense<0.000000e+00> : vector<5x32xf32>
    %227 = tpu.matmul %225, %226, %cst_126 {dimension_numbers = #tpu.dot_dimension_numbers<[1], [0], [0], [1], [0, 0, 1, 1], [], []>} : vector<5x8xbf16>, vector<8x32xbf16>, vector<5x32xf32> -> vector<5x32xf32>
    %228 = arith.addf %177, %227 : vector<5x32xf32>
    %c0_127 = arith.constant 0 : index
    %c0_128 = arith.constant 0 : index
    %229 = vector.load %arg9[%c0_127, %c0_128] : memref<1x32xf32, #tpu.memory_space<vmem>>, vector<1x32xf32>
    %230 = vector.broadcast %229 : vector<1x32xf32> to vector<5x32xf32>
    %231 = arith.addf %228, %230 : vector<5x32xf32>
    %232 = arith.addf %1, %231 : vector<5x32xf32>
    %c0_129 = arith.constant 0 : index
    %c0_130 = arith.constant 0 : index
    %233 = vector.load %arg12[%c0_129, %c0_130] : memref<1x32xf32, #tpu.memory_space<vmem>>, vector<1x32xf32>
    %c0_131 = arith.constant 0 : index
    %c0_132 = arith.constant 0 : index
    %234 = vector.load %arg13[%c0_131, %c0_132] : memref<1x32xf32, #tpu.memory_space<vmem>>, vector<1x32xf32>
    %cst_133 = arith.constant dense<0.000000e+00> : vector<5xf32>
    %235 = vector.multi_reduction <add>, %232, %cst_133 [1] : vector<5x32xf32> to vector<5xf32>
    %236 = vector.shape_cast %235 : vector<5xf32> to vector<5x1xf32>
    %cst_134 = arith.constant 3.200000e+01 : f32
    %237 = vector.broadcast %cst_134 : f32 to vector<5x1xf32>
    %238 = arith.divf %236, %237 : vector<5x1xf32>
    %239 = vector.broadcast %238 : vector<5x1xf32> to vector<5x32xf32>
    %240 = arith.subf %232, %239 : vector<5x32xf32>
    %241 = arith.mulf %240, %240 : vector<5x32xf32>
    %cst_135 = arith.constant dense<0.000000e+00> : vector<5xf32>
    %242 = vector.multi_reduction <add>, %241, %cst_135 [1] : vector<5x32xf32> to vector<5xf32>
    %243 = vector.shape_cast %242 : vector<5xf32> to vector<5x1xf32>
    %cst_136 = arith.constant 3.200000e+01 : f32
    %244 = vector.broadcast %cst_136 : f32 to vector<5x1xf32>
    %245 = arith.divf %243, %244 : vector<5x1xf32>
    %246 = vector.broadcast %238 : vector<5x1xf32> to vector<5x32xf32>
    %247 = arith.subf %232, %246 : vector<5x32xf32>
    %cst_137 = arith.constant 9.99999997E-7 : f32
    %248 = vector.broadcast %cst_137 : f32 to vector<5x1xf32>
    %249 = arith.addf %245, %248 : vector<5x1xf32>
    %250 = math.rsqrt %249 : vector<5x1xf32>
    %251 = vector.broadcast %250 : vector<5x1xf32> to vector<5x32xf32>
    %252 = arith.mulf %247, %251 : vector<5x32xf32>
    %253 = vector.broadcast %233 : vector<1x32xf32> to vector<5x32xf32>
    %254 = arith.mulf %252, %253 : vector<5x32xf32>
    %255 = vector.broadcast %234 : vector<1x32xf32> to vector<5x32xf32>
    %256 = arith.addf %254, %255 : vector<5x32xf32>
    %c0_138 = arith.constant 0 : index
    %c0_139 = arith.constant 0 : index
    %257 = vector.load %arg14[%c0_138, %c0_139] : memref<32x128xf32, #tpu.memory_space<vmem>>, vector<32x128xf32>
    %258 = arith.truncf %256 : vector<5x32xf32> to vector<5x32xbf16>
    %259 = arith.truncf %257 : vector<32x128xf32> to vector<32x128xbf16>
    %cst_140 = arith.constant dense<0.000000e+00> : vector<5x128xf32>
    %260 = tpu.matmul %258, %259, %cst_140 {dimension_numbers = #tpu.dot_dimension_numbers<[1], [0], [0], [1], [0, 0, 1, 1], [], []>} : vector<5x32xbf16>, vector<32x128xbf16>, vector<5x128xf32> -> vector<5x128xf32>
    %c0_141 = arith.constant 0 : index
    %c0_142 = arith.constant 0 : index
    %261 = vector.load %arg15[%c0_141, %c0_142] : memref<1x128xf32, #tpu.memory_space<vmem>>, vector<1x128xf32>
    %262 = vector.broadcast %261 : vector<1x128xf32> to vector<5x128xf32>
    %263 = arith.addf %260, %262 : vector<5x128xf32>
    %264 = arith.mulf %263, %263 : vector<5x128xf32>
    %265 = arith.mulf %263, %264 : vector<5x128xf32>
    %cst_143 = arith.constant 4.471500e-02 : f32
    %266 = vector.broadcast %cst_143 : f32 to vector<5x128xf32>
    %267 = arith.mulf %266, %265 : vector<5x128xf32>
    %268 = arith.addf %263, %267 : vector<5x128xf32>
    %cst_144 = arith.constant 0.797884583 : f32
    %269 = vector.broadcast %cst_144 : f32 to vector<5x128xf32>
    %270 = arith.mulf %269, %268 : vector<5x128xf32>
    %271 = math.tanh %270 : vector<5x128xf32>
    %cst_145 = arith.constant 1.000000e+00 : f32
    %272 = vector.broadcast %cst_145 : f32 to vector<5x128xf32>
    %273 = arith.addf %272, %271 : vector<5x128xf32>
    %cst_146 = arith.constant 5.000000e-01 : f32
    %274 = vector.broadcast %cst_146 : f32 to vector<5x128xf32>
    %275 = arith.mulf %274, %273 : vector<5x128xf32>
    %276 = arith.mulf %263, %275 : vector<5x128xf32>
    %c0_147 = arith.constant 0 : index
    %c0_148 = arith.constant 0 : index
    %277 = vector.load %arg16[%c0_147, %c0_148] : memref<128x32xf32, #tpu.memory_space<vmem>>, vector<128x32xf32>
    %278 = arith.truncf %276 : vector<5x128xf32> to vector<5x128xbf16>
    %279 = arith.truncf %277 : vector<128x32xf32> to vector<128x32xbf16>
    %cst_149 = arith.constant dense<0.000000e+00> : vector<5x32xf32>
    %280 = tpu.matmul %278, %279, %cst_149 {dimension_numbers = #tpu.dot_dimension_numbers<[1], [0], [0], [1], [0, 0, 1, 1], [], []>} : vector<5x128xbf16>, vector<128x32xbf16>, vector<5x32xf32> -> vector<5x32xf32>
    %c0_150 = arith.constant 0 : index
    %c0_151 = arith.constant 0 : index
    %281 = vector.load %arg17[%c0_150, %c0_151] : memref<1x32xf32, #tpu.memory_space<vmem>>, vector<1x32xf32>
    %282 = vector.broadcast %281 : vector<1x32xf32> to vector<5x32xf32>
    %283 = arith.addf %280, %282 : vector<5x32xf32>
    %284 = arith.addf %232, %283 : vector<5x32xf32>
    %c0_152 = arith.constant 0 : index
    %c0_153 = arith.constant 0 : index
    %285 = vector.load %arg18[%c0_152, %c0_153] : memref<1x32xf32, #tpu.memory_space<vmem>>, vector<1x32xf32>
    %c0_154 = arith.constant 0 : index
    %c0_155 = arith.constant 0 : index
    %286 = vector.load %arg19[%c0_154, %c0_155] : memref<1x32xf32, #tpu.memory_space<vmem>>, vector<1x32xf32>
    %cst_156 = arith.constant dense<0.000000e+00> : vector<5xf32>
    %287 = vector.multi_reduction <add>, %284, %cst_156 [1] : vector<5x32xf32> to vector<5xf32>
    %288 = vector.shape_cast %287 : vector<5xf32> to vector<5x1xf32>
    %cst_157 = arith.constant 3.200000e+01 : f32
    %289 = vector.broadcast %cst_157 : f32 to vector<5x1xf32>
    %290 = arith.divf %288, %289 : vector<5x1xf32>
    %291 = vector.broadcast %290 : vector<5x1xf32> to vector<5x32xf32>
    %292 = arith.subf %284, %291 : vector<5x32xf32>
    %293 = arith.mulf %292, %292 : vector<5x32xf32>
    %cst_158 = arith.constant dense<0.000000e+00> : vector<5xf32>
    %294 = vector.multi_reduction <add>, %293, %cst_158 [1] : vector<5x32xf32> to vector<5xf32>
    %295 = vector.shape_cast %294 : vector<5xf32> to vector<5x1xf32>
    %cst_159 = arith.constant 3.200000e+01 : f32
    %296 = vector.broadcast %cst_159 : f32 to vector<5x1xf32>
    %297 = arith.divf %295, %296 : vector<5x1xf32>
    %298 = vector.broadcast %290 : vector<5x1xf32> to vector<5x32xf32>
    %299 = arith.subf %284, %298 : vector<5x32xf32>
    %cst_160 = arith.constant 9.99999997E-7 : f32
    %300 = vector.broadcast %cst_160 : f32 to vector<5x1xf32>
    %301 = arith.addf %297, %300 : vector<5x1xf32>
    %302 = math.rsqrt %301 : vector<5x1xf32>
    %303 = vector.broadcast %302 : vector<5x1xf32> to vector<5x32xf32>
    %304 = arith.mulf %299, %303 : vector<5x32xf32>
    %305 = vector.broadcast %285 : vector<1x32xf32> to vector<5x32xf32>
    %306 = arith.mulf %304, %305 : vector<5x32xf32>
    %307 = vector.broadcast %286 : vector<1x32xf32> to vector<5x32xf32>
    %308 = arith.addf %306, %307 : vector<5x32xf32>
    %c0_161 = arith.constant 0 : index
    %c0_162 = arith.constant 0 : index
    %c0_163 = arith.constant 0 : index
    %309 = vector.load %arg20[%c0_161, %c0_162, %c0_163] : memref<1x5x32xf32, #tpu.memory_space<vmem>>, vector<1x5x32xf32>
    %310 = vector.shape_cast %309 : vector<1x5x32xf32> to vector<5x32xf32>
    %311 = vector.shape_cast %308 : vector<5x32xf32> to vector<1x5x32xf32>
    tpu.vector_store %arg20[%c0_161, %c0_162, %c0_163], %311 {strides = array<i32>} : memref<1x5x32xf32, #tpu.memory_space<vmem>>, vector<1x5x32xf32>,
    return
  }
  func.func @transform_0(%arg0: i32) -> (i32, i32, i32) {
    %c0_i32 = arith.constant 0 : i32
    %c0_i32_0 = arith.constant 0 : i32
    %c0_i32_1 = arith.constant 0 : i32
    return %arg0, %c0_i32, %c0_i32_0 : i32, i32, i32
  }
  func.func @transform_1(%arg0: i32) -> (i32, i32, i32) {
    %c0_i32 = arith.constant 0 : i32
    %c0_i32_0 = arith.constant 0 : i32
    %c0_i32_1 = arith.constant 0 : i32
    %c0_i32_2 = arith.constant 0 : i32
    return %c0_i32, %c0_i32_0, %c0_i32_1 : i32, i32, i32
  }
  func.func @transform_2(%arg0: i32) -> (i32, i32, i32) {
    %c0_i32 = arith.constant 0 : i32
    %c0_i32_0 = arith.constant 0 : i32
    %c0_i32_1 = arith.constant 0 : i32
    %c0_i32_2 = arith.constant 0 : i32
    return %c0_i32, %c0_i32_0, %c0_i32_1 : i32, i32, i32
  }
  func.func @transform_3(%arg0: i32) -> (i32, i32, i32) {
    %c0_i32 = arith.constant 0 : i32
    %c0_i32_0 = arith.constant 0 : i32
    %c0_i32_1 = arith.constant 0 : i32
    %c0_i32_2 = arith.constant 0 : i32
    return %c0_i32, %c0_i32_0, %c0_i32_1 : i32, i32, i32
  }
  func.func @transform_4(%arg0: i32) -> (i32, i32, i32) {
    %c0_i32 = arith.constant 0 : i32
    %c0_i32_0 = arith.constant 0 : i32
    %c0_i32_1 = arith.constant 0 : i32
    %c0_i32_2 = arith.constant 0 : i32
    return %c0_i32, %c0_i32_0, %c0_i32_1 : i32, i32, i32
  }
  func.func @transform_5(%arg0: i32) -> (i32, i32, i32) {
    %c0_i32 = arith.constant 0 : i32
    %c0_i32_0 = arith.constant 0 : i32
    %c0_i32_1 = arith.constant 0 : i32
    %c0_i32_2 = arith.constant 0 : i32
    return %c0_i32, %c0_i32_0, %c0_i32_1 : i32, i32, i32
  }
  func.func @transform_6(%arg0: i32) -> (i32, i32, i32) {
    %c0_i32 = arith.constant 0 : i32
    %c0_i32_0 = arith.constant 0 : i32
    %c0_i32_1 = arith.constant 0 : i32
    %c0_i32_2 = arith.constant 0 : i32
    return %c0_i32, %c0_i32_0, %c0_i32_1 : i32, i32, i32
  }
  func.func @transform_7(%arg0: i32) -> (i32, i32, i32) {
    %c0_i32 = arith.constant 0 : i32
    %c0_i32_0 = arith.constant 0 : i32
    %c0_i32_1 = arith.constant 0 : i32
    %c0_i32_2 = arith.constant 0 : i32
    return %c0_i32, %c0_i32_0, %c0_i32_1 : i32, i32, i32
  }
  func.func @transform_8(%arg0: i32) -> (i32, i32) {
    %c0_i32 = arith.constant 0 : i32
    %c0_i32_0 = arith.constant 0 : i32
    %c0_i32_1 = arith.constant 0 : i32
    return %c0_i32, %c0_i32_0 : i32, i32
  }
  func.func @transform_9(%arg0: i32) -> (i32, i32) {
    %c0_i32 = arith.constant 0 : i32
    %c0_i32_0 = arith.constant 0 : i32
    %c0_i32_1 = arith.constant 0 : i32
    return %c0_i32, %c0_i32_0 : i32, i32
  }
  func.func @transform_10(%arg0: i32) -> (i32, i32) {
    %c0_i32 = arith.constant 0 : i32
    %c0_i32_0 = arith.constant 0 : i32
    %c0_i32_1 = arith.constant 0 : i32
    return %c0_i32, %c0_i32_0 : i32, i32
  }
  func.func @transform_11(%arg0: i32) -> (i32, i32) {
    %c0_i32 = arith.constant 0 : i32
    %c0_i32_0 = arith.constant 0 : i32
    %c0_i32_1 = arith.constant 0 : i32
    return %c0_i32, %c0_i32_0 : i32, i32
  }
  func.func @transform_12(%arg0: i32) -> (i32, i32) {
    %c0_i32 = arith.constant 0 : i32
    %c0_i32_0 = arith.constant 0 : i32
    %c0_i32_1 = arith.constant 0 : i32
    return %c0_i32, %c0_i32_0 : i32, i32
  }
  func.func @transform_13(%arg0: i32) -> (i32, i32) {
    %c0_i32 = arith.constant 0 : i32
    %c0_i32_0 = arith.constant 0 : i32
    %c0_i32_1 = arith.constant 0 : i32
    return %c0_i32, %c0_i32_0 : i32, i32
  }
  func.func @transform_14(%arg0: i32) -> (i32, i32) {
    %c0_i32 = arith.constant 0 : i32
    %c0_i32_0 = arith.constant 0 : i32
    %c0_i32_1 = arith.constant 0 : i32
    return %c0_i32, %c0_i32_0 : i32, i32
  }
  func.func @transform_15(%arg0: i32) -> (i32, i32) {
    %c0_i32 = arith.constant 0 : i32
    %c0_i32_0 = arith.constant 0 : i32
    %c0_i32_1 = arith.constant 0 : i32
    return %c0_i32, %c0_i32_0 : i32, i32
  }
  func.func @transform_16(%arg0: i32) -> (i32, i32) {
    %c0_i32 = arith.constant 0 : i32
    %c0_i32_0 = arith.constant 0 : i32
    %c0_i32_1 = arith.constant 0 : i32
    return %c0_i32, %c0_i32_0 : i32, i32
  }
  func.func @transform_17(%arg0: i32) -> (i32, i32) {
    %c0_i32 = arith.constant 0 : i32
    %c0_i32_0 = arith.constant 0 : i32
    %c0_i32_1 = arith.constant 0 : i32
    return %c0_i32, %c0_i32_0 : i32, i32
  }
  func.func @transform_18(%arg0: i32) -> (i32, i32) {
    %c0_i32 = arith.constant 0 : i32
    %c0_i32_0 = arith.constant 0 : i32
    %c0_i32_1 = arith.constant 0 : i32
    return %c0_i32, %c0_i32_0 : i32, i32
  }
  func.func @transform_19(%arg0: i32) -> (i32, i32, i32) {
    %c0_i32 = arith.constant 0 : i32
    %c0_i32_0 = arith.constant 0 : i32
    %c0_i32_1 = arith.constant 0 : i32
    return %arg0, %c0_i32, %c0_i32_0 : i32, i32, i32
  }
}

module attributes {stable_mosaic.version = 11 : i64} {
  func.func @_itm_kernel(%arg0: i32, %arg1: memref<2x32xf32, #tpu.memory_space<vmem>>, %arg2: memref<32x2xf32, #tpu.memory_space<vmem>>, %arg3: memref<1x2xf32, #tpu.memory_space<vmem>>, %arg4: memref<2x2xf32, #tpu.memory_space<vmem>>) attributes {dimension_semantics = [#tpu.dimension_semantics<arbitrary>], iteration_bounds = array<i64: 1>, scalar_prefetch = 0 : i64, scratch_operands = 0 : i64, tpu.core_type = #tpu.core_type<tc>, window_params = [{pipeline_mode = #tpu.pipeline_mode<synchronous>, transform_indices = @transform_0, window_bounds = array<i64: 2, 32>}, {pipeline_mode = #tpu.pipeline_mode<synchronous>, transform_indices = @transform_1, window_bounds = array<i64: 32, 2>}, {pipeline_mode = #tpu.pipeline_mode<synchronous>, transform_indices = @transform_2, window_bounds = array<i64: 1, 2>}, {pipeline_mode = #tpu.pipeline_mode<synchronous>, transform_indices = @transform_3, window_bounds = array<i64: 2, 2>}]} {
    %c0 = arith.constant 0 : index
    %c0_0 = arith.constant 0 : index
    %0 = vector.load %arg1[%c0, %c0_0] : memref<2x32xf32, #tpu.memory_space<vmem>>, vector<2x32xf32>
    %c0_1 = arith.constant 0 : index
    %c0_2 = arith.constant 0 : index
    %1 = vector.load %arg2[%c0_1, %c0_2] : memref<32x2xf32, #tpu.memory_space<vmem>>, vector<32x2xf32>
    %2 = arith.truncf %0 : vector<2x32xf32> to vector<2x32xbf16>
    %3 = arith.truncf %1 : vector<32x2xf32> to vector<32x2xbf16>
    %cst = arith.constant dense<0.000000e+00> : vector<2x2xf32>
    %4 = tpu.matmul %2, %3, %cst {dimension_numbers = #tpu.dot_dimension_numbers<[1], [0], [0], [1], [0, 0, 1, 1], [], []>} : vector<2x32xbf16>, vector<32x2xbf16>, vector<2x2xf32> -> vector<2x2xf32>
    %c0_3 = arith.constant 0 : index
    %c0_4 = arith.constant 0 : index
    %5 = vector.load %arg3[%c0_3, %c0_4] : memref<1x2xf32, #tpu.memory_space<vmem>>, vector<1x2xf32>
    %6 = vector.broadcast %5 : vector<1x2xf32> to vector<2x2xf32>
    %7 = arith.addf %4, %6 : vector<2x2xf32>
    %c0_5 = arith.constant 0 : index
    %c0_6 = arith.constant 0 : index
    %8 = vector.load %arg4[%c0_5, %c0_6] : memref<2x2xf32, #tpu.memory_space<vmem>>, vector<2x2xf32>
    tpu.vector_store %arg4[%c0_5, %c0_6], %7 {strides = array<i32>} : memref<2x2xf32, #tpu.memory_space<vmem>>, vector<2x2xf32>,
    return
  }
  func.func @transform_0(%arg0: i32) -> (i32, i32) {
    %c0_i32 = arith.constant 0 : i32
    %c0_i32_0 = arith.constant 0 : i32
    %c0_i32_1 = arith.constant 0 : i32
    return %c0_i32, %c0_i32_0 : i32, i32
  }
  func.func @transform_1(%arg0: i32) -> (i32, i32) {
    %c0_i32 = arith.constant 0 : i32
    %c0_i32_0 = arith.constant 0 : i32
    %c0_i32_1 = arith.constant 0 : i32
    return %c0_i32, %c0_i32_0 : i32, i32
  }
  func.func @transform_2(%arg0: i32) -> (i32, i32) {
    %c0_i32 = arith.constant 0 : i32
    %c0_i32_0 = arith.constant 0 : i32
    %c0_i32_1 = arith.constant 0 : i32
    return %c0_i32, %c0_i32_0 : i32, i32
  }
  func.func @transform_3(%arg0: i32) -> (i32, i32) {
    %c0_i32 = arith.constant 0 : i32
    %c0_i32_0 = arith.constant 0 : i32
    %c0_i32_1 = arith.constant 0 : i32
    return %c0_i32, %c0_i32_0 : i32, i32
  }
}

module attributes {stable_mosaic.version = 11 : i64} {
  func.func @_bert_fusion_layer_kernel(%arg0: i32, %arg1: memref<1x8x32xf32, #tpu.memory_space<vmem>>, %arg2: memref<1x1x8xf32, #tpu.memory_space<vmem>>, %arg3: memref<1x5x32xf32, #tpu.memory_space<vmem>>, %arg4: memref<4x32x8xf32, #tpu.memory_space<vmem>>, %arg5: memref<4x1x8xf32, #tpu.memory_space<vmem>>, %arg6: memref<4x32x8xf32, #tpu.memory_space<vmem>>, %arg7: memref<4x1x8xf32, #tpu.memory_space<vmem>>, %arg8: memref<4x32x8xf32, #tpu.memory_space<vmem>>, %arg9: memref<4x1x8xf32, #tpu.memory_space<vmem>>, %arg10: memref<4x8x32xf32, #tpu.memory_space<vmem>>, %arg11: memref<1x32xf32, #tpu.memory_space<vmem>>, %arg12: memref<1x32xf32, #tpu.memory_space<vmem>>, %arg13: memref<1x32xf32, #tpu.memory_space<vmem>>, %arg14: memref<4x32x8xf32, #tpu.memory_space<vmem>>, %arg15: memref<4x1x8xf32, #tpu.memory_space<vmem>>, %arg16: memref<4x32x8xf32, #tpu.memory_space<vmem>>, %arg17: memref<4x1x8xf32, #tpu.memory_space<vmem>>, %arg18: memref<4x32x8xf32, #tpu.memory_space<vmem>>, %arg19: memref<4x1x8xf32, #tpu.memory_space<vmem>>, %arg20: memref<4x8x32xf32, #tpu.memory_space<vmem>>, %arg21: memref<1x32xf32, #tpu.memory_space<vmem>>, %arg22: memref<1x32xf32, #tpu.memory_space<vmem>>, %arg23: memref<1x32xf32, #tpu.memory_space<vmem>>, %arg24: memref<32x128xf32, #tpu.memory_space<vmem>>, %arg25: memref<1x128xf32, #tpu.memory_space<vmem>>, %arg26: memref<128x32xf32, #tpu.memory_space<vmem>>, %arg27: memref<1x32xf32, #tpu.memory_space<vmem>>, %arg28: memref<1x32xf32, #tpu.memory_space<vmem>>, %arg29: memref<1x32xf32, #tpu.memory_space<vmem>>, %arg30: memref<1x8x32xf32, #tpu.memory_space<vmem>>) attributes {dimension_semantics = [#tpu.dimension_semantics<parallel>], iteration_bounds = array<i64: 2>, scalar_prefetch = 0 : i64, scratch_operands = 0 : i64, tpu.core_type = #tpu.core_type<tc>, window_params = [{transform_indices = @transform_0, window_bounds = array<i64: 1, 8, 32>}, {transform_indices = @transform_1, window_bounds = array<i64: 1, 1, 8>}, {transform_indices = @transform_2, window_bounds = array<i64: 1, 5, 32>}, {pipeline_mode = #tpu.pipeline_mode<synchronous>, transform_indices = @transform_3, window_bounds = array<i64: 4, 32, 8>}, {pipeline_mode = #tpu.pipeline_mode<synchronous>, transform_indices = @transform_4, window_bounds = array<i64: 4, 1, 8>}, {pipeline_mode = #tpu.pipeline_mode<synchronous>, transform_indices = @transform_5, window_bounds = array<i64: 4, 32, 8>}, {pipeline_mode = #tpu.pipeline_mode<synchronous>, transform_indices = @transform_6, window_bounds = array<i64: 4, 1, 8>}, {pipeline_mode = #tpu.pipeline_mode<synchronous>, transform_indices = @transform_7, window_bounds = array<i64: 4, 32, 8>}, {pipeline_mode = #tpu.pipeline_mode<synchronous>, transform_indices = @transform_8, window_bounds = array<i64: 4, 1, 8>}, {pipeline_mode = #tpu.pipeline_mode<synchronous>, transform_indices = @transform_9, window_bounds = array<i64: 4, 8, 32>}, {pipeline_mode = #tpu.pipeline_mode<synchronous>, transform_indices = @transform_10, window_bounds = array<i64: 1, 32>}, {pipeline_mode = #tpu.pipeline_mode<synchronous>, transform_indices = @transform_11, window_bounds = array<i64: 1, 32>}, {pipeline_mode = #tpu.pipeline_mode<synchronous>, transform_indices = @transform_12, window_bounds = array<i64: 1, 32>}, {pipeline_mode = #tpu.pipeline_mode<synchronous>, transform_indices = @transform_13, window_bounds = array<i64: 4, 32, 8>}, {pipeline_mode = #tpu.pipeline_mode<synchronous>, transform_indices = @transform_14, window_bounds = array<i64: 4, 1, 8>}, {pipeline_mode = #tpu.pipeline_mode<synchronous>, transform_indices = @transform_15, window_bounds = array<i64: 4, 32, 8>}, {pipeline_mode = #tpu.pipeline_mode<synchronous>, transform_indices = @transform_16, window_bounds = array<i64: 4, 1, 8>}, {pipeline_mode = #tpu.pipeline_mode<synchronous>, transform_indices = @transform_17, window_bounds = array<i64: 4, 32, 8>}, {pipeline_mode = #tpu.pipeline_mode<synchronous>, transform_indices = @transform_18, window_bounds = array<i64: 4, 1, 8>}, {pipeline_mode = #tpu.pipeline_mode<synchronous>, transform_indices = @transform_19, window_bounds = array<i64: 4, 8, 32>}, {pipeline_mode = #tpu.pipeline_mode<synchronous>, transform_indices = @transform_20, window_bounds = array<i64: 1, 32>}, {pipeline_mode = #tpu.pipeline_mode<synchronous>, transform_indices = @transform_21, window_bounds = array<i64: 1, 32>}, {pipeline_mode = #tpu.pipeline_mode<synchronous>, transform_indices = @transform_22, window_bounds = array<i64: 1, 32>}, {pipeline_mode = #tpu.pipeline_mode<synchronous>, transform_indices = @transform_23, window_bounds = array<i64: 32, 128>}, {pipeline_mode = #tpu.pipeline_mode<synchronous>, transform_indices = @transform_24, window_bounds = array<i64: 1, 128>}, {pipeline_mode = #tpu.pipeline_mode<synchronous>, transform_indices = @transform_25, window_bounds = array<i64: 128, 32>}, {pipeline_mode = #tpu.pipeline_mode<synchronous>, transform_indices = @transform_26, window_bounds = array<i64: 1, 32>}, {pipeline_mode = #tpu.pipeline_mode<synchronous>, transform_indices = @transform_27, window_bounds = array<i64: 1, 32>}, {pipeline_mode = #tpu.pipeline_mode<synchronous>, transform_indices = @transform_28, window_bounds = array<i64: 1, 32>}, {transform_indices = @transform_29, window_bounds = array<i64: 1, 8, 32>}]} {
    %c0 = arith.constant 0 : index
    %c0_0 = arith.constant 0 : index
    %c0_1 = arith.constant 0 : index
    %0 = vector.load %arg1[%c0, %c0_0, %c0_1] : memref<1x8x32xf32, #tpu.memory_space<vmem>>, vector<1x8x32xf32>
    %1 = vector.shape_cast %0 : vector<1x8x32xf32> to vector<8x32xf32>
    %c0_2 = arith.constant 0 : index
    %c0_3 = arith.constant 0 : index
    %c0_4 = arith.constant 0 : index
    %2 = vector.load %arg3[%c0_2, %c0_3, %c0_4] : memref<1x5x32xf32, #tpu.memory_space<vmem>>, vector<1x5x32xf32>
    %3 = vector.shape_cast %2 : vector<1x5x32xf32> to vector<5x32xf32>
    %c0_5 = arith.constant 0 : index
    %c0_6 = arith.constant 0 : index
    %c0_7 = arith.constant 0 : index
    %4 = vector.load %arg2[%c0_5, %c0_6, %c0_7] : memref<1x1x8xf32, #tpu.memory_space<vmem>>, vector<1x1x8xf32>
    %5 = vector.shape_cast %4 : vector<1x1x8xf32> to vector<1x8xf32>
    %cst = arith.constant 1.000000e+00 : f32
    %6 = vector.broadcast %cst : f32 to vector<1x8xf32>
    %7 = arith.subf %6, %5 : vector<1x8xf32>
    %cst_8 = arith.constant -1.000000e+04 : f32
    %8 = vector.broadcast %cst_8 : f32 to vector<1x8xf32>
    %9 = arith.mulf %7, %8 : vector<1x8xf32>
    %c0_9 = arith.constant 0 : index
    %c0_10 = arith.constant 0 : index
    %c0_11 = arith.constant 0 : index
    %10 = vector.load %arg4[%c0_9, %c0_10, %c0_11] : memref<4x32x8xf32, #tpu.memory_space<vmem>>, vector<1x32x8xf32>
    %11 = vector.shape_cast %10 : vector<1x32x8xf32> to vector<32x8xf32>
    %12 = arith.truncf %1 : vector<8x32xf32> to vector<8x32xbf16>
    %13 = arith.truncf %11 : vector<32x8xf32> to vector<32x8xbf16>
    %cst_12 = arith.constant dense<0.000000e+00> : vector<8x8xf32>
    %14 = tpu.matmul %12, %13, %cst_12 {dimension_numbers = #tpu.dot_dimension_numbers<[1], [0], [0], [1], [0, 0, 1, 1], [], []>} : vector<8x32xbf16>, vector<32x8xbf16>, vector<8x8xf32> -> vector<8x8xf32>
    %c0_13 = arith.constant 0 : index
    %c0_14 = arith.constant 0 : index
    %c0_15 = arith.constant 0 : index
    %15 = vector.load %arg5[%c0_13, %c0_14, %c0_15] : memref<4x1x8xf32, #tpu.memory_space<vmem>>, vector<1x1x8xf32>
    %16 = vector.shape_cast %15 : vector<1x1x8xf32> to vector<1x8xf32>
    %17 = vector.broadcast %16 : vector<1x8xf32> to vector<8x8xf32>
    %18 = arith.addf %14, %17 : vector<8x8xf32>
    %c0_16 = arith.constant 0 : index
    %c0_17 = arith.constant 0 : index
    %c0_18 = arith.constant 0 : index
    %19 = vector.load %arg6[%c0_16, %c0_17, %c0_18] : memref<4x32x8xf32, #tpu.memory_space<vmem>>, vector<1x32x8xf32>
    %20 = vector.shape_cast %19 : vector<1x32x8xf32> to vector<32x8xf32>
    %21 = arith.truncf %1 : vector<8x32xf32> to vector<8x32xbf16>
    %22 = arith.truncf %20 : vector<32x8xf32> to vector<32x8xbf16>
    %cst_19 = arith.constant dense<0.000000e+00> : vector<8x8xf32>
    %23 = tpu.matmul %21, %22, %cst_19 {dimension_numbers = #tpu.dot_dimension_numbers<[1], [0], [0], [1], [0, 0, 1, 1], [], []>} : vector<8x32xbf16>, vector<32x8xbf16>, vector<8x8xf32> -> vector<8x8xf32>
    %c0_20 = arith.constant 0 : index
    %c0_21 = arith.constant 0 : index
    %c0_22 = arith.constant 0 : index
    %24 = vector.load %arg7[%c0_20, %c0_21, %c0_22] : memref<4x1x8xf32, #tpu.memory_space<vmem>>, vector<1x1x8xf32>
    %25 = vector.shape_cast %24 : vector<1x1x8xf32> to vector<1x8xf32>
    %26 = vector.broadcast %25 : vector<1x8xf32> to vector<8x8xf32>
    %27 = arith.addf %23, %26 : vector<8x8xf32>
    %c0_23 = arith.constant 0 : index
    %c0_24 = arith.constant 0 : index
    %c0_25 = arith.constant 0 : index
    %28 = vector.load %arg8[%c0_23, %c0_24, %c0_25] : memref<4x32x8xf32, #tpu.memory_space<vmem>>, vector<1x32x8xf32>
    %29 = vector.shape_cast %28 : vector<1x32x8xf32> to vector<32x8xf32>
    %30 = arith.truncf %1 : vector<8x32xf32> to vector<8x32xbf16>
    %31 = arith.truncf %29 : vector<32x8xf32> to vector<32x8xbf16>
    %cst_26 = arith.constant dense<0.000000e+00> : vector<8x8xf32>
    %32 = tpu.matmul %30, %31, %cst_26 {dimension_numbers = #tpu.dot_dimension_numbers<[1], [0], [0], [1], [0, 0, 1, 1], [], []>} : vector<8x32xbf16>, vector<32x8xbf16>, vector<8x8xf32> -> vector<8x8xf32>
    %c0_27 = arith.constant 0 : index
    %c0_28 = arith.constant 0 : index
    %c0_29 = arith.constant 0 : index
    %33 = vector.load %arg9[%c0_27, %c0_28, %c0_29] : memref<4x1x8xf32, #tpu.memory_space<vmem>>, vector<1x1x8xf32>
    %34 = vector.shape_cast %33 : vector<1x1x8xf32> to vector<1x8xf32>
    %35 = vector.broadcast %34 : vector<1x8xf32> to vector<8x8xf32>
    %36 = arith.addf %32, %35 : vector<8x8xf32>
    %37 = arith.truncf %18 : vector<8x8xf32> to vector<8x8xbf16>
    %38 = arith.truncf %27 : vector<8x8xf32> to vector<8x8xbf16>
    %cst_30 = arith.constant dense<0.000000e+00> : vector<8x8xf32>
    %39 = tpu.matmul %37, %38, %cst_30 {dimension_numbers = #tpu.dot_dimension_numbers<[1], [1], [0], [0], [0, 0, 1, 0], [], []>} : vector<8x8xbf16>, vector<8x8xbf16>, vector<8x8xf32> -> vector<8x8xf32>
    %cst_31 = arith.constant 0.353553385 : f32
    %40 = vector.broadcast %cst_31 : f32 to vector<8x8xf32>
    %41 = arith.mulf %39, %40 : vector<8x8xf32>
    %42 = vector.broadcast %9 : vector<1x8xf32> to vector<8x8xf32>
    %43 = arith.addf %41, %42 : vector<8x8xf32>
    %cst_32 = arith.constant dense<0xFF800000> : vector<8xf32>
    %44 = vector.multi_reduction <maximumf>, %43, %cst_32 [1] : vector<8x8xf32> to vector<8xf32>
    %45 = vector.shape_cast %44 : vector<8xf32> to vector<8x1xf32>
    %46 = vector.broadcast %45 : vector<8x1xf32> to vector<8x8xf32>
    %47 = arith.subf %43, %46 : vector<8x8xf32>
    %48 = math.exp %47 : vector<8x8xf32>
    %cst_33 = arith.constant dense<0.000000e+00> : vector<8xf32>
    %49 = vector.multi_reduction <add>, %48, %cst_33 [1] : vector<8x8xf32> to vector<8xf32>
    %50 = vector.shape_cast %49 : vector<8xf32> to vector<8x1xf32>
    %51 = tpu.reciprocal %50 {approx = true} : vector<8x1xf32> -> vector<8x1xf32>
    %52 = vector.broadcast %51 : vector<8x1xf32> to vector<8x8xf32>
    %53 = arith.mulf %48, %52 : vector<8x8xf32>
    %54 = arith.truncf %53 : vector<8x8xf32> to vector<8x8xbf16>
    %55 = arith.truncf %36 : vector<8x8xf32> to vector<8x8xbf16>
    %cst_34 = arith.constant dense<0.000000e+00> : vector<8x8xf32>
    %56 = tpu.matmul %54, %55, %cst_34 {dimension_numbers = #tpu.dot_dimension_numbers<[1], [0], [0], [1], [0, 0, 1, 1], [], []>} : vector<8x8xbf16>, vector<8x8xbf16>, vector<8x8xf32> -> vector<8x8xf32>
    %c0_35 = arith.constant 0 : index
    %c0_36 = arith.constant 0 : index
    %c0_37 = arith.constant 0 : index
    %57 = vector.load %arg10[%c0_35, %c0_36, %c0_37] : memref<4x8x32xf32, #tpu.memory_space<vmem>>, vector<1x8x32xf32>
    %58 = vector.shape_cast %57 : vector<1x8x32xf32> to vector<8x32xf32>
    %59 = arith.truncf %56 : vector<8x8xf32> to vector<8x8xbf16>
    %60 = arith.truncf %58 : vector<8x32xf32> to vector<8x32xbf16>
    %cst_38 = arith.constant dense<0.000000e+00> : vector<8x32xf32>
    %61 = tpu.matmul %59, %60, %cst_38 {dimension_numbers = #tpu.dot_dimension_numbers<[1], [0], [0], [1], [0, 0, 1, 1], [], []>} : vector<8x8xbf16>, vector<8x32xbf16>, vector<8x32xf32> -> vector<8x32xf32>
    %c1 = arith.constant 1 : index
    %c0_39 = arith.constant 0 : index
    %c0_40 = arith.constant 0 : index
    %62 = vector.load %arg4[%c1, %c0_39, %c0_40] : memref<4x32x8xf32, #tpu.memory_space<vmem>>, vector<1x32x8xf32>
    %63 = vector.shape_cast %62 : vector<1x32x8xf32> to vector<32x8xf32>
    %64 = arith.truncf %1 : vector<8x32xf32> to vector<8x32xbf16>
    %65 = arith.truncf %63 : vector<32x8xf32> to vector<32x8xbf16>
    %cst_41 = arith.constant dense<0.000000e+00> : vector<8x8xf32>
    %66 = tpu.matmul %64, %65, %cst_41 {dimension_numbers = #tpu.dot_dimension_numbers<[1], [0], [0], [1], [0, 0, 1, 1], [], []>} : vector<8x32xbf16>, vector<32x8xbf16>, vector<8x8xf32> -> vector<8x8xf32>
    %c1_42 = arith.constant 1 : index
    %c0_43 = arith.constant 0 : index
    %c0_44 = arith.constant 0 : index
    %67 = vector.load %arg5[%c1_42, %c0_43, %c0_44] : memref<4x1x8xf32, #tpu.memory_space<vmem>>, vector<1x1x8xf32>
    %68 = vector.shape_cast %67 : vector<1x1x8xf32> to vector<1x8xf32>
    %69 = vector.broadcast %68 : vector<1x8xf32> to vector<8x8xf32>
    %70 = arith.addf %66, %69 : vector<8x8xf32>
    %c1_45 = arith.constant 1 : index
    %c0_46 = arith.constant 0 : index
    %c0_47 = arith.constant 0 : index
    %71 = vector.load %arg6[%c1_45, %c0_46, %c0_47] : memref<4x32x8xf32, #tpu.memory_space<vmem>>, vector<1x32x8xf32>
    %72 = vector.shape_cast %71 : vector<1x32x8xf32> to vector<32x8xf32>
    %73 = arith.truncf %1 : vector<8x32xf32> to vector<8x32xbf16>
    %74 = arith.truncf %72 : vector<32x8xf32> to vector<32x8xbf16>
    %cst_48 = arith.constant dense<0.000000e+00> : vector<8x8xf32>
    %75 = tpu.matmul %73, %74, %cst_48 {dimension_numbers = #tpu.dot_dimension_numbers<[1], [0], [0], [1], [0, 0, 1, 1], [], []>} : vector<8x32xbf16>, vector<32x8xbf16>, vector<8x8xf32> -> vector<8x8xf32>
    %c1_49 = arith.constant 1 : index
    %c0_50 = arith.constant 0 : index
    %c0_51 = arith.constant 0 : index
    %76 = vector.load %arg7[%c1_49, %c0_50, %c0_51] : memref<4x1x8xf32, #tpu.memory_space<vmem>>, vector<1x1x8xf32>
    %77 = vector.shape_cast %76 : vector<1x1x8xf32> to vector<1x8xf32>
    %78 = vector.broadcast %77 : vector<1x8xf32> to vector<8x8xf32>
    %79 = arith.addf %75, %78 : vector<8x8xf32>
    %c1_52 = arith.constant 1 : index
    %c0_53 = arith.constant 0 : index
    %c0_54 = arith.constant 0 : index
    %80 = vector.load %arg8[%c1_52, %c0_53, %c0_54] : memref<4x32x8xf32, #tpu.memory_space<vmem>>, vector<1x32x8xf32>
    %81 = vector.shape_cast %80 : vector<1x32x8xf32> to vector<32x8xf32>
    %82 = arith.truncf %1 : vector<8x32xf32> to vector<8x32xbf16>
    %83 = arith.truncf %81 : vector<32x8xf32> to vector<32x8xbf16>
    %cst_55 = arith.constant dense<0.000000e+00> : vector<8x8xf32>
    %84 = tpu.matmul %82, %83, %cst_55 {dimension_numbers = #tpu.dot_dimension_numbers<[1], [0], [0], [1], [0, 0, 1, 1], [], []>} : vector<8x32xbf16>, vector<32x8xbf16>, vector<8x8xf32> -> vector<8x8xf32>
    %c1_56 = arith.constant 1 : index
    %c0_57 = arith.constant 0 : index
    %c0_58 = arith.constant 0 : index
    %85 = vector.load %arg9[%c1_56, %c0_57, %c0_58] : memref<4x1x8xf32, #tpu.memory_space<vmem>>, vector<1x1x8xf32>
    %86 = vector.shape_cast %85 : vector<1x1x8xf32> to vector<1x8xf32>
    %87 = vector.broadcast %86 : vector<1x8xf32> to vector<8x8xf32>
    %88 = arith.addf %84, %87 : vector<8x8xf32>
    %89 = arith.truncf %70 : vector<8x8xf32> to vector<8x8xbf16>
    %90 = arith.truncf %79 : vector<8x8xf32> to vector<8x8xbf16>
    %cst_59 = arith.constant dense<0.000000e+00> : vector<8x8xf32>
    %91 = tpu.matmul %89, %90, %cst_59 {dimension_numbers = #tpu.dot_dimension_numbers<[1], [1], [0], [0], [0, 0, 1, 0], [], []>} : vector<8x8xbf16>, vector<8x8xbf16>, vector<8x8xf32> -> vector<8x8xf32>
    %cst_60 = arith.constant 0.353553385 : f32
    %92 = vector.broadcast %cst_60 : f32 to vector<8x8xf32>
    %93 = arith.mulf %91, %92 : vector<8x8xf32>
    %94 = vector.broadcast %9 : vector<1x8xf32> to vector<8x8xf32>
    %95 = arith.addf %93, %94 : vector<8x8xf32>
    %cst_61 = arith.constant dense<0xFF800000> : vector<8xf32>
    %96 = vector.multi_reduction <maximumf>, %95, %cst_61 [1] : vector<8x8xf32> to vector<8xf32>
    %97 = vector.shape_cast %96 : vector<8xf32> to vector<8x1xf32>
    %98 = vector.broadcast %97 : vector<8x1xf32> to vector<8x8xf32>
    %99 = arith.subf %95, %98 : vector<8x8xf32>
    %100 = math.exp %99 : vector<8x8xf32>
    %cst_62 = arith.constant dense<0.000000e+00> : vector<8xf32>
    %101 = vector.multi_reduction <add>, %100, %cst_62 [1] : vector<8x8xf32> to vector<8xf32>
    %102 = vector.shape_cast %101 : vector<8xf32> to vector<8x1xf32>
    %103 = tpu.reciprocal %102 {approx = true} : vector<8x1xf32> -> vector<8x1xf32>
    %104 = vector.broadcast %103 : vector<8x1xf32> to vector<8x8xf32>
    %105 = arith.mulf %100, %104 : vector<8x8xf32>
    %106 = arith.truncf %105 : vector<8x8xf32> to vector<8x8xbf16>
    %107 = arith.truncf %88 : vector<8x8xf32> to vector<8x8xbf16>
    %cst_63 = arith.constant dense<0.000000e+00> : vector<8x8xf32>
    %108 = tpu.matmul %106, %107, %cst_63 {dimension_numbers = #tpu.dot_dimension_numbers<[1], [0], [0], [1], [0, 0, 1, 1], [], []>} : vector<8x8xbf16>, vector<8x8xbf16>, vector<8x8xf32> -> vector<8x8xf32>
    %c1_64 = arith.constant 1 : index
    %c0_65 = arith.constant 0 : index
    %c0_66 = arith.constant 0 : index
    %109 = vector.load %arg10[%c1_64, %c0_65, %c0_66] : memref<4x8x32xf32, #tpu.memory_space<vmem>>, vector<1x8x32xf32>
    %110 = vector.shape_cast %109 : vector<1x8x32xf32> to vector<8x32xf32>
    %111 = arith.truncf %108 : vector<8x8xf32> to vector<8x8xbf16>
    %112 = arith.truncf %110 : vector<8x32xf32> to vector<8x32xbf16>
    %cst_67 = arith.constant dense<0.000000e+00> : vector<8x32xf32>
    %113 = tpu.matmul %111, %112, %cst_67 {dimension_numbers = #tpu.dot_dimension_numbers<[1], [0], [0], [1], [0, 0, 1, 1], [], []>} : vector<8x8xbf16>, vector<8x32xbf16>, vector<8x32xf32> -> vector<8x32xf32>
    %114 = arith.addf %61, %113 : vector<8x32xf32>
    %c2 = arith.constant 2 : index
    %c0_68 = arith.constant 0 : index
    %c0_69 = arith.constant 0 : index
    %115 = vector.load %arg4[%c2, %c0_68, %c0_69] : memref<4x32x8xf32, #tpu.memory_space<vmem>>, vector<1x32x8xf32>
    %116 = vector.shape_cast %115 : vector<1x32x8xf32> to vector<32x8xf32>
    %117 = arith.truncf %1 : vector<8x32xf32> to vector<8x32xbf16>
    %118 = arith.truncf %116 : vector<32x8xf32> to vector<32x8xbf16>
    %cst_70 = arith.constant dense<0.000000e+00> : vector<8x8xf32>
    %119 = tpu.matmul %117, %118, %cst_70 {dimension_numbers = #tpu.dot_dimension_numbers<[1], [0], [0], [1], [0, 0, 1, 1], [], []>} : vector<8x32xbf16>, vector<32x8xbf16>, vector<8x8xf32> -> vector<8x8xf32>
    %c2_71 = arith.constant 2 : index
    %c0_72 = arith.constant 0 : index
    %c0_73 = arith.constant 0 : index
    %120 = vector.load %arg5[%c2_71, %c0_72, %c0_73] : memref<4x1x8xf32, #tpu.memory_space<vmem>>, vector<1x1x8xf32>
    %121 = vector.shape_cast %120 : vector<1x1x8xf32> to vector<1x8xf32>
    %122 = vector.broadcast %121 : vector<1x8xf32> to vector<8x8xf32>
    %123 = arith.addf %119, %122 : vector<8x8xf32>
    %c2_74 = arith.constant 2 : index
    %c0_75 = arith.constant 0 : index
    %c0_76 = arith.constant 0 : index
    %124 = vector.load %arg6[%c2_74, %c0_75, %c0_76] : memref<4x32x8xf32, #tpu.memory_space<vmem>>, vector<1x32x8xf32>
    %125 = vector.shape_cast %124 : vector<1x32x8xf32> to vector<32x8xf32>
    %126 = arith.truncf %1 : vector<8x32xf32> to vector<8x32xbf16>
    %127 = arith.truncf %125 : vector<32x8xf32> to vector<32x8xbf16>
    %cst_77 = arith.constant dense<0.000000e+00> : vector<8x8xf32>
    %128 = tpu.matmul %126, %127, %cst_77 {dimension_numbers = #tpu.dot_dimension_numbers<[1], [0], [0], [1], [0, 0, 1, 1], [], []>} : vector<8x32xbf16>, vector<32x8xbf16>, vector<8x8xf32> -> vector<8x8xf32>
    %c2_78 = arith.constant 2 : index
    %c0_79 = arith.constant 0 : index
    %c0_80 = arith.constant 0 : index
    %129 = vector.load %arg7[%c2_78, %c0_79, %c0_80] : memref<4x1x8xf32, #tpu.memory_space<vmem>>, vector<1x1x8xf32>
    %130 = vector.shape_cast %129 : vector<1x1x8xf32> to vector<1x8xf32>
    %131 = vector.broadcast %130 : vector<1x8xf32> to vector<8x8xf32>
    %132 = arith.addf %128, %131 : vector<8x8xf32>
    %c2_81 = arith.constant 2 : index
    %c0_82 = arith.constant 0 : index
    %c0_83 = arith.constant 0 : index
    %133 = vector.load %arg8[%c2_81, %c0_82, %c0_83] : memref<4x32x8xf32, #tpu.memory_space<vmem>>, vector<1x32x8xf32>
    %134 = vector.shape_cast %133 : vector<1x32x8xf32> to vector<32x8xf32>
    %135 = arith.truncf %1 : vector<8x32xf32> to vector<8x32xbf16>
    %136 = arith.truncf %134 : vector<32x8xf32> to vector<32x8xbf16>
    %cst_84 = arith.constant dense<0.000000e+00> : vector<8x8xf32>
    %137 = tpu.matmul %135, %136, %cst_84 {dimension_numbers = #tpu.dot_dimension_numbers<[1], [0], [0], [1], [0, 0, 1, 1], [], []>} : vector<8x32xbf16>, vector<32x8xbf16>, vector<8x8xf32> -> vector<8x8xf32>
    %c2_85 = arith.constant 2 : index
    %c0_86 = arith.constant 0 : index
    %c0_87 = arith.constant 0 : index
    %138 = vector.load %arg9[%c2_85, %c0_86, %c0_87] : memref<4x1x8xf32, #tpu.memory_space<vmem>>, vector<1x1x8xf32>
    %139 = vector.shape_cast %138 : vector<1x1x8xf32> to vector<1x8xf32>
    %140 = vector.broadcast %139 : vector<1x8xf32> to vector<8x8xf32>
    %141 = arith.addf %137, %140 : vector<8x8xf32>
    %142 = arith.truncf %123 : vector<8x8xf32> to vector<8x8xbf16>
    %143 = arith.truncf %132 : vector<8x8xf32> to vector<8x8xbf16>
    %cst_88 = arith.constant dense<0.000000e+00> : vector<8x8xf32>
    %144 = tpu.matmul %142, %143, %cst_88 {dimension_numbers = #tpu.dot_dimension_numbers<[1], [1], [0], [0], [0, 0, 1, 0], [], []>} : vector<8x8xbf16>, vector<8x8xbf16>, vector<8x8xf32> -> vector<8x8xf32>
    %cst_89 = arith.constant 0.353553385 : f32
    %145 = vector.broadcast %cst_89 : f32 to vector<8x8xf32>
    %146 = arith.mulf %144, %145 : vector<8x8xf32>
    %147 = vector.broadcast %9 : vector<1x8xf32> to vector<8x8xf32>
    %148 = arith.addf %146, %147 : vector<8x8xf32>
    %cst_90 = arith.constant dense<0xFF800000> : vector<8xf32>
    %149 = vector.multi_reduction <maximumf>, %148, %cst_90 [1] : vector<8x8xf32> to vector<8xf32>
    %150 = vector.shape_cast %149 : vector<8xf32> to vector<8x1xf32>
    %151 = vector.broadcast %150 : vector<8x1xf32> to vector<8x8xf32>
    %152 = arith.subf %148, %151 : vector<8x8xf32>
    %153 = math.exp %152 : vector<8x8xf32>
    %cst_91 = arith.constant dense<0.000000e+00> : vector<8xf32>
    %154 = vector.multi_reduction <add>, %153, %cst_91 [1] : vector<8x8xf32> to vector<8xf32>
    %155 = vector.shape_cast %154 : vector<8xf32> to vector<8x1xf32>
    %156 = tpu.reciprocal %155 {approx = true} : vector<8x1xf32> -> vector<8x1xf32>
    %157 = vector.broadcast %156 : vector<8x1xf32> to vector<8x8xf32>
    %158 = arith.mulf %153, %157 : vector<8x8xf32>
    %159 = arith.truncf %158 : vector<8x8xf32> to vector<8x8xbf16>
    %160 = arith.truncf %141 : vector<8x8xf32> to vector<8x8xbf16>
    %cst_92 = arith.constant dense<0.000000e+00> : vector<8x8xf32>
    %161 = tpu.matmul %159, %160, %cst_92 {dimension_numbers = #tpu.dot_dimension_numbers<[1], [0], [0], [1], [0, 0, 1, 1], [], []>} : vector<8x8xbf16>, vector<8x8xbf16>, vector<8x8xf32> -> vector<8x8xf32>
    %c2_93 = arith.constant 2 : index
    %c0_94 = arith.constant 0 : index
    %c0_95 = arith.constant 0 : index
    %162 = vector.load %arg10[%c2_93, %c0_94, %c0_95] : memref<4x8x32xf32, #tpu.memory_space<vmem>>, vector<1x8x32xf32>
    %163 = vector.shape_cast %162 : vector<1x8x32xf32> to vector<8x32xf32>
    %164 = arith.truncf %161 : vector<8x8xf32> to vector<8x8xbf16>
    %165 = arith.truncf %163 : vector<8x32xf32> to vector<8x32xbf16>
    %cst_96 = arith.constant dense<0.000000e+00> : vector<8x32xf32>
    %166 = tpu.matmul %164, %165, %cst_96 {dimension_numbers = #tpu.dot_dimension_numbers<[1], [0], [0], [1], [0, 0, 1, 1], [], []>} : vector<8x8xbf16>, vector<8x32xbf16>, vector<8x32xf32> -> vector<8x32xf32>
    %167 = arith.addf %114, %166 : vector<8x32xf32>
    %c3 = arith.constant 3 : index
    %c0_97 = arith.constant 0 : index
    %c0_98 = arith.constant 0 : index
    %168 = vector.load %arg4[%c3, %c0_97, %c0_98] : memref<4x32x8xf32, #tpu.memory_space<vmem>>, vector<1x32x8xf32>
    %169 = vector.shape_cast %168 : vector<1x32x8xf32> to vector<32x8xf32>
    %170 = arith.truncf %1 : vector<8x32xf32> to vector<8x32xbf16>
    %171 = arith.truncf %169 : vector<32x8xf32> to vector<32x8xbf16>
    %cst_99 = arith.constant dense<0.000000e+00> : vector<8x8xf32>
    %172 = tpu.matmul %170, %171, %cst_99 {dimension_numbers = #tpu.dot_dimension_numbers<[1], [0], [0], [1], [0, 0, 1, 1], [], []>} : vector<8x32xbf16>, vector<32x8xbf16>, vector<8x8xf32> -> vector<8x8xf32>
    %c3_100 = arith.constant 3 : index
    %c0_101 = arith.constant 0 : index
    %c0_102 = arith.constant 0 : index
    %173 = vector.load %arg5[%c3_100, %c0_101, %c0_102] : memref<4x1x8xf32, #tpu.memory_space<vmem>>, vector<1x1x8xf32>
    %174 = vector.shape_cast %173 : vector<1x1x8xf32> to vector<1x8xf32>
    %175 = vector.broadcast %174 : vector<1x8xf32> to vector<8x8xf32>
    %176 = arith.addf %172, %175 : vector<8x8xf32>
    %c3_103 = arith.constant 3 : index
    %c0_104 = arith.constant 0 : index
    %c0_105 = arith.constant 0 : index
    %177 = vector.load %arg6[%c3_103, %c0_104, %c0_105] : memref<4x32x8xf32, #tpu.memory_space<vmem>>, vector<1x32x8xf32>
    %178 = vector.shape_cast %177 : vector<1x32x8xf32> to vector<32x8xf32>
    %179 = arith.truncf %1 : vector<8x32xf32> to vector<8x32xbf16>
    %180 = arith.truncf %178 : vector<32x8xf32> to vector<32x8xbf16>
    %cst_106 = arith.constant dense<0.000000e+00> : vector<8x8xf32>
    %181 = tpu.matmul %179, %180, %cst_106 {dimension_numbers = #tpu.dot_dimension_numbers<[1], [0], [0], [1], [0, 0, 1, 1], [], []>} : vector<8x32xbf16>, vector<32x8xbf16>, vector<8x8xf32> -> vector<8x8xf32>
    %c3_107 = arith.constant 3 : index
    %c0_108 = arith.constant 0 : index
    %c0_109 = arith.constant 0 : index
    %182 = vector.load %arg7[%c3_107, %c0_108, %c0_109] : memref<4x1x8xf32, #tpu.memory_space<vmem>>, vector<1x1x8xf32>
    %183 = vector.shape_cast %182 : vector<1x1x8xf32> to vector<1x8xf32>
    %184 = vector.broadcast %183 : vector<1x8xf32> to vector<8x8xf32>
    %185 = arith.addf %181, %184 : vector<8x8xf32>
    %c3_110 = arith.constant 3 : index
    %c0_111 = arith.constant 0 : index
    %c0_112 = arith.constant 0 : index
    %186 = vector.load %arg8[%c3_110, %c0_111, %c0_112] : memref<4x32x8xf32, #tpu.memory_space<vmem>>, vector<1x32x8xf32>
    %187 = vector.shape_cast %186 : vector<1x32x8xf32> to vector<32x8xf32>
    %188 = arith.truncf %1 : vector<8x32xf32> to vector<8x32xbf16>
    %189 = arith.truncf %187 : vector<32x8xf32> to vector<32x8xbf16>
    %cst_113 = arith.constant dense<0.000000e+00> : vector<8x8xf32>
    %190 = tpu.matmul %188, %189, %cst_113 {dimension_numbers = #tpu.dot_dimension_numbers<[1], [0], [0], [1], [0, 0, 1, 1], [], []>} : vector<8x32xbf16>, vector<32x8xbf16>, vector<8x8xf32> -> vector<8x8xf32>
    %c3_114 = arith.constant 3 : index
    %c0_115 = arith.constant 0 : index
    %c0_116 = arith.constant 0 : index
    %191 = vector.load %arg9[%c3_114, %c0_115, %c0_116] : memref<4x1x8xf32, #tpu.memory_space<vmem>>, vector<1x1x8xf32>
    %192 = vector.shape_cast %191 : vector<1x1x8xf32> to vector<1x8xf32>
    %193 = vector.broadcast %192 : vector<1x8xf32> to vector<8x8xf32>
    %194 = arith.addf %190, %193 : vector<8x8xf32>
    %195 = arith.truncf %176 : vector<8x8xf32> to vector<8x8xbf16>
    %196 = arith.truncf %185 : vector<8x8xf32> to vector<8x8xbf16>
    %cst_117 = arith.constant dense<0.000000e+00> : vector<8x8xf32>
    %197 = tpu.matmul %195, %196, %cst_117 {dimension_numbers = #tpu.dot_dimension_numbers<[1], [1], [0], [0], [0, 0, 1, 0], [], []>} : vector<8x8xbf16>, vector<8x8xbf16>, vector<8x8xf32> -> vector<8x8xf32>
    %cst_118 = arith.constant 0.353553385 : f32
    %198 = vector.broadcast %cst_118 : f32 to vector<8x8xf32>
    %199 = arith.mulf %197, %198 : vector<8x8xf32>
    %200 = vector.broadcast %9 : vector<1x8xf32> to vector<8x8xf32>
    %201 = arith.addf %199, %200 : vector<8x8xf32>
    %cst_119 = arith.constant dense<0xFF800000> : vector<8xf32>
    %202 = vector.multi_reduction <maximumf>, %201, %cst_119 [1] : vector<8x8xf32> to vector<8xf32>
    %203 = vector.shape_cast %202 : vector<8xf32> to vector<8x1xf32>
    %204 = vector.broadcast %203 : vector<8x1xf32> to vector<8x8xf32>
    %205 = arith.subf %201, %204 : vector<8x8xf32>
    %206 = math.exp %205 : vector<8x8xf32>
    %cst_120 = arith.constant dense<0.000000e+00> : vector<8xf32>
    %207 = vector.multi_reduction <add>, %206, %cst_120 [1] : vector<8x8xf32> to vector<8xf32>
    %208 = vector.shape_cast %207 : vector<8xf32> to vector<8x1xf32>
    %209 = tpu.reciprocal %208 {approx = true} : vector<8x1xf32> -> vector<8x1xf32>
    %210 = vector.broadcast %209 : vector<8x1xf32> to vector<8x8xf32>
    %211 = arith.mulf %206, %210 : vector<8x8xf32>
    %212 = arith.truncf %211 : vector<8x8xf32> to vector<8x8xbf16>
    %213 = arith.truncf %194 : vector<8x8xf32> to vector<8x8xbf16>
    %cst_121 = arith.constant dense<0.000000e+00> : vector<8x8xf32>
    %214 = tpu.matmul %212, %213, %cst_121 {dimension_numbers = #tpu.dot_dimension_numbers<[1], [0], [0], [1], [0, 0, 1, 1], [], []>} : vector<8x8xbf16>, vector<8x8xbf16>, vector<8x8xf32> -> vector<8x8xf32>
    %c3_122 = arith.constant 3 : index
    %c0_123 = arith.constant 0 : index
    %c0_124 = arith.constant 0 : index
    %215 = vector.load %arg10[%c3_122, %c0_123, %c0_124] : memref<4x8x32xf32, #tpu.memory_space<vmem>>, vector<1x8x32xf32>
    %216 = vector.shape_cast %215 : vector<1x8x32xf32> to vector<8x32xf32>
    %217 = arith.truncf %214 : vector<8x8xf32> to vector<8x8xbf16>
    %218 = arith.truncf %216 : vector<8x32xf32> to vector<8x32xbf16>
    %cst_125 = arith.constant dense<0.000000e+00> : vector<8x32xf32>
    %219 = tpu.matmul %217, %218, %cst_125 {dimension_numbers = #tpu.dot_dimension_numbers<[1], [0], [0], [1], [0, 0, 1, 1], [], []>} : vector<8x8xbf16>, vector<8x32xbf16>, vector<8x32xf32> -> vector<8x32xf32>
    %220 = arith.addf %167, %219 : vector<8x32xf32>
    %c0_126 = arith.constant 0 : index
    %c0_127 = arith.constant 0 : index
    %221 = vector.load %arg11[%c0_126, %c0_127] : memref<1x32xf32, #tpu.memory_space<vmem>>, vector<1x32xf32>
    %222 = vector.broadcast %221 : vector<1x32xf32> to vector<8x32xf32>
    %223 = arith.addf %220, %222 : vector<8x32xf32>
    %224 = arith.addf %223, %1 : vector<8x32xf32>
    %c0_128 = arith.constant 0 : index
    %c0_129 = arith.constant 0 : index
    %225 = vector.load %arg12[%c0_128, %c0_129] : memref<1x32xf32, #tpu.memory_space<vmem>>, vector<1x32xf32>
    %c0_130 = arith.constant 0 : index
    %c0_131 = arith.constant 0 : index
    %226 = vector.load %arg13[%c0_130, %c0_131] : memref<1x32xf32, #tpu.memory_space<vmem>>, vector<1x32xf32>
    %cst_132 = arith.constant dense<0.000000e+00> : vector<8xf32>
    %227 = vector.multi_reduction <add>, %224, %cst_132 [1] : vector<8x32xf32> to vector<8xf32>
    %228 = vector.shape_cast %227 : vector<8xf32> to vector<8x1xf32>
    %cst_133 = arith.constant 3.200000e+01 : f32
    %229 = vector.broadcast %cst_133 : f32 to vector<8x1xf32>
    %230 = arith.divf %228, %229 : vector<8x1xf32>
    %231 = vector.broadcast %230 : vector<8x1xf32> to vector<8x32xf32>
    %232 = arith.subf %224, %231 : vector<8x32xf32>
    %233 = arith.mulf %232, %232 : vector<8x32xf32>
    %cst_134 = arith.constant dense<0.000000e+00> : vector<8xf32>
    %234 = vector.multi_reduction <add>, %233, %cst_134 [1] : vector<8x32xf32> to vector<8xf32>
    %235 = vector.shape_cast %234 : vector<8xf32> to vector<8x1xf32>
    %cst_135 = arith.constant 3.200000e+01 : f32
    %236 = vector.broadcast %cst_135 : f32 to vector<8x1xf32>
    %237 = arith.divf %235, %236 : vector<8x1xf32>
    %238 = vector.broadcast %230 : vector<8x1xf32> to vector<8x32xf32>
    %239 = arith.subf %224, %238 : vector<8x32xf32>
    %cst_136 = arith.constant 9.99999996E-13 : f32
    %240 = vector.broadcast %cst_136 : f32 to vector<8x1xf32>
    %241 = arith.addf %237, %240 : vector<8x1xf32>
    %242 = math.rsqrt %241 : vector<8x1xf32>
    %243 = vector.broadcast %242 : vector<8x1xf32> to vector<8x32xf32>
    %244 = arith.mulf %239, %243 : vector<8x32xf32>
    %245 = vector.broadcast %225 : vector<1x32xf32> to vector<8x32xf32>
    %246 = arith.mulf %244, %245 : vector<8x32xf32>
    %247 = vector.broadcast %226 : vector<1x32xf32> to vector<8x32xf32>
    %248 = arith.addf %246, %247 : vector<8x32xf32>
    %c0_137 = arith.constant 0 : index
    %c0_138 = arith.constant 0 : index
    %c0_139 = arith.constant 0 : index
    %249 = vector.load %arg14[%c0_137, %c0_138, %c0_139] : memref<4x32x8xf32, #tpu.memory_space<vmem>>, vector<1x32x8xf32>
    %250 = vector.shape_cast %249 : vector<1x32x8xf32> to vector<32x8xf32>
    %251 = arith.truncf %248 : vector<8x32xf32> to vector<8x32xbf16>
    %252 = arith.truncf %250 : vector<32x8xf32> to vector<32x8xbf16>
    %cst_140 = arith.constant dense<0.000000e+00> : vector<8x8xf32>
    %253 = tpu.matmul %251, %252, %cst_140 {dimension_numbers = #tpu.dot_dimension_numbers<[1], [0], [0], [1], [0, 0, 1, 1], [], []>} : vector<8x32xbf16>, vector<32x8xbf16>, vector<8x8xf32> -> vector<8x8xf32>
    %c0_141 = arith.constant 0 : index
    %c0_142 = arith.constant 0 : index
    %c0_143 = arith.constant 0 : index
    %254 = vector.load %arg15[%c0_141, %c0_142, %c0_143] : memref<4x1x8xf32, #tpu.memory_space<vmem>>, vector<1x1x8xf32>
    %255 = vector.shape_cast %254 : vector<1x1x8xf32> to vector<1x8xf32>
    %256 = vector.broadcast %255 : vector<1x8xf32> to vector<8x8xf32>
    %257 = arith.addf %253, %256 : vector<8x8xf32>
    %c0_144 = arith.constant 0 : index
    %c0_145 = arith.constant 0 : index
    %c0_146 = arith.constant 0 : index
    %258 = vector.load %arg16[%c0_144, %c0_145, %c0_146] : memref<4x32x8xf32, #tpu.memory_space<vmem>>, vector<1x32x8xf32>
    %259 = vector.shape_cast %258 : vector<1x32x8xf32> to vector<32x8xf32>
    %260 = arith.truncf %3 : vector<5x32xf32> to vector<5x32xbf16>
    %261 = arith.truncf %259 : vector<32x8xf32> to vector<32x8xbf16>
    %cst_147 = arith.constant dense<0.000000e+00> : vector<5x8xf32>
    %262 = tpu.matmul %260, %261, %cst_147 {dimension_numbers = #tpu.dot_dimension_numbers<[1], [0], [0], [1], [0, 0, 1, 1], [], []>} : vector<5x32xbf16>, vector<32x8xbf16>, vector<5x8xf32> -> vector<5x8xf32>
    %c0_148 = arith.constant 0 : index
    %c0_149 = arith.constant 0 : index
    %c0_150 = arith.constant 0 : index
    %263 = vector.load %arg17[%c0_148, %c0_149, %c0_150] : memref<4x1x8xf32, #tpu.memory_space<vmem>>, vector<1x1x8xf32>
    %264 = vector.shape_cast %263 : vector<1x1x8xf32> to vector<1x8xf32>
    %265 = vector.broadcast %264 : vector<1x8xf32> to vector<5x8xf32>
    %266 = arith.addf %262, %265 : vector<5x8xf32>
    %c0_151 = arith.constant 0 : index
    %c0_152 = arith.constant 0 : index
    %c0_153 = arith.constant 0 : index
    %267 = vector.load %arg18[%c0_151, %c0_152, %c0_153] : memref<4x32x8xf32, #tpu.memory_space<vmem>>, vector<1x32x8xf32>
    %268 = vector.shape_cast %267 : vector<1x32x8xf32> to vector<32x8xf32>
    %269 = arith.truncf %3 : vector<5x32xf32> to vector<5x32xbf16>
    %270 = arith.truncf %268 : vector<32x8xf32> to vector<32x8xbf16>
    %cst_154 = arith.constant dense<0.000000e+00> : vector<5x8xf32>
    %271 = tpu.matmul %269, %270, %cst_154 {dimension_numbers = #tpu.dot_dimension_numbers<[1], [0], [0], [1], [0, 0, 1, 1], [], []>} : vector<5x32xbf16>, vector<32x8xbf16>, vector<5x8xf32> -> vector<5x8xf32>
    %c0_155 = arith.constant 0 : index
    %c0_156 = arith.constant 0 : index
    %c0_157 = arith.constant 0 : index
    %272 = vector.load %arg19[%c0_155, %c0_156, %c0_157] : memref<4x1x8xf32, #tpu.memory_space<vmem>>, vector<1x1x8xf32>
    %273 = vector.shape_cast %272 : vector<1x1x8xf32> to vector<1x8xf32>
    %274 = vector.broadcast %273 : vector<1x8xf32> to vector<5x8xf32>
    %275 = arith.addf %271, %274 : vector<5x8xf32>
    %276 = arith.truncf %257 : vector<8x8xf32> to vector<8x8xbf16>
    %277 = arith.truncf %266 : vector<5x8xf32> to vector<5x8xbf16>
    %cst_158 = arith.constant dense<0.000000e+00> : vector<8x5xf32>
    %278 = tpu.matmul %276, %277, %cst_158 {dimension_numbers = #tpu.dot_dimension_numbers<[1], [1], [0], [0], [0, 0, 1, 0], [], []>} : vector<8x8xbf16>, vector<5x8xbf16>, vector<8x5xf32> -> vector<8x5xf32>
    %cst_159 = arith.constant 0.353553385 : f32
    %279 = vector.broadcast %cst_159 : f32 to vector<8x5xf32>
    %280 = arith.mulf %278, %279 : vector<8x5xf32>
    %cst_160 = arith.constant dense<0xFF800000> : vector<8xf32>
    %281 = vector.multi_reduction <maximumf>, %280, %cst_160 [1] : vector<8x5xf32> to vector<8xf32>
    %282 = vector.shape_cast %281 : vector<8xf32> to vector<8x1xf32>
    %283 = vector.broadcast %282 : vector<8x1xf32> to vector<8x5xf32>
    %284 = arith.subf %280, %283 : vector<8x5xf32>
    %285 = math.exp %284 : vector<8x5xf32>
    %cst_161 = arith.constant dense<0.000000e+00> : vector<8xf32>
    %286 = vector.multi_reduction <add>, %285, %cst_161 [1] : vector<8x5xf32> to vector<8xf32>
    %287 = vector.shape_cast %286 : vector<8xf32> to vector<8x1xf32>
    %288 = tpu.reciprocal %287 {approx = true} : vector<8x1xf32> -> vector<8x1xf32>
    %289 = vector.broadcast %288 : vector<8x1xf32> to vector<8x5xf32>
    %290 = arith.mulf %285, %289 : vector<8x5xf32>
    %291 = arith.truncf %290 : vector<8x5xf32> to vector<8x5xbf16>
    %292 = arith.truncf %275 : vector<5x8xf32> to vector<5x8xbf16>
    %cst_162 = arith.constant dense<0.000000e+00> : vector<8x8xf32>
    %293 = tpu.matmul %291, %292, %cst_162 {dimension_numbers = #tpu.dot_dimension_numbers<[1], [0], [0], [1], [0, 0, 1, 1], [], []>} : vector<8x5xbf16>, vector<5x8xbf16>, vector<8x8xf32> -> vector<8x8xf32>
    %c0_163 = arith.constant 0 : index
    %c0_164 = arith.constant 0 : index
    %c0_165 = arith.constant 0 : index
    %294 = vector.load %arg20[%c0_163, %c0_164, %c0_165] : memref<4x8x32xf32, #tpu.memory_space<vmem>>, vector<1x8x32xf32>
    %295 = vector.shape_cast %294 : vector<1x8x32xf32> to vector<8x32xf32>
    %296 = arith.truncf %293 : vector<8x8xf32> to vector<8x8xbf16>
    %297 = arith.truncf %295 : vector<8x32xf32> to vector<8x32xbf16>
    %cst_166 = arith.constant dense<0.000000e+00> : vector<8x32xf32>
    %298 = tpu.matmul %296, %297, %cst_166 {dimension_numbers = #tpu.dot_dimension_numbers<[1], [0], [0], [1], [0, 0, 1, 1], [], []>} : vector<8x8xbf16>, vector<8x32xbf16>, vector<8x32xf32> -> vector<8x32xf32>
    %c1_167 = arith.constant 1 : index
    %c0_168 = arith.constant 0 : index
    %c0_169 = arith.constant 0 : index
    %299 = vector.load %arg14[%c1_167, %c0_168, %c0_169] : memref<4x32x8xf32, #tpu.memory_space<vmem>>, vector<1x32x8xf32>
    %300 = vector.shape_cast %299 : vector<1x32x8xf32> to vector<32x8xf32>
    %301 = arith.truncf %248 : vector<8x32xf32> to vector<8x32xbf16>
    %302 = arith.truncf %300 : vector<32x8xf32> to vector<32x8xbf16>
    %cst_170 = arith.constant dense<0.000000e+00> : vector<8x8xf32>
    %303 = tpu.matmul %301, %302, %cst_170 {dimension_numbers = #tpu.dot_dimension_numbers<[1], [0], [0], [1], [0, 0, 1, 1], [], []>} : vector<8x32xbf16>, vector<32x8xbf16>, vector<8x8xf32> -> vector<8x8xf32>
    %c1_171 = arith.constant 1 : index
    %c0_172 = arith.constant 0 : index
    %c0_173 = arith.constant 0 : index
    %304 = vector.load %arg15[%c1_171, %c0_172, %c0_173] : memref<4x1x8xf32, #tpu.memory_space<vmem>>, vector<1x1x8xf32>
    %305 = vector.shape_cast %304 : vector<1x1x8xf32> to vector<1x8xf32>
    %306 = vector.broadcast %305 : vector<1x8xf32> to vector<8x8xf32>
    %307 = arith.addf %303, %306 : vector<8x8xf32>
    %c1_174 = arith.constant 1 : index
    %c0_175 = arith.constant 0 : index
    %c0_176 = arith.constant 0 : index
    %308 = vector.load %arg16[%c1_174, %c0_175, %c0_176] : memref<4x32x8xf32, #tpu.memory_space<vmem>>, vector<1x32x8xf32>
    %309 = vector.shape_cast %308 : vector<1x32x8xf32> to vector<32x8xf32>
    %310 = arith.truncf %3 : vector<5x32xf32> to vector<5x32xbf16>
    %311 = arith.truncf %309 : vector<32x8xf32> to vector<32x8xbf16>
    %cst_177 = arith.constant dense<0.000000e+00> : vector<5x8xf32>
    %312 = tpu.matmul %310, %311, %cst_177 {dimension_numbers = #tpu.dot_dimension_numbers<[1], [0], [0], [1], [0, 0, 1, 1], [], []>} : vector<5x32xbf16>, vector<32x8xbf16>, vector<5x8xf32> -> vector<5x8xf32>
    %c1_178 = arith.constant 1 : index
    %c0_179 = arith.constant 0 : index
    %c0_180 = arith.constant 0 : index
    %313 = vector.load %arg17[%c1_178, %c0_179, %c0_180] : memref<4x1x8xf32, #tpu.memory_space<vmem>>, vector<1x1x8xf32>
    %314 = vector.shape_cast %313 : vector<1x1x8xf32> to vector<1x8xf32>
    %315 = vector.broadcast %314 : vector<1x8xf32> to vector<5x8xf32>
    %316 = arith.addf %312, %315 : vector<5x8xf32>
    %c1_181 = arith.constant 1 : index
    %c0_182 = arith.constant 0 : index
    %c0_183 = arith.constant 0 : index
    %317 = vector.load %arg18[%c1_181, %c0_182, %c0_183] : memref<4x32x8xf32, #tpu.memory_space<vmem>>, vector<1x32x8xf32>
    %318 = vector.shape_cast %317 : vector<1x32x8xf32> to vector<32x8xf32>
    %319 = arith.truncf %3 : vector<5x32xf32> to vector<5x32xbf16>
    %320 = arith.truncf %318 : vector<32x8xf32> to vector<32x8xbf16>
    %cst_184 = arith.constant dense<0.000000e+00> : vector<5x8xf32>
    %321 = tpu.matmul %319, %320, %cst_184 {dimension_numbers = #tpu.dot_dimension_numbers<[1], [0], [0], [1], [0, 0, 1, 1], [], []>} : vector<5x32xbf16>, vector<32x8xbf16>, vector<5x8xf32> -> vector<5x8xf32>
    %c1_185 = arith.constant 1 : index
    %c0_186 = arith.constant 0 : index
    %c0_187 = arith.constant 0 : index
    %322 = vector.load %arg19[%c1_185, %c0_186, %c0_187] : memref<4x1x8xf32, #tpu.memory_space<vmem>>, vector<1x1x8xf32>
    %323 = vector.shape_cast %322 : vector<1x1x8xf32> to vector<1x8xf32>
    %324 = vector.broadcast %323 : vector<1x8xf32> to vector<5x8xf32>
    %325 = arith.addf %321, %324 : vector<5x8xf32>
    %326 = arith.truncf %307 : vector<8x8xf32> to vector<8x8xbf16>
    %327 = arith.truncf %316 : vector<5x8xf32> to vector<5x8xbf16>
    %cst_188 = arith.constant dense<0.000000e+00> : vector<8x5xf32>
    %328 = tpu.matmul %326, %327, %cst_188 {dimension_numbers = #tpu.dot_dimension_numbers<[1], [1], [0], [0], [0, 0, 1, 0], [], []>} : vector<8x8xbf16>, vector<5x8xbf16>, vector<8x5xf32> -> vector<8x5xf32>
    %cst_189 = arith.constant 0.353553385 : f32
    %329 = vector.broadcast %cst_189 : f32 to vector<8x5xf32>
    %330 = arith.mulf %328, %329 : vector<8x5xf32>
    %cst_190 = arith.constant dense<0xFF800000> : vector<8xf32>
    %331 = vector.multi_reduction <maximumf>, %330, %cst_190 [1] : vector<8x5xf32> to vector<8xf32>
    %332 = vector.shape_cast %331 : vector<8xf32> to vector<8x1xf32>
    %333 = vector.broadcast %332 : vector<8x1xf32> to vector<8x5xf32>
    %334 = arith.subf %330, %333 : vector<8x5xf32>
    %335 = math.exp %334 : vector<8x5xf32>
    %cst_191 = arith.constant dense<0.000000e+00> : vector<8xf32>
    %336 = vector.multi_reduction <add>, %335, %cst_191 [1] : vector<8x5xf32> to vector<8xf32>
    %337 = vector.shape_cast %336 : vector<8xf32> to vector<8x1xf32>
    %338 = tpu.reciprocal %337 {approx = true} : vector<8x1xf32> -> vector<8x1xf32>
    %339 = vector.broadcast %338 : vector<8x1xf32> to vector<8x5xf32>
    %340 = arith.mulf %335, %339 : vector<8x5xf32>
    %341 = arith.truncf %340 : vector<8x5xf32> to vector<8x5xbf16>
    %342 = arith.truncf %325 : vector<5x8xf32> to vector<5x8xbf16>
    %cst_192 = arith.constant dense<0.000000e+00> : vector<8x8xf32>
    %343 = tpu.matmul %341, %342, %cst_192 {dimension_numbers = #tpu.dot_dimension_numbers<[1], [0], [0], [1], [0, 0, 1, 1], [], []>} : vector<8x5xbf16>, vector<5x8xbf16>, vector<8x8xf32> -> vector<8x8xf32>
    %c1_193 = arith.constant 1 : index
    %c0_194 = arith.constant 0 : index
    %c0_195 = arith.constant 0 : index
    %344 = vector.load %arg20[%c1_193, %c0_194, %c0_195] : memref<4x8x32xf32, #tpu.memory_space<vmem>>, vector<1x8x32xf32>
    %345 = vector.shape_cast %344 : vector<1x8x32xf32> to vector<8x32xf32>
    %346 = arith.truncf %343 : vector<8x8xf32> to vector<8x8xbf16>
    %347 = arith.truncf %345 : vector<8x32xf32> to vector<8x32xbf16>
    %cst_196 = arith.constant dense<0.000000e+00> : vector<8x32xf32>
    %348 = tpu.matmul %346, %347, %cst_196 {dimension_numbers = #tpu.dot_dimension_numbers<[1], [0], [0], [1], [0, 0, 1, 1], [], []>} : vector<8x8xbf16>, vector<8x32xbf16>, vector<8x32xf32> -> vector<8x32xf32>
    %349 = arith.addf %298, %348 : vector<8x32xf32>
    %c2_197 = arith.constant 2 : index
    %c0_198 = arith.constant 0 : index
    %c0_199 = arith.constant 0 : index
    %350 = vector.load %arg14[%c2_197, %c0_198, %c0_199] : memref<4x32x8xf32, #tpu.memory_space<vmem>>, vector<1x32x8xf32>
    %351 = vector.shape_cast %350 : vector<1x32x8xf32> to vector<32x8xf32>
    %352 = arith.truncf %248 : vector<8x32xf32> to vector<8x32xbf16>
    %353 = arith.truncf %351 : vector<32x8xf32> to vector<32x8xbf16>
    %cst_200 = arith.constant dense<0.000000e+00> : vector<8x8xf32>
    %354 = tpu.matmul %352, %353, %cst_200 {dimension_numbers = #tpu.dot_dimension_numbers<[1], [0], [0], [1], [0, 0, 1, 1], [], []>} : vector<8x32xbf16>, vector<32x8xbf16>, vector<8x8xf32> -> vector<8x8xf32>
    %c2_201 = arith.constant 2 : index
    %c0_202 = arith.constant 0 : index
    %c0_203 = arith.constant 0 : index
    %355 = vector.load %arg15[%c2_201, %c0_202, %c0_203] : memref<4x1x8xf32, #tpu.memory_space<vmem>>, vector<1x1x8xf32>
    %356 = vector.shape_cast %355 : vector<1x1x8xf32> to vector<1x8xf32>
    %357 = vector.broadcast %356 : vector<1x8xf32> to vector<8x8xf32>
    %358 = arith.addf %354, %357 : vector<8x8xf32>
    %c2_204 = arith.constant 2 : index
    %c0_205 = arith.constant 0 : index
    %c0_206 = arith.constant 0 : index
    %359 = vector.load %arg16[%c2_204, %c0_205, %c0_206] : memref<4x32x8xf32, #tpu.memory_space<vmem>>, vector<1x32x8xf32>
    %360 = vector.shape_cast %359 : vector<1x32x8xf32> to vector<32x8xf32>
    %361 = arith.truncf %3 : vector<5x32xf32> to vector<5x32xbf16>
    %362 = arith.truncf %360 : vector<32x8xf32> to vector<32x8xbf16>
    %cst_207 = arith.constant dense<0.000000e+00> : vector<5x8xf32>
    %363 = tpu.matmul %361, %362, %cst_207 {dimension_numbers = #tpu.dot_dimension_numbers<[1], [0], [0], [1], [0, 0, 1, 1], [], []>} : vector<5x32xbf16>, vector<32x8xbf16>, vector<5x8xf32> -> vector<5x8xf32>
    %c2_208 = arith.constant 2 : index
    %c0_209 = arith.constant 0 : index
    %c0_210 = arith.constant 0 : index
    %364 = vector.load %arg17[%c2_208, %c0_209, %c0_210] : memref<4x1x8xf32, #tpu.memory_space<vmem>>, vector<1x1x8xf32>
    %365 = vector.shape_cast %364 : vector<1x1x8xf32> to vector<1x8xf32>
    %366 = vector.broadcast %365 : vector<1x8xf32> to vector<5x8xf32>
    %367 = arith.addf %363, %366 : vector<5x8xf32>
    %c2_211 = arith.constant 2 : index
    %c0_212 = arith.constant 0 : index
    %c0_213 = arith.constant 0 : index
    %368 = vector.load %arg18[%c2_211, %c0_212, %c0_213] : memref<4x32x8xf32, #tpu.memory_space<vmem>>, vector<1x32x8xf32>
    %369 = vector.shape_cast %368 : vector<1x32x8xf32> to vector<32x8xf32>
    %370 = arith.truncf %3 : vector<5x32xf32> to vector<5x32xbf16>
    %371 = arith.truncf %369 : vector<32x8xf32> to vector<32x8xbf16>
    %cst_214 = arith.constant dense<0.000000e+00> : vector<5x8xf32>
    %372 = tpu.matmul %370, %371, %cst_214 {dimension_numbers = #tpu.dot_dimension_numbers<[1], [0], [0], [1], [0, 0, 1, 1], [], []>} : vector<5x32xbf16>, vector<32x8xbf16>, vector<5x8xf32> -> vector<5x8xf32>
    %c2_215 = arith.constant 2 : index
    %c0_216 = arith.constant 0 : index
    %c0_217 = arith.constant 0 : index
    %373 = vector.load %arg19[%c2_215, %c0_216, %c0_217] : memref<4x1x8xf32, #tpu.memory_space<vmem>>, vector<1x1x8xf32>
    %374 = vector.shape_cast %373 : vector<1x1x8xf32> to vector<1x8xf32>
    %375 = vector.broadcast %374 : vector<1x8xf32> to vector<5x8xf32>
    %376 = arith.addf %372, %375 : vector<5x8xf32>
    %377 = arith.truncf %358 : vector<8x8xf32> to vector<8x8xbf16>
    %378 = arith.truncf %367 : vector<5x8xf32> to vector<5x8xbf16>
    %cst_218 = arith.constant dense<0.000000e+00> : vector<8x5xf32>
    %379 = tpu.matmul %377, %378, %cst_218 {dimension_numbers = #tpu.dot_dimension_numbers<[1], [1], [0], [0], [0, 0, 1, 0], [], []>} : vector<8x8xbf16>, vector<5x8xbf16>, vector<8x5xf32> -> vector<8x5xf32>
    %cst_219 = arith.constant 0.353553385 : f32
    %380 = vector.broadcast %cst_219 : f32 to vector<8x5xf32>
    %381 = arith.mulf %379, %380 : vector<8x5xf32>
    %cst_220 = arith.constant dense<0xFF800000> : vector<8xf32>
    %382 = vector.multi_reduction <maximumf>, %381, %cst_220 [1] : vector<8x5xf32> to vector<8xf32>
    %383 = vector.shape_cast %382 : vector<8xf32> to vector<8x1xf32>
    %384 = vector.broadcast %383 : vector<8x1xf32> to vector<8x5xf32>
    %385 = arith.subf %381, %384 : vector<8x5xf32>
    %386 = math.exp %385 : vector<8x5xf32>
    %cst_221 = arith.constant dense<0.000000e+00> : vector<8xf32>
    %387 = vector.multi_reduction <add>, %386, %cst_221 [1] : vector<8x5xf32> to vector<8xf32>
    %388 = vector.shape_cast %387 : vector<8xf32> to vector<8x1xf32>
    %389 = tpu.reciprocal %388 {approx = true} : vector<8x1xf32> -> vector<8x1xf32>
    %390 = vector.broadcast %389 : vector<8x1xf32> to vector<8x5xf32>
    %391 = arith.mulf %386, %390 : vector<8x5xf32>
    %392 = arith.truncf %391 : vector<8x5xf32> to vector<8x5xbf16>
    %393 = arith.truncf %376 : vector<5x8xf32> to vector<5x8xbf16>
    %cst_222 = arith.constant dense<0.000000e+00> : vector<8x8xf32>
    %394 = tpu.matmul %392, %393, %cst_222 {dimension_numbers = #tpu.dot_dimension_numbers<[1], [0], [0], [1], [0, 0, 1, 1], [], []>} : vector<8x5xbf16>, vector<5x8xbf16>, vector<8x8xf32> -> vector<8x8xf32>
    %c2_223 = arith.constant 2 : index
    %c0_224 = arith.constant 0 : index
    %c0_225 = arith.constant 0 : index
    %395 = vector.load %arg20[%c2_223, %c0_224, %c0_225] : memref<4x8x32xf32, #tpu.memory_space<vmem>>, vector<1x8x32xf32>
    %396 = vector.shape_cast %395 : vector<1x8x32xf32> to vector<8x32xf32>
    %397 = arith.truncf %394 : vector<8x8xf32> to vector<8x8xbf16>
    %398 = arith.truncf %396 : vector<8x32xf32> to vector<8x32xbf16>
    %cst_226 = arith.constant dense<0.000000e+00> : vector<8x32xf32>
    %399 = tpu.matmul %397, %398, %cst_226 {dimension_numbers = #tpu.dot_dimension_numbers<[1], [0], [0], [1], [0, 0, 1, 1], [], []>} : vector<8x8xbf16>, vector<8x32xbf16>, vector<8x32xf32> -> vector<8x32xf32>
    %400 = arith.addf %349, %399 : vector<8x32xf32>
    %c3_227 = arith.constant 3 : index
    %c0_228 = arith.constant 0 : index
    %c0_229 = arith.constant 0 : index
    %401 = vector.load %arg14[%c3_227, %c0_228, %c0_229] : memref<4x32x8xf32, #tpu.memory_space<vmem>>, vector<1x32x8xf32>
    %402 = vector.shape_cast %401 : vector<1x32x8xf32> to vector<32x8xf32>
    %403 = arith.truncf %248 : vector<8x32xf32> to vector<8x32xbf16>
    %404 = arith.truncf %402 : vector<32x8xf32> to vector<32x8xbf16>
    %cst_230 = arith.constant dense<0.000000e+00> : vector<8x8xf32>
    %405 = tpu.matmul %403, %404, %cst_230 {dimension_numbers = #tpu.dot_dimension_numbers<[1], [0], [0], [1], [0, 0, 1, 1], [], []>} : vector<8x32xbf16>, vector<32x8xbf16>, vector<8x8xf32> -> vector<8x8xf32>
    %c3_231 = arith.constant 3 : index
    %c0_232 = arith.constant 0 : index
    %c0_233 = arith.constant 0 : index
    %406 = vector.load %arg15[%c3_231, %c0_232, %c0_233] : memref<4x1x8xf32, #tpu.memory_space<vmem>>, vector<1x1x8xf32>
    %407 = vector.shape_cast %406 : vector<1x1x8xf32> to vector<1x8xf32>
    %408 = vector.broadcast %407 : vector<1x8xf32> to vector<8x8xf32>
    %409 = arith.addf %405, %408 : vector<8x8xf32>
    %c3_234 = arith.constant 3 : index
    %c0_235 = arith.constant 0 : index
    %c0_236 = arith.constant 0 : index
    %410 = vector.load %arg16[%c3_234, %c0_235, %c0_236] : memref<4x32x8xf32, #tpu.memory_space<vmem>>, vector<1x32x8xf32>
    %411 = vector.shape_cast %410 : vector<1x32x8xf32> to vector<32x8xf32>
    %412 = arith.truncf %3 : vector<5x32xf32> to vector<5x32xbf16>
    %413 = arith.truncf %411 : vector<32x8xf32> to vector<32x8xbf16>
    %cst_237 = arith.constant dense<0.000000e+00> : vector<5x8xf32>
    %414 = tpu.matmul %412, %413, %cst_237 {dimension_numbers = #tpu.dot_dimension_numbers<[1], [0], [0], [1], [0, 0, 1, 1], [], []>} : vector<5x32xbf16>, vector<32x8xbf16>, vector<5x8xf32> -> vector<5x8xf32>
    %c3_238 = arith.constant 3 : index
    %c0_239 = arith.constant 0 : index
    %c0_240 = arith.constant 0 : index
    %415 = vector.load %arg17[%c3_238, %c0_239, %c0_240] : memref<4x1x8xf32, #tpu.memory_space<vmem>>, vector<1x1x8xf32>
    %416 = vector.shape_cast %415 : vector<1x1x8xf32> to vector<1x8xf32>
    %417 = vector.broadcast %416 : vector<1x8xf32> to vector<5x8xf32>
    %418 = arith.addf %414, %417 : vector<5x8xf32>
    %c3_241 = arith.constant 3 : index
    %c0_242 = arith.constant 0 : index
    %c0_243 = arith.constant 0 : index
    %419 = vector.load %arg18[%c3_241, %c0_242, %c0_243] : memref<4x32x8xf32, #tpu.memory_space<vmem>>, vector<1x32x8xf32>
    %420 = vector.shape_cast %419 : vector<1x32x8xf32> to vector<32x8xf32>
    %421 = arith.truncf %3 : vector<5x32xf32> to vector<5x32xbf16>
    %422 = arith.truncf %420 : vector<32x8xf32> to vector<32x8xbf16>
    %cst_244 = arith.constant dense<0.000000e+00> : vector<5x8xf32>
    %423 = tpu.matmul %421, %422, %cst_244 {dimension_numbers = #tpu.dot_dimension_numbers<[1], [0], [0], [1], [0, 0, 1, 1], [], []>} : vector<5x32xbf16>, vector<32x8xbf16>, vector<5x8xf32> -> vector<5x8xf32>
    %c3_245 = arith.constant 3 : index
    %c0_246 = arith.constant 0 : index
    %c0_247 = arith.constant 0 : index
    %424 = vector.load %arg19[%c3_245, %c0_246, %c0_247] : memref<4x1x8xf32, #tpu.memory_space<vmem>>, vector<1x1x8xf32>
    %425 = vector.shape_cast %424 : vector<1x1x8xf32> to vector<1x8xf32>
    %426 = vector.broadcast %425 : vector<1x8xf32> to vector<5x8xf32>
    %427 = arith.addf %423, %426 : vector<5x8xf32>
    %428 = arith.truncf %409 : vector<8x8xf32> to vector<8x8xbf16>
    %429 = arith.truncf %418 : vector<5x8xf32> to vector<5x8xbf16>
    %cst_248 = arith.constant dense<0.000000e+00> : vector<8x5xf32>
    %430 = tpu.matmul %428, %429, %cst_248 {dimension_numbers = #tpu.dot_dimension_numbers<[1], [1], [0], [0], [0, 0, 1, 0], [], []>} : vector<8x8xbf16>, vector<5x8xbf16>, vector<8x5xf32> -> vector<8x5xf32>
    %cst_249 = arith.constant 0.353553385 : f32
    %431 = vector.broadcast %cst_249 : f32 to vector<8x5xf32>
    %432 = arith.mulf %430, %431 : vector<8x5xf32>
    %cst_250 = arith.constant dense<0xFF800000> : vector<8xf32>
    %433 = vector.multi_reduction <maximumf>, %432, %cst_250 [1] : vector<8x5xf32> to vector<8xf32>
    %434 = vector.shape_cast %433 : vector<8xf32> to vector<8x1xf32>
    %435 = vector.broadcast %434 : vector<8x1xf32> to vector<8x5xf32>
    %436 = arith.subf %432, %435 : vector<8x5xf32>
    %437 = math.exp %436 : vector<8x5xf32>
    %cst_251 = arith.constant dense<0.000000e+00> : vector<8xf32>
    %438 = vector.multi_reduction <add>, %437, %cst_251 [1] : vector<8x5xf32> to vector<8xf32>
    %439 = vector.shape_cast %438 : vector<8xf32> to vector<8x1xf32>
    %440 = tpu.reciprocal %439 {approx = true} : vector<8x1xf32> -> vector<8x1xf32>
    %441 = vector.broadcast %440 : vector<8x1xf32> to vector<8x5xf32>
    %442 = arith.mulf %437, %441 : vector<8x5xf32>
    %443 = arith.truncf %442 : vector<8x5xf32> to vector<8x5xbf16>
    %444 = arith.truncf %427 : vector<5x8xf32> to vector<5x8xbf16>
    %cst_252 = arith.constant dense<0.000000e+00> : vector<8x8xf32>
    %445 = tpu.matmul %443, %444, %cst_252 {dimension_numbers = #tpu.dot_dimension_numbers<[1], [0], [0], [1], [0, 0, 1, 1], [], []>} : vector<8x5xbf16>, vector<5x8xbf16>, vector<8x8xf32> -> vector<8x8xf32>
    %c3_253 = arith.constant 3 : index
    %c0_254 = arith.constant 0 : index
    %c0_255 = arith.constant 0 : index
    %446 = vector.load %arg20[%c3_253, %c0_254, %c0_255] : memref<4x8x32xf32, #tpu.memory_space<vmem>>, vector<1x8x32xf32>
    %447 = vector.shape_cast %446 : vector<1x8x32xf32> to vector<8x32xf32>
    %448 = arith.truncf %445 : vector<8x8xf32> to vector<8x8xbf16>
    %449 = arith.truncf %447 : vector<8x32xf32> to vector<8x32xbf16>
    %cst_256 = arith.constant dense<0.000000e+00> : vector<8x32xf32>
    %450 = tpu.matmul %448, %449, %cst_256 {dimension_numbers = #tpu.dot_dimension_numbers<[1], [0], [0], [1], [0, 0, 1, 1], [], []>} : vector<8x8xbf16>, vector<8x32xbf16>, vector<8x32xf32> -> vector<8x32xf32>
    %451 = arith.addf %400, %450 : vector<8x32xf32>
    %c0_257 = arith.constant 0 : index
    %c0_258 = arith.constant 0 : index
    %452 = vector.load %arg21[%c0_257, %c0_258] : memref<1x32xf32, #tpu.memory_space<vmem>>, vector<1x32xf32>
    %453 = vector.broadcast %452 : vector<1x32xf32> to vector<8x32xf32>
    %454 = arith.addf %451, %453 : vector<8x32xf32>
    %455 = arith.addf %454, %248 : vector<8x32xf32>
    %c0_259 = arith.constant 0 : index
    %c0_260 = arith.constant 0 : index
    %456 = vector.load %arg22[%c0_259, %c0_260] : memref<1x32xf32, #tpu.memory_space<vmem>>, vector<1x32xf32>
    %c0_261 = arith.constant 0 : index
    %c0_262 = arith.constant 0 : index
    %457 = vector.load %arg23[%c0_261, %c0_262] : memref<1x32xf32, #tpu.memory_space<vmem>>, vector<1x32xf32>
    %cst_263 = arith.constant dense<0.000000e+00> : vector<8xf32>
    %458 = vector.multi_reduction <add>, %455, %cst_263 [1] : vector<8x32xf32> to vector<8xf32>
    %459 = vector.shape_cast %458 : vector<8xf32> to vector<8x1xf32>
    %cst_264 = arith.constant 3.200000e+01 : f32
    %460 = vector.broadcast %cst_264 : f32 to vector<8x1xf32>
    %461 = arith.divf %459, %460 : vector<8x1xf32>
    %462 = vector.broadcast %461 : vector<8x1xf32> to vector<8x32xf32>
    %463 = arith.subf %455, %462 : vector<8x32xf32>
    %464 = arith.mulf %463, %463 : vector<8x32xf32>
    %cst_265 = arith.constant dense<0.000000e+00> : vector<8xf32>
    %465 = vector.multi_reduction <add>, %464, %cst_265 [1] : vector<8x32xf32> to vector<8xf32>
    %466 = vector.shape_cast %465 : vector<8xf32> to vector<8x1xf32>
    %cst_266 = arith.constant 3.200000e+01 : f32
    %467 = vector.broadcast %cst_266 : f32 to vector<8x1xf32>
    %468 = arith.divf %466, %467 : vector<8x1xf32>
    %469 = vector.broadcast %461 : vector<8x1xf32> to vector<8x32xf32>
    %470 = arith.subf %455, %469 : vector<8x32xf32>
    %cst_267 = arith.constant 9.99999996E-13 : f32
    %471 = vector.broadcast %cst_267 : f32 to vector<8x1xf32>
    %472 = arith.addf %468, %471 : vector<8x1xf32>
    %473 = math.rsqrt %472 : vector<8x1xf32>
    %474 = vector.broadcast %473 : vector<8x1xf32> to vector<8x32xf32>
    %475 = arith.mulf %470, %474 : vector<8x32xf32>
    %476 = vector.broadcast %456 : vector<1x32xf32> to vector<8x32xf32>
    %477 = arith.mulf %475, %476 : vector<8x32xf32>
    %478 = vector.broadcast %457 : vector<1x32xf32> to vector<8x32xf32>
    %479 = arith.addf %477, %478 : vector<8x32xf32>
    %c0_268 = arith.constant 0 : index
    %c0_269 = arith.constant 0 : index
    %480 = vector.load %arg24[%c0_268, %c0_269] : memref<32x128xf32, #tpu.memory_space<vmem>>, vector<32x128xf32>
    %481 = arith.truncf %479 : vector<8x32xf32> to vector<8x32xbf16>
    %482 = arith.truncf %480 : vector<32x128xf32> to vector<32x128xbf16>
    %cst_270 = arith.constant dense<0.000000e+00> : vector<8x128xf32>
    %483 = tpu.matmul %481, %482, %cst_270 {dimension_numbers = #tpu.dot_dimension_numbers<[1], [0], [0], [1], [0, 0, 1, 1], [], []>} : vector<8x32xbf16>, vector<32x128xbf16>, vector<8x128xf32> -> vector<8x128xf32>
    %c0_271 = arith.constant 0 : index
    %c0_272 = arith.constant 0 : index
    %484 = vector.load %arg25[%c0_271, %c0_272] : memref<1x128xf32, #tpu.memory_space<vmem>>, vector<1x128xf32>
    %485 = vector.broadcast %484 : vector<1x128xf32> to vector<8x128xf32>
    %486 = arith.addf %483, %485 : vector<8x128xf32>
    %487 = arith.mulf %486, %486 : vector<8x128xf32>
    %488 = arith.mulf %486, %487 : vector<8x128xf32>
    %cst_273 = arith.constant 4.471500e-02 : f32
    %489 = vector.broadcast %cst_273 : f32 to vector<8x128xf32>
    %490 = arith.mulf %489, %488 : vector<8x128xf32>
    %491 = arith.addf %486, %490 : vector<8x128xf32>
    %cst_274 = arith.constant 0.797884583 : f32
    %492 = vector.broadcast %cst_274 : f32 to vector<8x128xf32>
    %493 = arith.mulf %492, %491 : vector<8x128xf32>
    %494 = math.tanh %493 : vector<8x128xf32>
    %cst_275 = arith.constant 1.000000e+00 : f32
    %495 = vector.broadcast %cst_275 : f32 to vector<8x128xf32>
    %496 = arith.addf %495, %494 : vector<8x128xf32>
    %cst_276 = arith.constant 5.000000e-01 : f32
    %497 = vector.broadcast %cst_276 : f32 to vector<8x128xf32>
    %498 = arith.mulf %497, %496 : vector<8x128xf32>
    %499 = arith.mulf %486, %498 : vector<8x128xf32>
    %c0_277 = arith.constant 0 : index
    %c0_278 = arith.constant 0 : index
    %500 = vector.load %arg26[%c0_277, %c0_278] : memref<128x32xf32, #tpu.memory_space<vmem>>, vector<128x32xf32>
    %501 = arith.truncf %499 : vector<8x128xf32> to vector<8x128xbf16>
    %502 = arith.truncf %500 : vector<128x32xf32> to vector<128x32xbf16>
    %cst_279 = arith.constant dense<0.000000e+00> : vector<8x32xf32>
    %503 = tpu.matmul %501, %502, %cst_279 {dimension_numbers = #tpu.dot_dimension_numbers<[1], [0], [0], [1], [0, 0, 1, 1], [], []>} : vector<8x128xbf16>, vector<128x32xbf16>, vector<8x32xf32> -> vector<8x32xf32>
    %c0_280 = arith.constant 0 : index
    %c0_281 = arith.constant 0 : index
    %504 = vector.load %arg27[%c0_280, %c0_281] : memref<1x32xf32, #tpu.memory_space<vmem>>, vector<1x32xf32>
    %505 = vector.broadcast %504 : vector<1x32xf32> to vector<8x32xf32>
    %506 = arith.addf %503, %505 : vector<8x32xf32>
    %507 = arith.addf %506, %479 : vector<8x32xf32>
    %c0_282 = arith.constant 0 : index
    %c0_283 = arith.constant 0 : index
    %508 = vector.load %arg28[%c0_282, %c0_283] : memref<1x32xf32, #tpu.memory_space<vmem>>, vector<1x32xf32>
    %c0_284 = arith.constant 0 : index
    %c0_285 = arith.constant 0 : index
    %509 = vector.load %arg29[%c0_284, %c0_285] : memref<1x32xf32, #tpu.memory_space<vmem>>, vector<1x32xf32>
    %cst_286 = arith.constant dense<0.000000e+00> : vector<8xf32>
    %510 = vector.multi_reduction <add>, %507, %cst_286 [1] : vector<8x32xf32> to vector<8xf32>
    %511 = vector.shape_cast %510 : vector<8xf32> to vector<8x1xf32>
    %cst_287 = arith.constant 3.200000e+01 : f32
    %512 = vector.broadcast %cst_287 : f32 to vector<8x1xf32>
    %513 = arith.divf %511, %512 : vector<8x1xf32>
    %514 = vector.broadcast %513 : vector<8x1xf32> to vector<8x32xf32>
    %515 = arith.subf %507, %514 : vector<8x32xf32>
    %516 = arith.mulf %515, %515 : vector<8x32xf32>
    %cst_288 = arith.constant dense<0.000000e+00> : vector<8xf32>
    %517 = vector.multi_reduction <add>, %516, %cst_288 [1] : vector<8x32xf32> to vector<8xf32>
    %518 = vector.shape_cast %517 : vector<8xf32> to vector<8x1xf32>
    %cst_289 = arith.constant 3.200000e+01 : f32
    %519 = vector.broadcast %cst_289 : f32 to vector<8x1xf32>
    %520 = arith.divf %518, %519 : vector<8x1xf32>
    %521 = vector.broadcast %513 : vector<8x1xf32> to vector<8x32xf32>
    %522 = arith.subf %507, %521 : vector<8x32xf32>
    %cst_290 = arith.constant 9.99999996E-13 : f32
    %523 = vector.broadcast %cst_290 : f32 to vector<8x1xf32>
    %524 = arith.addf %520, %523 : vector<8x1xf32>
    %525 = math.rsqrt %524 : vector<8x1xf32>
    %526 = vector.broadcast %525 : vector<8x1xf32> to vector<8x32xf32>
    %527 = arith.mulf %522, %526 : vector<8x32xf32>
    %528 = vector.broadcast %508 : vector<1x32xf32> to vector<8x32xf32>
    %529 = arith.mulf %527, %528 : vector<8x32xf32>
    %530 = vector.broadcast %509 : vector<1x32xf32> to vector<8x32xf32>
    %531 = arith.addf %529, %530 : vector<8x32xf32>
    %c0_291 = arith.constant 0 : index
    %c0_292 = arith.constant 0 : index
    %c0_293 = arith.constant 0 : index
    %532 = vector.load %arg30[%c0_291, %c0_292, %c0_293] : memref<1x8x32xf32, #tpu.memory_space<vmem>>, vector<1x8x32xf32>
    %533 = vector.shape_cast %532 : vector<1x8x32xf32> to vector<8x32xf32>
    %534 = vector.shape_cast %531 : vector<8x32xf32> to vector<1x8x32xf32>
    tpu.vector_store %arg30[%c0_291, %c0_292, %c0_293], %534 {strides = array<i32>} : memref<1x8x32xf32, #tpu.memory_space<vmem>>, vector<1x8x32xf32>,
    return
  }
  func.func @transform_0(%arg0: i32) -> (i32, i32, i32) {
    %c0_i32 = arith.constant 0 : i32
    %c0_i32_0 = arith.constant 0 : i32
    %c0_i32_1 = arith.constant 0 : i32
    return %arg0, %c0_i32, %c0_i32_0 : i32, i32, i32
  }
  func.func @transform_1(%arg0: i32) -> (i32, i32, i32) {
    %c0_i32 = arith.constant 0 : i32
    %c0_i32_0 = arith.constant 0 : i32
    %c0_i32_1 = arith.constant 0 : i32
    return %arg0, %c0_i32, %c0_i32_0 : i32, i32, i32
  }
  func.func @transform_2(%arg0: i32) -> (i32, i32, i32) {
    %c0_i32 = arith.constant 0 : i32
    %c0_i32_0 = arith.constant 0 : i32
    %c0_i32_1 = arith.constant 0 : i32
    return %arg0, %c0_i32, %c0_i32_0 : i32, i32, i32
  }
  func.func @transform_3(%arg0: i32) -> (i32, i32, i32) {
    %c0_i32 = arith.constant 0 : i32
    %c0_i32_0 = arith.constant 0 : i32
    %c0_i32_1 = arith.constant 0 : i32
    %c0_i32_2 = arith.constant 0 : i32
    return %c0_i32, %c0_i32_0, %c0_i32_1 : i32, i32, i32
  }
  func.func @transform_4(%arg0: i32) -> (i32, i32, i32) {
    %c0_i32 = arith.constant 0 : i32
    %c0_i32_0 = arith.constant 0 : i32
    %c0_i32_1 = arith.constant 0 : i32
    %c0_i32_2 = arith.constant 0 : i32
    return %c0_i32, %c0_i32_0, %c0_i32_1 : i32, i32, i32
  }
  func.func @transform_5(%arg0: i32) -> (i32, i32, i32) {
    %c0_i32 = arith.constant 0 : i32
    %c0_i32_0 = arith.constant 0 : i32
    %c0_i32_1 = arith.constant 0 : i32
    %c0_i32_2 = arith.constant 0 : i32
    return %c0_i32, %c0_i32_0, %c0_i32_1 : i32, i32, i32
  }
  func.func @transform_6(%arg0: i32) -> (i32, i32, i32) {
    %c0_i32 = arith.constant 0 : i32
    %c0_i32_0 = arith.constant 0 : i32
    %c0_i32_1 = arith.constant 0 : i32
    %c0_i32_2 = arith.constant 0 : i32
    return %c0_i32, %c0_i32_0, %c0_i32_1 : i32, i32, i32
  }
  func.func @transform_7(%arg0: i32) -> (i32, i32, i32) {
    %c0_i32 = arith.constant 0 : i32
    %c0_i32_0 = arith.constant 0 : i32
    %c0_i32_1 = arith.constant 0 : i32
    %c0_i32_2 = arith.constant 0 : i32
    return %c0_i32, %c0_i32_0, %c0_i32_1 : i32, i32, i32
  }
  func.func @transform_8(%arg0: i32) -> (i32, i32, i32) {
    %c0_i32 = arith.constant 0 : i32
    %c0_i32_0 = arith.constant 0 : i32
    %c0_i32_1 = arith.constant 0 : i32
    %c0_i32_2 = arith.constant 0 : i32
    return %c0_i32, %c0_i32_0, %c0_i32_1 : i32, i32, i32
  }
  func.func @transform_9(%arg0: i32) -> (i32, i32, i32) {
    %c0_i32 = arith.constant 0 : i32
    %c0_i32_0 = arith.constant 0 : i32
    %c0_i32_1 = arith.constant 0 : i32
    %c0_i32_2 = arith.constant 0 : i32
    return %c0_i32, %c0_i32_0, %c0_i32_1 : i32, i32, i32
  }
  func.func @transform_10(%arg0: i32) -> (i32, i32) {
    %c0_i32 = arith.constant 0 : i32
    %c0_i32_0 = arith.constant 0 : i32
    %c0_i32_1 = arith.constant 0 : i32
    return %c0_i32, %c0_i32_0 : i32, i32
  }
  func.func @transform_11(%arg0: i32) -> (i32, i32) {
    %c0_i32 = arith.constant 0 : i32
    %c0_i32_0 = arith.constant 0 : i32
    %c0_i32_1 = arith.constant 0 : i32
    return %c0_i32, %c0_i32_0 : i32, i32
  }
  func.func @transform_12(%arg0: i32) -> (i32, i32) {
    %c0_i32 = arith.constant 0 : i32
    %c0_i32_0 = arith.constant 0 : i32
    %c0_i32_1 = arith.constant 0 : i32
    return %c0_i32, %c0_i32_0 : i32, i32
  }
  func.func @transform_13(%arg0: i32) -> (i32, i32, i32) {
    %c0_i32 = arith.constant 0 : i32
    %c0_i32_0 = arith.constant 0 : i32
    %c0_i32_1 = arith.constant 0 : i32
    %c0_i32_2 = arith.constant 0 : i32
    return %c0_i32, %c0_i32_0, %c0_i32_1 : i32, i32, i32
  }
  func.func @transform_14(%arg0: i32) -> (i32, i32, i32) {
    %c0_i32 = arith.constant 0 : i32
    %c0_i32_0 = arith.constant 0 : i32
    %c0_i32_1 = arith.constant 0 : i32
    %c0_i32_2 = arith.constant 0 : i32
    return %c0_i32, %c0_i32_0, %c0_i32_1 : i32, i32, i32
  }
  func.func @transform_15(%arg0: i32) -> (i32, i32, i32) {
    %c0_i32 = arith.constant 0 : i32
    %c0_i32_0 = arith.constant 0 : i32
    %c0_i32_1 = arith.constant 0 : i32
    %c0_i32_2 = arith.constant 0 : i32
    return %c0_i32, %c0_i32_0, %c0_i32_1 : i32, i32, i32
  }
  func.func @transform_16(%arg0: i32) -> (i32, i32, i32) {
    %c0_i32 = arith.constant 0 : i32
    %c0_i32_0 = arith.constant 0 : i32
    %c0_i32_1 = arith.constant 0 : i32
    %c0_i32_2 = arith.constant 0 : i32
    return %c0_i32, %c0_i32_0, %c0_i32_1 : i32, i32, i32
  }
  func.func @transform_17(%arg0: i32) -> (i32, i32, i32) {
    %c0_i32 = arith.constant 0 : i32
    %c0_i32_0 = arith.constant 0 : i32
    %c0_i32_1 = arith.constant 0 : i32
    %c0_i32_2 = arith.constant 0 : i32
    return %c0_i32, %c0_i32_0, %c0_i32_1 : i32, i32, i32
  }
  func.func @transform_18(%arg0: i32) -> (i32, i32, i32) {
    %c0_i32 = arith.constant 0 : i32
    %c0_i32_0 = arith.constant 0 : i32
    %c0_i32_1 = arith.constant 0 : i32
    %c0_i32_2 = arith.constant 0 : i32
    return %c0_i32, %c0_i32_0, %c0_i32_1 : i32, i32, i32
  }
  func.func @transform_19(%arg0: i32) -> (i32, i32, i32) {
    %c0_i32 = arith.constant 0 : i32
    %c0_i32_0 = arith.constant 0 : i32
    %c0_i32_1 = arith.constant 0 : i32
    %c0_i32_2 = arith.constant 0 : i32
    return %c0_i32, %c0_i32_0, %c0_i32_1 : i32, i32, i32
  }
  func.func @transform_20(%arg0: i32) -> (i32, i32) {
    %c0_i32 = arith.constant 0 : i32
    %c0_i32_0 = arith.constant 0 : i32
    %c0_i32_1 = arith.constant 0 : i32
    return %c0_i32, %c0_i32_0 : i32, i32
  }
  func.func @transform_21(%arg0: i32) -> (i32, i32) {
    %c0_i32 = arith.constant 0 : i32
    %c0_i32_0 = arith.constant 0 : i32
    %c0_i32_1 = arith.constant 0 : i32
    return %c0_i32, %c0_i32_0 : i32, i32
  }
  func.func @transform_22(%arg0: i32) -> (i32, i32) {
    %c0_i32 = arith.constant 0 : i32
    %c0_i32_0 = arith.constant 0 : i32
    %c0_i32_1 = arith.constant 0 : i32
    return %c0_i32, %c0_i32_0 : i32, i32
  }
  func.func @transform_23(%arg0: i32) -> (i32, i32) {
    %c0_i32 = arith.constant 0 : i32
    %c0_i32_0 = arith.constant 0 : i32
    %c0_i32_1 = arith.constant 0 : i32
    return %c0_i32, %c0_i32_0 : i32, i32
  }
  func.func @transform_24(%arg0: i32) -> (i32, i32) {
    %c0_i32 = arith.constant 0 : i32
    %c0_i32_0 = arith.constant 0 : i32
    %c0_i32_1 = arith.constant 0 : i32
    return %c0_i32, %c0_i32_0 : i32, i32
  }
  func.func @transform_25(%arg0: i32) -> (i32, i32) {
    %c0_i32 = arith.constant 0 : i32
    %c0_i32_0 = arith.constant 0 : i32
    %c0_i32_1 = arith.constant 0 : i32
    return %c0_i32, %c0_i32_0 : i32, i32
  }
  func.func @transform_26(%arg0: i32) -> (i32, i32) {
    %c0_i32 = arith.constant 0 : i32
    %c0_i32_0 = arith.constant 0 : i32
    %c0_i32_1 = arith.constant 0 : i32
    return %c0_i32, %c0_i32_0 : i32, i32
  }
  func.func @transform_27(%arg0: i32) -> (i32, i32) {
    %c0_i32 = arith.constant 0 : i32
    %c0_i32_0 = arith.constant 0 : i32
    %c0_i32_1 = arith.constant 0 : i32
    return %c0_i32, %c0_i32_0 : i32, i32
  }
  func.func @transform_28(%arg0: i32) -> (i32, i32) {
    %c0_i32 = arith.constant 0 : i32
    %c0_i32_0 = arith.constant 0 : i32
    %c0_i32_1 = arith.constant 0 : i32
    return %c0_i32, %c0_i32_0 : i32, i32
  }
  func.func @transform_29(%arg0: i32) -> (i32, i32, i32) {
    %c0_i32 = arith.constant 0 : i32
    %c0_i32_0 = arith.constant 0 : i32
    %c0_i32_1 = arith.constant 0 : i32
    return %arg0, %c0_i32, %c0_i32_0 : i32, i32, i32
  }
}

</mosaic_0001>

<bundles_post_ra>
// kernel: vl_transformer_itm_forward.10
= control target key start
LH: loop header
LB: loop body
LE: loop exit
PB: predicated region body
PF: predicated region fallthrough
CT: control target
= control target key end

     0   :  { %s376_s18 = smov 0   ;;  %s408_s0 = inlined_call_operand.vmem [shape: f32[2,8,32], index: 0, kind: input, shape index: {}]   ;;  %s409_s1 = inlined_call_operand.vmem [shape: f32[8,32], index: 1, kind: input, shape index: {}]   ;;  %s410_s2 = inlined_call_operand.vmem [shape: f32[1,32], index: 2, kind: input, shape index: {}]   ;;  %s411_s3 = inlined_call_operand.vmem [shape: f32[1,32], index: 3, kind: input, shape index: {}]   ;;  %s412_s4 = inlined_call_operand.vmem [shape: f32[1,32], index: 4, kind: input, shape index: {}]   ;;  %s413_s5 = inlined_call_operand.vmem [shape: f32[2,8,32], index: 5, kind: output, shape index: {}]  }
   0x1 LB: > { %s316_s19 = sadd.s32 4294967295, %s344_s18   ;;  %p320_p0 = scmp.ge.s32.totalorder %s344_s18, 1  ;;  %s344_s18 = sphi %s376_s18, %s15_s18  }
   0x2   : > { %p186_p1 = scmp.lt.s32.totalorder %s344_s18, 3 }
   0x4   : > { %p187_p2 = pnand %p320_p0, %p186_p1 }
   0x5   : > { %p212_p3 = scmp.lt.s32.totalorder (!%p187_p2), %s316_s19, 1 }
   0x6   : > { %190 = sbr.rel (%p187_p2) target bundleno = 328 (0x148), region = 40 }
   0xb   : > { %s415_s19 = smov (!%p212_p3, %s316_s19), 1  ;;  %v221_v0 = vld [vmem:[%s409_s1] sm:$0xff]  ;;  %vm233_vm0 = vcmask 261120  }
   0xc   : > { %s321_s20 = sshll.u32 %s415_s19, 3  ;;  %v323_v2 = vld [vmem:[%s410_s2] ss:$0 sm:$0xff] }
   0xd   : > { %s215_s25 = scalar_lea.vmem %s408_s0, %s321_s20  ;;  %v324_v15 = vld [vmem:[%s411_s3] ss:$0 sm:$0xff]  ;;  %s219_s9 = scalar_lea.vmem %s413_s5, %s321_s20 }
   0xe   : > { %v220_v1 = vld [vmem:[%s215_s25] sm:$0xff] }
   0xf   : > { %v222_v3 = vadd.f32 %v221_v0, %v220_v1  ;;  %v325_v17 = vld [vmem:[%s412_s4] ss:$0 sm:$0xff] }
  0x11   : > { %v230_v4 = vadd.f32 %v323_v2, %v222_v3 }
  0x13   : > { %v234_v5 = vsel %vm233_vm0, %v230_v4, 0.0 }
  0x14   : > { %235 = vadd.xlane.f32.xlu0 %v234_v5 }
  0x9d   : > { %v236_v6 = vpop.xlane.xlu0 %235 }
  0x9e   : > { %v238_v7 = vmul.f32 0.03125, %v236_v6 }
  0xa0   : > { %v239_v8 = vsub.f32 %v230_v4, %v238_v7 }
  0xa2   : > { %v240_v9 = vmul.f32 %v239_v8, %v239_v8 }
  0xa4   : > { %v241_v10 = vsel %vm233_vm0, %v240_v9, 0.0 }
  0xa5   : > { %242 = vadd.xlane.f32.xlu0 %v241_v10 }
 0x12e   : > { %v243_v11 = vpop.xlane.xlu0 %242 }
 0x12f   : > { %v244_v12 = vmul.f32 0.03125, %v243_v11 }
 0x131   : > { %v245_v13 = vadd.f32 1e-12, %v244_v12 }
 0x133   : > { %336 = vrsqrt.f32 %v245_v13 }
 0x140   : > { %v337_v14 = vpop.eup %336 }
 0x141   : > { %v247_v16 = vmul.f32 %v337_v14, %v239_v8 }
 0x143   : > { %v254_v18 = vmul.f32 %v324_v15, %v247_v16 }
 0x145   : > { %v261_v19 = vadd.f32 %v325_v17, %v254_v18 }
 0x147   : > { %262 = vst.msk [vmem:[%s219_s9] sm:$0xff] %vm233_vm0, %v261_v19 }
 0x148 PF: > { %s15_s18 = sadd.s32 1, %s344_s18  }
 0x149   : > { %p12_p4 = scmp.ge.s32.totalorder %s15_s18, 4  }
 0x14b   :  { %14 = sbr.rel (!%p12_p4) target bundleno = 1 (0x1), region = 70 }

// kernel: vl_transformer_itm_forward.11
= control target key start
LH: loop header
LB: loop body
LE: loop exit
PB: predicated region body
PF: predicated region fallthrough
CT: control target
= control target key end

     0   :  { %s2670_s27 = smov 0   ;;  %s3162_s0 = inlined_call_operand.vmem [shape: f32[2,8,32], index: 0, kind: input, shape index: {}]   ;;  %s3163_s1 = inlined_call_operand.vmem [shape: f32[2,1,8], index: 1, kind: input, shape index: {}]   ;;  %s3164_s2 = inlined_call_operand.vmem [shape: f32[4,32,8], index: 2, kind: input, shape index: {}]   ;;  %s3165_s3 = inlined_call_operand.vmem [shape: f32[4,1,8], index: 3, kind: input, shape index: {}]   ;;  %s3166_s4 = inlined_call_operand.vmem [shape: f32[4,32,8], index: 4, kind: input, shape index: {}]   ;;  %s3167_s5 = inlined_call_operand.vmem [shape: f32[4,1,8], index: 5, kind: input, shape index: {}]   ;;  %s3168_s6 = inlined_call_operand.vmem [shape: f32[4,32,8], index: 6, kind: input, shape index: {}]   ;;  %s3169_s7 = inlined_call_operand.vmem [shape: f32[4,1,8], index: 7, kind: input, shape index: {}]   ;;  %s3170_s8 = inlined_call_operand.vmem [shape: f32[4,8,32], index: 8, kind: input, shape index: {}]   ;;  %s3171_s9 = inlined_call_operand.vmem [shape: f32[1,32], index: 9, kind: input, shape index: {}]   ;;  %s3172_s10 = inlined_call_operand.vmem [shape: f32[1,32], index: 10, kind: input, shape index: {}]   ;;  %s3173_s11 = inlined_call_operand.vmem [shape: f32[1,32], index: 11, kind: input, shape index: {}]   ;;  %s3174_s12 = inlined_call_operand.vmem [shape: f32[32,128], index: 12, kind: input, shape index: {}]   ;;  %s3175_s13 = inlined_call_operand.vmem [shape: f32[1,128], index: 13, kind: input, shape index: {}]   ;;  %s3176_s14 = inlined_call_operand.vmem [shape: f32[128,32], index: 14, kind: input, shape index: {}]   ;;  %s3177_s15 = inlined_call_operand.vmem [shape: f32[1,32], index: 15, kind: input, shape index: {}]   ;;  %s3178_s16 = inlined_call_operand.vmem [shape: f32[1,32], index: 16, kind: input, shape index: {}]   ;;  %s3179_s17 = inlined_call_operand.vmem [shape: f32[1,32], index: 17, kind: input, shape index: {}]   ;;  %s3180_s18 = inlined_call_operand.vmem [shape: f32[2,8,32], index: 18, kind: output, shape index: {}]  }
   0x1   :  { %3182 = sst [smem:[#allocation2_spill]] %s3162_s0 }
   0x2   :  { %3183 = sst [smem:[#allocation3_spill]] %s3163_s1 }
   0x3   :  { %3184 = sst [smem:[#allocation4_spill]] %s3164_s2 }
   0x4 LB: > { %s2164_s28 = sadd.s32 4294967295, %s2571_s27   ;;  %p2168_p0 = scmp.ge.s32.totalorder %s2571_s27, 1  ;;  %s2571_s27 = sphi %s2670_s27, %s28_s27  }
   0x5   : > { %p519_p1 = scmp.lt.s32.totalorder %s2571_s27, 3 }
   0x7   : > { %p520_p2 = pnand %p2168_p0, %p519_p1 }
   0x8   : > { %s3185_s0 = sld [smem:[#allocation4_spill]] (!%p520_p2)  ;;  %p574_p3 = scmp.lt.s32.totalorder (!%p520_p2), %s2164_s28, 1 }
   0x9   : > { %523 = sbr.rel (%p520_p2) target bundleno = 4739 (0x1283), region = 92  ;;  %s3186_s1 = sld [smem:[#allocation2_spill]] (!%p520_p2) }
   0xa   : > { %s3187_s30 = sld [smem:[#allocation3_spill]] (!%p520_p2) }
   0xe   : > { %v592_v0 = vld [vmem:[%s3185_s0 + $0x10] sm:$0xff]  ;;  %v593_v1 = vld [vmem:[%s3185_s0 + $0x18] sm:$0xff]  ;;  %v590_v2 = vld [vmem:[%s3185_s0] sm:$0xff]  ;;  %v2573_v3 = vmov 0.0   ;;  %vm2574_vm0 = vmmov 0   ;;  %s3189_s28 = smov (!%p574_p3, %s2164_s28), 1  ;;  %v805_v36 = vlaneseq }
   0xf   : > { %2337 = vmatprep.subr.bf16.mxu0 %v2573_v3  ;;  %v596_v4 = vpack.c.bf16 %v593_v1, %v592_v0  ;;  %v591_v5 = vld [vmem:[%s3185_s0 + $0x8] sm:$0xff]  ;;  %2341 = vmatprep.mubr.msk.bf16.mxu0 %vm2574_vm0, %v2573_v3  ;;  %s2169_s23 = sshll.u32 %s3189_s28, 3  ;;  %v650_v7 = vld [vmem:[%s3166_s4 + $0x10] sm:$0xff]  ;;  %v651_v8 = vld [vmem:[%s3166_s4 + $0x18] sm:$0xff]  ;;  %vm604_vm1 = vcmask 261120   ;;  %vm756_vm2 = vcmask 64512  }
  0x10   : > { %2361 = vmatprep.subr.bf16.mxu1 %v2573_v3  ;;  %2363 = vmatprep.mubr.msk.bf16.mxu1 %vm2574_vm0, %v2573_v3  ;;  %v595_v6 = vpack.c.bf16 %v591_v5, %v590_v2  ;;  %s577_s20 = scalar_lea.vmem %s3186_s1, %s2169_s23  ;;  %v653_v11 = vpack.c.bf16 %v651_v8, %v650_v7  ;;  %v648_v12 = vld [vmem:[%s3166_s4] sm:$0xff]  ;;  %v649_v13 = vld [vmem:[%s3166_s4 + $0x8] sm:$0xff]  ;;  %v703_v30 = vld [vmem:[%s3168_s6 + $0x10] sm:$0xff]  ;;  %s580_s19 = scalar_lea.vmem %s3187_s30, %s3189_s28  ;;  %v806_v39 = vshrl.u32 %v805_v36, 7  ;;  %vm827_vm3 = vcmask 1043456  }
  0x11   : > { %2338 = vmatpush3.bf16.msra.mxu0 %v596_v4  ;;  %v2711_v9 = vld [vmem:[%s577_s20] sm:$0xff]  ;;  %v652_v14 = vpack.c.bf16 %v649_v13, %v648_v12  ;;  %v704_v31 = vld [vmem:[%s3168_s6 + $0x18] sm:$0xff]  ;;  %v702_v34 = vld [vmem:[%s3168_s6 + $0x8] sm:$0xff]  ;;  %s584_s21 = scalar_lea.vmem %s3180_s18, %s2169_s23 }
  0x12   : > { %2339 = vmatprep.subr.bf16.mxu0 %v2573_v3  ;;  %v2715_v10 = vpack.c.bf16 %v2711_v9, %v2711_v9  ;;  %v2173_v19 = vld [vmem:[%s3167_s5] ss:$0 sm:$0xff]  ;;  %v706_v33 = vpack.c.bf16 %v704_v31, %v703_v30  ;;  %v807_v41 = vsub.s32 0, %v806_v39  ;;  %v2181_v63 = vld [vmem:[%s3185_s0 + $0x30] sm:$0xff]  ;;  %v2182_v0 = vld [vmem:[%s3185_s0 + $0x38] sm:$0xff] }
  0x13   : > { %v2171_v24 = vld [vmem:[%s3165_s3] ss:$0 sm:$0xff]  ;;  %v880_v1 = vpack.c.bf16 %v2182_v0, %v2181_v63  ;;  %v2180_v4 = vld [vmem:[%s3185_s0 + $0x28] sm:$0xff]  ;;  %v2188_v7 = vld [vmem:[%s3166_s4 + $0x30] sm:$0xff] }
  0x14   : > { %v701_v32 = vld [vmem:[%s3168_s6] sm:$0xff]  ;;  %v2189_v8 = vld [vmem:[%s3166_s4 + $0x38] sm:$0xff]  ;;  %v2202_v0 = vld [vmem:[%s3170_s8 + $0x8] sm:$0xff] }
  0x15   : > { %2340 = vmatpush3.bf16.msra.mxu0 %v595_v6  ;;  %v705_v35 = vpack.c.bf16 %v702_v34, %v701_v32  ;;  %v587_v37 = vld [vmem:[%s580_s19] sm:$0x1]  ;;  %v935_v13 = vpack.c.bf16 %v2189_v8, %v2188_v7 }
  0x16   : > { %2345 = vmatprep.subr.bf16.mxu0 %v2573_v3  ;;  %v588_v38 = vsub.f32 1.0, %v587_v37  ;;  %v2175_v55 = vld [vmem:[%s3169_s7] ss:$0 sm:$0xff]  ;;  %v2195_v37 = vld [vmem:[%s3168_s6 + $0x30] sm:$0xff] }
  0x17   : > { %v2179_v2 = vld [vmem:[%s3185_s0 + $0x20] sm:$0xff] }
  0x18   : > { %2342 = vmatmul.mubr.msk.bf16.vlgmr.msra.gmra.mxu0 %vm604_vm1, %v2715_v10  ;;  %v589_v40 = vmul.f32 -10000.0, %v588_v38  ;;  %v879_v5 = vpack.c.bf16 %v2180_v4, %v2179_v2  ;;  %v2196_v38 = vld [vmem:[%s3168_s6 + $0x38] sm:$0xff]  ;;  %v2193_v39 = vld [vmem:[%s3168_s6 + $0x20] sm:$0xff] }
  0x19   : > { %2346 = vmatpush3.bf16.msra.mxu0 %v653_v11  ;;  %2349 = vmatprep.mubr.msk.bf16.mxu0 %vm2574_vm0, %v2573_v3 }
  0x1a   : > { %2347 = vmatprep.subr.bf16.mxu0 %v2573_v3  ;;  %v2767_v42 = vrot.slane %v589_v40, %v807_v41  ;;  %v990_v40 = vpack.c.bf16 %v2196_v38, %v2195_v37  ;;  %v2194_v41 = vld [vmem:[%s3168_s6 + $0x28] sm:$0xff] }
  0x1d   : > { %2348 = vmatpush3.bf16.msra.mxu0 %v652_v14 }
  0x1e   : > { %2353 = vmatprep.subr.bf16.mxu0 %v2573_v3 }
  0x20   : > { %2350 = vmatmul.mubr.msk.bf16.vlgmr.msra.gmra.mxu0 %vm604_vm1, %v2715_v10 }
  0x21   : > { %2357 = vmatprep.mubr.msk.bf16.mxu0 %vm2574_vm0, %v2573_v3  ;;  %2354 = vmatpush3.bf16.msra.mxu0 %v706_v33 }
  0x22   : > { %2355 = vmatprep.subr.bf16.mxu0 %v2573_v3 }
  0x25   : > { %2356 = vmatpush3.bf16.msra.mxu0 %v705_v35 }
  0x26   : > { %2367 = vmatprep.subr.bf16.mxu0 %v2573_v3 }
  0x28   : > { %2358 = vmatmul.mubr.msk.bf16.vlgmr.msra.gmra.mxu0 %vm604_vm1, %v2715_v10 }
  0x29   : > { %2369 = vmatprep.mubr.msk.bf16.mxu0 %vm2574_vm0, %v2573_v3 }
  0xd8   : > { %v642_v15 = vpop.f32.mrf.mxu0 }
  0xd9   : > { %v643_v28 = vadd.f32 %v2171_v24, %v642_v15  ;;  %v2186_v15 = vld [vmem:[%s3166_s4 + $0x20] sm:$0xff] }
  0xda   : > { %v2343_v16 = vpop.f32.mrf.mxu0 }
  0xdb   : > { %v754_v29 = vpack.c.bf16 %v643_v28, %v643_v28  ;;  %v2187_v16 = vld [vmem:[%s3166_s4 + $0x28] sm:$0xff] }
  0xdc   : > { %v645_v17 = vpop.f32.mrf.mxu0 }
  0xdd   : > { %v934_v17 = vpack.c.bf16 %v2187_v16, %v2186_v15 }
  0xde   : > { %v2344_v18 = vpop.f32.mrf.mxu0 }
  0xe0   : > { %v695_v20 = vpop.f32.mrf.mxu0 }
  0xe1   : > { %v696_v21 = vadd.f32 %v2173_v19, %v695_v20 }
  0xe2   : > { %v2351_v22 = vpop.f32.mrf.mxu0 }
  0xe3   : > { %v755_v23 = vpack.c.bf16 %v696_v21, %v696_v21 }
  0xe4   : > { %v698_v25 = vpop.f32.mrf.mxu0 }
  0xe5   : > { %v761_v26 = vsel %vm756_vm2, %v755_v23, 0 }
  0xe6   : > { %v2352_v27 = vpop.f32.mrf.mxu0  ;;  %2362 = vmatpush3.bf16.xpose.msra.mxu1 %v761_v26  ;;  %v2191_v26 = vld [vmem:[%s3167_s5 + $0x1] ss:$0 sm:$0xff] }
  0xe7   : > { %2373 = vmatprep.subr.bf16.mxu1 %v2573_v3 }
  0xe8   : > { %v748_v56 = vpop.f32.mrf.mxu0 }
  0xe9   : > { %v749_v57 = vadd.f32 %v2175_v55, %v748_v56 }
  0xea   : > { %v2359_v58 = vpop.f32.mrf.mxu0 }
  0xeb   : > { %v823_v59 = vpack.c.bf16 %v749_v57, %v749_v57 }
  0xec   : > { %v751_v60 = vpop.f32.mrf.mxu0 }
  0xed   : > { %2364 = vmatmul.mubr.msk.bf16.vlgmr.msra.gmra.mxu1 %vm756_vm2, %v754_v29  ;;  %v829_v61 = vsel %vm827_vm3, %v823_v59, 0  ;;  %v2184_v29 = vld [vmem:[%s3165_s3 + $0x1] ss:$0 sm:$0xff] }
  0xee   : > { %2377 = vmatprep.mubr.msk.bf16.mxu1 %vm2574_vm0, %v2573_v3  ;;  %v2360_v62 = vpop.f32.mrf.mxu0  ;;  %2368 = vmatpush3.bf16.msra.mxu0 %v829_v61 }
  0xef   : > { %2381 = vmatprep.subr.bf16.mxu0 %v2573_v3  ;;  %2374 = vmatpush3.bf16.msra.mxu1 %v880_v1  ;;  %v1151_v1 = vpack.c.bf16 %v2202_v0, %v2202_v0 }
  0xf0   : > { %2375 = vmatprep.subr.bf16.mxu1 %v2573_v3 }
  0xf1   : > { %v1156_v2 = vsel %vm827_vm3, %v1151_v1, 0 }
  0xf3   : > { %2376 = vmatpush3.bf16.msra.mxu1 %v879_v5  ;;  %v871_v5 = vld [vmem:[%s3170_s8] sm:$0xff] }
  0xf4   : > { %2389 = vmatprep.subr.bf16.mxu1 %v2573_v3 }
  0xf6   : > { %2378 = vmatmul.mubr.msk.bf16.vlgmr.msra.gmra.mxu1 %vm604_vm1, %v2715_v10 }
  0xf7   : > { %2393 = vmatprep.mubr.msk.bf16.mxu1 %vm2574_vm0, %v2573_v3  ;;  %2390 = vmatpush3.bf16.msra.mxu1 %v990_v40 }
  0xf8   : > { %2391 = vmatprep.subr.bf16.mxu1 %v2573_v3 }
 0x1ad   : > { %v797_v43 = vpop.f32.mrf.mxu1 }
 0x1ae   : > { %v803_v44 = vmul.f32 0.35355338, %v797_v43  ;;  %v989_v43 = vpack.c.bf16 %v2194_v41, %v2193_v39 }
 0x1af   : > { %v2365_v45 = vpop.f32.mrf.mxu1 }
 0x1b0   : > { %v810_v46 = vadd.f32 %v2767_v42, %v803_v44  ;;  %2392 = vmatpush3.bf16.msra.mxu1 %v989_v43 }
 0x1b1   : > { %v800_v47 = vpop.f32.mrf.mxu1  ;;  %2403 = vmatprep.subr.bf16.mxu1 %v2573_v3 }
 0x1b2   : > { %v811_v48 = vsel %vm756_vm2, %v810_v46, -inf }
 0x1b3   : > { %812 = vmax.xlane.f32.xlu0 %v811_v48  ;;  %v2366_v49 = vpop.f32.mrf.mxu1  ;;  %2394 = vmatmul.mubr.msk.bf16.vlgmr.msra.gmra.mxu1 %vm604_vm1, %v2715_v10 }
 0x1b4   : > { %2405 = vmatprep.mubr.msk.bf16.mxu1 %vm2574_vm0, %v2573_v3 }
 0x1b6   : > { %v923_v18 = vpop.f32.mrf.mxu1 }
 0x1b7   : > { %v924_v34 = vadd.f32 %v2184_v29, %v923_v18  ;;  %v2213_v18 = vld [vmem:[%s3166_s4 + $0x48] sm:$0xff] }
 0x1b8   : > { %v2379_v19 = vpop.f32.mrf.mxu1 }
 0x1b9   : > { %v1039_v36 = vpack.c.bf16 %v924_v34, %v924_v34 }
 0x1ba   : > { %v926_v20 = vpop.f32.mrf.mxu1 }
 0x1bb   : > { %v2207_v20 = vld [vmem:[%s3185_s0 + $0x50] sm:$0xff] }
 0x1bc   : > { %v2380_v21 = vpop.f32.mrf.mxu1 }
 0x1bd   : > { %v2208_v21 = vld [vmem:[%s3185_s0 + $0x58] sm:$0xff] }
 0x23c   : > { %v813_v50 = vpop.xlane.xlu0 %812 }
 0x23d   : > { %v814_v51 = vsub.f32 %v810_v46, %v813_v50 }
 0x23f   : > { %v815_v52 = vmul.f32 1.442695, %v814_v51  ;;  %v2198_v51 = vld [vmem:[%s3169_s7 + $0x1] ss:$0 sm:$0xff] }
 0x241   : > { %2543 = vpow2.f32 %v815_v52 }
 0x24e   : > { %v2544_v53 = vpop.eup %2543 }
 0x24f   : > { %v817_v54 = vsel %vm756_vm2, %v2544_v53, 0.0 }
 0x250   : > { %818 = vadd.xlane.f32.xlu0 %v817_v54 }
 0x273   : > { %v1033_v52 = vpop.f32.mrf.mxu1 }
 0x275   : > { %v2395_v54 = vpop.f32.mrf.mxu1 }
 0x277   : > { %v1036_v56 = vpop.f32.mrf.mxu1 }
 0x278   : > { %v2222_v56 = vld [vmem:[%s3168_s6 + $0x58] sm:$0xff] }
 0x279   : > { %v2396_v58 = vpop.f32.mrf.mxu1 }
 0x2d9   : > { %v819_v6 = vpop.xlane.xlu0 %818 }
 0x2da   : > { %2545 = vrcp.f32 %v819_v6  ;;  %v873_v6 = vpack.c.bf16 %v871_v5, %v871_v5 }
 0x2e7   : > { %v2546_v11 = vpop.eup %2545 }
 0x2e8   : > { %v821_v12 = vmul.f32 %v2546_v11, %v2544_v53  ;;  %v1034_v53 = vadd.f32 %v2198_v51, %v1033_v52 }
 0x2ea   : > { %v822_v14 = vpack.c.bf16 %v821_v12, %v821_v12  ;;  %v1101_v55 = vpack.c.bf16 %v1034_v53, %v1034_v53  ;;  %v1202_v12 = vsel %vm827_vm3, %v873_v6, 0 }
 0x2ec   : > { %2370 = vmatmul.mubr.msk.bf16.vlgmr.msra.gmra.mxu0 %vm756_vm2, %v822_v14  ;;  %v1106_v57 = vsel %vm827_vm3, %v1101_v55, 0  ;;  %v2215_v14 = vld [vmem:[%s3166_s4 + $0x58] sm:$0xff]  ;;  %v2221_v55 = vld [vmem:[%s3168_s6 + $0x50] sm:$0xff] }
 0x2ed   : > { %2382 = vmatpush3.bf16.msra.mxu0 %v935_v13  ;;  %2385 = vmatprep.mubr.msk.bf16.mxu0 %vm2574_vm0, %v2573_v3  ;;  %v2214_v13 = vld [vmem:[%s3166_s4 + $0x50] sm:$0xff]  ;;  %v1360_v58 = vpack.c.bf16 %v2222_v56, %v2221_v55 }
 0x2ee   : > { %2383 = vmatprep.subr.bf16.mxu0 %v2573_v3  ;;  %2404 = vmatpush3.bf16.msra.mxu1 %v1106_v57  ;;  %v1305_v15 = vpack.c.bf16 %v2215_v14, %v2214_v13  ;;  %v2219_v57 = vld [vmem:[%s3168_s6 + $0x40] sm:$0xff] }
 0x2ef   : > { %2415 = vmatprep.subr.bf16.mxu1 %v2573_v3 }
 0x2f1   : > { %2384 = vmatpush3.bf16.msra.mxu0 %v934_v17  ;;  %v2212_v17 = vld [vmem:[%s3166_s4 + $0x40] sm:$0xff] }
 0x2f2   : > { %2397 = vmatprep.subr.bf16.mxu0 %v2573_v3  ;;  %v1304_v19 = vpack.c.bf16 %v2213_v18, %v2212_v17 }
 0x2f4   : > { %2386 = vmatmul.mubr.msk.bf16.vlgmr.msra.gmra.mxu0 %vm604_vm1, %v2715_v10 }
 0x2f5   : > { %2399 = vmatprep.mubr.msk.bf16.mxu0 %vm2574_vm0, %v2573_v3 }
 0x3ac   : > { %v2816_v22 = vpop.f32.mrf.mxu0 }
 0x3ad   : > { %v872_v16 = vpack.c.bf16 %v2816_v22, %v2816_v22 }
 0x3ae   : > { %v2371_v23 = vpop.f32.mrf.mxu0 }
 0x3af   : > { %v1250_v23 = vpack.c.bf16 %v2208_v21, %v2207_v20  ;;  %v2228_v20 = vld [vmem:[%s3170_s8 + $0x10] sm:$0xff] }
 0x3b0   : > { %v868_v24 = vpop.f32.mrf.mxu0  ;;  %v1521_v21 = vpack.c.bf16 %v2228_v20, %v2228_v20 }
 0x3b2   : > { %v2372_v25 = vpop.f32.mrf.mxu0 }
 0x3b3   : > { %v2205_v25 = vld [vmem:[%s3185_s0 + $0x40] sm:$0xff] }
 0x3b4   : > { %v978_v27 = vpop.f32.mrf.mxu0 }
 0x3b5   : > { %v979_v28 = vadd.f32 %v2191_v26, %v978_v27  ;;  %v2206_v26 = vld [vmem:[%s3185_s0 + $0x48] sm:$0xff] }
 0x3b6   : > { %v2387_v30 = vpop.f32.mrf.mxu0  ;;  %v1249_v29 = vpack.c.bf16 %v2206_v26, %v2205_v25 }
 0x3b7   : > { %v1040_v31 = vpack.c.bf16 %v979_v28, %v979_v28 }
 0x3b8   : > { %v981_v32 = vpop.f32.mrf.mxu0 }
 0x3b9   : > { %v1045_v33 = vsel %vm756_vm2, %v1040_v31, 0 }
 0x3ba   : > { %v2388_v35 = vpop.f32.mrf.mxu0  ;;  %2398 = vmatpush3.bf16.xpose.msra.mxu0 %v1045_v33 }
 0x3bb   : > { %2409 = vmatprep.subr.bf16.mxu0 %v2573_v3  ;;  %v2217_v35 = vld [vmem:[%s3167_s5 + $0x2] ss:$0 sm:$0xff] }
 0x3c1   : > { %2400 = vmatmul.mubr.msk.bf16.vlgmr.msra.gmra.mxu0 %vm756_vm2, %v1039_v36 }
 0x3c2   : > { %2411 = vmatprep.mubr.msk.bf16.mxu0 %vm2574_vm0, %v2573_v3  ;;  %2410 = vmatpush3.bf16.msra.mxu0 %v1156_v2 }
 0x3c3   : > { %2421 = vmatprep.subr.bf16.mxu0 %v2573_v3 }
 0x481   : > { %v1081_v44 = vpop.f32.mrf.mxu0 }
 0x482   : > { %v1087_v45 = vmul.f32 0.35355338, %v1081_v44 }
 0x483   : > { %v2401_v46 = vpop.f32.mrf.mxu0 }
 0x484   : > { %v1088_v47 = vadd.f32 %v1087_v45, %v2767_v42 }
 0x485   : > { %v1084_v48 = vpop.f32.mrf.mxu0 }
 0x486   : > { %v1089_v49 = vsel %vm756_vm2, %v1088_v47, -inf  ;;  %v2210_v48 = vld [vmem:[%s3165_s3 + $0x2] ss:$0 sm:$0xff] }
 0x487   : > { %1090 = vmax.xlane.f32.xlu1 %v1089_v49  ;;  %v2402_v50 = vpop.f32.mrf.mxu0 }
 0x510   : > { %v1091_v59 = vpop.xlane.xlu1 %1090 }
 0x511   : > { %v1092_v60 = vsub.f32 %v1088_v47, %v1091_v59  ;;  %v2220_v59 = vld [vmem:[%s3168_s6 + $0x48] sm:$0xff] }
 0x513   : > { %v1093_v61 = vmul.f32 1.442695, %v1092_v60  ;;  %v1359_v60 = vpack.c.bf16 %v2220_v59, %v2219_v57  ;;  %v2242_v57 = vld [vmem:[%s3167_s5 + $0x3] ss:$0 sm:$0xff] }
 0x515   : > { %2547 = vpow2.f32 %v1093_v61 }
 0x522   : > { %v2548_v62 = vpop.eup %2547 }
 0x523   : > { %v1095_v63 = vsel %vm756_vm2, %v2548_v62, 0.0 }
 0x524   : > { %1096 = vadd.xlane.f32.xlu1 %v1095_v63 }
 0x5ad   : > { %v1097_v4 = vpop.xlane.xlu1 %1096 }
 0x5ae   : > { %2549 = vrcp.f32 %v1097_v4 }
 0x5bb   : > { %v2550_v7 = vpop.eup %2549 }
 0x5bc   : > { %v1099_v8 = vmul.f32 %v2550_v7, %v2548_v62 }
 0x5be   : > { %v1100_v11 = vpack.c.bf16 %v1099_v8, %v1099_v8 }
 0x5c0   : > { %2406 = vmatmul.mubr.msk.bf16.vlgmr.msra.gmra.mxu1 %vm756_vm2, %v1100_v11 }
 0x5c1   : > { %2416 = vmatpush3.bf16.msra.mxu1 %v1202_v12  ;;  %2417 = vmatprep.mubr.msk.bf16.mxu1 %vm2574_vm0, %v2573_v3  ;;  %v2224_v12 = vld [vmem:[%s3169_s7 + $0x2] ss:$0 sm:$0xff] }
 0x5c2   : > { %2429 = vmatprep.subr.bf16.mxu1 %v2573_v3 }
 0x5c8   : > { %2418 = vmatmul.mubr.msk.bf16.vlgmr.msra.gmra.mxu1 %vm756_vm2, %v872_v16 }
 0x5c9   : > { %2430 = vmatpush3.bf16.msra.mxu1 %v1305_v15  ;;  %2433 = vmatprep.mubr.msk.bf16.mxu1 %vm2574_vm0, %v2573_v3 }
 0x5ca   : > { %2431 = vmatprep.subr.bf16.mxu1 %v2573_v3 }
 0x5cd   : > { %2432 = vmatpush3.bf16.msra.mxu1 %v1304_v19 }
 0x5ce   : > { %2445 = vmatprep.subr.bf16.mxu1 %v2573_v3 }
 0x5d0   : > { %2434 = vmatmul.mubr.msk.bf16.vlgmr.msra.gmra.mxu1 %vm604_vm1, %v2715_v10 }
 0x5d1   : > { %2447 = vmatprep.mubr.msk.bf16.mxu1 %vm2574_vm0, %v2573_v3 }
 0x680   : > { %v1142_v22 = vpop.f32.mrf.mxu1 }
 0x681   : > { %v1150_v24 = vpack.c.bf16 %v1142_v22, %v1142_v22  ;;  %v1526_v22 = vsel %vm827_vm3, %v1521_v21, 0 }
 0x682   : > { %v2407_v27 = vpop.f32.mrf.mxu1 }
 0x683   : > { %2412 = vmatmul.mubr.msk.bf16.vlgmr.msra.gmra.mxu0 %vm756_vm2, %v1150_v24  ;;  %v2232_v27 = vld [vmem:[%s3185_s0 + $0x70] sm:$0xff] }
 0x684   : > { %v1145_v28 = vpop.f32.mrf.mxu1  ;;  %2422 = vmatpush3.bf16.msra.mxu0 %v1250_v23  ;;  %2425 = vmatprep.mubr.msk.bf16.mxu0 %vm2574_vm0, %v2573_v3 }
 0x685   : > { %2423 = vmatprep.subr.bf16.mxu0 %v2573_v3  ;;  %v2233_v28 = vld [vmem:[%s3185_s0 + $0x78] sm:$0xff] }
 0x686   : > { %v2408_v30 = vpop.f32.mrf.mxu1 }
 0x687   : > { %v2230_v30 = vld [vmem:[%s3185_s0 + $0x60] sm:$0xff] }
 0x688   : > { %v2907_v31 = vpop.f32.mrf.mxu1  ;;  %2424 = vmatpush3.bf16.msra.mxu0 %v1249_v29  ;;  %v1575_v29 = vpack.c.bf16 %v2233_v28, %v2232_v27 }
 0x689   : > { %2437 = vmatprep.subr.bf16.mxu0 %v2573_v3 }
 0x68a   : > { %v2419_v32 = vpop.f32.mrf.mxu1 }
 0x68b   : > { %2426 = vmatmul.mubr.msk.bf16.vlgmr.msra.gmra.mxu0 %vm604_vm1, %v2715_v10  ;;  %v2231_v32 = vld [vmem:[%s3185_s0 + $0x68] sm:$0xff] }
 0x68c   : > { %v1241_v33 = vpop.f32.mrf.mxu1  ;;  %2441 = vmatprep.mubr.msk.bf16.mxu0 %vm2574_vm0, %v2573_v3  ;;  %2438 = vmatpush3.bf16.msra.mxu0 %v1360_v58 }
 0x68d   : > { %2439 = vmatprep.subr.bf16.mxu0 %v2573_v3  ;;  %v1574_v33 = vpack.c.bf16 %v2231_v32, %v2230_v30 }
 0x68e   : > { %v2420_v34 = vpop.f32.mrf.mxu1 }
 0x68f   : > { %v2239_v34 = vld [vmem:[%s3166_s4 + $0x70] sm:$0xff] }
 0x690   : > { %v1348_v36 = vpop.f32.mrf.mxu1  ;;  %2440 = vmatpush3.bf16.msra.mxu0 %v1359_v60 }
 0x691   : > { %v1349_v37 = vadd.f32 %v2217_v35, %v1348_v36  ;;  %2451 = vmatprep.subr.bf16.mxu0 %v2573_v3  ;;  %v2240_v35 = vld [vmem:[%s3166_s4 + $0x78] sm:$0xff] }
 0x692   : > { %v2435_v38 = vpop.f32.mrf.mxu1 }
 0x693   : > { %v1410_v39 = vpack.c.bf16 %v1349_v37, %v1349_v37  ;;  %2442 = vmatmul.mubr.msk.bf16.vlgmr.msra.gmra.mxu0 %vm604_vm1, %v2715_v10  ;;  %v1630_v37 = vpack.c.bf16 %v2240_v35, %v2239_v34 }
 0x694   : > { %v1351_v40 = vpop.f32.mrf.mxu1  ;;  %2453 = vmatprep.mubr.msk.bf16.mxu0 %vm2574_vm0, %v2573_v3 }
 0x695   : > { %v1415_v41 = vsel %vm756_vm2, %v1410_v39, 0  ;;  %v2237_v39 = vld [vmem:[%s3166_s4 + $0x60] sm:$0xff]  ;;  %v2238_v40 = vld [vmem:[%s3166_s4 + $0x68] sm:$0xff] }
 0x696   : > { %v2436_v43 = vpop.f32.mrf.mxu1  ;;  %2446 = vmatpush3.bf16.xpose.msra.mxu1 %v1415_v41 }
 0x697   : > { %2457 = vmatprep.subr.bf16.mxu1 %v2573_v3 }
 0x743   : > { %v2919_v44 = vpop.f32.mrf.mxu0 }
 0x745   : > { %v2413_v45 = vpop.f32.mrf.mxu0 }
 0x746   : > { %v1629_v45 = vpack.c.bf16 %v2238_v40, %v2237_v39 }
 0x747   : > { %v1195_v46 = vpop.f32.mrf.mxu0 }
 0x749   : > { %v2414_v47 = vpop.f32.mrf.mxu0 }
 0x74b   : > { %v1293_v49 = vpop.f32.mrf.mxu0 }
 0x74c   : > { %v1294_v50 = vadd.f32 %v2210_v48, %v1293_v49 }
 0x74d   : > { %v2427_v51 = vpop.f32.mrf.mxu0 }
 0x74e   : > { %v1409_v52 = vpack.c.bf16 %v1294_v50, %v1294_v50  ;;  %v1239_v51 = vadd.f32 %v2907_v31, %v2919_v44 }
 0x74f   : > { %v1296_v53 = vpop.f32.mrf.mxu0 }
 0x750   : > { %2448 = vmatmul.mubr.msk.bf16.vlgmr.msra.gmra.mxu1 %vm756_vm2, %v1409_v52 }
 0x751   : > { %v2428_v54 = vpop.f32.mrf.mxu0  ;;  %2459 = vmatprep.mubr.msk.bf16.mxu1 %vm2574_vm0, %v2573_v3  ;;  %2458 = vmatpush3.bf16.msra.mxu1 %v1526_v22  ;;  %v2249_v22 = vld [vmem:[%s3169_s7 + $0x3] ss:$0 sm:$0xff] }
 0x752   : > { %2471 = vmatprep.subr.bf16.mxu1 %v2573_v3 }
 0x753   : > { %v1403_v13 = vpop.f32.mrf.mxu0 }
 0x754   : > { %v1404_v14 = vadd.f32 %v2224_v12, %v1403_v13 }
 0x755   : > { %v2443_v15 = vpop.f32.mrf.mxu0 }
 0x756   : > { %v1471_v16 = vpack.c.bf16 %v1404_v14, %v1404_v14 }
 0x757   : > { %v1406_v17 = vpop.f32.mrf.mxu0 }
 0x758   : > { %v1476_v18 = vsel %vm827_vm3, %v1471_v16, 0 }
 0x759   : > { %v2444_v19 = vpop.f32.mrf.mxu0  ;;  %2452 = vmatpush3.bf16.msra.mxu0 %v1476_v18 }
 0x75a   : > { %2463 = vmatprep.subr.bf16.mxu0 %v2573_v3 }
 0x810   : > { %v1451_v61 = vpop.f32.mrf.mxu1 }
 0x811   : > { %v1457_v62 = vmul.f32 0.35355338, %v1451_v61  ;;  %v2235_v61 = vld [vmem:[%s3165_s3 + $0x3] ss:$0 sm:$0xff] }
 0x812   : > { %v2449_v63 = vpop.f32.mrf.mxu1 }
 0x813   : > { %v1458_v0 = vadd.f32 %v1457_v62, %v2767_v42 }
 0x814   : > { %v1454_v1 = vpop.f32.mrf.mxu1 }
 0x815   : > { %v1459_v2 = vsel %vm756_vm2, %v1458_v0, -inf }
 0x816   : > { %1460 = vmax.xlane.f32.xlu0 %v1459_v2  ;;  %v2450_v4 = vpop.f32.mrf.mxu1  ;;  %v2246_v2 = vld [vmem:[%s3168_s6 + $0x70] sm:$0xff] }
 0x817   : > { %v2247_v4 = vld [vmem:[%s3168_s6 + $0x78] sm:$0xff] }
 0x89f   : > { %v1461_v5 = vpop.xlane.xlu0 %1460 }
 0x8a0   : > { %v1462_v6 = vsub.f32 %v1458_v0, %v1461_v5  ;;  %v2244_v5 = vld [vmem:[%s3168_s6 + $0x60] sm:$0xff] }
 0x8a2   : > { %v1463_v7 = vmul.f32 1.442695, %v1462_v6  ;;  %v1685_v6 = vpack.c.bf16 %v2247_v4, %v2246_v2  ;;  %v2257_v4 = vld [vmem:[%s3173_s11] ss:$0 sm:$0xff] }
 0x8a4   : > { %2551 = vpow2.f32 %v1463_v7  ;;  %v2245_v7 = vld [vmem:[%s3168_s6 + $0x68] sm:$0xff] }
 0x8b1   : > { %v2552_v8 = vpop.eup %2551 }
 0x8b2   : > { %v1465_v11 = vsel %vm756_vm2, %v2552_v8, 0.0 }
 0x8b3   : > { %1466 = vadd.xlane.f32.xlu1 %v1465_v11 }
 0x93c   : > { %v1467_v23 = vpop.xlane.xlu1 %1466 }
 0x93d   : > { %2553 = vrcp.f32 %v1467_v23 }
 0x94a   : > { %v2554_v24 = vpop.eup %2553 }
 0x94b   : > { %v1469_v25 = vmul.f32 %v2554_v24, %v2552_v8  ;;  %v1684_v8 = vpack.c.bf16 %v2245_v7, %v2244_v5 }
 0x94d   : > { %v1470_v26 = vpack.c.bf16 %v1469_v25, %v1469_v25 }
 0x94f   : > { %2454 = vmatmul.mubr.msk.bf16.vlgmr.msra.gmra.mxu0 %vm756_vm2, %v1470_v26 }
 0x950   : > { %2467 = vmatprep.mubr.msk.bf16.mxu0 %vm2574_vm0, %v2573_v3  ;;  %2464 = vmatpush3.bf16.msra.mxu0 %v1575_v29  ;;  %v2253_v29 = vld [vmem:[%s3170_s8 + $0x18] sm:$0xff] }
 0x951   : > { %2465 = vmatprep.subr.bf16.mxu0 %v2573_v3  ;;  %v1846_v30 = vpack.c.bf16 %v2253_v29, %v2253_v29  ;;  %v1999_v29 = vld [vmem:[%s3176_s14] sm:$0xff] }
 0x953   : > { %v1851_v32 = vsel %vm827_vm3, %v1846_v30, 0  ;;  %v2000_v30 = vld [vmem:[%s3176_s14 + $0x8] sm:$0xff] }
 0x954   : > { %2466 = vmatpush3.bf16.msra.mxu0 %v1574_v33 }
 0x955   : > { %2479 = vmatprep.subr.bf16.mxu0 %v2573_v3 }
 0x957   : > { %2468 = vmatmul.mubr.msk.bf16.vlgmr.msra.gmra.mxu0 %vm604_vm1, %v2715_v10 }
 0x958   : > { %2483 = vmatprep.mubr.msk.bf16.mxu0 %vm2574_vm0, %v2573_v3  ;;  %2480 = vmatpush3.bf16.msra.mxu0 %v1685_v6 }
 0x959   : > { %2481 = vmatprep.subr.bf16.mxu0 %v2573_v3 }
 0x95c   : > { %2482 = vmatpush3.bf16.msra.mxu0 %v1684_v8  ;;  %v2013_v8 = vld [vmem:[%s3176_s14 + $0x70] sm:$0xff] }
 0x95d   : > { %2493 = vmatprep.subr.bf16.mxu0 %v2573_v3 }
 0x95f   : > { %2484 = vmatmul.mubr.msk.bf16.vlgmr.msra.gmra.mxu0 %vm604_vm1, %v2715_v10 }
 0x960   : > { %2495 = vmatprep.mubr.msk.bf16.mxu0 %vm2574_vm0, %v2573_v3 }
 0xa0f   : > { %v1512_v36 = vpop.f32.mrf.mxu0 }
 0xa10   : > { %v1520_v38 = vpack.c.bf16 %v1512_v36, %v1512_v36 }
 0xa11   : > { %v2455_v41 = vpop.f32.mrf.mxu0 }
 0xa12   : > { %2460 = vmatmul.mubr.msk.bf16.vlgmr.msra.gmra.mxu1 %vm756_vm2, %v1520_v38 }
 0xa13   : > { %v1515_v43 = vpop.f32.mrf.mxu0  ;;  %2472 = vmatpush3.bf16.msra.mxu1 %v1630_v37  ;;  %2475 = vmatprep.mubr.msk.bf16.mxu1 %vm2574_vm0, %v2573_v3 }
 0xa14   : > { %2473 = vmatprep.subr.bf16.mxu1 %v2573_v3 }
 0xa15   : > { %v2456_v46 = vpop.f32.mrf.mxu0 }
 0xa17   : > { %2474 = vmatpush3.bf16.msra.mxu1 %v1629_v45  ;;  %v1618_v47 = vpop.f32.mrf.mxu0  ;;  %v2255_v45 = vld [vmem:[%s3171_s9] ss:$0 sm:$0xff] }
 0xa18   : > { %2487 = vmatprep.subr.bf16.mxu1 %v2573_v3  ;;  %v1619_v44 = vadd.f32 %v2235_v61, %v1618_v47  ;;  %v1934_v61 = vld [vmem:[%s3174_s12 + $0x8] sm:$0xff] }
 0xa19   : > { %v2469_v48 = vpop.f32.mrf.mxu0 }
 0xa1a   : > { %2476 = vmatmul.mubr.msk.bf16.vlgmr.msra.gmra.mxu1 %vm604_vm1, %v2715_v10  ;;  %v1734_v1 = vpack.c.bf16 %v1619_v44, %v1619_v44 }
 0xa1b   : > { %2489 = vmatprep.mubr.msk.bf16.mxu1 %vm2574_vm0, %v2573_v3  ;;  %v1621_v49 = vpop.f32.mrf.mxu0 }
 0xa1d   : > { %v2470_v50 = vpop.f32.mrf.mxu0 }
 0xa1f   : > { %v1728_v23 = vpop.f32.mrf.mxu0 }
 0xa20   : > { %v1729_v24 = vadd.f32 %v2249_v22, %v1728_v23  ;;  %v2006_v22 = vld [vmem:[%s3176_s14 + $0x38] sm:$0xff] }
 0xa22   : > { %v1796_v25 = vpack.c.bf16 %v1729_v24, %v1729_v24  ;;  %v2003_v24 = vld [vmem:[%s3176_s14 + $0x20] sm:$0xff] }
 0xa24   : > { %v1801_v27 = vsel %vm827_vm3, %v1796_v25, 0 }
 0xa25   : > { %2494 = vmatpush3.bf16.msra.mxu0 %v1801_v27  ;;  %v2002_v27 = vld [vmem:[%s3176_s14 + $0x18] sm:$0xff] }
 0xa26   : > { %2505 = vmatprep.subr.bf16.mxu0 %v2573_v3 }
 0xad2   : > { %v1562_v52 = vpop.f32.mrf.mxu1 }
 0xad3   : > { %v3002_v53 = vadd.f32 %v1562_v52, %v1239_v51 }
 0xad4   : > { %v2461_v54 = vpop.f32.mrf.mxu1 }
 0xad6   : > { %v1565_v55 = vpop.f32.mrf.mxu1 }
 0xad8   : > { %v2462_v56 = vpop.f32.mrf.mxu1 }
 0xada   : > { %v1673_v58 = vpop.f32.mrf.mxu1 }
 0xadb   : > { %v1674_v59 = vadd.f32 %v2242_v57, %v1673_v58 }
 0xadc   : > { %v2477_v60 = vpop.f32.mrf.mxu1 }
 0xadd   : > { %v1735_v62 = vpack.c.bf16 %v1674_v59, %v1674_v59  ;;  %v1936_v59 = vld [vmem:[%s3174_s12 + $0x18] sm:$0xff]  ;;  %v1933_v60 = vld [vmem:[%s3174_s12] sm:$0xff] }
 0xade   : > { %v1676_v63 = vpop.f32.mrf.mxu1 }
 0xadf   : > { %v1740_v31 = vsel %vm756_vm2, %v1735_v62, 0  ;;  %v1938_v62 = vpack.c.bf16 %v1934_v61, %v1933_v60 }
 0xae0   : > { %v2478_v0 = vpop.f32.mrf.mxu1  ;;  %2488 = vmatpush3.bf16.xpose.msra.mxu1 %v1740_v31 }
 0xae1   : > { %2499 = vmatprep.subr.bf16.mxu1 %v2573_v3 }
 0xae7   : > { %2490 = vmatmul.mubr.msk.bf16.vlgmr.msra.gmra.mxu1 %vm756_vm2, %v1734_v1  ;;  %v2256_v1 = vld [vmem:[%s3172_s10] ss:$0 sm:$0xff] }
 0xae8   : > { %2501 = vmatprep.mubr.msk.bf16.mxu1 %vm2574_vm0, %v2573_v3  ;;  %2500 = vmatpush3.bf16.msra.mxu1 %v1851_v32  ;;  %v2016_v32 = vpack.c.bf16 %v2000_v30, %v1999_v29 }
 0xae9   : > { %2513 = vmatprep.subr.bf16.mxu1 %v2573_v3 }
 0xba7   : > { %v1776_v11 = vpop.f32.mrf.mxu1 }
 0xba8   : > { %v1782_v12 = vmul.f32 0.35355338, %v1776_v11  ;;  %v2014_v11 = vld [vmem:[%s3176_s14 + $0x78] sm:$0xff] }
 0xba9   : > { %v2491_v13 = vpop.f32.mrf.mxu1 }
 0xbaa   : > { %v1783_v14 = vadd.f32 %v1782_v12, %v2767_v42  ;;  %v2485_v42 = vpop.f32.mrf.mxu0  ;;  %v2023_v12 = vpack.c.bf16 %v2014_v11, %v2013_v8  ;;  %v2011_v13 = vld [vmem:[%s3176_s14 + $0x60] sm:$0xff] }
 0xbab   : > { %v1779_v15 = vpop.f32.mrf.mxu1  ;;  %v2004_v42 = vld [vmem:[%s3176_s14 + $0x28] sm:$0xff] }
 0xbac   : > { %v1784_v16 = vsel %vm756_vm2, %v1783_v14, -inf  ;;  %v1731_v26 = vpop.f32.mrf.mxu0  ;;  %v2018_v25 = vpack.c.bf16 %v2004_v42, %v2003_v24 }
 0xbad   : > { %1785 = vmax.xlane.f32.xlu0 %v1784_v16  ;;  %v2492_v17 = vpop.f32.mrf.mxu1  ;;  %v2009_v16 = vld [vmem:[%s3176_s14 + $0x50] sm:$0xff] }
 0xbae   : > { %v2486_v28 = vpop.f32.mrf.mxu0  ;;  %v2010_v17 = vld [vmem:[%s3176_s14 + $0x58] sm:$0xff]  ;;  %v2001_v26 = vld [vmem:[%s3176_s14 + $0x10] sm:$0xff] }
 0xbaf   : > { %v2017_v28 = vpack.c.bf16 %v2002_v27, %v2001_v26 }
 0xc36   : > { %v1786_v18 = vpop.xlane.xlu0 %1785 }
 0xc37   : > { %v1787_v19 = vsub.f32 %v1783_v14, %v1786_v18  ;;  %v2012_v14 = vld [vmem:[%s3176_s14 + $0x68] sm:$0xff]  ;;  %v2021_v18 = vpack.c.bf16 %v2010_v17, %v2009_v16 }
 0xc38   : > { %v2022_v15 = vpack.c.bf16 %v2012_v14, %v2011_v13 }
 0xc39   : > { %v1788_v20 = vmul.f32 1.442695, %v1787_v19  ;;  %v2007_v19 = vld [vmem:[%s3176_s14 + $0x40] sm:$0xff] }
 0xc3b   : > { %2555 = vpow2.f32 %v1788_v20  ;;  %v2008_v20 = vld [vmem:[%s3176_s14 + $0x48] sm:$0xff] }
 0xc48   : > { %v2556_v21 = vpop.eup %2555 }
 0xc49   : > { %v1790_v10 = vsel %vm756_vm2, %v2556_v21, 0.0 }
 0xc4a   : > { %1791 = vadd.xlane.f32.xlu1 %v1790_v10  ;;  %v2020_v10 = vpack.c.bf16 %v2008_v20, %v2007_v19 }
 0xcd3   : > { %v1792_v33 = vpop.xlane.xlu1 %1791 }
 0xcd4   : > { %2557 = vrcp.f32 %v1792_v33  ;;  %v2258_v33 = vld [vmem:[%s3175_s13] ss:$0 sm:$0xff] }
 0xce1   : > { %v2558_v34 = vpop.eup %2557 }
 0xce2   : > { %v1794_v35 = vmul.f32 %v2558_v34, %v2556_v21  ;;  %v2005_v21 = vld [vmem:[%s3176_s14 + $0x30] sm:$0xff] }
 0xce3   : > { %v2019_v23 = vpack.c.bf16 %v2006_v22, %v2005_v21 }
 0xce4   : > { %v1795_v36 = vpack.c.bf16 %v1794_v35, %v1794_v35 }
 0xce6   : > { %2496 = vmatmul.mubr.msk.bf16.vlgmr.msra.gmra.mxu0 %vm756_vm2, %v1795_v36 }
 0xce7   : > { %2509 = vmatprep.mubr.msk.bf16.mxu0 %vm2574_vm0, %v2573_v3 }
 0xda6   : > { %v1837_v37 = vpop.f32.mrf.mxu0 }
 0xda7   : > { %v1845_v38 = vpack.c.bf16 %v1837_v37, %v1837_v37 }
 0xda8   : > { %v2497_v39 = vpop.f32.mrf.mxu0 }
 0xda9   : > { %2502 = vmatmul.mubr.msk.bf16.vlgmr.msra.gmra.mxu1 %vm756_vm2, %v1845_v38 }
 0xdaa   : > { %v1840_v40 = vpop.f32.mrf.mxu0  ;;  %2529 = vmatprep.mubr.msk.bf16.mxu1 %vm2574_vm0, %v2573_v3  ;;  %2514 = vmatpush3.bf16.msra.mxu1 %v2023_v12 }
 0xdab   : > { %2515 = vmatprep.subr.bf16.mxu1 %v2573_v3 }
 0xdac   : > { %v2498_v41 = vpop.f32.mrf.mxu0 }
 0xdae   : > { %2516 = vmatpush3.bf16.msra.mxu1 %v2022_v15 }
 0xdaf   : > { %2517 = vmatprep.subr.bf16.mxu1 %v2573_v3 }
 0xdb2   : > { %2518 = vmatpush3.bf16.msra.mxu1 %v2021_v18 }
 0xdb3   : > { %2519 = vmatprep.subr.bf16.mxu1 %v2573_v3 }
 0xdb6   : > { %2520 = vmatpush3.bf16.msra.mxu1 %v2020_v10 }
 0xdb7   : > { %2521 = vmatprep.subr.bf16.mxu1 %v2573_v3 }
 0xdba   : > { %2522 = vmatpush3.bf16.msra.mxu1 %v2019_v23 }
 0xdbb   : > { %2523 = vmatprep.subr.bf16.mxu1 %v2573_v3 }
 0xdbe   : > { %2524 = vmatpush3.bf16.msra.mxu1 %v2018_v25 }
 0xdbf   : > { %2525 = vmatprep.subr.bf16.mxu1 %v2573_v3 }
 0xdc2   : > { %2526 = vmatpush3.bf16.msra.mxu1 %v2017_v28 }
 0xdc3   : > { %2527 = vmatprep.subr.bf16.mxu1 %v2573_v3 }
 0xdc6   : > { %2528 = vmatpush3.bf16.msra.mxu1 %v2016_v32 }
 0xe69   : > { %v1887_v43 = vpop.f32.mrf.mxu1 }
 0xe6a   : > { %v1893_v46 = vadd.f32 %v1887_v43, %v3002_v53  ;;  %v1935_v53 = vld [vmem:[%s3174_s12 + $0x10] sm:$0xff] }
 0xe6b   : > { %v2503_v47 = vpop.f32.mrf.mxu1 }
 0xe6c   : > { %v1901_v48 = vadd.f32 %v2255_v45, %v1893_v46 }
 0xe6d   : > { %v1890_v49 = vpop.f32.mrf.mxu1 }
 0xe6e   : > { %v1902_v50 = vadd.f32 %v1901_v48, %v2711_v9  ;;  %v1939_v9 = vpack.c.bf16 %v1936_v59, %v1935_v53 }
 0xe6f   : > { %v2504_v51 = vpop.f32.mrf.mxu1 }
 0xe70   : > { %v1905_v52 = vsel %vm604_vm1, %v1902_v50, 0.0  ;;  %2506 = vmatpush3.bf16.msra.mxu0 %v1939_v9 }
 0xe71   : > { %1906 = vadd.xlane.f32.xlu0 %v1905_v52  ;;  %2507 = vmatprep.subr.bf16.mxu0 %v2573_v3 }
 0xe74   : > { %2508 = vmatpush3.bf16.msra.mxu0 %v1938_v62 }
 0xefa   : > { %v1907_v54 = vpop.xlane.xlu0 %1906 }
 0xefb   : > { %v1909_v55 = vmul.f32 0.03125, %v1907_v54 }
 0xefd   : > { %v1910_v56 = vsub.f32 %v1902_v50, %v1909_v55  ;;  %v2260_v50 = vld [vmem:[%s3177_s15] ss:$0 sm:$0xff] }
 0xeff   : > { %v1911_v57 = vmul.f32 %v1910_v56, %v1910_v56 }
 0xf01   : > { %v1912_v58 = vsel %vm604_vm1, %v1911_v57, 0.0 }
 0xf02   : > { %1913 = vadd.xlane.f32.xlu1 %v1912_v58 }
 0xf8b   : > { %v1914_v63 = vpop.xlane.xlu1 %1913 }
 0xf8c   : > { %v1915_v31 = vmul.f32 0.03125, %v1914_v63 }
 0xf8e   : > { %v1916_v44 = vadd.f32 1e-12, %v1915_v31 }
 0xf90   : > { %2559 = vrsqrt.f32 %v1916_v44 }
 0xf9d   : > { %v2560_v0 = vpop.eup %2559 }
 0xf9e   : > { %v1918_v2 = vmul.f32 %v2560_v0, %v1910_v56  ;;  %v2261_v0 = vld [vmem:[%s3178_s16] ss:$0 sm:$0xff] }
 0xfa0   : > { %v1925_v5 = vmul.f32 %v2256_v1, %v1918_v2  ;;  %v2262_v2 = vld [vmem:[%s3179_s17] ss:$0 sm:$0xff] }
 0xfa2   : > { %v3078_v6 = vadd.f32 %v2257_v4, %v1925_v5 }
 0xfa4   : > { %v1937_v7 = vpack.c.bf16 %v3078_v6, %v3078_v6 }
 0xfa6   : > { %2510 = vmatmul.mubr.msk.bf16.vlgmr.msra.gmra.mxu0 %vm604_vm1, %v1937_v7 }
0x1066   : > { %v1984_v34 = vpop.f32.mrf.mxu0 }
0x1067   : > { %v1985_v35 = vadd.f32 %v2258_v33, %v1984_v34 }
0x1068   : > { %v2511_v36 = vpop.f32.mrf.mxu0 }
0x1069   : > { %v1990_v37 = vmul.f32 %v1985_v35, %v1985_v35 }
0x106a   : > { %v1987_v38 = vpop.f32.mrf.mxu0 }
0x106b   : > { %v1991_v39 = vmul.f32 %v1990_v37, %v1985_v35 }
0x106c   : > { %v2512_v40 = vpop.f32.mrf.mxu0 }
0x106d   : > { %v1992_v41 = vmul.f32 0.044715, %v1991_v39 }
0x106f   : > { %v1993_v43 = vadd.f32 %v1992_v41, %v1985_v35 }
0x1071   : > { %v1994_v45 = vmul.f32 0.7978846, %v1993_v43 }
0x1073   : > { %2561 = vtanh.f32 %v1994_v45 }
0x1080   : > { %v2562_v46 = vpop.eup %2561 }
0x1081   : > { %v1996_v47 = vadd.f32 1.0, %v2562_v46 }
0x1083   : > { %v1997_v48 = vmul.f32 0.5, %v1996_v47 }
0x1085   : > { %v1998_v3 = vmul.f32 %v1997_v48, %v1985_v35 }
0x1087   : > { %v2015_v49 = vpack.c.bf16 %v1998_v3, %v1998_v3 }
0x1089   : > { %2530 = vmatmul.mubr.bf16.vlgmr.msra.gmra.mxu1 %v2015_v49 }
0x1149   : > { %v2065_v51 = vpop.f32.mrf.mxu1 }
0x114a   : > { %v2066_v52 = vadd.f32 %v2260_v50, %v2065_v51 }
0x114b   : > { %v2531_v54 = vpop.f32.mrf.mxu1 }
0x114c   : > { %v2071_v55 = vadd.f32 %v2066_v52, %v3078_v6 }
0x114d   : > { %v2068_v56 = vpop.f32.mrf.mxu1 }
0x114e   : > { %v2074_v57 = vsel %vm604_vm1, %v2071_v55, 0.0 }
0x114f   : > { %2075 = vadd.xlane.f32.xlu0 %v2074_v57  ;;  %v2532_v58 = vpop.f32.mrf.mxu1 }
0x11d8   : > { %v2076_v53 = vpop.xlane.xlu0 %2075 }
0x11d9   : > { %v2077_v59 = vmul.f32 0.03125, %v2076_v53 }
0x11db   : > { %v2078_v9 = vsub.f32 %v2071_v55, %v2077_v59 }
0x11dd   : > { %v2079_v60 = vmul.f32 %v2078_v9, %v2078_v9 }
0x11df   : > { %v2080_v61 = vsel %vm604_vm1, %v2079_v60, 0.0 }
0x11e0   : > { %2081 = vadd.xlane.f32.xlu1 %v2080_v61 }
0x1269   : > { %v2082_v62 = vpop.xlane.xlu1 %2081 }
0x126a   : > { %v2083_v63 = vmul.f32 0.03125, %v2082_v62 }
0x126c   : > { %v2084_v31 = vadd.f32 1e-12, %v2083_v63 }
0x126e   : > { %2563 = vrsqrt.f32 %v2084_v31 }
0x127b   : > { %v2564_v44 = vpop.eup %2563 }
0x127c   : > { %v2086_v1 = vmul.f32 %v2564_v44, %v2078_v9 }
0x127e   : > { %v2093_v4 = vmul.f32 %v2261_v0, %v2086_v1 }
0x1280   : > { %v2100_v5 = vadd.f32 %v2262_v2, %v2093_v4 }
0x1282   : > { %2101 = vst.msk [vmem:[%s584_s21] sm:$0xff] %vm604_vm1, %v2100_v5 }
0x1283 PF: > { %s28_s27 = sadd.s32 1, %s2571_s27  }
0x1284   : > { %p25_p4 = scmp.ge.s32.totalorder %s28_s27, 4  }
0x1286   :  { %27 = sbr.rel (!%p25_p4) target bundleno = 4 (0x4), region = 146 }

// kernel: vl_transformer_itm_forward.7
= control target key start
LH: loop header
LB: loop body
LE: loop exit
PB: predicated region body
PF: predicated region fallthrough
CT: control target
= control target key end

     0   :  { %s664_s15 = smov 0   ;;  %s1000_s0 = inlined_call_operand.vmem [shape: f32[2,4,768], index: 0, kind: input, shape index: {}]   ;;  %s1001_s1 = inlined_call_operand.vmem [shape: f32[768,32], index: 1, kind: input, shape index: {}]   ;;  %s1002_s2 = inlined_call_operand.vmem [shape: f32[1,32], index: 2, kind: input, shape index: {}]   ;;  %s1003_s3 = inlined_call_operand.vmem [shape: f32[4,32], index: 3, kind: input, shape index: {}]   ;;  %s1004_s4 = inlined_call_operand.vmem [shape: f32[2,4,32], index: 4, kind: output, shape index: {}]  }
   0x1 LB: > { %s543_s16 = sadd.s32 4294967295, %s637_s15   ;;  %p547_p0 = scmp.ge.s32.totalorder %s637_s15, 1  ;;  %s637_s15 = sphi %s664_s15, %s14_s15  }
   0x2   : > { %p162_p1 = scmp.lt.s32.totalorder %s637_s15, 3 }
   0x4   : > { %p163_p2 = pnand %p547_p0, %p162_p1 }
   0x5   : > { %p728_p3 = scmp.lt.s32.totalorder (!%p163_p2), %s543_s16, 1 }
   0x6   : > { %166 = sbr.rel (%p163_p2) target bundleno = 280 (0x118), region = 36 }
   0xb   : > { %v230_v0 = vld [vmem:[%s1001_s1 + $0xf0] sm:$0xff]  ;;  %v231_v1 = vld [vmem:[%s1001_s1 + $0xf8] sm:$0xff]  ;;  %v228_v11 = vld [vmem:[%s1001_s1 + $0xe0] sm:$0xff]  ;;  %s1007_s16 = smov (!%p728_p3, %s543_s16), 1  ;;  %vm488_vm0 = vcmask 257024  }
   0xc   : > { %v214_v2 = vld [vmem:[%s1001_s1 + $0x70] sm:$0xff]  ;;  %v326_v3 = vpack.c.bf16 %v231_v1, %v230_v0  ;;  %v215_v4 = vld [vmem:[%s1001_s1 + $0x78] sm:$0xff]  ;;  %v229_v13 = vld [vmem:[%s1001_s1 + $0xe8] sm:$0xff]  ;;  %s619_s24 = smul.u32 24, %s1007_s16 }
   0xd   : > { %v262_v5 = vld [vmem:[%s1001_s1 + $0x1f0] sm:$0xff]  ;;  %v263_v6 = vld [vmem:[%s1001_s1 + $0x1f8] sm:$0xff]  ;;  %v318_v7 = vpack.c.bf16 %v215_v4, %v214_v2  ;;  %v212_v14 = vld [vmem:[%s1001_s1 + $0x60] sm:$0xff]  ;;  %v325_v16 = vpack.c.bf16 %v229_v13, %v228_v11 }
   0xe   : > { %v342_v8 = vpack.c.bf16 %v263_v6, %v262_v5  ;;  %v246_v9 = vld [vmem:[%s1001_s1 + $0x170] sm:$0xff]  ;;  %v247_v10 = vld [vmem:[%s1001_s1 + $0x178] sm:$0xff]  ;;  %553 = vmatprep.subr.bf16.mxu0 %v326_v3  ;;  %v213_v15 = vld [vmem:[%s1001_s1 + $0x68] sm:$0xff]  ;;  %s829_s19 = scalar_lea.vmem %s1000_s0, %s619_s24 }
   0xf   : > { %v334_v12 = vpack.c.bf16 %v247_v10, %v246_v9  ;;  %554 = vmatpush3.bf16.msra.mxu0 %v318_v7  ;;  %v317_v17 = vpack.c.bf16 %v213_v15, %v212_v14  ;;  %v260_v18 = vld [vmem:[%s1001_s1 + $0x1e0] sm:$0xff]  ;;  %v261_v19 = vld [vmem:[%s1001_s1 + $0x1e8] sm:$0xff]  ;;  %v226_v23 = vld [vmem:[%s1001_s1 + $0xd0] sm:$0xff] }
  0x10   : > { %575 = vmatprep.subr.bf16.mxu1 %v342_v8  ;;  %v244_v20 = vld [vmem:[%s1001_s1 + $0x160] sm:$0xff]  ;;  %v341_v21 = vpack.c.bf16 %v261_v19, %v260_v18  ;;  %v245_v22 = vld [vmem:[%s1001_s1 + $0x168] sm:$0xff]  ;;  %v227_v24 = vld [vmem:[%s1001_s1 + $0xd8] sm:$0xff]  ;;  %555 = vmatprep.subr.bf16.mxu0 %v325_v16 }
  0x11   : > { %576 = vmatpush3.bf16.msra.mxu1 %v334_v12  ;;  %v333_v25 = vpack.c.bf16 %v245_v22, %v244_v20  ;;  %v324_v26 = vpack.c.bf16 %v227_v24, %v226_v23  ;;  %v210_v27 = vld [vmem:[%s1001_s1 + $0x50] sm:$0xff]  ;;  %v211_v28 = vld [vmem:[%s1001_s1 + $0x58] sm:$0xff]  ;;  %v224_v35 = vld [vmem:[%s1001_s1 + $0xc0] sm:$0xff] }
  0x12   : > { %v258_v29 = vld [vmem:[%s1001_s1 + $0x1d0] sm:$0xff]  ;;  %577 = vmatprep.subr.bf16.mxu1 %v341_v21  ;;  %v259_v30 = vld [vmem:[%s1001_s1 + $0x1d8] sm:$0xff]  ;;  %v316_v33 = vpack.c.bf16 %v211_v28, %v210_v27  ;;  %v225_v36 = vld [vmem:[%s1001_s1 + $0xc8] sm:$0xff] }
  0x13   : > { %v242_v31 = vld [vmem:[%s1001_s1 + $0x150] sm:$0xff]  ;;  %v243_v32 = vld [vmem:[%s1001_s1 + $0x158] sm:$0xff]  ;;  %556 = vmatpush3.bf16.msra.mxu0 %v317_v17  ;;  %v340_v34 = vpack.c.bf16 %v259_v30, %v258_v29  ;;  %v208_v37 = vld [vmem:[%s1001_s1 + $0x40] sm:$0xff]  ;;  %v323_v39 = vpack.c.bf16 %v225_v36, %v224_v35 }
  0x14   : > { %557 = vmatprep.subr.bf16.mxu0 %v324_v26  ;;  %v332_v38 = vpack.c.bf16 %v243_v32, %v242_v31  ;;  %v209_v40 = vld [vmem:[%s1001_s1 + $0x48] sm:$0xff]  ;;  %v256_v41 = vld [vmem:[%s1001_s1 + $0x1c0] sm:$0xff]  ;;  %v222_v46 = vld [vmem:[%s1001_s1 + $0xb0] sm:$0xff] }
  0x15   : > { %578 = vmatpush3.bf16.msra.mxu1 %v333_v25  ;;  %v257_v42 = vld [vmem:[%s1001_s1 + $0x1c8] sm:$0xff]  ;;  %v240_v44 = vld [vmem:[%s1001_s1 + $0x140] sm:$0xff]  ;;  %v223_v47 = vld [vmem:[%s1001_s1 + $0xb8] sm:$0xff]  ;;  %v315_v48 = vpack.c.bf16 %v209_v40, %v208_v37 }
  0x16   : > { %579 = vmatprep.subr.bf16.mxu1 %v340_v34  ;;  %v339_v43 = vpack.c.bf16 %v257_v42, %v256_v41  ;;  %v241_v45 = vld [vmem:[%s1001_s1 + $0x148] sm:$0xff]  ;;  %v254_v49 = vld [vmem:[%s1001_s1 + $0x1b0] sm:$0xff]  ;;  %v255_v50 = vld [vmem:[%s1001_s1 + $0x1b8] sm:$0xff]  ;;  %v322_v52 = vpack.c.bf16 %v223_v47, %v222_v46 }
  0x17   : > { %558 = vmatpush3.bf16.msra.mxu0 %v316_v33  ;;  %v331_v51 = vpack.c.bf16 %v241_v45, %v240_v44  ;;  %v206_v53 = vld [vmem:[%s1001_s1 + $0x30] sm:$0xff]  ;;  %v207_v54 = vld [vmem:[%s1001_s1 + $0x38] sm:$0xff]  ;;  %v338_v56 = vpack.c.bf16 %v255_v50, %v254_v49  ;;  %v220_v58 = vld [vmem:[%s1001_s1 + $0xa0] sm:$0xff] }
  0x18   : > { %559 = vmatprep.subr.bf16.mxu0 %v323_v39  ;;  %v238_v55 = vld [vmem:[%s1001_s1 + $0x130] sm:$0xff]  ;;  %v239_v57 = vld [vmem:[%s1001_s1 + $0x138] sm:$0xff]  ;;  %v221_v59 = vld [vmem:[%s1001_s1 + $0xa8] sm:$0xff]  ;;  %v314_v62 = vpack.c.bf16 %v207_v54, %v206_v53 }
  0x19   : > { %580 = vmatpush3.bf16.msra.mxu1 %v332_v38  ;;  %v252_v60 = vld [vmem:[%s1001_s1 + $0x1a0] sm:$0xff]  ;;  %v253_v61 = vld [vmem:[%s1001_s1 + $0x1a8] sm:$0xff]  ;;  %v330_v63 = vpack.c.bf16 %v239_v57, %v238_v55  ;;  %v321_v0 = vpack.c.bf16 %v221_v59, %v220_v58  ;;  %v218_v6 = vld [vmem:[%s1001_s1 + $0x90] sm:$0xff] }
  0x1a   : > { %581 = vmatprep.subr.bf16.mxu1 %v339_v43  ;;  %v204_v1 = vld [vmem:[%s1001_s1 + $0x20] sm:$0xff]  ;;  %v205_v2 = vld [vmem:[%s1001_s1 + $0x28] sm:$0xff]  ;;  %v337_v4 = vpack.c.bf16 %v253_v61, %v252_v60  ;;  %v219_v7 = vld [vmem:[%s1001_s1 + $0x98] sm:$0xff] }
  0x1b   : > { %560 = vmatpush3.bf16.msra.mxu0 %v315_v48  ;;  %v236_v3 = vld [vmem:[%s1001_s1 + $0x120] sm:$0xff]  ;;  %v237_v5 = vld [vmem:[%s1001_s1 + $0x128] sm:$0xff]  ;;  %v250_v8 = vld [vmem:[%s1001_s1 + $0x190] sm:$0xff]  ;;  %v313_v10 = vpack.c.bf16 %v205_v2, %v204_v1  ;;  %v320_v14 = vpack.c.bf16 %v219_v7, %v218_v6 }
  0x1c   : > { %561 = vmatprep.subr.bf16.mxu0 %v322_v52  ;;  %v251_v9 = vld [vmem:[%s1001_s1 + $0x198] sm:$0xff]  ;;  %v202_v11 = vld [vmem:[%s1001_s1 + $0x10] sm:$0xff]  ;;  %v197_v12 = vld [vmem:[%s829_s19] sm:$0xff]  ;;  %v329_v13 = vpack.c.bf16 %v237_v5, %v236_v3 }
  0x1d   : > { %582 = vmatpush3.bf16.msra.mxu1 %v331_v51  ;;  %v203_v15 = vld [vmem:[%s1001_s1 + $0x18] sm:$0xff]  ;;  %v234_v16 = vld [vmem:[%s1001_s1 + $0x110] sm:$0xff]  ;;  %v299_v18 = vcombine.high %v197_v12, %v197_v12  ;;  %v336_v19 = vpack.c.bf16 %v251_v9, %v250_v8  ;;  %v216_v20 = vld [vmem:[%s1001_s1 + $0x80] sm:$0xff]  ;;  %v305_v45 = vpack.c.bf16 %v197_v12, %v197_v12 }
  0x1e   : > { %583 = vmatprep.subr.bf16.mxu1 %v338_v56  ;;  %v235_v17 = vld [vmem:[%s1001_s1 + $0x118] sm:$0xff]  ;;  %v217_v21 = vld [vmem:[%s1001_s1 + $0x88] sm:$0xff]  ;;  %v248_v23 = vld [vmem:[%s1001_s1 + $0x180] sm:$0xff]  ;;  %v312_v27 = vpack.c.bf16 %v203_v15, %v202_v11 }
  0x1f   : > { %562 = vmatpush3.bf16.msra.mxu0 %v314_v62  ;;  %v198_v22 = vld [vmem:[%s829_s19 + $0x8] sm:$0xff]  ;;  %v306_v25 = vpack.c.bf16 %v299_v18, %v299_v18  ;;  %v328_v28 = vpack.c.bf16 %v235_v17, %v234_v16  ;;  %v319_v29 = vpack.c.bf16 %v217_v21, %v216_v20  ;;  %v200_v30 = vld [vmem:[%s1001_s1] sm:$0xff]  ;;  %v294_v36 = vld [vmem:[%s1001_s1 + $0x2f0] sm:$0xff] }
  0x20   : > { %563 = vmatprep.subr.bf16.mxu0 %v321_v0  ;;  %v249_v24 = vld [vmem:[%s1001_s1 + $0x188] sm:$0xff]  ;;  %v300_v26 = vcombine.high %v198_v22, %v198_v22  ;;  %v232_v32 = vld [vmem:[%s1001_s1 + $0x100] sm:$0xff]  ;;  %v295_v37 = vld [vmem:[%s1001_s1 + $0x2f8] sm:$0xff]  ;;  %v307_v46 = vpack.c.bf16 %v198_v22, %v198_v22 }
  0x21   : > { %584 = vmatpush3.bf16.msra.mxu1 %v330_v63  ;;  %v201_v31 = vld [vmem:[%s1001_s1 + $0x8] sm:$0xff]  ;;  %v335_v34 = vpack.c.bf16 %v249_v24, %v248_v23  ;;  %398 = vmatprep.mubr.bf16.mxu0 %v306_v25  ;;  %v358_v40 = vpack.c.bf16 %v295_v37, %v294_v36  ;;  %v278_v41 = vld [vmem:[%s1001_s1 + $0x270] sm:$0xff]  ;;  %v279_v42 = vld [vmem:[%s1001_s1 + $0x278] sm:$0xff] }
  0x22   : > { %585 = vmatprep.subr.bf16.mxu1 %v337_v4  ;;  %v308_v33 = vpack.c.bf16 %v300_v26, %v300_v26  ;;  %v233_v35 = vld [vmem:[%s1001_s1 + $0x108] sm:$0xff]  ;;  %v311_v38 = vpack.c.bf16 %v201_v31, %v200_v30  ;;  %v292_v43 = vld [vmem:[%s1001_s1 + $0x2e0] sm:$0xff]  ;;  %v350_v47 = vpack.c.bf16 %v279_v42, %v278_v41  ;;  %v903_v48 = vld [vmem:[%s829_s19 + $0x10] sm:$0xff]  ;;  %s549_s19 = sshll.u32 %s1007_s16, 2 }
  0x23   : > { %564 = vmatpush3.bf16.msra.mxu0 %v313_v10  ;;  %v327_v39 = vpack.c.bf16 %v233_v35, %v232_v32  ;;  %v293_v44 = vld [vmem:[%s1001_s1 + $0x2e8] sm:$0xff]  ;;  %v276_v50 = vld [vmem:[%s1001_s1 + $0x260] sm:$0xff]  ;;  %v301_v52 = vcombine.high %v903_v48, %v903_v48  ;;  %v290_v53 = vld [vmem:[%s1001_s1 + $0x2d0] sm:$0xff]  ;;  %s195_s5 = scalar_lea.vmem %s1004_s4, %s549_s19 }
  0x24   : > { %565 = vmatprep.subr.bf16.mxu0 %v320_v14  ;;  %438 = vmatprep.mubr.bf16.mxu1 %v308_v33  ;;  %v357_v49 = vpack.c.bf16 %v293_v44, %v292_v43  ;;  %v277_v51 = vld [vmem:[%s1001_s1 + $0x268] sm:$0xff]  ;;  %v291_v54 = vld [vmem:[%s1001_s1 + $0x2d8] sm:$0xff]  ;;  %v274_v58 = vld [vmem:[%s1001_s1 + $0x250] sm:$0xff] }
  0x25   : > { %586 = vmatpush3.bf16.msra.mxu1 %v329_v13  ;;  %v310_v55 = vpack.c.bf16 %v301_v52, %v301_v52  ;;  %v349_v56 = vpack.c.bf16 %v277_v51, %v276_v50  ;;  %v356_v57 = vpack.c.bf16 %v291_v54, %v290_v53  ;;  %v275_v59 = vld [vmem:[%s1001_s1 + $0x258] sm:$0xff]  ;;  %v288_v60 = vld [vmem:[%s1001_s1 + $0x2c0] sm:$0xff]  ;;  %v289_v61 = vld [vmem:[%s1001_s1 + $0x2c8] sm:$0xff] }
  0x26   : > { %587 = vmatprep.subr.bf16.mxu1 %v336_v19  ;;  %v348_v62 = vpack.c.bf16 %v275_v59, %v274_v58  ;;  %v355_v63 = vpack.c.bf16 %v289_v61, %v288_v60  ;;  %v272_v0 = vld [vmem:[%s1001_s1 + $0x240] sm:$0xff]  ;;  %v273_v1 = vld [vmem:[%s1001_s1 + $0x248] sm:$0xff]  ;;  %v286_v2 = vld [vmem:[%s1001_s1 + $0x2b0] sm:$0xff] }
  0x27   : > { %566 = vmatpush3.bf16.msra.mxu0 %v312_v27  ;;  %v287_v3 = vld [vmem:[%s1001_s1 + $0x2b8] sm:$0xff]  ;;  %v347_v4 = vpack.c.bf16 %v273_v1, %v272_v0  ;;  %v270_v6 = vld [vmem:[%s1001_s1 + $0x230] sm:$0xff]  ;;  %v284_v8 = vld [vmem:[%s1001_s1 + $0x2a0] sm:$0xff]  ;;  %v309_v27 = vpack.c.bf16 %v903_v48, %v903_v48 }
  0x28   : > { %567 = vmatprep.subr.bf16.mxu0 %v319_v29  ;;  %v354_v5 = vpack.c.bf16 %v287_v3, %v286_v2  ;;  %v271_v7 = vld [vmem:[%s1001_s1 + $0x238] sm:$0xff]  ;;  %v285_v9 = vld [vmem:[%s1001_s1 + $0x2a8] sm:$0xff]  ;;  %v268_v12 = vld [vmem:[%s1001_s1 + $0x220] sm:$0xff] }
  0x29   : > { %588 = vmatpush3.bf16.msra.mxu1 %v328_v28  ;;  %v346_v10 = vpack.c.bf16 %v271_v7, %v270_v6  ;;  %v353_v11 = vpack.c.bf16 %v285_v9, %v284_v8  ;;  %v269_v13 = vld [vmem:[%s1001_s1 + $0x228] sm:$0xff]  ;;  %v282_v14 = vld [vmem:[%s1001_s1 + $0x290] sm:$0xff]  ;;  %v283_v15 = vld [vmem:[%s1001_s1 + $0x298] sm:$0xff] }
  0x2a   : > { %589 = vmatprep.subr.bf16.mxu1 %v335_v34  ;;  %v345_v16 = vpack.c.bf16 %v269_v13, %v268_v12  ;;  %v352_v17 = vpack.c.bf16 %v283_v15, %v282_v14  ;;  %v266_v18 = vld [vmem:[%s1001_s1 + $0x210] sm:$0xff]  ;;  %v267_v19 = vld [vmem:[%s1001_s1 + $0x218] sm:$0xff]  ;;  %v280_v20 = vld [vmem:[%s1001_s1 + $0x280] sm:$0xff] }
  0x2b   : > { %568 = vmatpush3.bf16.msra.mxu0 %v311_v38  ;;  %v281_v21 = vld [vmem:[%s1001_s1 + $0x288] sm:$0xff]  ;;  %v344_v22 = vpack.c.bf16 %v267_v19, %v266_v18  ;;  %v264_v24 = vld [vmem:[%s1001_s1 + $0x200] sm:$0xff] }
  0x2c   : > { %597 = vmatprep.subr.bf16.mxu0 %v358_v40  ;;  %v351_v23 = vpack.c.bf16 %v281_v21, %v280_v20  ;;  %v265_v25 = vld [vmem:[%s1001_s1 + $0x208] sm:$0xff]  ;;  %v550_v37 = vld [vmem:[%s1002_s2] ss:$0 sm:$0xff] }
  0x2d   : > { %590 = vmatpush3.bf16.msra.mxu1 %v327_v39  ;;  %v343_v26 = vpack.c.bf16 %v265_v25, %v264_v24  ;;  %v486_v44 = vld [vmem:[%s1003_s3] sm:$0xf] }
  0x2e   : > { %399 = vmatmul.mubr.bf16.vlgmr.msra.gmra.mxu0 %v305_v45 }
  0x2f   : > { %598 = vmatpush3.bf16.msra.mxu0 %v350_v47  ;;  %478 = vmatprep.mubr.bf16.mxu0 %v310_v55 }
  0x30   : > { %439 = vmatmul.mubr.bf16.vlgmr.msra.gmra.mxu1 %v307_v46  ;;  %599 = vmatprep.subr.bf16.mxu0 %v357_v49 }
  0x33   : > { %600 = vmatpush3.bf16.msra.mxu0 %v349_v56 }
  0x34   : > { %601 = vmatprep.subr.bf16.mxu0 %v356_v57 }
  0x37   : > { %602 = vmatpush3.bf16.msra.mxu0 %v348_v62 }
  0x38   : > { %603 = vmatprep.subr.bf16.mxu0 %v355_v63 }
  0x3b   : > { %604 = vmatpush3.bf16.msra.mxu0 %v347_v4 }
  0x3c   : > { %605 = vmatprep.subr.bf16.mxu0 %v354_v5 }
  0x3f   : > { %606 = vmatpush3.bf16.msra.mxu0 %v346_v10 }
  0x40   : > { %607 = vmatprep.subr.bf16.mxu0 %v353_v11 }
  0x43   : > { %608 = vmatpush3.bf16.msra.mxu0 %v345_v16 }
  0x44   : > { %609 = vmatprep.subr.bf16.mxu0 %v352_v17 }
  0x47   : > { %610 = vmatpush3.bf16.msra.mxu0 %v344_v22 }
  0x48   : > { %611 = vmatprep.subr.bf16.mxu0 %v351_v23 }
  0x4b   : > { %612 = vmatpush3.bf16.msra.mxu0 %v343_v26 }
  0x4e   : > { %479 = vmatmul.mubr.bf16.vlgmr.msra.gmra.mxu0 %v309_v27 }
  0xee   : > { %v569_v28 = vpop.f32.mrf.mxu0 }
  0xf0   : > { %v591_v29 = vpop.f32.mrf.mxu1  ;;  %v570_v30 = vpop.f32.mrf.mxu0 }
  0xf1   : > { %v571_v36 = vadd.f32 %v570_v30, %v569_v28 }
  0xf2   : > { %v592_v31 = vpop.f32.mrf.mxu1  ;;  %v572_v32 = vpop.f32.mrf.mxu0 }
  0xf3   : > { %v401_v38 = vadd.f32 %v571_v36, %v550_v37  ;;  %v593_v39 = vadd.f32 %v592_v31, %v591_v29 }
  0xf4   : > { %v594_v33 = vpop.f32.mrf.mxu1  ;;  %v573_v34 = vpop.f32.mrf.mxu0 }
  0xf5   : > { %v441_v42 = vadd.f32 %v593_v39, %v401_v38 }
  0xf6   : > { %v595_v35 = vpop.f32.mrf.mxu1 }
 0x10e   : > { %v613_v40 = vpop.f32.mrf.mxu0 }
 0x110   : > { %v614_v41 = vpop.f32.mrf.mxu0 }
 0x111   : > { %v615_v43 = vadd.f32 %v614_v41, %v613_v40 }
 0x112   : > { %v616_v45 = vpop.f32.mrf.mxu0 }
 0x113   : > { %v481_v46 = vadd.f32 %v615_v43, %v441_v42 }
 0x114   : > { %v617_v47 = vpop.f32.mrf.mxu0 }
 0x115   : > { %v487_v48 = vadd.f32 %v486_v44, %v481_v46 }
 0x117   : > { %489 = vst.msk [vmem:[%s195_s5] sm:$0xf] %vm488_vm0, %v487_v48 }
 0x118 PF: > { %s14_s15 = sadd.s32 1, %s637_s15  }
 0x119   : > { %p11_p4 = scmp.ge.s32.totalorder %s14_s15, 4  }
 0x11b   :  { %13 = sbr.rel (!%p11_p4) target bundleno = 1 (0x1), region = 66 }

// kernel: vl_transformer_itm_forward.9
= control target key start
LH: loop header
LB: loop body
LE: loop exit
PB: predicated region body
PF: predicated region fallthrough
CT: control target
= control target key end

     0   :  { %s3193_s0 = inlined_call_operand.vmem [shape: f32[2,5,32], index: 0, kind: input, shape index: {}]   ;;  %s3194_s1 = inlined_call_operand.vmem [shape: f32[4,32,8], index: 1, kind: input, shape index: {}]   ;;  %s3195_s2 = inlined_call_operand.vmem [shape: f32[4,1,8], index: 2, kind: input, shape index: {}]   ;;  %s3196_s3 = inlined_call_operand.vmem [shape: f32[4,32,8], index: 3, kind: input, shape index: {}]   ;;  %s3197_s4 = inlined_call_operand.vmem [shape: f32[4,1,8], index: 4, kind: input, shape index: {}]   ;;  %s3198_s5 = inlined_call_operand.vmem [shape: f32[4,32,8], index: 5, kind: input, shape index: {}]   ;;  %s3199_s6 = inlined_call_operand.vmem [shape: f32[4,1,8], index: 6, kind: input, shape index: {}]   ;;  %s3200_s7 = inlined_call_operand.vmem [shape: f32[4,8,32], index: 7, kind: input, shape index: {}]   ;;  %s3201_s8 = inlined_call_operand.vmem [shape: f32[1,32], index: 8, kind: input, shape index: {}]   ;;  %s3202_s9 = inlined_call_operand.vmem [shape: f32[1,32], index: 9, kind: input, shape index: {}]   ;;  %s3203_s10 = inlined_call_operand.vmem [shape: f32[1,32], index: 10, kind: input, shape index: {}]   ;;  %s3204_s11 = inlined_call_operand.vmem [shape: f32[1,32], index: 11, kind: input, shape index: {}]   ;;  %s3205_s12 = inlined_call_operand.vmem [shape: f32[1,32], index: 12, kind: input, shape index: {}]   ;;  %s3206_s13 = inlined_call_operand.vmem [shape: f32[32,128], index: 13, kind: input, shape index: {}]   ;;  %s3207_s14 = inlined_call_operand.vmem [shape: f32[1,128], index: 14, kind: input, shape index: {}]   ;;  %s3208_s15 = inlined_call_operand.vmem [shape: f32[128,32], index: 15, kind: input, shape index: {}]   ;;  %s3209_s16 = inlined_call_operand.vmem [shape: f32[1,32], index: 16, kind: input, shape index: {}]   ;;  %s3210_s17 = inlined_call_operand.vmem [shape: f32[1,32], index: 17, kind: input, shape index: {}]   ;;  %s3211_s18 = inlined_call_operand.vmem [shape: f32[1,32], index: 18, kind: input, shape index: {}]   ;;  %s3212_s19 = inlined_call_operand.vmem [shape: f32[2,5,32], index: 19, kind: output, shape index: {}]  }
   0x1   :  { %3217 = sst [smem:[#allocation2_spill]] %s3193_s0  ;;  %s2708_s0 = smov 0  }
   0x2   :  { %3218 = sst [smem:[#allocation3_spill]] %s3194_s1 }
   0x3   :  { %3219 = sst [smem:[#allocation4_spill]] %s3195_s2 }
   0x4   :  { %3220 = sst [smem:[#allocation5_spill]] %s3196_s3 }
   0x5 LB: > { %s2191_s30 = sadd.s32 4294967295, %s2603_s0   ;;  %p2195_p0 = scmp.ge.s32.totalorder %s2603_s0, 1  ;;  %s2603_s0 = sphi %s2708_s0, %s29_s0  }
   0x6   : > { %p536_p1 = scmp.lt.s32.totalorder %s2603_s0, 3 }
   0x8   : > { %p537_p2 = pnand %p2195_p0, %p536_p1 }
   0x9   : > { %p590_p3 = scmp.lt.s32.totalorder (!%p537_p2), %s2191_s30, 1  ;;  %s3221_s22 = sld [smem:[#allocation2_spill]] (!%p537_p2) }
   0xa   : > { %540 = sbr.rel (%p537_p2) target bundleno = 5036 (0x13ac), region = 96  ;;  %s3222_s25 = sld [smem:[#allocation3_spill]] (!%p537_p2) }
   0xb   : > { %s3223_s26 = sld [smem:[#allocation5_spill]] (!%p537_p2) }
   0xc   : > { %s3224_s24 = sld [smem:[#allocation4_spill]] (!%p537_p2) }
   0xf   : > { %s3227_s30 = smov (!%p590_p3, %s2191_s30), 1  ;;  %vm602_vm0 = vcmask 258048   ;;  %v2605_v10 = vmov 0.0   ;;  %vm2606_vm1 = vmmov 0   ;;  %v2198_v18 = vld [vmem:[%s3202_s9] ss:$0 sm:$0xff] }
  0x10   : > { %s3216_s20 = sshll.u32 %s3227_s30, 3  ;;  %v633_v7 = vld [vmem:[%s3222_s25 + $0x10] sm:$0xff]  ;;  %v634_v8 = vld [vmem:[%s3222_s25 + $0x18] sm:$0xff]  ;;  %2366 = vmatprep.subr.bf16.mxu0 %v2605_v10  ;;  %2390 = vmatprep.subr.bf16.mxu1 %v2605_v10  ;;  %v631_v11 = vld [vmem:[%s3222_s25] sm:$0xff]  ;;  %vm645_vm2 = vcmask 261120   ;;  %vm797_vm3 = vcmask 64512  }
  0x11   : > { %s593_s2 = scalar_lea.vmem %s3221_s22, %s3216_s20  ;;  %v637_v9 = vpack.c.bf16 %v634_v8, %v633_v7  ;;  %v632_v12 = vld [vmem:[%s3222_s25 + $0x8] sm:$0xff]  ;;  %2370 = vmatprep.mubr.msk.bf16.mxu0 %vm2606_vm1, %v2605_v10  ;;  %2392 = vmatprep.mubr.msk.bf16.mxu1 %vm2606_vm1, %v2605_v10  ;;  %v2199_v20 = vld [vmem:[%s3203_s10] ss:$0 sm:$0xff]  ;;  %v691_v22 = vld [vmem:[%s3223_s26 + $0x10] sm:$0xff]  ;;  %vm863_vm4 = vcmask 1041408   ;;  %vm864_vm5 = vcmask 1042432  }
  0x12   : > { %v2724_v0 = vld [vmem:[%s593_s2] sm:$0x1f]  ;;  %v636_v13 = vpack.c.bf16 %v632_v12, %v631_v11  ;;  %v692_v23 = vld [vmem:[%s3223_s26 + $0x18] sm:$0xff]  ;;  %v690_v28 = vld [vmem:[%s3223_s26 + $0x8] sm:$0xff]  ;;  %v2607_v51 = vmov 65535   ;;  %vm845_vm6 = vcmask 36864  }
  0x13   : > { %v603_v1 = vsel %vm602_vm0, %v2724_v0, 0.0  ;;  %2367 = vmatpush3.bf16.msra.mxu0 %v637_v9  ;;  %v694_v25 = vpack.c.bf16 %v692_v23, %v691_v22  ;;  %v689_v27 = vld [vmem:[%s3223_s26] sm:$0xff]  ;;  %v744_v30 = vld [vmem:[%s3198_s5 + $0x10] sm:$0xff]  ;;  %v745_v31 = vld [vmem:[%s3198_s5 + $0x18] sm:$0xff]  ;;  %v865_v52 = vsel %vm863_vm4, 4294967295, %v2607_v51  ;;  %vm859_vm7 = vcmask 39936  }
  0x14   : > { %604 = vadd.xlane.f32.xlu0 %v603_v1  ;;  %2368 = vmatprep.subr.bf16.mxu0 %v2605_v10  ;;  %v693_v29 = vpack.c.bf16 %v690_v28, %v689_v27  ;;  %v747_v32 = vpack.c.bf16 %v745_v31, %v744_v30  ;;  %v742_v33 = vld [vmem:[%s3198_s5] sm:$0xff]  ;;  %v743_v34 = vld [vmem:[%s3198_s5 + $0x8] sm:$0xff]  ;;  %v2210_v53 = vld [vmem:[%s3222_s25 + $0x30] sm:$0xff]  ;;  %v2815_v57 = vsel %vm864_vm5, %v865_v52, 0  ;;  %vm1193_vm8 = vcmask 1043456   ;;  %s3225_s2 = sshll.u32 %s3227_s30, 3 }
  0x15   : > { %v746_v35 = vpack.c.bf16 %v743_v34, %v742_v33  ;;  %v2202_v40 = vld [vmem:[%s3197_s4] ss:$0 sm:$0xff]  ;;  %v2211_v54 = vld [vmem:[%s3222_s25 + $0x38] sm:$0xff]  ;;  %v2209_v63 = vld [vmem:[%s3222_s25 + $0x28] sm:$0xff]  ;;  %s597_s27 = scalar_lea.vmem %s3212_s19, %s3225_s2 }
  0x16   : > { %v2200_v45 = vld [vmem:[%s3224_s24] ss:$0 sm:$0xff]  ;;  %v919_v59 = vpack.c.bf16 %v2211_v54, %v2210_v53  ;;  %v2223_v9 = vld [vmem:[%s3198_s5 + $0x28] sm:$0xff]  ;;  %v2227_v22 = vld [vmem:[%s3199_s6 + $0x1] ss:$0 sm:$0xff] }
  0x17   : > { %2369 = vmatpush3.bf16.msra.mxu0 %v636_v13  ;;  %v2204_v49 = vld [vmem:[%s3199_s6] ss:$0 sm:$0xff] }
  0x18   : > { %2374 = vmatprep.subr.bf16.mxu0 %v2605_v10  ;;  %v2208_v62 = vld [vmem:[%s3222_s25 + $0x20] sm:$0xff] }
  0x19   : > { %v2222_v8 = vld [vmem:[%s3198_s5 + $0x20] sm:$0xff] }
  0x1a   : > { %v1028_v11 = vpack.c.bf16 %v2223_v9, %v2222_v8 }
  0x9d   : > { %v605_v2 = vpop.xlane.xlu0 %604 }
  0x9e   : > { %v607_v3 = vmul.f32 0.03125, %v605_v2 }
  0xa0   : > { %v608_v4 = vsub.f32 %v2724_v0, %v607_v3 }
  0xa2   : > { %v609_v5 = vmul.f32 %v608_v4, %v608_v4 }
  0xa4   : > { %v610_v6 = vsel %vm602_vm0, %v609_v5, 0.0  ;;  %v2224_v5 = vld [vmem:[%s3198_s5 + $0x30] sm:$0xff] }
  0xa5   : > { %611 = vadd.xlane.f32.xlu0 %v610_v6  ;;  %v2225_v6 = vld [vmem:[%s3198_s5 + $0x38] sm:$0xff] }
  0xa6   : > { %v1029_v7 = vpack.c.bf16 %v2225_v6, %v2224_v5 }
 0x12e   : > { %v612_v14 = vpop.xlane.xlu0 %611 }
 0x12f   : > { %v613_v15 = vmul.f32 0.03125, %v612_v14 }
 0x131   : > { %v614_v16 = vadd.f32 1e-06, %v613_v15 }
 0x133   : > { %2573 = vrsqrt.f32 %v614_v16 }
 0x140   : > { %v2574_v17 = vpop.eup %2573 }
 0x141   : > { %v616_v19 = vmul.f32 %v2574_v17, %v608_v4  ;;  %v918_v4 = vpack.c.bf16 %v2209_v63, %v2208_v62 }
 0x143   : > { %v623_v21 = vmul.f32 %v2198_v18, %v616_v19 }
 0x145   : > { %v630_v24 = vadd.f32 %v2199_v20, %v623_v21 }
 0x147   : > { %v2762_v26 = vpack.c.bf16 %v630_v24, %v630_v24 }
 0x149   : > { %2371 = vmatmul.mubr.msk.bf16.vlgmr.msra.gmra.mxu0 %vm645_vm2, %v2762_v26 }
 0x14a   : > { %2375 = vmatpush3.bf16.msra.mxu0 %v694_v25  ;;  %2378 = vmatprep.mubr.msk.bf16.mxu0 %vm2606_vm1, %v2605_v10 }
 0x14b   : > { %2376 = vmatprep.subr.bf16.mxu0 %v2605_v10 }
 0x14e   : > { %2377 = vmatpush3.bf16.msra.mxu0 %v693_v29 }
 0x14f   : > { %2382 = vmatprep.subr.bf16.mxu0 %v2605_v10 }
 0x151   : > { %2379 = vmatmul.mubr.msk.bf16.vlgmr.msra.gmra.mxu0 %vm645_vm2, %v2762_v26 }
 0x152   : > { %2383 = vmatpush3.bf16.msra.mxu0 %v747_v32  ;;  %2386 = vmatprep.mubr.msk.bf16.mxu0 %vm2606_vm1, %v2605_v10 }
 0x153   : > { %2384 = vmatprep.subr.bf16.mxu0 %v2605_v10 }
 0x156   : > { %2385 = vmatpush3.bf16.msra.mxu0 %v746_v35 }
 0x157   : > { %2396 = vmatprep.subr.bf16.mxu0 %v2605_v10 }
 0x159   : > { %2387 = vmatmul.mubr.msk.bf16.vlgmr.msra.gmra.mxu0 %vm645_vm2, %v2762_v26 }
 0x15a   : > { %2398 = vmatprep.mubr.msk.bf16.mxu0 %vm2606_vm1, %v2605_v10 }
 0x209   : > { %v683_v36 = vpop.f32.mrf.mxu0 }
 0x20a   : > { %v684_v50 = vadd.f32 %v2200_v45, %v683_v36 }
 0x20b   : > { %v2372_v37 = vpop.f32.mrf.mxu0 }
 0x20c   : > { %v795_v60 = vpack.c.bf16 %v684_v50, %v684_v50  ;;  %v2217_v37 = vld [vmem:[%s3223_s26 + $0x30] sm:$0xff]  ;;  %v2220_v50 = vld [vmem:[%s3197_s4 + $0x1] ss:$0 sm:$0xff] }
 0x20d   : > { %v686_v38 = vpop.f32.mrf.mxu0 }
 0x20e   : > { %v2218_v38 = vld [vmem:[%s3223_s26 + $0x38] sm:$0xff] }
 0x20f   : > { %v2373_v39 = vpop.f32.mrf.mxu0 }
 0x211   : > { %v736_v41 = vpop.f32.mrf.mxu0 }
 0x212   : > { %v737_v42 = vadd.f32 %v2202_v40, %v736_v41  ;;  %v974_v41 = vpack.c.bf16 %v2218_v38, %v2217_v37 }
 0x213   : > { %v2380_v43 = vpop.f32.mrf.mxu0 }
 0x214   : > { %v796_v44 = vpack.c.bf16 %v737_v42, %v737_v42  ;;  %v2215_v43 = vld [vmem:[%s3223_s26 + $0x20] sm:$0xff] }
 0x215   : > { %v739_v46 = vpop.f32.mrf.mxu0 }
 0x216   : > { %v802_v47 = vsel %vm797_vm3, %v796_v44, 0  ;;  %v2216_v44 = vld [vmem:[%s3223_s26 + $0x28] sm:$0xff] }
 0x217   : > { %v2381_v48 = vpop.f32.mrf.mxu0  ;;  %2391 = vmatpush3.bf16.xpose.msra.mxu1 %v802_v47  ;;  %v973_v45 = vpack.c.bf16 %v2216_v44, %v2215_v43  ;;  %v2248_v44 = vld [vmem:[%s3198_s5 + $0x40] sm:$0xff] }
 0x218   : > { %2402 = vmatprep.subr.bf16.mxu1 %v2605_v10 }
 0x219   : > { %v789_v55 = vpop.f32.mrf.mxu0 }
 0x21a   : > { %v790_v56 = vadd.f32 %v2204_v49, %v789_v55  ;;  %v2213_v55 = vld [vmem:[%s3224_s24 + $0x1] ss:$0 sm:$0xff] }
 0x21b   : > { %v2388_v58 = vpop.f32.mrf.mxu0 }
 0x21c   : > { %v858_v61 = vpack.c.bf16 %v790_v56, %v790_v56 }
 0x21d   : > { %v792_v1 = vpop.f32.mrf.mxu0 }
 0x21e   : > { %v868_v2 = vand.u32 %v2815_v57, %v858_v61  ;;  %2393 = vmatmul.mubr.msk.bf16.vlgmr.msra.gmra.mxu1 %vm797_vm3, %v795_v60 }
 0x21f   : > { %v2389_v3 = vpop.f32.mrf.mxu0  ;;  %2403 = vmatpush3.bf16.msra.mxu1 %v919_v59  ;;  %2406 = vmatprep.mubr.msk.bf16.mxu1 %vm2606_vm1, %v2605_v10 }
 0x220   : > { %2397 = vmatpush3.bf16.msra.mxu0 %v868_v2  ;;  %2404 = vmatprep.subr.bf16.mxu1 %v2605_v10 }
 0x221   : > { %2410 = vmatprep.subr.bf16.mxu0 %v2605_v10 }
 0x223   : > { %2405 = vmatpush3.bf16.msra.mxu1 %v918_v4 }
 0x224   : > { %2418 = vmatprep.subr.bf16.mxu1 %v2605_v10 }
 0x226   : > { %2407 = vmatmul.mubr.msk.bf16.vlgmr.msra.gmra.mxu1 %vm645_vm2, %v2762_v26 }
 0x227   : > { %2419 = vmatpush3.bf16.msra.mxu1 %v1029_v7  ;;  %2422 = vmatprep.mubr.msk.bf16.mxu1 %vm2606_vm1, %v2605_v10 }
 0x228   : > { %2420 = vmatprep.subr.bf16.mxu1 %v2605_v10 }
 0x22b   : > { %2421 = vmatpush3.bf16.msra.mxu1 %v1028_v11  ;;  %v2231_v11 = vld [vmem:[%s3200_s7 + $0x8] sm:$0xff] }
 0x22c   : > { %2432 = vmatprep.subr.bf16.mxu1 %v2605_v10 }
 0x22e   : > { %2423 = vmatmul.mubr.msk.bf16.vlgmr.msra.gmra.mxu1 %vm645_vm2, %v2762_v26 }
 0x22f   : > { %2434 = vmatprep.mubr.msk.bf16.mxu1 %vm2606_vm1, %v2605_v10 }
 0x2de   : > { %v838_v12 = vpop.f32.mrf.mxu1 }
 0x2df   : > { %v844_v13 = vmul.f32 0.35355338, %v838_v12  ;;  %v1189_v12 = vpack.c.bf16 %v2231_v11, %v2231_v11 }
 0x2e0   : > { %v2394_v14 = vpop.f32.mrf.mxu1 }
 0x2e1   : > { %v846_v15 = vsel %vm845_vm6, %v844_v13, -inf }
 0x2e2   : > { %847 = vmax.xlane.f32.xlu1 %v846_v15  ;;  %v841_v16 = vpop.f32.mrf.mxu1  ;;  %v910_v15 = vld [vmem:[%s3200_s7] sm:$0xff] }
 0x2e3   : > { %v912_v16 = vpack.c.bf16 %v910_v15, %v910_v15 }
 0x2e4   : > { %v2395_v17 = vpop.f32.mrf.mxu1 }
 0x2e6   : > { %v962_v18 = vpop.f32.mrf.mxu1 }
 0x2e7   : > { %v963_v60 = vadd.f32 %v2213_v55, %v962_v18 }
 0x2e8   : > { %v2408_v19 = vpop.f32.mrf.mxu1 }
 0x2e9   : > { %v1078_v61 = vpack.c.bf16 %v963_v60, %v963_v60 }
 0x2ea   : > { %v965_v20 = vpop.f32.mrf.mxu1 }
 0x2eb   : > { %v1241_v20 = vsel %vm1193_vm8, %v912_v16, 0 }
 0x2ec   : > { %v2409_v21 = vpop.f32.mrf.mxu1 }
 0x2ed   : > { %v2243_v21 = vld [vmem:[%s3223_s26 + $0x50] sm:$0xff] }
 0x2ee   : > { %v1072_v23 = vpop.f32.mrf.mxu1 }
 0x2ef   : > { %v1073_v24 = vadd.f32 %v2227_v22, %v1072_v23  ;;  %v2244_v22 = vld [vmem:[%s3223_s26 + $0x58] sm:$0xff] }
 0x2f0   : > { %v2424_v25 = vpop.f32.mrf.mxu1  ;;  %v1344_v23 = vpack.c.bf16 %v2244_v22, %v2243_v21 }
 0x2f1   : > { %v1139_v27 = vpack.c.bf16 %v1073_v24, %v1073_v24  ;;  %v2241_v25 = vld [vmem:[%s3223_s26 + $0x40] sm:$0xff] }
 0x2f2   : > { %v1075_v28 = vpop.f32.mrf.mxu1 }
 0x2f3   : > { %v1144_v29 = vand.u32 %v1139_v27, %v2815_v57  ;;  %v2242_v27 = vld [vmem:[%s3223_s26 + $0x48] sm:$0xff] }
 0x2f4   : > { %v2425_v30 = vpop.f32.mrf.mxu1  ;;  %v1343_v28 = vpack.c.bf16 %v2242_v27, %v2241_v25 }
 0x2f5   : > { %2433 = vmatpush3.bf16.msra.mxu1 %v1144_v29  ;;  %v2236_v29 = vld [vmem:[%s3222_s25 + $0x50] sm:$0xff]  ;;  %v2237_v30 = vld [vmem:[%s3222_s25 + $0x58] sm:$0xff] }
 0x2f6   : > { %2444 = vmatprep.subr.bf16.mxu1 %v2605_v10 }
 0x36b   : > { %v848_v31 = vpop.xlane.xlu1 %847 }
 0x36c   : > { %v849_v32 = vsub.f32 %v844_v13, %v848_v31  ;;  %v1195_v13 = vsel %vm1193_vm8, %v1189_v12, 0 }
 0x36e   : > { %v850_v33 = vmul.f32 1.442695, %v849_v32  ;;  %v1289_v32 = vpack.c.bf16 %v2237_v30, %v2236_v29 }
 0x370   : > { %2575 = vpow2.f32 %v850_v33 }
 0x37d   : > { %v2576_v34 = vpop.eup %2575 }
 0x37e   : > { %v852_v35 = vsel %vm845_vm6, %v2576_v34, 0.0 }
 0x37f   : > { %853 = vadd.xlane.f32.xlu1 %v852_v35  ;;  %v2235_v35 = vld [vmem:[%s3222_s25 + $0x48] sm:$0xff] }
 0x408   : > { %v854_v36 = vpop.xlane.xlu1 %853 }
 0x409   : > { %2577 = vrcp.f32 %v854_v36 }
 0x416   : > { %v2578_v39 = vpop.eup %2577 }
 0x417   : > { %v856_v40 = vmul.f32 %v2578_v39, %v2576_v34  ;;  %v2234_v34 = vld [vmem:[%s3222_s25 + $0x40] sm:$0xff]  ;;  %v2250_v39 = vld [vmem:[%s3198_s5 + $0x50] sm:$0xff] }
 0x418   : > { %v1288_v38 = vpack.c.bf16 %v2235_v35, %v2234_v34 }
 0x419   : > { %v857_v42 = vpack.c.bf16 %v856_v40, %v856_v40  ;;  %v2251_v40 = vld [vmem:[%s3198_s5 + $0x58] sm:$0xff] }
 0x41a   : > { %v1399_v43 = vpack.c.bf16 %v2251_v40, %v2250_v39  ;;  %v2260_v39 = vld [vmem:[%s3222_s25 + $0x68] sm:$0xff] }
 0x41b   : > { %2399 = vmatmul.mubr.msk.bf16.vlgmr.msra.gmra.mxu0 %vm859_vm7, %v857_v42 }
 0x41c   : > { %2411 = vmatpush3.bf16.msra.mxu0 %v974_v41  ;;  %2414 = vmatprep.mubr.msk.bf16.mxu0 %vm2606_vm1, %v2605_v10 }
 0x41d   : > { %2412 = vmatprep.subr.bf16.mxu0 %v2605_v10 }
 0x420   : > { %2413 = vmatpush3.bf16.msra.mxu0 %v973_v45  ;;  %v2249_v45 = vld [vmem:[%s3198_s5 + $0x48] sm:$0xff] }
 0x421   : > { %2426 = vmatprep.subr.bf16.mxu0 %v2605_v10 }
 0x423   : > { %2415 = vmatmul.mubr.msk.bf16.vlgmr.msra.gmra.mxu0 %vm645_vm2, %v2762_v26 }
 0x424   : > { %2428 = vmatprep.mubr.msk.bf16.mxu0 %vm2606_vm1, %v2605_v10 }
 0x4db   : > { %v904_v46 = vpop.f32.mrf.mxu0 }
 0x4dc   : > { %v911_v24 = vpack.c.bf16 %v904_v46, %v904_v46 }
 0x4dd   : > { %v2400_v47 = vpop.f32.mrf.mxu0 }
 0x4df   : > { %v907_v48 = vpop.f32.mrf.mxu0 }
 0x4e0   : > { %v1398_v48 = vpack.c.bf16 %v2249_v45, %v2248_v44  ;;  %v2273_v45 = vld [vmem:[%s3198_s5 + $0x60] sm:$0xff] }
 0x4e1   : > { %v2401_v49 = vpop.f32.mrf.mxu0 }
 0x4e3   : > { %v1017_v51 = vpop.f32.mrf.mxu0 }
 0x4e4   : > { %v1018_v52 = vadd.f32 %v2220_v50, %v1017_v51  ;;  %v2246_v50 = vld [vmem:[%s3197_s4 + $0x2] ss:$0 sm:$0xff] }
 0x4e5   : > { %v2416_v53 = vpop.f32.mrf.mxu0 }
 0x4e6   : > { %v1079_v54 = vpack.c.bf16 %v1018_v52, %v1018_v52 }
 0x4e7   : > { %v1020_v56 = vpop.f32.mrf.mxu0 }
 0x4e8   : > { %v1084_v58 = vsel %vm797_vm3, %v1079_v54, 0 }
 0x4e9   : > { %v2417_v59 = vpop.f32.mrf.mxu0  ;;  %2427 = vmatpush3.bf16.xpose.msra.mxu0 %v1084_v58 }
 0x4ea   : > { %2438 = vmatprep.subr.bf16.mxu0 %v2605_v10 }
 0x4f0   : > { %2429 = vmatmul.mubr.msk.bf16.vlgmr.msra.gmra.mxu0 %vm797_vm3, %v1078_v61 }
 0x4f1   : > { %2440 = vmatprep.mubr.msk.bf16.mxu0 %vm2606_vm1, %v2605_v10  ;;  %2439 = vmatpush3.bf16.msra.mxu0 %v1195_v13 }
 0x4f2   : > { %2450 = vmatprep.subr.bf16.mxu0 %v2605_v10 }
 0x5b0   : > { %v1120_v62 = vpop.f32.mrf.mxu0 }
 0x5b1   : > { %v1126_v63 = vmul.f32 0.35355338, %v1120_v62 }
 0x5b2   : > { %v2430_v1 = vpop.f32.mrf.mxu0 }
 0x5b3   : > { %v1127_v2 = vsel %vm845_vm6, %v1126_v63, -inf }
 0x5b4   : > { %1128 = vmax.xlane.f32.xlu0 %v1127_v2  ;;  %v1123_v3 = vpop.f32.mrf.mxu0 }
 0x5b6   : > { %v2431_v4 = vpop.f32.mrf.mxu0 }
 0x63d   : > { %v1129_v5 = vpop.xlane.xlu0 %1128 }
 0x63e   : > { %v1130_v6 = vsub.f32 %v1126_v63, %v1129_v5  ;;  %v2239_v63 = vld [vmem:[%s3224_s24 + $0x2] ss:$0 sm:$0xff] }
 0x640   : > { %v1131_v7 = vmul.f32 1.442695, %v1130_v6 }
 0x642   : > { %2579 = vpow2.f32 %v1131_v7  ;;  %v2253_v7 = vld [vmem:[%s3199_s6 + $0x2] ss:$0 sm:$0xff] }
 0x64f   : > { %v2580_v8 = vpop.eup %2579 }
 0x650   : > { %v1133_v9 = vsel %vm845_vm6, %v2580_v8, 0.0 }
 0x651   : > { %1134 = vadd.xlane.f32.xlu1 %v1133_v9 }
 0x6da   : > { %v1135_v14 = vpop.xlane.xlu1 %1134 }
 0x6db   : > { %2581 = vrcp.f32 %v1135_v14 }
 0x6e8   : > { %v2582_v17 = vpop.eup %2581 }
 0x6e9   : > { %v1137_v18 = vmul.f32 %v2582_v17, %v2580_v8 }
 0x6eb   : > { %v1138_v19 = vpack.c.bf16 %v1137_v18, %v1137_v18 }
 0x6ed   : > { %2435 = vmatmul.mubr.msk.bf16.vlgmr.msra.gmra.mxu1 %vm859_vm7, %v1138_v19 }
 0x6ee   : > { %2445 = vmatpush3.bf16.msra.mxu1 %v1241_v20  ;;  %2446 = vmatprep.mubr.msk.bf16.mxu1 %vm2606_vm1, %v2605_v10 }
 0x6ef   : > { %2458 = vmatprep.subr.bf16.mxu1 %v2605_v10 }
 0x6f5   : > { %2447 = vmatmul.mubr.msk.bf16.vlgmr.msra.gmra.mxu1 %vm797_vm3, %v911_v24 }
 0x6f6   : > { %2459 = vmatpush3.bf16.msra.mxu1 %v1344_v23  ;;  %2462 = vmatprep.mubr.msk.bf16.mxu1 %vm2606_vm1, %v2605_v10 }
 0x6f7   : > { %2460 = vmatprep.subr.bf16.mxu1 %v2605_v10 }
 0x6fa   : > { %2461 = vmatpush3.bf16.msra.mxu1 %v1343_v28  ;;  %v2257_v28 = vld [vmem:[%s3200_s7 + $0x10] sm:$0xff] }
 0x6fb   : > { %2474 = vmatprep.subr.bf16.mxu1 %v2605_v10  ;;  %v1559_v29 = vpack.c.bf16 %v2257_v28, %v2257_v28 }
 0x6fd   : > { %2463 = vmatmul.mubr.msk.bf16.vlgmr.msra.gmra.mxu1 %vm645_vm2, %v2762_v26  ;;  %v1564_v30 = vsel %vm1193_vm8, %v1559_v29, 0 }
 0x6fe   : > { %2476 = vmatprep.mubr.msk.bf16.mxu1 %vm2606_vm1, %v2605_v10 }
 0x7ad   : > { %v1180_v31 = vpop.f32.mrf.mxu1 }
 0x7ae   : > { %v1188_v33 = vpack.c.bf16 %v1180_v31, %v1180_v31 }
 0x7af   : > { %v2436_v36 = vpop.f32.mrf.mxu1 }
 0x7b0   : > { %2441 = vmatmul.mubr.msk.bf16.vlgmr.msra.gmra.mxu0 %vm797_vm3, %v1188_v33  ;;  %v2262_v33 = vld [vmem:[%s3222_s25 + $0x78] sm:$0xff] }
 0x7b1   : > { %v1183_v37 = vpop.f32.mrf.mxu1  ;;  %2451 = vmatpush3.bf16.msra.mxu0 %v1289_v32  ;;  %2454 = vmatprep.mubr.msk.bf16.mxu0 %vm2606_vm1, %v2605_v10  ;;  %v2261_v32 = vld [vmem:[%s3222_s25 + $0x70] sm:$0xff] }
 0x7b2   : > { %2452 = vmatprep.subr.bf16.mxu0 %v2605_v10  ;;  %v1613_v36 = vpack.c.bf16 %v2262_v33, %v2261_v32 }
 0x7b3   : > { %v2437_v41 = vpop.f32.mrf.mxu1 }
 0x7b4   : > { %v2275_v41 = vld [vmem:[%s3198_s5 + $0x70] sm:$0xff] }
 0x7b5   : > { %v2949_v42 = vpop.f32.mrf.mxu1  ;;  %2453 = vmatpush3.bf16.msra.mxu0 %v1288_v38  ;;  %v2259_v38 = vld [vmem:[%s3222_s25 + $0x60] sm:$0xff] }
 0x7b6   : > { %2466 = vmatprep.subr.bf16.mxu0 %v2605_v10  ;;  %v1612_v40 = vpack.c.bf16 %v2260_v39, %v2259_v38 }
 0x7b7   : > { %v2448_v46 = vpop.f32.mrf.mxu1 }
 0x7b8   : > { %2455 = vmatmul.mubr.msk.bf16.vlgmr.msra.gmra.mxu0 %vm645_vm2, %v2762_v26  ;;  %v2274_v46 = vld [vmem:[%s3198_s5 + $0x68] sm:$0xff] }
 0x7b9   : > { %v1280_v47 = vpop.f32.mrf.mxu1  ;;  %2467 = vmatpush3.bf16.msra.mxu0 %v1399_v43  ;;  %2470 = vmatprep.mubr.msk.bf16.mxu0 %vm2606_vm1, %v2605_v10  ;;  %v2276_v43 = vld [vmem:[%s3198_s5 + $0x78] sm:$0xff] }
 0x7ba   : > { %2468 = vmatprep.subr.bf16.mxu0 %v2605_v10  ;;  %v1723_v44 = vpack.c.bf16 %v2276_v43, %v2275_v41  ;;  %v1722_v47 = vpack.c.bf16 %v2274_v46, %v2273_v45 }
 0x7bb   : > { %v2449_v49 = vpop.f32.mrf.mxu1 }
 0x7bc   : > { %v2269_v49 = vld [vmem:[%s3223_s26 + $0x78] sm:$0xff] }
 0x7bd   : > { %v1387_v51 = vpop.f32.mrf.mxu1  ;;  %2469 = vmatpush3.bf16.msra.mxu0 %v1398_v48  ;;  %v2268_v48 = vld [vmem:[%s3223_s26 + $0x70] sm:$0xff] }
 0x7be   : > { %v1388_v52 = vadd.f32 %v2246_v50, %v1387_v51  ;;  %2480 = vmatprep.subr.bf16.mxu0 %v2605_v10  ;;  %v1668_v51 = vpack.c.bf16 %v2269_v49, %v2268_v48 }
 0x7bf   : > { %v2464_v53 = vpop.f32.mrf.mxu1 }
 0x7c0   : > { %v1449_v54 = vpack.c.bf16 %v1388_v52, %v1388_v52  ;;  %2471 = vmatmul.mubr.msk.bf16.vlgmr.msra.gmra.mxu0 %vm645_vm2, %v2762_v26  ;;  %v2266_v53 = vld [vmem:[%s3223_s26 + $0x60] sm:$0xff] }
 0x7c1   : > { %v1390_v55 = vpop.f32.mrf.mxu1  ;;  %2482 = vmatprep.mubr.msk.bf16.mxu0 %vm2606_vm1, %v2605_v10 }
 0x7c2   : > { %v1454_v56 = vsel %vm797_vm3, %v1449_v54, 0  ;;  %v2267_v54 = vld [vmem:[%s3223_s26 + $0x68] sm:$0xff] }
 0x7c3   : > { %v2465_v58 = vpop.f32.mrf.mxu1  ;;  %2475 = vmatpush3.bf16.xpose.msra.mxu1 %v1454_v56 }
 0x7c4   : > { %2486 = vmatprep.subr.bf16.mxu1 %v2605_v10  ;;  %v1667_v58 = vpack.c.bf16 %v2267_v54, %v2266_v53 }
 0x870   : > { %v2973_v59 = vpop.f32.mrf.mxu0 }
 0x872   : > { %v2442_v60 = vpop.f32.mrf.mxu0 }
 0x874   : > { %v1234_v61 = vpop.f32.mrf.mxu0 }
 0x876   : > { %v2443_v62 = vpop.f32.mrf.mxu0 }
 0x878   : > { %v1332_v1 = vpop.f32.mrf.mxu0 }
 0x879   : > { %v1333_v2 = vadd.f32 %v2239_v63, %v1332_v1 }
 0x87a   : > { %v2456_v3 = vpop.f32.mrf.mxu0 }
 0x87b   : > { %v1448_v4 = vpack.c.bf16 %v1333_v2, %v1333_v2  ;;  %v2278_v2 = vld [vmem:[%s3199_s6 + $0x3] ss:$0 sm:$0xff] }
 0x87c   : > { %v1335_v5 = vpop.f32.mrf.mxu0 }
 0x87d   : > { %2477 = vmatmul.mubr.msk.bf16.vlgmr.msra.gmra.mxu1 %vm797_vm3, %v1448_v4 }
 0x87e   : > { %v2457_v6 = vpop.f32.mrf.mxu0  ;;  %2488 = vmatprep.mubr.msk.bf16.mxu1 %vm2606_vm1, %v2605_v10  ;;  %2487 = vmatpush3.bf16.msra.mxu1 %v1564_v30 }
 0x87f   : > { %2500 = vmatprep.subr.bf16.mxu1 %v2605_v10 }
 0x880   : > { %v1442_v8 = vpop.f32.mrf.mxu0 }
 0x881   : > { %v1443_v9 = vadd.f32 %v2253_v7, %v1442_v8 }
 0x882   : > { %v2472_v11 = vpop.f32.mrf.mxu0 }
 0x883   : > { %v1509_v12 = vpack.c.bf16 %v1443_v9, %v1443_v9 }
 0x884   : > { %v1445_v13 = vpop.f32.mrf.mxu0 }
 0x885   : > { %v1514_v14 = vand.u32 %v1509_v12, %v2815_v57 }
 0x886   : > { %v2473_v15 = vpop.f32.mrf.mxu0 }
 0x887   : > { %2481 = vmatpush3.bf16.msra.mxu0 %v1514_v14 }
 0x888   : > { %2492 = vmatprep.subr.bf16.mxu0 %v2605_v10 }
 0x93d   : > { %v1490_v16 = vpop.f32.mrf.mxu1 }
 0x93e   : > { %v1496_v17 = vmul.f32 0.35355338, %v1490_v16  ;;  %v2271_v16 = vld [vmem:[%s3197_s4 + $0x3] ss:$0 sm:$0xff] }
 0x93f   : > { %v2478_v18 = vpop.f32.mrf.mxu1 }
 0x940   : > { %v1497_v19 = vsel %vm845_vm6, %v1496_v17, -inf }
 0x941   : > { %1498 = vmax.xlane.f32.xlu0 %v1497_v19  ;;  %v1493_v20 = vpop.f32.mrf.mxu1 }
 0x942   : > { %v2264_v20 = vld [vmem:[%s3224_s24 + $0x3] ss:$0 sm:$0xff] }
 0x943   : > { %v2479_v21 = vpop.f32.mrf.mxu1 }
 0x9ca   : > { %v1499_v22 = vpop.xlane.xlu0 %1498 }
 0x9cb   : > { %v1500_v23 = vsub.f32 %v1496_v17, %v1499_v22 }
 0x9cd   : > { %v1501_v24 = vmul.f32 1.442695, %v1500_v23 }
 0x9cf   : > { %2583 = vpow2.f32 %v1501_v24 }
 0x9dc   : > { %v2584_v25 = vpop.eup %2583 }
 0x9dd   : > { %v1503_v27 = vsel %vm845_vm6, %v2584_v25, 0.0 }
 0x9de   : > { %1504 = vadd.xlane.f32.xlu1 %v1503_v27 }
 0xa67   : > { %v1505_v31 = vpop.xlane.xlu1 %1504 }
 0xa68   : > { %2585 = vrcp.f32 %v1505_v31 }
 0xa75   : > { %v2586_v34 = vpop.eup %2585 }
 0xa76   : > { %v1507_v35 = vmul.f32 %v2586_v34, %v2584_v25 }
 0xa78   : > { %v1508_v37 = vpack.c.bf16 %v1507_v35, %v1507_v35 }
 0xa7a   : > { %2483 = vmatmul.mubr.msk.bf16.vlgmr.msra.gmra.mxu0 %vm859_vm7, %v1508_v37 }
 0xa7b   : > { %2493 = vmatpush3.bf16.msra.mxu0 %v1613_v36  ;;  %2496 = vmatprep.mubr.msk.bf16.mxu0 %vm2606_vm1, %v2605_v10  ;;  %v2282_v36 = vld [vmem:[%s3200_s7 + $0x18] sm:$0xff] }
 0xa7c   : > { %2494 = vmatprep.subr.bf16.mxu0 %v2605_v10  ;;  %v1883_v37 = vpack.c.bf16 %v2282_v36, %v2282_v36  ;;  %v2035_v36 = vld [vmem:[%s3208_s15] sm:$0xff] }
 0xa7e   : > { %v1888_v38 = vsel %vm1193_vm8, %v1883_v37, 0  ;;  %v2036_v37 = vld [vmem:[%s3208_s15 + $0x8] sm:$0xff] }
 0xa7f   : > { %2495 = vmatpush3.bf16.msra.mxu0 %v1612_v40 }
 0xa80   : > { %2508 = vmatprep.subr.bf16.mxu0 %v2605_v10 }
 0xa82   : > { %2497 = vmatmul.mubr.msk.bf16.vlgmr.msra.gmra.mxu0 %vm645_vm2, %v2762_v26 }
 0xa83   : > { %2509 = vmatpush3.bf16.msra.mxu0 %v1723_v44  ;;  %2512 = vmatprep.mubr.msk.bf16.mxu0 %vm2606_vm1, %v2605_v10 }
 0xa84   : > { %2510 = vmatprep.subr.bf16.mxu0 %v2605_v10 }
 0xa87   : > { %2511 = vmatpush3.bf16.msra.mxu0 %v1722_v47 }
 0xa88   : > { %2522 = vmatprep.subr.bf16.mxu0 %v2605_v10 }
 0xa8a   : > { %2513 = vmatmul.mubr.msk.bf16.vlgmr.msra.gmra.mxu0 %vm645_vm2, %v2762_v26 }
 0xa8b   : > { %2524 = vmatprep.mubr.msk.bf16.mxu0 %vm2606_vm1, %v2605_v10 }
 0xb3a   : > { %v1550_v50 = vpop.f32.mrf.mxu0 }
 0xb3b   : > { %v1558_v52 = vpack.c.bf16 %v1550_v50, %v1550_v50  ;;  %v2284_v50 = vld [vmem:[%s3201_s8] ss:$0 sm:$0xff] }
 0xb3c   : > { %v2484_v55 = vpop.f32.mrf.mxu0 }
 0xb3d   : > { %2489 = vmatmul.mubr.msk.bf16.vlgmr.msra.gmra.mxu1 %vm797_vm3, %v1558_v52 }
 0xb3e   : > { %v1553_v56 = vpop.f32.mrf.mxu0  ;;  %2501 = vmatpush3.bf16.msra.mxu1 %v1668_v51  ;;  %2504 = vmatprep.mubr.msk.bf16.mxu1 %vm2606_vm1, %v2605_v10 }
 0xb3f   : > { %2502 = vmatprep.subr.bf16.mxu1 %v2605_v10 }
 0xb40   : > { %v2485_v60 = vpop.f32.mrf.mxu0 }
 0xb42   : > { %v1656_v61 = vpop.f32.mrf.mxu0  ;;  %2503 = vmatpush3.bf16.msra.mxu1 %v1667_v58 }
 0xb43   : > { %2516 = vmatprep.subr.bf16.mxu1 %v2605_v10  ;;  %v1657_v22 = vadd.f32 %v2264_v20, %v1656_v61  ;;  %v2048_v20 = vld [vmem:[%s3208_s15 + $0x68] sm:$0xff] }
 0xb44   : > { %v2498_v62 = vpop.f32.mrf.mxu0 }
 0xb45   : > { %2505 = vmatmul.mubr.msk.bf16.vlgmr.msra.gmra.mxu1 %vm645_vm2, %v2762_v26  ;;  %v1278_v26 = vadd.f32 %v2949_v42, %v2973_v59  ;;  %v1772_v23 = vpack.c.bf16 %v1657_v22, %v1657_v22 }
 0xb46   : > { %v1659_v63 = vpop.f32.mrf.mxu0  ;;  %2518 = vmatprep.mubr.msk.bf16.mxu1 %vm2606_vm1, %v2605_v10 }
 0xb48   : > { %v2499_v1 = vpop.f32.mrf.mxu0 }
 0xb4a   : > { %v1766_v3 = vpop.f32.mrf.mxu0 }
 0xb4b   : > { %v1767_v4 = vadd.f32 %v2278_v2, %v1766_v3  ;;  %v1971_v2 = vld [vmem:[%s3206_s13 + $0x10] sm:$0xff] }
 0xb4c   : > { %v2514_v5 = vpop.f32.mrf.mxu0 }
 0xb4d   : > { %v1833_v6 = vpack.c.bf16 %v1767_v4, %v1767_v4  ;;  %v1969_v4 = vld [vmem:[%s3206_s13] sm:$0xff]  ;;  %v1970_v5 = vld [vmem:[%s3206_s13 + $0x8] sm:$0xff] }
 0xb4e   : > { %v1769_v7 = vpop.f32.mrf.mxu0 }
 0xb4f   : > { %v1838_v8 = vand.u32 %v1833_v6, %v2815_v57  ;;  %v1974_v6 = vpack.c.bf16 %v1970_v5, %v1969_v4 }
 0xb50   : > { %v2515_v9 = vpop.f32.mrf.mxu0 }
 0xb51   : > { %2523 = vmatpush3.bf16.msra.mxu0 %v1838_v8 }
 0xb52   : > { %2534 = vmatprep.subr.bf16.mxu0 %v2605_v10 }
 0xbfd   : > { %v1600_v11 = vpop.f32.mrf.mxu1 }
 0xbfe   : > { %v1606_v12 = vadd.f32 %v1600_v11, %v1278_v26  ;;  %v2285_v11 = vld [vmem:[%s3204_s11] ss:$0 sm:$0xff] }
 0xbff   : > { %v2490_v13 = vpop.f32.mrf.mxu1 }
 0xc00   : > { %v2286_v13 = vld [vmem:[%s3205_s12] ss:$0 sm:$0xff] }
 0xc01   : > { %v1603_v14 = vpop.f32.mrf.mxu1 }
 0xc03   : > { %v2491_v15 = vpop.f32.mrf.mxu1 }
 0xc05   : > { %v1711_v17 = vpop.f32.mrf.mxu1 }
 0xc06   : > { %v1712_v18 = vadd.f32 %v2271_v16, %v1711_v17  ;;  %v2049_v17 = vld [vmem:[%s3208_s15 + $0x70] sm:$0xff] }
 0xc07   : > { %v2506_v19 = vpop.f32.mrf.mxu1 }
 0xc08   : > { %v1773_v57 = vpack.c.bf16 %v1712_v18, %v1712_v18  ;;  %v2050_v18 = vld [vmem:[%s3208_s15 + $0x78] sm:$0xff] }
 0xc09   : > { %v1714_v21 = vpop.f32.mrf.mxu1  ;;  %v2059_v19 = vpack.c.bf16 %v2050_v18, %v2049_v17 }
 0xc0a   : > { %v1778_v42 = vsel %vm797_vm3, %v1773_v57, 0  ;;  %v2047_v57 = vld [vmem:[%s3208_s15 + $0x60] sm:$0xff] }
 0xc0b   : > { %v2507_v59 = vpop.f32.mrf.mxu1  ;;  %2517 = vmatpush3.bf16.xpose.msra.mxu1 %v1778_v42  ;;  %v2058_v21 = vpack.c.bf16 %v2048_v20, %v2047_v57  ;;  %v2045_v42 = vld [vmem:[%s3208_s15 + $0x50] sm:$0xff] }
 0xc0c   : > { %2528 = vmatprep.subr.bf16.mxu1 %v2605_v10  ;;  %v2046_v59 = vld [vmem:[%s3208_s15 + $0x58] sm:$0xff] }
 0xc0d   : > { %v2057_v22 = vpack.c.bf16 %v2046_v59, %v2045_v42 }
 0xc12   : > { %2519 = vmatmul.mubr.msk.bf16.vlgmr.msra.gmra.mxu1 %vm797_vm3, %v1772_v23  ;;  %v2043_v23 = vld [vmem:[%s3208_s15 + $0x40] sm:$0xff] }
 0xc13   : > { %2530 = vmatprep.mubr.msk.bf16.mxu1 %vm2606_vm1, %v2605_v10  ;;  %2529 = vmatpush3.bf16.msra.mxu1 %v1888_v38  ;;  %v2052_v38 = vpack.c.bf16 %v2036_v37, %v2035_v36 }
 0xc14   : > { %2542 = vmatprep.subr.bf16.mxu1 %v2605_v10 }
 0xcd2   : > { %v1814_v24 = vpop.f32.mrf.mxu1 }
 0xcd3   : > { %v1820_v25 = vmul.f32 0.35355338, %v1814_v24  ;;  %v2044_v24 = vld [vmem:[%s3208_s15 + $0x48] sm:$0xff] }
 0xcd4   : > { %v2520_v27 = vpop.f32.mrf.mxu1 }
 0xcd5   : > { %v1821_v28 = vsel %vm845_vm6, %v1820_v25, -inf  ;;  %v2056_v27 = vpack.c.bf16 %v2044_v24, %v2043_v23 }
 0xcd6   : > { %1822 = vmax.xlane.f32.xlu0 %v1821_v28  ;;  %v1817_v29 = vpop.f32.mrf.mxu1  ;;  %v2042_v28 = vld [vmem:[%s3208_s15 + $0x38] sm:$0xff] }
 0xcd8   : > { %v2521_v30 = vpop.f32.mrf.mxu1 }
 0xcd9   : > { %v2039_v30 = vld [vmem:[%s3208_s15 + $0x20] sm:$0xff] }
 0xd5f   : > { %v1823_v31 = vpop.xlane.xlu0 %1822 }
 0xd60   : > { %v1824_v32 = vsub.f32 %v1820_v25, %v1823_v31  ;;  %v2041_v25 = vld [vmem:[%s3208_s15 + $0x30] sm:$0xff]  ;;  %v2040_v31 = vld [vmem:[%s3208_s15 + $0x28] sm:$0xff] }
 0xd61   : > { %v2055_v29 = vpack.c.bf16 %v2042_v28, %v2041_v25 }
 0xd62   : > { %v1825_v33 = vmul.f32 1.442695, %v1824_v32  ;;  %v2054_v32 = vpack.c.bf16 %v2040_v31, %v2039_v30 }
 0xd64   : > { %2587 = vpow2.f32 %v1825_v33  ;;  %v2037_v33 = vld [vmem:[%s3208_s15 + $0x10] sm:$0xff] }
 0xd71   : > { %v2588_v34 = vpop.eup %2587 }
 0xd72   : > { %v1827_v35 = vsel %vm845_vm6, %v2588_v34, 0.0 }
 0xd73   : > { %1828 = vadd.xlane.f32.xlu1 %v1827_v35 }
 0xdfc   : > { %v1829_v39 = vpop.xlane.xlu1 %1828 }
 0xdfd   : > { %2589 = vrcp.f32 %v1829_v39  ;;  %v2287_v39 = vld [vmem:[%s3207_s14] ss:$0 sm:$0xff] }
 0xe0a   : > { %v2590_v40 = vpop.eup %2589 }
 0xe0b   : > { %v1831_v41 = vmul.f32 %v2590_v40, %v2588_v34  ;;  %v2038_v34 = vld [vmem:[%s3208_s15 + $0x18] sm:$0xff] }
 0xe0c   : > { %v2053_v35 = vpack.c.bf16 %v2038_v34, %v2037_v33 }
 0xe0d   : > { %v1832_v43 = vpack.c.bf16 %v1831_v41, %v1831_v41 }
 0xe0f   : > { %2525 = vmatmul.mubr.msk.bf16.vlgmr.msra.gmra.mxu0 %vm859_vm7, %v1832_v43 }
 0xe10   : > { %2538 = vmatprep.mubr.msk.bf16.mxu0 %vm2606_vm1, %v2605_v10 }
 0xecf   : > { %v1874_v44 = vpop.f32.mrf.mxu0 }
 0xed0   : > { %v1882_v45 = vpack.c.bf16 %v1874_v44, %v1874_v44 }
 0xed1   : > { %v2526_v46 = vpop.f32.mrf.mxu0 }
 0xed2   : > { %2531 = vmatmul.mubr.msk.bf16.vlgmr.msra.gmra.mxu1 %vm797_vm3, %v1882_v45 }
 0xed3   : > { %v1877_v47 = vpop.f32.mrf.mxu0  ;;  %2558 = vmatprep.mubr.msk.bf16.mxu1 %vm2606_vm1, %v2605_v10  ;;  %2543 = vmatpush3.bf16.msra.mxu1 %v2059_v19 }
 0xed4   : > { %2544 = vmatprep.subr.bf16.mxu1 %v2605_v10 }
 0xed5   : > { %v2527_v48 = vpop.f32.mrf.mxu0 }
 0xed7   : > { %2545 = vmatpush3.bf16.msra.mxu1 %v2058_v21 }
 0xed8   : > { %2546 = vmatprep.subr.bf16.mxu1 %v2605_v10 }
 0xedb   : > { %2547 = vmatpush3.bf16.msra.mxu1 %v2057_v22 }
 0xedc   : > { %2548 = vmatprep.subr.bf16.mxu1 %v2605_v10 }
 0xedf   : > { %2549 = vmatpush3.bf16.msra.mxu1 %v2056_v27 }
 0xee0   : > { %2550 = vmatprep.subr.bf16.mxu1 %v2605_v10 }
 0xee3   : > { %2551 = vmatpush3.bf16.msra.mxu1 %v2055_v29 }
 0xee4   : > { %2552 = vmatprep.subr.bf16.mxu1 %v2605_v10 }
 0xee7   : > { %2553 = vmatpush3.bf16.msra.mxu1 %v2054_v32 }
 0xee8   : > { %2554 = vmatprep.subr.bf16.mxu1 %v2605_v10 }
 0xeeb   : > { %2555 = vmatpush3.bf16.msra.mxu1 %v2053_v35 }
 0xeec   : > { %2556 = vmatprep.subr.bf16.mxu1 %v2605_v10 }
 0xeef   : > { %2557 = vmatpush3.bf16.msra.mxu1 %v2052_v38 }
 0xf92   : > { %v1924_v49 = vpop.f32.mrf.mxu1 }
 0xf93   : > { %v1930_v51 = vadd.f32 %v1924_v49, %v1606_v12 }
 0xf94   : > { %v2532_v52 = vpop.f32.mrf.mxu1 }
 0xf95   : > { %v1938_v53 = vadd.f32 %v2284_v50, %v1930_v51 }
 0xf96   : > { %v1927_v54 = vpop.f32.mrf.mxu1 }
 0xf97   : > { %v3088_v55 = vadd.f32 %v1938_v53, %v2724_v0  ;;  %v1972_v0 = vld [vmem:[%s3206_s13 + $0x18] sm:$0xff] }
 0xf98   : > { %v2533_v56 = vpop.f32.mrf.mxu1  ;;  %v1975_v3 = vpack.c.bf16 %v1972_v0, %v1971_v2 }
 0xf99   : > { %v1942_v58 = vsel %vm602_vm0, %v3088_v55, 0.0  ;;  %v2289_v56 = vld [vmem:[%s3209_s16] ss:$0 sm:$0xff] }
 0xf9a   : > { %1943 = vadd.xlane.f32.xlu0 %v1942_v58  ;;  %2535 = vmatpush3.bf16.msra.mxu0 %v1975_v3 }
 0xf9b   : > { %2536 = vmatprep.subr.bf16.mxu0 %v2605_v10 }
 0xf9e   : > { %2537 = vmatpush3.bf16.msra.mxu0 %v1974_v6 }
0x1023   : > { %v1944_v60 = vpop.xlane.xlu0 %1943 }
0x1024   : > { %v1945_v61 = vmul.f32 0.03125, %v1944_v60 }
0x1026   : > { %v1946_v62 = vsub.f32 %v3088_v55, %v1945_v61 }
0x1028   : > { %v1947_v63 = vmul.f32 %v1946_v62, %v1946_v62 }
0x102a   : > { %v1948_v1 = vsel %vm602_vm0, %v1947_v63, 0.0 }
0x102b   : > { %1949 = vadd.xlane.f32.xlu1 %v1948_v1 }
0x10b4   : > { %v1950_v7 = vpop.xlane.xlu1 %1949 }
0x10b5   : > { %v1951_v8 = vmul.f32 0.03125, %v1950_v7 }
0x10b7   : > { %v1952_v9 = vadd.f32 1e-06, %v1951_v8 }
0x10b9   : > { %2591 = vrsqrt.f32 %v1952_v9 }
0x10c6   : > { %v2592_v26 = vpop.eup %2591 }
0x10c7   : > { %v1954_v12 = vmul.f32 %v2592_v26, %v1946_v62 }
0x10c9   : > { %v1961_v14 = vmul.f32 %v2285_v11, %v1954_v12  ;;  %v2291_v12 = vld [vmem:[%s3211_s18] ss:$0 sm:$0xff] }
0x10cb   : > { %v1968_v15 = vadd.f32 %v2286_v13, %v1961_v14 }
0x10cd   : > { %v1973_v16 = vpack.c.bf16 %v1968_v15, %v1968_v15 }
0x10cf   : > { %2539 = vmatmul.mubr.msk.bf16.vlgmr.msra.gmra.mxu0 %vm645_vm2, %v1973_v16 }
0x118f   : > { %v2020_v40 = vpop.f32.mrf.mxu0 }
0x1190   : > { %v2021_v41 = vadd.f32 %v2287_v39, %v2020_v40 }
0x1191   : > { %v2540_v43 = vpop.f32.mrf.mxu0 }
0x1192   : > { %v2026_v44 = vmul.f32 %v2021_v41, %v2021_v41 }
0x1193   : > { %v2023_v45 = vpop.f32.mrf.mxu0 }
0x1194   : > { %v2027_v46 = vmul.f32 %v2026_v44, %v2021_v41 }
0x1195   : > { %v2541_v47 = vpop.f32.mrf.mxu0 }
0x1196   : > { %v2028_v48 = vmul.f32 0.044715, %v2027_v46 }
0x1198   : > { %v2029_v49 = vadd.f32 %v2028_v48, %v2021_v41 }
0x119a   : > { %v2030_v50 = vmul.f32 0.7978846, %v2029_v49 }
0x119c   : > { %2593 = vtanh.f32 %v2030_v50 }
0x11a9   : > { %v2594_v51 = vpop.eup %2593 }
0x11aa   : > { %v2032_v52 = vadd.f32 1.0, %v2594_v51 }
0x11ac   : > { %v2033_v53 = vmul.f32 0.5, %v2032_v52 }
0x11ae   : > { %v2034_v10 = vmul.f32 %v2033_v53, %v2021_v41 }
0x11b0   : > { %v2051_v54 = vpack.c.bf16 %v2034_v10, %v2034_v10 }
0x11b2   : > { %2559 = vmatmul.mubr.bf16.vlgmr.msra.gmra.mxu1 %v2051_v54 }
0x1272   : > { %v2101_v58 = vpop.f32.mrf.mxu1 }
0x1273   : > { %v2102_v60 = vadd.f32 %v2289_v56, %v2101_v58 }
0x1274   : > { %v2560_v61 = vpop.f32.mrf.mxu1 }
0x1275   : > { %v2107_v62 = vadd.f32 %v2102_v60, %v3088_v55  ;;  %v2290_v55 = vld [vmem:[%s3210_s17] ss:$0 sm:$0xff] }
0x1276   : > { %v2104_v63 = vpop.f32.mrf.mxu1 }
0x1277   : > { %v2110_v1 = vsel %vm602_vm0, %v2107_v62, 0.0 }
0x1278   : > { %2111 = vadd.xlane.f32.xlu0 %v2110_v1  ;;  %v2561_v2 = vpop.f32.mrf.mxu1 }
0x1301   : > { %v2112_v0 = vpop.xlane.xlu0 %2111 }
0x1302   : > { %v2113_v3 = vmul.f32 0.03125, %v2112_v0 }
0x1304   : > { %v2114_v4 = vsub.f32 %v2107_v62, %v2113_v3 }
0x1306   : > { %v2115_v5 = vmul.f32 %v2114_v4, %v2114_v4 }
0x1308   : > { %v2116_v6 = vsel %vm602_vm0, %v2115_v5, 0.0 }
0x1309   : > { %2117 = vadd.xlane.f32.xlu1 %v2116_v6 }
0x1392   : > { %v2118_v7 = vpop.xlane.xlu1 %2117 }
0x1393   : > { %v2119_v8 = vmul.f32 0.03125, %v2118_v7 }
0x1395   : > { %v2120_v9 = vadd.f32 1e-06, %v2119_v8 }
0x1397   : > { %2595 = vrsqrt.f32 %v2120_v9 }
0x13a4   : > { %v2596_v26 = vpop.eup %2595 }
0x13a5   : > { %v2122_v11 = vmul.f32 %v2596_v26, %v2114_v4 }
0x13a7   : > { %v2129_v13 = vmul.f32 %v2290_v55, %v2122_v11 }
0x13a9   : > { %v2136_v14 = vadd.f32 %v2291_v12, %v2129_v13 }
0x13ab   : > { %2137 = vst.msk [vmem:[%s597_s27] sm:$0x1f] %vm602_vm0, %v2136_v14 }
0x13ac PF: > { %s29_s0 = sadd.s32 1, %s2603_s0  }
0x13ad   : > { %p26_p4 = scmp.ge.s32.totalorder %s29_s0, 4  }
0x13af   :  { %28 = sbr.rel (!%p26_p4) target bundleno = 5 (0x5), region = 147 }

// kernel: vl_transformer_itm_forward.8
= control target key start
LH: loop header
LB: loop body
LE: loop exit
PB: predicated region body
PF: predicated region fallthrough
CT: control target
= control target key end

     0   :  { %s3152_s0 = inlined_call_operand.vmem [shape: f32[2,5,32], index: 0, kind: input, shape index: {}]   ;;  %s3153_s1 = inlined_call_operand.vmem [shape: f32[4,32,8], index: 1, kind: input, shape index: {}]   ;;  %s3154_s2 = inlined_call_operand.vmem [shape: f32[4,1,8], index: 2, kind: input, shape index: {}]   ;;  %s3155_s3 = inlined_call_operand.vmem [shape: f32[4,32,8], index: 3, kind: input, shape index: {}]   ;;  %s3156_s4 = inlined_call_operand.vmem [shape: f32[4,1,8], index: 4, kind: input, shape index: {}]   ;;  %s3157_s5 = inlined_call_operand.vmem [shape: f32[4,32,8], index: 5, kind: input, shape index: {}]   ;;  %s3158_s6 = inlined_call_operand.vmem [shape: f32[4,1,8], index: 6, kind: input, shape index: {}]   ;;  %s3159_s7 = inlined_call_operand.vmem [shape: f32[4,8,32], index: 7, kind: input, shape index: {}]   ;;  %s3160_s8 = inlined_call_operand.vmem [shape: f32[1,32], index: 8, kind: input, shape index: {}]   ;;  %s3161_s9 = inlined_call_operand.vmem [shape: f32[1,32], index: 9, kind: input, shape index: {}]   ;;  %s3162_s10 = inlined_call_operand.vmem [shape: f32[1,32], index: 10, kind: input, shape index: {}]   ;;  %s3163_s11 = inlined_call_operand.vmem [shape: f32[1,32], index: 11, kind: input, shape index: {}]   ;;  %s3164_s12 = inlined_call_operand.vmem [shape: f32[1,32], index: 12, kind: input, shape index: {}]   ;;  %s3165_s13 = inlined_call_operand.vmem [shape: f32[32,128], index: 13, kind: input, shape index: {}]   ;;  %s3166_s14 = inlined_call_operand.vmem [shape: f32[1,128], index: 14, kind: input, shape index: {}]   ;;  %s3167_s15 = inlined_call_operand.vmem [shape: f32[128,32], index: 15, kind: input, shape index: {}]   ;;  %s3168_s16 = inlined_call_operand.vmem [shape: f32[1,32], index: 16, kind: input, shape index: {}]   ;;  %s3169_s17 = inlined_call_operand.vmem [shape: f32[1,32], index: 17, kind: input, shape index: {}]   ;;  %s3170_s18 = inlined_call_operand.vmem [shape: f32[1,32], index: 18, kind: input, shape index: {}]   ;;  %s3171_s19 = inlined_call_operand.vmem [shape: f32[2,5,32], index: 19, kind: output, shape index: {}]  }
   0x1   :  { %3175 = sst [smem:[#allocation2_spill]] %s3152_s0  ;;  %s2675_s0 = smov 0  }
   0x2   :  { %3176 = sst [smem:[#allocation3_spill]] %s3153_s1 }
   0x3   :  { %3177 = sst [smem:[#allocation4_spill]] %s3154_s2 }
   0x4   :  { %3178 = sst [smem:[#allocation5_spill]] %s3155_s3 }
   0x5 LB: > { %s2162_s30 = sadd.s32 4294967295, %s2570_s0   ;;  %p2166_p0 = scmp.ge.s32.totalorder %s2570_s0, 1  ;;  %s2570_s0 = sphi %s2675_s0, %s29_s0  }
   0x6   : > { %p536_p1 = scmp.lt.s32.totalorder %s2570_s0, 3 }
   0x8   : > { %p537_p2 = pnand %p2166_p0, %p536_p1 }
   0x9   : > { %p590_p3 = scmp.lt.s32.totalorder (!%p537_p2), %s2162_s30, 1  ;;  %s3179_s21 = sld [smem:[#allocation2_spill]] (!%p537_p2) }
   0xa   : > { %540 = sbr.rel (%p537_p2) target bundleno = 4729 (0x1279), region = 96  ;;  %s3180_s23 = sld [smem:[#allocation3_spill]] (!%p537_p2) }
   0xb   : > { %s3181_s2 = sld [smem:[#allocation5_spill]] (!%p537_p2) }
   0xc   : > { %s3182_s29 = sld [smem:[#allocation4_spill]] (!%p537_p2) }
   0xf   : > { %s3184_s30 = smov (!%p590_p3, %s2162_s30), 1  ;;  %vm602_vm0 = vcmask 258048   ;;  %v2572_v10 = vmov 0.0   ;;  %vm2573_vm1 = vmmov 0   ;;  %v2169_v18 = vld [vmem:[%s3161_s9] ss:$0 sm:$0xff] }
  0x10   : > { %s2167_s17 = sshll.u32 %s3184_s30, 3  ;;  %v633_v7 = vld [vmem:[%s3180_s23 + $0x10] sm:$0xff]  ;;  %v634_v8 = vld [vmem:[%s3180_s23 + $0x18] sm:$0xff]  ;;  %2335 = vmatprep.subr.bf16.mxu0 %v2572_v10  ;;  %2359 = vmatprep.subr.bf16.mxu1 %v2572_v10  ;;  %v631_v11 = vld [vmem:[%s3180_s23] sm:$0xff]  ;;  %vm645_vm2 = vcmask 261120   ;;  %vm797_vm3 = vcmask 64512  }
  0x11   : > { %s593_s1 = scalar_lea.vmem %s3179_s21, %s2167_s17  ;;  %v637_v9 = vpack.c.bf16 %v634_v8, %v633_v7  ;;  %v632_v12 = vld [vmem:[%s3180_s23 + $0x8] sm:$0xff]  ;;  %2339 = vmatprep.mubr.msk.bf16.mxu0 %vm2573_vm1, %v2572_v10  ;;  %2361 = vmatprep.mubr.msk.bf16.mxu1 %vm2573_vm1, %v2572_v10  ;;  %v2170_v20 = vld [vmem:[%s3162_s10] ss:$0 sm:$0xff]  ;;  %v691_v22 = vld [vmem:[%s3181_s2 + $0x10] sm:$0xff]  ;;  %vm863_vm4 = vcmask 1041408   ;;  %vm864_vm5 = vcmask 1042432   ;;  %s597_s27 = scalar_lea.vmem %s3171_s19, %s2167_s17 }
  0x12   : > { %v2691_v0 = vld [vmem:[%s593_s1] sm:$0x1f]  ;;  %v636_v13 = vpack.c.bf16 %v632_v12, %v631_v11  ;;  %v692_v23 = vld [vmem:[%s3181_s2 + $0x18] sm:$0xff]  ;;  %v690_v28 = vld [vmem:[%s3181_s2 + $0x8] sm:$0xff]  ;;  %v2574_v51 = vmov 65535   ;;  %vm845_vm6 = vcmask 36864  }
  0x13   : > { %v603_v1 = vsel %vm602_vm0, %v2691_v0, 0.0  ;;  %2336 = vmatpush3.bf16.msra.mxu0 %v637_v9  ;;  %v694_v25 = vpack.c.bf16 %v692_v23, %v691_v22  ;;  %v689_v27 = vld [vmem:[%s3181_s2] sm:$0xff]  ;;  %v744_v30 = vld [vmem:[%s3157_s5 + $0x10] sm:$0xff]  ;;  %v745_v31 = vld [vmem:[%s3157_s5 + $0x18] sm:$0xff]  ;;  %v865_v52 = vsel %vm863_vm4, 4294967295, %v2574_v51  ;;  %vm859_vm7 = vcmask 39936  }
  0x14   : > { %604 = vadd.xlane.f32.xlu0 %v603_v1  ;;  %2337 = vmatprep.subr.bf16.mxu0 %v2572_v10  ;;  %v693_v29 = vpack.c.bf16 %v690_v28, %v689_v27  ;;  %v747_v32 = vpack.c.bf16 %v745_v31, %v744_v30  ;;  %v742_v33 = vld [vmem:[%s3157_s5] sm:$0xff]  ;;  %v743_v34 = vld [vmem:[%s3157_s5 + $0x8] sm:$0xff]  ;;  %v2181_v53 = vld [vmem:[%s3180_s23 + $0x30] sm:$0xff]  ;;  %v2782_v57 = vsel %vm864_vm5, %v865_v52, 0  ;;  %vm1193_vm8 = vcmask 1043456  }
  0x15   : > { %v746_v35 = vpack.c.bf16 %v743_v34, %v742_v33  ;;  %v2173_v40 = vld [vmem:[%s3156_s4] ss:$0 sm:$0xff]  ;;  %v2182_v54 = vld [vmem:[%s3180_s23 + $0x38] sm:$0xff]  ;;  %v2180_v63 = vld [vmem:[%s3180_s23 + $0x28] sm:$0xff] }
  0x16   : > { %v2171_v45 = vld [vmem:[%s3182_s29] ss:$0 sm:$0xff]  ;;  %v919_v59 = vpack.c.bf16 %v2182_v54, %v2181_v53  ;;  %v2194_v9 = vld [vmem:[%s3157_s5 + $0x28] sm:$0xff]  ;;  %v2198_v22 = vld [vmem:[%s3158_s6 + $0x1] ss:$0 sm:$0xff] }
  0x17   : > { %2338 = vmatpush3.bf16.msra.mxu0 %v636_v13  ;;  %v2175_v49 = vld [vmem:[%s3158_s6] ss:$0 sm:$0xff] }
  0x18   : > { %2343 = vmatprep.subr.bf16.mxu0 %v2572_v10  ;;  %v2179_v62 = vld [vmem:[%s3180_s23 + $0x20] sm:$0xff] }
  0x19   : > { %v2193_v8 = vld [vmem:[%s3157_s5 + $0x20] sm:$0xff] }
  0x1a   : > { %v1028_v11 = vpack.c.bf16 %v2194_v9, %v2193_v8 }
  0x9d   : > { %v605_v2 = vpop.xlane.xlu0 %604 }
  0x9e   : > { %v607_v3 = vmul.f32 0.03125, %v605_v2 }
  0xa0   : > { %v608_v4 = vsub.f32 %v2691_v0, %v607_v3 }
  0xa2   : > { %v609_v5 = vmul.f32 %v608_v4, %v608_v4 }
  0xa4   : > { %v610_v6 = vsel %vm602_vm0, %v609_v5, 0.0  ;;  %v2195_v5 = vld [vmem:[%s3157_s5 + $0x30] sm:$0xff] }
  0xa5   : > { %611 = vadd.xlane.f32.xlu0 %v610_v6  ;;  %v2196_v6 = vld [vmem:[%s3157_s5 + $0x38] sm:$0xff] }
  0xa6   : > { %v1029_v7 = vpack.c.bf16 %v2196_v6, %v2195_v5 }
 0x12e   : > { %v612_v14 = vpop.xlane.xlu0 %611 }
 0x12f   : > { %v613_v15 = vmul.f32 0.03125, %v612_v14 }
 0x131   : > { %v614_v16 = vadd.f32 1e-06, %v613_v15 }
 0x133   : > { %2542 = vrsqrt.f32 %v614_v16 }
 0x140   : > { %v2543_v17 = vpop.eup %2542 }
 0x141   : > { %v616_v19 = vmul.f32 %v2543_v17, %v608_v4  ;;  %v918_v4 = vpack.c.bf16 %v2180_v63, %v2179_v62 }
 0x143   : > { %v623_v21 = vmul.f32 %v2169_v18, %v616_v19 }
 0x145   : > { %v630_v24 = vadd.f32 %v2170_v20, %v623_v21 }
 0x147   : > { %v2729_v26 = vpack.c.bf16 %v630_v24, %v630_v24 }
 0x149   : > { %2340 = vmatmul.mubr.msk.bf16.vlgmr.msra.gmra.mxu0 %vm645_vm2, %v2729_v26 }
 0x14a   : > { %2344 = vmatpush3.bf16.msra.mxu0 %v694_v25  ;;  %2347 = vmatprep.mubr.msk.bf16.mxu0 %vm2573_vm1, %v2572_v10 }
 0x14b   : > { %2345 = vmatprep.subr.bf16.mxu0 %v2572_v10 }
 0x14e   : > { %2346 = vmatpush3.bf16.msra.mxu0 %v693_v29 }
 0x14f   : > { %2351 = vmatprep.subr.bf16.mxu0 %v2572_v10 }
 0x151   : > { %2348 = vmatmul.mubr.msk.bf16.vlgmr.msra.gmra.mxu0 %vm645_vm2, %v2729_v26 }
 0x152   : > { %2352 = vmatpush3.bf16.msra.mxu0 %v747_v32  ;;  %2355 = vmatprep.mubr.msk.bf16.mxu0 %vm2573_vm1, %v2572_v10 }
 0x153   : > { %2353 = vmatprep.subr.bf16.mxu0 %v2572_v10 }
 0x156   : > { %2354 = vmatpush3.bf16.msra.mxu0 %v746_v35 }
 0x157   : > { %2365 = vmatprep.subr.bf16.mxu0 %v2572_v10 }
 0x159   : > { %2356 = vmatmul.mubr.msk.bf16.vlgmr.msra.gmra.mxu0 %vm645_vm2, %v2729_v26 }
 0x15a   : > { %2367 = vmatprep.mubr.msk.bf16.mxu0 %vm2573_vm1, %v2572_v10 }
 0x209   : > { %v683_v36 = vpop.f32.mrf.mxu0 }
 0x20a   : > { %v684_v50 = vadd.f32 %v2171_v45, %v683_v36 }
 0x20b   : > { %v2341_v37 = vpop.f32.mrf.mxu0 }
 0x20c   : > { %v795_v60 = vpack.c.bf16 %v684_v50, %v684_v50  ;;  %v2188_v37 = vld [vmem:[%s3181_s2 + $0x30] sm:$0xff]  ;;  %v2191_v50 = vld [vmem:[%s3156_s4 + $0x1] ss:$0 sm:$0xff] }
 0x20d   : > { %v686_v38 = vpop.f32.mrf.mxu0 }
 0x20e   : > { %v2189_v38 = vld [vmem:[%s3181_s2 + $0x38] sm:$0xff] }
 0x20f   : > { %v2342_v39 = vpop.f32.mrf.mxu0 }
 0x211   : > { %v736_v41 = vpop.f32.mrf.mxu0 }
 0x212   : > { %v737_v42 = vadd.f32 %v2173_v40, %v736_v41  ;;  %v974_v41 = vpack.c.bf16 %v2189_v38, %v2188_v37 }
 0x213   : > { %v2349_v43 = vpop.f32.mrf.mxu0 }
 0x214   : > { %v796_v44 = vpack.c.bf16 %v737_v42, %v737_v42  ;;  %v2186_v43 = vld [vmem:[%s3181_s2 + $0x20] sm:$0xff] }
 0x215   : > { %v739_v46 = vpop.f32.mrf.mxu0 }
 0x216   : > { %v802_v47 = vsel %vm797_vm3, %v796_v44, 0  ;;  %v2187_v44 = vld [vmem:[%s3181_s2 + $0x28] sm:$0xff] }
 0x217   : > { %v2350_v48 = vpop.f32.mrf.mxu0  ;;  %2360 = vmatpush3.bf16.xpose.msra.mxu1 %v802_v47  ;;  %v973_v45 = vpack.c.bf16 %v2187_v44, %v2186_v43  ;;  %v2219_v44 = vld [vmem:[%s3157_s5 + $0x40] sm:$0xff] }
 0x218   : > { %2371 = vmatprep.subr.bf16.mxu1 %v2572_v10 }
 0x219   : > { %v789_v55 = vpop.f32.mrf.mxu0 }
 0x21a   : > { %v790_v56 = vadd.f32 %v2175_v49, %v789_v55  ;;  %v2184_v55 = vld [vmem:[%s3182_s29 + $0x1] ss:$0 sm:$0xff] }
 0x21b   : > { %v2357_v58 = vpop.f32.mrf.mxu0 }
 0x21c   : > { %v858_v61 = vpack.c.bf16 %v790_v56, %v790_v56 }
 0x21d   : > { %v792_v1 = vpop.f32.mrf.mxu0 }
 0x21e   : > { %v868_v2 = vand.u32 %v2782_v57, %v858_v61  ;;  %2362 = vmatmul.mubr.msk.bf16.vlgmr.msra.gmra.mxu1 %vm797_vm3, %v795_v60 }
 0x21f   : > { %v2358_v3 = vpop.f32.mrf.mxu0  ;;  %2372 = vmatpush3.bf16.msra.mxu1 %v919_v59  ;;  %2375 = vmatprep.mubr.msk.bf16.mxu1 %vm2573_vm1, %v2572_v10 }
 0x220   : > { %2366 = vmatpush3.bf16.msra.mxu0 %v868_v2  ;;  %2373 = vmatprep.subr.bf16.mxu1 %v2572_v10 }
 0x221   : > { %2379 = vmatprep.subr.bf16.mxu0 %v2572_v10 }
 0x223   : > { %2374 = vmatpush3.bf16.msra.mxu1 %v918_v4 }
 0x224   : > { %2387 = vmatprep.subr.bf16.mxu1 %v2572_v10 }
 0x226   : > { %2376 = vmatmul.mubr.msk.bf16.vlgmr.msra.gmra.mxu1 %vm645_vm2, %v2729_v26 }
 0x227   : > { %2388 = vmatpush3.bf16.msra.mxu1 %v1029_v7  ;;  %2391 = vmatprep.mubr.msk.bf16.mxu1 %vm2573_vm1, %v2572_v10 }
 0x228   : > { %2389 = vmatprep.subr.bf16.mxu1 %v2572_v10 }
 0x22b   : > { %2390 = vmatpush3.bf16.msra.mxu1 %v1028_v11  ;;  %v2202_v11 = vld [vmem:[%s3159_s7 + $0x8] sm:$0xff] }
 0x22c   : > { %2401 = vmatprep.subr.bf16.mxu1 %v2572_v10 }
 0x22e   : > { %2392 = vmatmul.mubr.msk.bf16.vlgmr.msra.gmra.mxu1 %vm645_vm2, %v2729_v26 }
 0x22f   : > { %2403 = vmatprep.mubr.msk.bf16.mxu1 %vm2573_vm1, %v2572_v10 }
 0x2de   : > { %v838_v12 = vpop.f32.mrf.mxu1 }
 0x2df   : > { %v844_v13 = vmul.f32 0.35355338, %v838_v12  ;;  %v1189_v12 = vpack.c.bf16 %v2202_v11, %v2202_v11 }
 0x2e0   : > { %v2363_v14 = vpop.f32.mrf.mxu1 }
 0x2e1   : > { %v846_v15 = vsel %vm845_vm6, %v844_v13, -inf }
 0x2e2   : > { %847 = vmax.xlane.f32.xlu1 %v846_v15  ;;  %v841_v16 = vpop.f32.mrf.mxu1  ;;  %v910_v15 = vld [vmem:[%s3159_s7] sm:$0xff] }
 0x2e3   : > { %v912_v16 = vpack.c.bf16 %v910_v15, %v910_v15 }
 0x2e4   : > { %v2364_v17 = vpop.f32.mrf.mxu1 }
 0x2e6   : > { %v962_v18 = vpop.f32.mrf.mxu1 }
 0x2e7   : > { %v963_v60 = vadd.f32 %v2184_v55, %v962_v18 }
 0x2e8   : > { %v2377_v19 = vpop.f32.mrf.mxu1 }
 0x2e9   : > { %v1078_v61 = vpack.c.bf16 %v963_v60, %v963_v60 }
 0x2ea   : > { %v965_v20 = vpop.f32.mrf.mxu1 }
 0x2eb   : > { %v1241_v20 = vsel %vm1193_vm8, %v912_v16, 0 }
 0x2ec   : > { %v2378_v21 = vpop.f32.mrf.mxu1 }
 0x2ed   : > { %v2214_v21 = vld [vmem:[%s3181_s2 + $0x50] sm:$0xff] }
 0x2ee   : > { %v1072_v23 = vpop.f32.mrf.mxu1 }
 0x2ef   : > { %v1073_v24 = vadd.f32 %v2198_v22, %v1072_v23  ;;  %v2215_v22 = vld [vmem:[%s3181_s2 + $0x58] sm:$0xff] }
 0x2f0   : > { %v2393_v25 = vpop.f32.mrf.mxu1  ;;  %v1344_v23 = vpack.c.bf16 %v2215_v22, %v2214_v21 }
 0x2f1   : > { %v1139_v27 = vpack.c.bf16 %v1073_v24, %v1073_v24  ;;  %v2212_v25 = vld [vmem:[%s3181_s2 + $0x40] sm:$0xff] }
 0x2f2   : > { %v1075_v28 = vpop.f32.mrf.mxu1 }
 0x2f3   : > { %v1144_v29 = vand.u32 %v1139_v27, %v2782_v57  ;;  %v2213_v27 = vld [vmem:[%s3181_s2 + $0x48] sm:$0xff] }
 0x2f4   : > { %v2394_v30 = vpop.f32.mrf.mxu1  ;;  %v1343_v28 = vpack.c.bf16 %v2213_v27, %v2212_v25 }
 0x2f5   : > { %2402 = vmatpush3.bf16.msra.mxu1 %v1144_v29  ;;  %v2207_v29 = vld [vmem:[%s3180_s23 + $0x50] sm:$0xff]  ;;  %v2208_v30 = vld [vmem:[%s3180_s23 + $0x58] sm:$0xff] }
 0x2f6   : > { %2413 = vmatprep.subr.bf16.mxu1 %v2572_v10 }
 0x36b   : > { %v848_v31 = vpop.xlane.xlu1 %847 }
 0x36c   : > { %v849_v32 = vsub.f32 %v844_v13, %v848_v31  ;;  %v1195_v13 = vsel %vm1193_vm8, %v1189_v12, 0 }
 0x36e   : > { %v850_v33 = vmul.f32 1.442695, %v849_v32  ;;  %v1289_v32 = vpack.c.bf16 %v2208_v30, %v2207_v29 }
 0x370   : > { %2544 = vpow2.f32 %v850_v33 }
 0x37d   : > { %v2545_v34 = vpop.eup %2544 }
 0x37e   : > { %v852_v35 = vsel %vm845_vm6, %v2545_v34, 0.0 }
 0x37f   : > { %853 = vadd.xlane.f32.xlu1 %v852_v35  ;;  %v2206_v35 = vld [vmem:[%s3180_s23 + $0x48] sm:$0xff] }
 0x408   : > { %v854_v36 = vpop.xlane.xlu1 %853 }
 0x409   : > { %2546 = vrcp.f32 %v854_v36 }
 0x416   : > { %v2547_v39 = vpop.eup %2546 }
 0x417   : > { %v856_v40 = vmul.f32 %v2547_v39, %v2545_v34  ;;  %v2205_v34 = vld [vmem:[%s3180_s23 + $0x40] sm:$0xff]  ;;  %v2221_v39 = vld [vmem:[%s3157_s5 + $0x50] sm:$0xff] }
 0x418   : > { %v1288_v38 = vpack.c.bf16 %v2206_v35, %v2205_v34 }
 0x419   : > { %v857_v42 = vpack.c.bf16 %v856_v40, %v856_v40  ;;  %v2222_v40 = vld [vmem:[%s3157_s5 + $0x58] sm:$0xff] }
 0x41a   : > { %v1399_v43 = vpack.c.bf16 %v2222_v40, %v2221_v39  ;;  %v2231_v39 = vld [vmem:[%s3180_s23 + $0x68] sm:$0xff] }
 0x41b   : > { %2368 = vmatmul.mubr.msk.bf16.vlgmr.msra.gmra.mxu0 %vm859_vm7, %v857_v42 }
 0x41c   : > { %2380 = vmatpush3.bf16.msra.mxu0 %v974_v41  ;;  %2383 = vmatprep.mubr.msk.bf16.mxu0 %vm2573_vm1, %v2572_v10 }
 0x41d   : > { %2381 = vmatprep.subr.bf16.mxu0 %v2572_v10 }
 0x420   : > { %2382 = vmatpush3.bf16.msra.mxu0 %v973_v45  ;;  %v2220_v45 = vld [vmem:[%s3157_s5 + $0x48] sm:$0xff] }
 0x421   : > { %2395 = vmatprep.subr.bf16.mxu0 %v2572_v10 }
 0x423   : > { %2384 = vmatmul.mubr.msk.bf16.vlgmr.msra.gmra.mxu0 %vm645_vm2, %v2729_v26 }
 0x424   : > { %2397 = vmatprep.mubr.msk.bf16.mxu0 %vm2573_vm1, %v2572_v10 }
 0x4db   : > { %v904_v46 = vpop.f32.mrf.mxu0 }
 0x4dc   : > { %v911_v24 = vpack.c.bf16 %v904_v46, %v904_v46 }
 0x4dd   : > { %v2369_v47 = vpop.f32.mrf.mxu0 }
 0x4df   : > { %v907_v48 = vpop.f32.mrf.mxu0 }
 0x4e0   : > { %v1398_v48 = vpack.c.bf16 %v2220_v45, %v2219_v44  ;;  %v2244_v45 = vld [vmem:[%s3157_s5 + $0x60] sm:$0xff] }
 0x4e1   : > { %v2370_v49 = vpop.f32.mrf.mxu0 }
 0x4e3   : > { %v1017_v51 = vpop.f32.mrf.mxu0 }
 0x4e4   : > { %v1018_v52 = vadd.f32 %v2191_v50, %v1017_v51  ;;  %v2217_v50 = vld [vmem:[%s3156_s4 + $0x2] ss:$0 sm:$0xff] }
 0x4e5   : > { %v2385_v53 = vpop.f32.mrf.mxu0 }
 0x4e6   : > { %v1079_v54 = vpack.c.bf16 %v1018_v52, %v1018_v52 }
 0x4e7   : > { %v1020_v56 = vpop.f32.mrf.mxu0 }
 0x4e8   : > { %v1084_v58 = vsel %vm797_vm3, %v1079_v54, 0 }
 0x4e9   : > { %v2386_v59 = vpop.f32.mrf.mxu0  ;;  %2396 = vmatpush3.bf16.xpose.msra.mxu0 %v1084_v58 }
 0x4ea   : > { %2407 = vmatprep.subr.bf16.mxu0 %v2572_v10 }
 0x4f0   : > { %2398 = vmatmul.mubr.msk.bf16.vlgmr.msra.gmra.mxu0 %vm797_vm3, %v1078_v61 }
 0x4f1   : > { %2409 = vmatprep.mubr.msk.bf16.mxu0 %vm2573_vm1, %v2572_v10  ;;  %2408 = vmatpush3.bf16.msra.mxu0 %v1195_v13 }
 0x4f2   : > { %2419 = vmatprep.subr.bf16.mxu0 %v2572_v10 }
 0x5b0   : > { %v1120_v62 = vpop.f32.mrf.mxu0 }
 0x5b1   : > { %v1126_v63 = vmul.f32 0.35355338, %v1120_v62 }
 0x5b2   : > { %v2399_v1 = vpop.f32.mrf.mxu0 }
 0x5b3   : > { %v1127_v2 = vsel %vm845_vm6, %v1126_v63, -inf }
 0x5b4   : > { %1128 = vmax.xlane.f32.xlu0 %v1127_v2  ;;  %v1123_v3 = vpop.f32.mrf.mxu0 }
 0x5b6   : > { %v2400_v4 = vpop.f32.mrf.mxu0 }
 0x63d   : > { %v1129_v5 = vpop.xlane.xlu0 %1128 }
 0x63e   : > { %v1130_v6 = vsub.f32 %v1126_v63, %v1129_v5  ;;  %v2210_v63 = vld [vmem:[%s3182_s29 + $0x2] ss:$0 sm:$0xff] }
 0x640   : > { %v1131_v7 = vmul.f32 1.442695, %v1130_v6 }
 0x642   : > { %2548 = vpow2.f32 %v1131_v7  ;;  %v2224_v7 = vld [vmem:[%s3158_s6 + $0x2] ss:$0 sm:$0xff] }
 0x64f   : > { %v2549_v8 = vpop.eup %2548 }
 0x650   : > { %v1133_v9 = vsel %vm845_vm6, %v2549_v8, 0.0 }
 0x651   : > { %1134 = vadd.xlane.f32.xlu1 %v1133_v9 }
 0x6da   : > { %v1135_v14 = vpop.xlane.xlu1 %1134 }
 0x6db   : > { %2550 = vrcp.f32 %v1135_v14 }
 0x6e8   : > { %v2551_v17 = vpop.eup %2550 }
 0x6e9   : > { %v1137_v18 = vmul.f32 %v2551_v17, %v2549_v8 }
 0x6eb   : > { %v1138_v19 = vpack.c.bf16 %v1137_v18, %v1137_v18 }
 0x6ed   : > { %2404 = vmatmul.mubr.msk.bf16.vlgmr.msra.gmra.mxu1 %vm859_vm7, %v1138_v19 }
 0x6ee   : > { %2414 = vmatpush3.bf16.msra.mxu1 %v1241_v20  ;;  %2415 = vmatprep.mubr.msk.bf16.mxu1 %vm2573_vm1, %v2572_v10 }
 0x6ef   : > { %2427 = vmatprep.subr.bf16.mxu1 %v2572_v10 }
 0x6f5   : > { %2416 = vmatmul.mubr.msk.bf16.vlgmr.msra.gmra.mxu1 %vm797_vm3, %v911_v24 }
 0x6f6   : > { %2428 = vmatpush3.bf16.msra.mxu1 %v1344_v23  ;;  %2431 = vmatprep.mubr.msk.bf16.mxu1 %vm2573_vm1, %v2572_v10 }
 0x6f7   : > { %2429 = vmatprep.subr.bf16.mxu1 %v2572_v10 }
 0x6fa   : > { %2430 = vmatpush3.bf16.msra.mxu1 %v1343_v28  ;;  %v2228_v28 = vld [vmem:[%s3159_s7 + $0x10] sm:$0xff] }
 0x6fb   : > { %2443 = vmatprep.subr.bf16.mxu1 %v2572_v10  ;;  %v1559_v29 = vpack.c.bf16 %v2228_v28, %v2228_v28 }
 0x6fd   : > { %2432 = vmatmul.mubr.msk.bf16.vlgmr.msra.gmra.mxu1 %vm645_vm2, %v2729_v26  ;;  %v1564_v30 = vsel %vm1193_vm8, %v1559_v29, 0 }
 0x6fe   : > { %2445 = vmatprep.mubr.msk.bf16.mxu1 %vm2573_vm1, %v2572_v10 }
 0x7ad   : > { %v1180_v31 = vpop.f32.mrf.mxu1 }
 0x7ae   : > { %v1188_v33 = vpack.c.bf16 %v1180_v31, %v1180_v31 }
 0x7af   : > { %v2405_v36 = vpop.f32.mrf.mxu1 }
 0x7b0   : > { %2410 = vmatmul.mubr.msk.bf16.vlgmr.msra.gmra.mxu0 %vm797_vm3, %v1188_v33  ;;  %v2233_v33 = vld [vmem:[%s3180_s23 + $0x78] sm:$0xff] }
 0x7b1   : > { %v1183_v37 = vpop.f32.mrf.mxu1  ;;  %2420 = vmatpush3.bf16.msra.mxu0 %v1289_v32  ;;  %2423 = vmatprep.mubr.msk.bf16.mxu0 %vm2573_vm1, %v2572_v10  ;;  %v2232_v32 = vld [vmem:[%s3180_s23 + $0x70] sm:$0xff] }
 0x7b2   : > { %2421 = vmatprep.subr.bf16.mxu0 %v2572_v10  ;;  %v1613_v36 = vpack.c.bf16 %v2233_v33, %v2232_v32 }
 0x7b3   : > { %v2406_v41 = vpop.f32.mrf.mxu1 }
 0x7b4   : > { %v2246_v41 = vld [vmem:[%s3157_s5 + $0x70] sm:$0xff] }
 0x7b5   : > { %v2916_v42 = vpop.f32.mrf.mxu1  ;;  %2422 = vmatpush3.bf16.msra.mxu0 %v1288_v38  ;;  %v2230_v38 = vld [vmem:[%s3180_s23 + $0x60] sm:$0xff] }
 0x7b6   : > { %2435 = vmatprep.subr.bf16.mxu0 %v2572_v10  ;;  %v1612_v40 = vpack.c.bf16 %v2231_v39, %v2230_v38 }
 0x7b7   : > { %v2417_v46 = vpop.f32.mrf.mxu1 }
 0x7b8   : > { %2424 = vmatmul.mubr.msk.bf16.vlgmr.msra.gmra.mxu0 %vm645_vm2, %v2729_v26  ;;  %v2245_v46 = vld [vmem:[%s3157_s5 + $0x68] sm:$0xff] }
 0x7b9   : > { %v1280_v47 = vpop.f32.mrf.mxu1  ;;  %2436 = vmatpush3.bf16.msra.mxu0 %v1399_v43  ;;  %2439 = vmatprep.mubr.msk.bf16.mxu0 %vm2573_vm1, %v2572_v10  ;;  %v2247_v43 = vld [vmem:[%s3157_s5 + $0x78] sm:$0xff] }
 0x7ba   : > { %2437 = vmatprep.subr.bf16.mxu0 %v2572_v10  ;;  %v1723_v44 = vpack.c.bf16 %v2247_v43, %v2246_v41  ;;  %v1722_v47 = vpack.c.bf16 %v2245_v46, %v2244_v45 }
 0x7bb   : > { %v2418_v49 = vpop.f32.mrf.mxu1 }
 0x7bc   : > { %v2240_v49 = vld [vmem:[%s3181_s2 + $0x78] sm:$0xff] }
 0x7bd   : > { %v1387_v51 = vpop.f32.mrf.mxu1  ;;  %2438 = vmatpush3.bf16.msra.mxu0 %v1398_v48  ;;  %v2239_v48 = vld [vmem:[%s3181_s2 + $0x70] sm:$0xff] }
 0x7be   : > { %v1388_v52 = vadd.f32 %v2217_v50, %v1387_v51  ;;  %2449 = vmatprep.subr.bf16.mxu0 %v2572_v10  ;;  %v1668_v51 = vpack.c.bf16 %v2240_v49, %v2239_v48 }
 0x7bf   : > { %v2433_v53 = vpop.f32.mrf.mxu1 }
 0x7c0   : > { %v1449_v54 = vpack.c.bf16 %v1388_v52, %v1388_v52  ;;  %2440 = vmatmul.mubr.msk.bf16.vlgmr.msra.gmra.mxu0 %vm645_vm2, %v2729_v26  ;;  %v2237_v53 = vld [vmem:[%s3181_s2 + $0x60] sm:$0xff] }
 0x7c1   : > { %v1390_v55 = vpop.f32.mrf.mxu1  ;;  %2451 = vmatprep.mubr.msk.bf16.mxu0 %vm2573_vm1, %v2572_v10 }
 0x7c2   : > { %v1454_v56 = vsel %vm797_vm3, %v1449_v54, 0  ;;  %v2238_v54 = vld [vmem:[%s3181_s2 + $0x68] sm:$0xff] }
 0x7c3   : > { %v2434_v58 = vpop.f32.mrf.mxu1  ;;  %2444 = vmatpush3.bf16.xpose.msra.mxu1 %v1454_v56 }
 0x7c4   : > { %2455 = vmatprep.subr.bf16.mxu1 %v2572_v10  ;;  %v1667_v58 = vpack.c.bf16 %v2238_v54, %v2237_v53 }
 0x870   : > { %v2940_v59 = vpop.f32.mrf.mxu0 }
 0x872   : > { %v2411_v60 = vpop.f32.mrf.mxu0 }
 0x874   : > { %v1234_v61 = vpop.f32.mrf.mxu0 }
 0x876   : > { %v2412_v62 = vpop.f32.mrf.mxu0 }
 0x878   : > { %v1332_v1 = vpop.f32.mrf.mxu0 }
 0x879   : > { %v1333_v2 = vadd.f32 %v2210_v63, %v1332_v1 }
 0x87a   : > { %v2425_v3 = vpop.f32.mrf.mxu0 }
 0x87b   : > { %v1448_v4 = vpack.c.bf16 %v1333_v2, %v1333_v2  ;;  %v2249_v2 = vld [vmem:[%s3158_s6 + $0x3] ss:$0 sm:$0xff] }
 0x87c   : > { %v1335_v5 = vpop.f32.mrf.mxu0 }
 0x87d   : > { %2446 = vmatmul.mubr.msk.bf16.vlgmr.msra.gmra.mxu1 %vm797_vm3, %v1448_v4 }
 0x87e   : > { %v2426_v6 = vpop.f32.mrf.mxu0  ;;  %2457 = vmatprep.mubr.msk.bf16.mxu1 %vm2573_vm1, %v2572_v10  ;;  %2456 = vmatpush3.bf16.msra.mxu1 %v1564_v30 }
 0x87f   : > { %2469 = vmatprep.subr.bf16.mxu1 %v2572_v10 }
 0x880   : > { %v1442_v8 = vpop.f32.mrf.mxu0 }
 0x881   : > { %v1443_v9 = vadd.f32 %v2224_v7, %v1442_v8 }
 0x882   : > { %v2441_v11 = vpop.f32.mrf.mxu0 }
 0x883   : > { %v1509_v12 = vpack.c.bf16 %v1443_v9, %v1443_v9 }
 0x884   : > { %v1445_v13 = vpop.f32.mrf.mxu0 }
 0x885   : > { %v1514_v14 = vand.u32 %v1509_v12, %v2782_v57 }
 0x886   : > { %v2442_v15 = vpop.f32.mrf.mxu0 }
 0x887   : > { %2450 = vmatpush3.bf16.msra.mxu0 %v1514_v14 }
 0x888   : > { %2461 = vmatprep.subr.bf16.mxu0 %v2572_v10 }
 0x93d   : > { %v1490_v16 = vpop.f32.mrf.mxu1 }
 0x93e   : > { %v1496_v17 = vmul.f32 0.35355338, %v1490_v16  ;;  %v2242_v16 = vld [vmem:[%s3156_s4 + $0x3] ss:$0 sm:$0xff] }
 0x93f   : > { %v2447_v18 = vpop.f32.mrf.mxu1 }
 0x940   : > { %v1497_v19 = vsel %vm845_vm6, %v1496_v17, -inf }
 0x941   : > { %1498 = vmax.xlane.f32.xlu0 %v1497_v19  ;;  %v1493_v20 = vpop.f32.mrf.mxu1 }
 0x942   : > { %v2235_v20 = vld [vmem:[%s3182_s29 + $0x3] ss:$0 sm:$0xff] }
 0x943   : > { %v2448_v21 = vpop.f32.mrf.mxu1 }
 0x9ca   : > { %v1499_v22 = vpop.xlane.xlu0 %1498 }
 0x9cb   : > { %v1500_v23 = vsub.f32 %v1496_v17, %v1499_v22 }
 0x9cd   : > { %v1501_v24 = vmul.f32 1.442695, %v1500_v23 }
 0x9cf   : > { %2552 = vpow2.f32 %v1501_v24 }
 0x9dc   : > { %v2553_v25 = vpop.eup %2552 }
 0x9dd   : > { %v1503_v27 = vsel %vm845_vm6, %v2553_v25, 0.0 }
 0x9de   : > { %1504 = vadd.xlane.f32.xlu1 %v1503_v27 }
 0xa67   : > { %v1505_v31 = vpop.xlane.xlu1 %1504 }
 0xa68   : > { %2554 = vrcp.f32 %v1505_v31 }
 0xa75   : > { %v2555_v34 = vpop.eup %2554 }
 0xa76   : > { %v1507_v35 = vmul.f32 %v2555_v34, %v2553_v25 }
 0xa78   : > { %v1508_v37 = vpack.c.bf16 %v1507_v35, %v1507_v35 }
 0xa7a   : > { %2452 = vmatmul.mubr.msk.bf16.vlgmr.msra.gmra.mxu0 %vm859_vm7, %v1508_v37 }
 0xa7b   : > { %2462 = vmatpush3.bf16.msra.mxu0 %v1613_v36  ;;  %2465 = vmatprep.mubr.msk.bf16.mxu0 %vm2573_vm1, %v2572_v10  ;;  %v2253_v36 = vld [vmem:[%s3159_s7 + $0x18] sm:$0xff] }
 0xa7c   : > { %2463 = vmatprep.subr.bf16.mxu0 %v2572_v10  ;;  %v1883_v37 = vpack.c.bf16 %v2253_v36, %v2253_v36  ;;  %v2035_v36 = vld [vmem:[%s3167_s15] sm:$0xff] }
 0xa7e   : > { %v1888_v38 = vsel %vm1193_vm8, %v1883_v37, 0  ;;  %v2036_v37 = vld [vmem:[%s3167_s15 + $0x8] sm:$0xff] }
 0xa7f   : > { %2464 = vmatpush3.bf16.msra.mxu0 %v1612_v40 }
 0xa80   : > { %2477 = vmatprep.subr.bf16.mxu0 %v2572_v10 }
 0xa82   : > { %2466 = vmatmul.mubr.msk.bf16.vlgmr.msra.gmra.mxu0 %vm645_vm2, %v2729_v26 }
 0xa83   : > { %2478 = vmatpush3.bf16.msra.mxu0 %v1723_v44  ;;  %2481 = vmatprep.mubr.msk.bf16.mxu0 %vm2573_vm1, %v2572_v10 }
 0xa84   : > { %2479 = vmatprep.subr.bf16.mxu0 %v2572_v10 }
 0xa87   : > { %2480 = vmatpush3.bf16.msra.mxu0 %v1722_v47 }
 0xa88   : > { %2491 = vmatprep.subr.bf16.mxu0 %v2572_v10 }
 0xa8a   : > { %2482 = vmatmul.mubr.msk.bf16.vlgmr.msra.gmra.mxu0 %vm645_vm2, %v2729_v26 }
 0xa8b   : > { %2493 = vmatprep.mubr.msk.bf16.mxu0 %vm2573_vm1, %v2572_v10 }
 0xb3a   : > { %v1550_v50 = vpop.f32.mrf.mxu0 }
 0xb3b   : > { %v1558_v52 = vpack.c.bf16 %v1550_v50, %v1550_v50  ;;  %v2255_v50 = vld [vmem:[%s3160_s8] ss:$0 sm:$0xff] }
 0xb3c   : > { %v2453_v55 = vpop.f32.mrf.mxu0 }
 0xb3d   : > { %2458 = vmatmul.mubr.msk.bf16.vlgmr.msra.gmra.mxu1 %vm797_vm3, %v1558_v52 }
 0xb3e   : > { %v1553_v56 = vpop.f32.mrf.mxu0  ;;  %2470 = vmatpush3.bf16.msra.mxu1 %v1668_v51  ;;  %2473 = vmatprep.mubr.msk.bf16.mxu1 %vm2573_vm1, %v2572_v10 }
 0xb3f   : > { %2471 = vmatprep.subr.bf16.mxu1 %v2572_v10 }
 0xb40   : > { %v2454_v60 = vpop.f32.mrf.mxu0 }
 0xb42   : > { %v1656_v61 = vpop.f32.mrf.mxu0  ;;  %2472 = vmatpush3.bf16.msra.mxu1 %v1667_v58 }
 0xb43   : > { %2485 = vmatprep.subr.bf16.mxu1 %v2572_v10  ;;  %v1657_v22 = vadd.f32 %v2235_v20, %v1656_v61  ;;  %v2048_v20 = vld [vmem:[%s3167_s15 + $0x68] sm:$0xff] }
 0xb44   : > { %v2467_v62 = vpop.f32.mrf.mxu0 }
 0xb45   : > { %2474 = vmatmul.mubr.msk.bf16.vlgmr.msra.gmra.mxu1 %vm645_vm2, %v2729_v26  ;;  %v1278_v26 = vadd.f32 %v2916_v42, %v2940_v59  ;;  %v1772_v23 = vpack.c.bf16 %v1657_v22, %v1657_v22 }
 0xb46   : > { %v1659_v63 = vpop.f32.mrf.mxu0  ;;  %2487 = vmatprep.mubr.msk.bf16.mxu1 %vm2573_vm1, %v2572_v10 }
 0xb48   : > { %v2468_v1 = vpop.f32.mrf.mxu0 }
 0xb4a   : > { %v1766_v3 = vpop.f32.mrf.mxu0 }
 0xb4b   : > { %v1767_v4 = vadd.f32 %v2249_v2, %v1766_v3  ;;  %v1971_v2 = vld [vmem:[%s3165_s13 + $0x10] sm:$0xff] }
 0xb4c   : > { %v2483_v5 = vpop.f32.mrf.mxu0 }
 0xb4d   : > { %v1833_v6 = vpack.c.bf16 %v1767_v4, %v1767_v4  ;;  %v1969_v4 = vld [vmem:[%s3165_s13] sm:$0xff]  ;;  %v1970_v5 = vld [vmem:[%s3165_s13 + $0x8] sm:$0xff] }
 0xb4e   : > { %v1769_v7 = vpop.f32.mrf.mxu0 }
 0xb4f   : > { %v1838_v8 = vand.u32 %v1833_v6, %v2782_v57  ;;  %v1974_v6 = vpack.c.bf16 %v1970_v5, %v1969_v4 }
 0xb50   : > { %v2484_v9 = vpop.f32.mrf.mxu0 }
 0xb51   : > { %2492 = vmatpush3.bf16.msra.mxu0 %v1838_v8 }
 0xb52   : > { %2503 = vmatprep.subr.bf16.mxu0 %v2572_v10 }
 0xbfd   : > { %v1600_v11 = vpop.f32.mrf.mxu1 }
 0xbfe   : > { %v1606_v12 = vadd.f32 %v1600_v11, %v1278_v26  ;;  %v2256_v11 = vld [vmem:[%s3163_s11] ss:$0 sm:$0xff] }
 0xbff   : > { %v2459_v13 = vpop.f32.mrf.mxu1 }
 0xc00   : > { %v2257_v13 = vld [vmem:[%s3164_s12] ss:$0 sm:$0xff] }
 0xc01   : > { %v1603_v14 = vpop.f32.mrf.mxu1 }
 0xc03   : > { %v2460_v15 = vpop.f32.mrf.mxu1 }
 0xc05   : > { %v1711_v17 = vpop.f32.mrf.mxu1 }
 0xc06   : > { %v1712_v18 = vadd.f32 %v2242_v16, %v1711_v17  ;;  %v2049_v17 = vld [vmem:[%s3167_s15 + $0x70] sm:$0xff] }
 0xc07   : > { %v2475_v19 = vpop.f32.mrf.mxu1 }
 0xc08   : > { %v1773_v57 = vpack.c.bf16 %v1712_v18, %v1712_v18  ;;  %v2050_v18 = vld [vmem:[%s3167_s15 + $0x78] sm:$0xff] }
 0xc09   : > { %v1714_v21 = vpop.f32.mrf.mxu1  ;;  %v2059_v19 = vpack.c.bf16 %v2050_v18, %v2049_v17 }
 0xc0a   : > { %v1778_v42 = vsel %vm797_vm3, %v1773_v57, 0  ;;  %v2047_v57 = vld [vmem:[%s3167_s15 + $0x60] sm:$0xff] }
 0xc0b   : > { %v2476_v59 = vpop.f32.mrf.mxu1  ;;  %2486 = vmatpush3.bf16.xpose.msra.mxu1 %v1778_v42  ;;  %v2058_v21 = vpack.c.bf16 %v2048_v20, %v2047_v57  ;;  %v2045_v42 = vld [vmem:[%s3167_s15 + $0x50] sm:$0xff] }
 0xc0c   : > { %2497 = vmatprep.subr.bf16.mxu1 %v2572_v10  ;;  %v2046_v59 = vld [vmem:[%s3167_s15 + $0x58] sm:$0xff] }
 0xc0d   : > { %v2057_v22 = vpack.c.bf16 %v2046_v59, %v2045_v42 }
 0xc12   : > { %2488 = vmatmul.mubr.msk.bf16.vlgmr.msra.gmra.mxu1 %vm797_vm3, %v1772_v23  ;;  %v2043_v23 = vld [vmem:[%s3167_s15 + $0x40] sm:$0xff] }
 0xc13   : > { %2499 = vmatprep.mubr.msk.bf16.mxu1 %vm2573_vm1, %v2572_v10  ;;  %2498 = vmatpush3.bf16.msra.mxu1 %v1888_v38  ;;  %v2052_v38 = vpack.c.bf16 %v2036_v37, %v2035_v36 }
 0xc14   : > { %2511 = vmatprep.subr.bf16.mxu1 %v2572_v10 }
 0xcd2   : > { %v1814_v24 = vpop.f32.mrf.mxu1 }
 0xcd3   : > { %v1820_v25 = vmul.f32 0.35355338, %v1814_v24  ;;  %v2044_v24 = vld [vmem:[%s3167_s15 + $0x48] sm:$0xff] }
 0xcd4   : > { %v2489_v27 = vpop.f32.mrf.mxu1 }
 0xcd5   : > { %v1821_v28 = vsel %vm845_vm6, %v1820_v25, -inf  ;;  %v2056_v27 = vpack.c.bf16 %v2044_v24, %v2043_v23 }
 0xcd6   : > { %1822 = vmax.xlane.f32.xlu0 %v1821_v28  ;;  %v1817_v29 = vpop.f32.mrf.mxu1  ;;  %v2042_v28 = vld [vmem:[%s3167_s15 + $0x38] sm:$0xff] }
 0xcd8   : > { %v2490_v30 = vpop.f32.mrf.mxu1 }
 0xcd9   : > { %v2039_v30 = vld [vmem:[%s3167_s15 + $0x20] sm:$0xff] }
 0xd5f   : > { %v1823_v31 = vpop.xlane.xlu0 %1822 }
 0xd60   : > { %v1824_v32 = vsub.f32 %v1820_v25, %v1823_v31  ;;  %v2041_v25 = vld [vmem:[%s3167_s15 + $0x30] sm:$0xff]  ;;  %v2040_v31 = vld [vmem:[%s3167_s15 + $0x28] sm:$0xff] }
 0xd61   : > { %v2055_v29 = vpack.c.bf16 %v2042_v28, %v2041_v25 }
 0xd62   : > { %v1825_v33 = vmul.f32 1.442695, %v1824_v32  ;;  %v2054_v32 = vpack.c.bf16 %v2040_v31, %v2039_v30 }
 0xd64   : > { %2556 = vpow2.f32 %v1825_v33  ;;  %v2037_v33 = vld [vmem:[%s3167_s15 + $0x10] sm:$0xff] }
 0xd71   : > { %v2557_v34 = vpop.eup %2556 }
 0xd72   : > { %v1827_v35 = vsel %vm845_vm6, %v2557_v34, 0.0 }
 0xd73   : > { %1828 = vadd.xlane.f32.xlu1 %v1827_v35 }
 0xdfc   : > { %v1829_v39 = vpop.xlane.xlu1 %1828 }
 0xdfd   : > { %2558 = vrcp.f32 %v1829_v39  ;;  %v2258_v39 = vld [vmem:[%s3166_s14] ss:$0 sm:$0xff] }
 0xe0a   : > { %v2559_v40 = vpop.eup %2558 }
 0xe0b   : > { %v1831_v41 = vmul.f32 %v2559_v40, %v2557_v34  ;;  %v2038_v34 = vld [vmem:[%s3167_s15 + $0x18] sm:$0xff] }
 0xe0c   : > { %v2053_v35 = vpack.c.bf16 %v2038_v34, %v2037_v33 }
 0xe0d   : > { %v1832_v43 = vpack.c.bf16 %v1831_v41, %v1831_v41 }
 0xe0f   : > { %2494 = vmatmul.mubr.msk.bf16.vlgmr.msra.gmra.mxu0 %vm859_vm7, %v1832_v43 }
 0xe10   : > { %2507 = vmatprep.mubr.msk.bf16.mxu0 %vm2573_vm1, %v2572_v10 }
 0xecf   : > { %v1874_v44 = vpop.f32.mrf.mxu0 }
 0xed0   : > { %v1882_v45 = vpack.c.bf16 %v1874_v44, %v1874_v44 }
 0xed1   : > { %v2495_v46 = vpop.f32.mrf.mxu0 }
 0xed2   : > { %2500 = vmatmul.mubr.msk.bf16.vlgmr.msra.gmra.mxu1 %vm797_vm3, %v1882_v45 }
 0xed3   : > { %v1877_v47 = vpop.f32.mrf.mxu0  ;;  %2527 = vmatprep.mubr.msk.bf16.mxu1 %vm2573_vm1, %v2572_v10  ;;  %2512 = vmatpush3.bf16.msra.mxu1 %v2059_v19 }
 0xed4   : > { %2513 = vmatprep.subr.bf16.mxu1 %v2572_v10 }
 0xed5   : > { %v2496_v48 = vpop.f32.mrf.mxu0 }
 0xed7   : > { %2514 = vmatpush3.bf16.msra.mxu1 %v2058_v21 }
 0xed8   : > { %2515 = vmatprep.subr.bf16.mxu1 %v2572_v10 }
 0xedb   : > { %2516 = vmatpush3.bf16.msra.mxu1 %v2057_v22 }
 0xedc   : > { %2517 = vmatprep.subr.bf16.mxu1 %v2572_v10 }
 0xedf   : > { %2518 = vmatpush3.bf16.msra.mxu1 %v2056_v27 }
 0xee0   : > { %2519 = vmatprep.subr.bf16.mxu1 %v2572_v10 }
 0xee3   : > { %2520 = vmatpush3.bf16.msra.mxu1 %v2055_v29 }
 0xee4   : > { %2521 = vmatprep.subr.bf16.mxu1 %v2572_v10 }
 0xee7   : > { %2522 = vmatpush3.bf16.msra.mxu1 %v2054_v32 }
 0xee8   : > { %2523 = vmatprep.subr.bf16.mxu1 %v2572_v10 }
 0xeeb   : > { %2524 = vmatpush3.bf16.msra.mxu1 %v2053_v35 }
 0xeec   : > { %2525 = vmatprep.subr.bf16.mxu1 %v2572_v10 }
 0xeef   : > { %2526 = vmatpush3.bf16.msra.mxu1 %v2052_v38 }
 0xf92   : > { %v1924_v49 = vpop.f32.mrf.mxu1 }
 0xf93   : > { %v1930_v51 = vadd.f32 %v1924_v49, %v1606_v12 }
 0xf94   : > { %v2501_v52 = vpop.f32.mrf.mxu1 }
 0xf95   : > { %v1938_v53 = vadd.f32 %v2255_v50, %v1930_v51 }
 0xf96   : > { %v1927_v54 = vpop.f32.mrf.mxu1 }
 0xf97   : > { %v3055_v55 = vadd.f32 %v1938_v53, %v2691_v0  ;;  %v1972_v0 = vld [vmem:[%s3165_s13 + $0x18] sm:$0xff] }
 0xf98   : > { %v2502_v56 = vpop.f32.mrf.mxu1  ;;  %v1975_v3 = vpack.c.bf16 %v1972_v0, %v1971_v2 }
 0xf99   : > { %v1942_v58 = vsel %vm602_vm0, %v3055_v55, 0.0  ;;  %v2260_v56 = vld [vmem:[%s3168_s16] ss:$0 sm:$0xff] }
 0xf9a   : > { %1943 = vadd.xlane.f32.xlu0 %v1942_v58  ;;  %2504 = vmatpush3.bf16.msra.mxu0 %v1975_v3 }
 0xf9b   : > { %2505 = vmatprep.subr.bf16.mxu0 %v2572_v10 }
 0xf9e   : > { %2506 = vmatpush3.bf16.msra.mxu0 %v1974_v6 }
0x1023   : > { %v1944_v60 = vpop.xlane.xlu0 %1943 }
0x1024   : > { %v1945_v61 = vmul.f32 0.03125, %v1944_v60 }
0x1026   : > { %v1946_v62 = vsub.f32 %v3055_v55, %v1945_v61 }
0x1028   : > { %v1947_v63 = vmul.f32 %v1946_v62, %v1946_v62 }
0x102a   : > { %v1948_v1 = vsel %vm602_vm0, %v1947_v63, 0.0 }
0x102b   : > { %1949 = vadd.xlane.f32.xlu1 %v1948_v1 }
0x10b4   : > { %v1950_v7 = vpop.xlane.xlu1 %1949 }
0x10b5   : > { %v1951_v8 = vmul.f32 0.03125, %v1950_v7 }
0x10b7   : > { %v1952_v9 = vadd.f32 1e-06, %v1951_v8 }
0x10b9   : > { %2560 = vrsqrt.f32 %v1952_v9 }
0x10c6   : > { %v2561_v26 = vpop.eup %2560 }
0x10c7   : > { %v1954_v12 = vmul.f32 %v2561_v26, %v1946_v62 }
0x10c9   : > { %v1961_v14 = vmul.f32 %v2256_v11, %v1954_v12 }
0x10cb   : > { %v1968_v15 = vadd.f32 %v2257_v13, %v1961_v14 }
0x10cd   : > { %v1973_v16 = vpack.c.bf16 %v1968_v15, %v1968_v15 }
0x10cf   : > { %2508 = vmatmul.mubr.msk.bf16.vlgmr.msra.gmra.mxu0 %vm645_vm2, %v1973_v16 }
0x118f   : > { %v2020_v40 = vpop.f32.mrf.mxu0 }
0x1190   : > { %v2021_v41 = vadd.f32 %v2258_v39, %v2020_v40 }
0x1191   : > { %v2509_v43 = vpop.f32.mrf.mxu0 }
0x1192   : > { %v2026_v44 = vmul.f32 %v2021_v41, %v2021_v41 }
0x1193   : > { %v2023_v45 = vpop.f32.mrf.mxu0 }
0x1194   : > { %v2027_v46 = vmul.f32 %v2026_v44, %v2021_v41 }
0x1195   : > { %v2510_v47 = vpop.f32.mrf.mxu0 }
0x1196   : > { %v2028_v48 = vmul.f32 0.044715, %v2027_v46 }
0x1198   : > { %v2029_v49 = vadd.f32 %v2028_v48, %v2021_v41 }
0x119a   : > { %v2030_v50 = vmul.f32 0.7978846, %v2029_v49 }
0x119c   : > { %2562 = vtanh.f32 %v2030_v50 }
0x11a9   : > { %v2563_v51 = vpop.eup %2562 }
0x11aa   : > { %v2032_v52 = vadd.f32 1.0, %v2563_v51 }
0x11ac   : > { %v2033_v10 = vmul.f32 0.5, %v2032_v52 }
0x11ae   : > { %v2034_v53 = vmul.f32 %v2033_v10, %v2021_v41 }
0x11b0   : > { %v2051_v54 = vpack.c.bf16 %v2034_v53, %v2034_v53 }
0x11b2   : > { %2528 = vmatmul.mubr.bf16.vlgmr.msra.gmra.mxu1 %v2051_v54 }
0x1272   : > { %v2101_v58 = vpop.f32.mrf.mxu1 }
0x1273   : > { %v2102_v60 = vadd.f32 %v2260_v56, %v2101_v58 }
0x1274   : > { %v2529_v61 = vpop.f32.mrf.mxu1 }
0x1275   : > { %v2107_v62 = vadd.f32 %v2102_v60, %v3055_v55 }
0x1276   : > { %v2104_v63 = vpop.f32.mrf.mxu1 }
0x1277   : > { %2108 = vst.msk [vmem:[%s597_s27] sm:$0x1f] %vm602_vm0, %v2107_v62 }
0x1278   : > { %v2530_v1 = vpop.f32.mrf.mxu1 }
0x1279 PF: > { %s29_s0 = sadd.s32 1, %s2570_s0  }
0x127a   : > { %p26_p4 = scmp.ge.s32.totalorder %s29_s0, 4  }
0x127c   :  { %28 = sbr.rel (!%p26_p4) target bundleno = 5 (0x5), region = 147 }

// kernel: vl_transformer_itm_forward.13
= control target key start
LH: loop header
LB: loop body
LE: loop exit
PB: predicated region body
PF: predicated region fallthrough
CT: control target
= control target key end

     0   :  { %v129_v3 = vmov 0.0   ;;  %vm130_vm0 = vmmov 0   ;;  %s173_s0 = inlined_call_operand.vmem [shape: f32[2,32], index: 0, kind: input, shape index: {}]   ;;  %s174_s1 = inlined_call_operand.vmem [shape: f32[32,2], index: 1, kind: input, shape index: {}]   ;;  %s175_s2 = inlined_call_operand.vmem [shape: f32[1,2], index: 2, kind: input, shape index: {}]   ;;  %s176_s3 = inlined_call_operand.hbm [shape: f32[2,2], index: 3, kind: output, shape index: {}]  }
   0x1   :  { %v19_v0 = vld [vmem:[%s174_s1 + $0x10] sm:$0xff]  ;;  %v20_v1 = vld [vmem:[%s174_s1 + $0x18] sm:$0xff]  ;;  %v17_v2 = vld [vmem:[%s174_s1] sm:$0xff]  ;;  %96 = vmatprep.subr.bf16.mxu0 %v129_v3  ;;  %100 = vmatprep.mubr.msk.bf16.mxu0 %vm130_vm0, %v129_v3 }
   0x2   :  { %v23_v4 = vpack.c.bf16 %v20_v1, %v19_v0  ;;  %v18_v5 = vld [vmem:[%s174_s1 + $0x8] sm:$0xff] }
   0x3   :  { %8 = vsyncpa [#allocation3], 0  ;;  %v22_v6 = vpack.c.bf16 %v18_v5, %v17_v2  ;;  %v16_v7 = vld [vmem:[%s173_s0] sm:$0x3]  ;;  %vm31_vm1 = vcmask 261120   ;;  %s131_s24 = smov [#allocation2]  }
   0x4   :  { %97 = vmatpush3.bf16.msra.mxu0 %v23_v4  ;;  %v21_v8 = vpack.c.bf16 %v16_v7, %v16_v7  ;;  %v91_v9 = vld [vmem:[%s175_s2] ss:$0 sm:$0xff]  ;;  %s83_s1 = sshll.u32 %s131_s24, 4  ;;  %vm75_vm2 = vcmask 9216   ;;  %s84_s1 = int_to_ptr.vmem [resolvable:$true] %s83_s1 }
   0x5   :  { %98 = vmatprep.subr.bf16.mxu0 %v129_v3  ;;  %s107_s25 = scalar_lea.vmem %s84_s1, 32  ;;  %p112_p1 = scmp.lt.s32.totalorder %s84_s1, %s84_s1 }
   0x6   :  { %p108_p0 = scmp.ne.s32.totalorder %s84_s1, %s107_s25  ;;  %p113_p2 = scmp.lt.s32.totalorder %s107_s25, %s107_s25 }
   0x8   :  { %99 = vmatpush3.bf16.msra.mxu0 %v22_v6  ;;  %p114_p3 = por %p113_p2, %p112_p1 }
   0xa   :  { %p115_p4 = pnand %p114_p3, %p108_p0 }
   0xb   :  { %101 = vmatmul.mubr.msk.bf16.vlgmr.msra.gmra.mxu0 %vm31_vm1, %v21_v8 }
  0xcb   :  { %v69_v10 = vpop.f32.mrf.mxu0 }
  0xcc   :  { %v70_v11 = vadd.f32 %v91_v9, %v69_v10 }
  0xcd   :  { %v102_v12 = vpop.f32.mrf.mxu0 }
  0xce   :  { %76 = vst.msk [vmem:[#allocation2] sm:$0x3] %vm75_vm2, %v70_v11 }
  0xcf   :  { %v72_v13 = vpop.f32.mrf.mxu0 }
  0xd0   :  { %118 = shalt.err (!%p115_p4)
}
  0xd1   :  { %86 = dma.vmem_to_hbm [thread:$0]  %s84_s1, 32, %s176_s3, [#allocation3]   ;;  %v103_v14 = vpop.f32.mrf.mxu0 }
  0xd2   :  { %127 = dma.done.wait [#allocation3], 32  }
  0xd3   :  { %128 = vsyncadd [#allocation3], 4294967264 }
  0xd4   :  { %90 = vsyncpa [#allocation3], 1 }

// kernel: vl_transformer_itm_forward.12
= control target key start
LH: loop header
LB: loop body
LE: loop exit
PB: predicated region body
PF: predicated region fallthrough
CT: control target
= control target key end

     0   :  { %s4661_s6 = smov 1   ;;  %s4662_s10 = smov 2   ;;  %s5387_s0 = inlined_call_operand.smem [shape: u32[30], index: -1, kind: input, shape index: {}] }
   0x1   :  { %s4701_s5 = sld [smem:[%s5387_s0]]   ;;  %s4663_s14 = smov 3  }
   0x2   :  { %s4706_s9 = sld [smem:[%s5387_s0 + %s4661_s6]]   ;;  %s4664_s18 = smov 4  }
   0x3   :  { %s4711_s13 = sld [smem:[%s5387_s0 + %s4662_s10]]   ;;  %s4665_s22 = smov 5  }
   0x4   :  { %s4716_s17 = sld [smem:[%s5387_s0 + %s4663_s14]]   ;;  %s4666_s26 = smov 6  }
   0x5   :  { %s4721_s21 = sld [smem:[%s5387_s0 + %s4664_s18]]   ;;  %s4667_s30 = smov 7  }
   0x6   :  { %s4726_s25 = sld [smem:[%s5387_s0 + %s4665_s22]]   ;;  %s4668_s4 = smov 8  }
   0x7   :  { %s4731_s29 = sld [smem:[%s5387_s0 + %s4666_s26]]   ;;  %s4669_s10 = smov 9  }
   0x8   :  { %s4736_s3 = sld [smem:[%s5387_s0 + %s4667_s30]]   ;;  %s4670_s15 = smov 10  }
   0x9   :  { %s4741_s8 = sld [smem:[%s5387_s0 + %s4668_s4]]   ;;  %s4671_s20 = smov 11  }
   0xa   :  { %s4746_s14 = sld [smem:[%s5387_s0 + %s4669_s10]]   ;;  %s4672_s26 = smov 12  }
   0xb   :  { %s4751_s19 = sld [smem:[%s5387_s0 + %s4670_s15]]   ;;  %s4673_s1 = smov 13  }
   0xc   :  { %s4756_s24 = sld [smem:[%s5387_s0 + %s4671_s20]]   ;;  %s4674_s7 = smov 14  }
   0xd   :  { %s4761_s30 = sld [smem:[%s5387_s0 + %s4672_s26]]   ;;  %s4675_s15 = smov 15  }
   0xe   :  { %s4766_s6 = sld [smem:[%s5387_s0 + %s4673_s1]]   ;;  %s4676_s22 = smov 16  }
   0xf   :  { %s4771_s12 = sld [smem:[%s5387_s0 + %s4674_s7]]   ;;  %s4677_s28 = smov 17  }
  0x10   :  { %s4776_s20 = sld [smem:[%s5387_s0 + %s4675_s15]]   ;;  %s4678_s7 = smov 18  }
  0x11   :  { %s4781_s27 = sld [smem:[%s5387_s0 + %s4676_s22]]   ;;  %s4679_s15 = smov 19  }
  0x12   :  { %s4786_s4 = sld [smem:[%s5387_s0 + %s4677_s28]]   ;;  %s4680_s22 = smov 20  }
  0x13   :  { %5395 = sst [smem:[#allocation2_spill]] %s4761_s30  ;;  %s4681_s28 = smov 21  }
  0x14   :  { %s4796_s30 = sld [smem:[%s5387_s0 + %s4679_s15]]   ;;  %s4683_s15 = smov 23  }
  0x15   :  { %5396 = sst [smem:[#allocation3_spill]] %s4771_s12 }
  0x16   :  { %s4791_s12 = sld [smem:[%s5387_s0 + %s4678_s7]]   ;;  %s4682_s7 = smov 22  }
  0x17   :  { %5397 = sst [smem:[#allocation4_spill]] %s4781_s27 }
  0x18   :  { %5398 = sst [smem:[#allocation5_spill]] %s4786_s4 }
  0x19   :  { %s4801_s27 = sld [smem:[%s5387_s0 + %s4680_s22]]   ;;  %s4684_s22 = smov 24  }
  0x1a   :  { %5400 = sst [smem:[#allocation7_spill]] %s4796_s30 }
  0x1b   :  { %s4806_s4 = sld [smem:[%s5387_s0 + %s4681_s28]]   ;;  %s4685_s28 = smov 25  }
  0x1c   :  { %5399 = sst [smem:[#allocation6_spill]] %s4791_s12 }
  0x1d   :  { %s4811_s12 = sld [smem:[%s5387_s0 + %s4682_s7]]   ;;  %s4686_s7 = smov 26  }
  0x1e   :  { %s4816_s30 = sld [smem:[%s5387_s0 + %s4683_s15]]   ;;  %s4687_s15 = smov 27  }
  0x1f   :  { %5401 = sst [smem:[#allocation8_spill]] %s4801_s27 }
  0x20   :  { %s4821_s27 = sld [smem:[%s5387_s0 + %s4684_s22]]   ;;  %s4688_s22 = smov 28  }
  0x21   :  { %5402 = sst [smem:[#allocation9_spill]] %s4806_s4 }
  0x22   :  { %s4826_s4 = sld [smem:[%s5387_s0 + %s4685_s28]]   ;;  %s4689_s28 = smov 29  }
  0x23   :  { %5403 = sst [smem:[#allocation10_spill]] %s4811_s12 }
  0x24   :  { %5404 = sst [smem:[#allocation11_spill]] %s4816_s30 }
  0x25   :  { %s4831_s12 = sld [smem:[%s5387_s0 + %s4686_s7]]   ;;  %s4848_s7 = smov 0  }
  0x26   :  { %5405 = sst [smem:[#allocation12_spill]] %s4821_s27 }
  0x27   :  { %s4836_s30 = sld [smem:[%s5387_s0 + %s4687_s15]]  }
  0x28   :  { %5406 = sst [smem:[#allocation13_spill]] %s4826_s4 }
  0x29   :  { %s4841_s27 = sld [smem:[%s5387_s0 + %s4688_s22]]  }
  0x2a   :  { %s4846_s4 = sld [smem:[%s5387_s0 + %s4689_s28]]  }
  0x2b LB: > { %s3888_s10 = sadd.s32 4294967295, %s4659_s7   ;;  %p3892_p0 = scmp.ge.s32.totalorder %s4659_s7, 1  ;;  %s4659_s7 = sphi %s4848_s7, %s69_s7  }
  0x2c   : > { %p833_p1 = scmp.lt.s32.totalorder %s4659_s7, 3 }
  0x2e   : > { %p834_p2 = pnand %p3892_p0, %p833_p1 }
  0x2f   : > { %p914_p3 = scmp.lt.s32.totalorder (!%p834_p2), %s3888_s10, 1  ;;  %s5407_s18 = sld [smem:[#allocation2_spill]] (!%p834_p2) }
  0x30   : > { %837 = sbr.rel (%p834_p2) target bundleno = 8736 (0x2220), region = 136  ;;  %s5408_s22 = sld [smem:[#allocation4_spill]] (!%p834_p2) }
  0x31   : > { %s5409_s23 = sld [smem:[#allocation3_spill]] (!%p834_p2) }
  0x32   : > { %s5410_s26 = sld [smem:[#allocation5_spill]] (!%p834_p2) }
  0x33   : > { %s5411_s28 = sld [smem:[#allocation6_spill]] (!%p834_p2) }
  0x34   : > { %s5412_s1 = sld [smem:[#allocation7_spill]] (!%p834_p2) }
  0x35   : > { %v937_v0 = vld [vmem:[%s4716_s17 + $0x10] sm:$0xff]  ;;  %v938_v1 = vld [vmem:[%s4716_s17 + $0x18] sm:$0xff]  ;;  %v935_v2 = vld [vmem:[%s4716_s17] sm:$0xff]  ;;  %v4690_v3 = vmov 0.0   ;;  %vm4691_vm0 = vmmov 0   ;;  %s5420_s10 = smov (!%p914_p3, %s3888_s10), 1  ;;  %v1150_v36 = vlaneseq }
  0x36   : > { %4209 = vmatprep.subr.bf16.mxu0 %v4690_v3  ;;  %v941_v4 = vpack.c.bf16 %v938_v1, %v937_v0  ;;  %v936_v5 = vld [vmem:[%s4716_s17 + $0x8] sm:$0xff]  ;;  %4213 = vmatprep.mubr.msk.bf16.mxu0 %vm4691_vm0, %v4690_v3  ;;  %s4870_s0 = sshll.u32 %s5420_s10, 3  ;;  %v995_v7 = vld [vmem:[%s4726_s25 + $0x10] sm:$0xff]  ;;  %v996_v8 = vld [vmem:[%s4726_s25 + $0x18] sm:$0xff]  ;;  %vm949_vm1 = vcmask 261120   ;;  %vm1101_vm2 = vcmask 64512   ;;  %s920_s15 = scalar_lea.vmem %s4706_s9, %s5420_s10 }
  0x37   : > { %4233 = vmatprep.subr.bf16.mxu1 %v4690_v3  ;;  %4235 = vmatprep.mubr.msk.bf16.mxu1 %vm4691_vm0, %v4690_v3  ;;  %v940_v6 = vpack.c.bf16 %v936_v5, %v935_v2  ;;  %s917_s11 = scalar_lea.vmem %s4701_s5, %s4870_s0  ;;  %v998_v11 = vpack.c.bf16 %v996_v8, %v995_v7  ;;  %v993_v12 = vld [vmem:[%s4726_s25] sm:$0xff]  ;;  %v994_v13 = vld [vmem:[%s4726_s25 + $0x8] sm:$0xff]  ;;  %v1048_v30 = vld [vmem:[%s4736_s3 + $0x10] sm:$0xff]  ;;  %v1151_v39 = vshrl.u32 %v1150_v36, 7  ;;  %vm1172_vm3 = vcmask 1043456   ;;  %s924_s16 = scalar_lea.vmem %s4711_s13, %s4870_s0 }
  0x38   : > { %4210 = vmatpush3.bf16.msra.mxu0 %v941_v4  ;;  %v4876_v9 = vld [vmem:[%s917_s11] sm:$0xff]  ;;  %v997_v14 = vpack.c.bf16 %v994_v13, %v993_v12  ;;  %v1049_v31 = vld [vmem:[%s4736_s3 + $0x18] sm:$0xff]  ;;  %v1047_v34 = vld [vmem:[%s4736_s3 + $0x8] sm:$0xff]  ;;  %vm2494_vm4 = vcmask 39936   ;;  %vm2511_vm5 = vcmask 1041408   ;;  %vm2512_vm6 = vcmask 1042432  }
  0x39   : > { %4211 = vmatprep.subr.bf16.mxu0 %v4690_v3  ;;  %v4880_v10 = vpack.c.bf16 %v4876_v9, %v4876_v9  ;;  %v3898_v19 = vld [vmem:[%s4731_s29] ss:$0 sm:$0xff]  ;;  %v1051_v33 = vpack.c.bf16 %v1049_v31, %v1048_v30  ;;  %v1152_v41 = vsub.s32 0, %v1151_v39  ;;  %v3906_v63 = vld [vmem:[%s4716_s17 + $0x30] sm:$0xff]  ;;  %v3907_v0 = vld [vmem:[%s4716_s17 + $0x38] sm:$0xff]  ;;  %s5413_s2 = sld [smem:[#allocation8_spill]] }
  0x3a   : > { %v3896_v24 = vld [vmem:[%s4721_s21] ss:$0 sm:$0xff]  ;;  %v1225_v1 = vpack.c.bf16 %v3907_v0, %v3906_v63  ;;  %v3905_v4 = vld [vmem:[%s4716_s17 + $0x28] sm:$0xff]  ;;  %v3913_v7 = vld [vmem:[%s4726_s25 + $0x30] sm:$0xff]  ;;  %s5414_s10 = sld [smem:[#allocation11_spill]] }
  0x3b   : > { %v1046_v32 = vld [vmem:[%s4736_s3] sm:$0xff]  ;;  %v3914_v8 = vld [vmem:[%s4726_s25 + $0x38] sm:$0xff]  ;;  %v3927_v0 = vld [vmem:[%s4746_s14 + $0x8] sm:$0xff]  ;;  %s5415_s11 = sld [smem:[#allocation9_spill]] }
  0x3c   : > { %4212 = vmatpush3.bf16.msra.mxu0 %v940_v6  ;;  %v1050_v35 = vpack.c.bf16 %v1047_v34, %v1046_v32  ;;  %v932_v37 = vld [vmem:[%s920_s15] sm:$0x1]  ;;  %v1280_v13 = vpack.c.bf16 %v3914_v8, %v3913_v7  ;;  %s5416_s15 = sld [smem:[#allocation10_spill]] }
  0x3d   : > { %4217 = vmatprep.subr.bf16.mxu0 %v4690_v3  ;;  %v933_v38 = vsub.f32 1.0, %v932_v37  ;;  %v3900_v55 = vld [vmem:[%s4741_s8] ss:$0 sm:$0xff]  ;;  %v3920_v37 = vld [vmem:[%s4736_s3 + $0x30] sm:$0xff] }
  0x3e   : > { %v3904_v2 = vld [vmem:[%s4716_s17 + $0x20] sm:$0xff] }
  0x3f   : > { %4214 = vmatmul.mubr.msk.bf16.vlgmr.msra.gmra.mxu0 %vm949_vm1, %v4880_v10  ;;  %v934_v40 = vmul.f32 -10000.0, %v933_v38  ;;  %v1224_v5 = vpack.c.bf16 %v3905_v4, %v3904_v2  ;;  %v3921_v38 = vld [vmem:[%s4736_s3 + $0x38] sm:$0xff]  ;;  %v3918_v39 = vld [vmem:[%s4736_s3 + $0x20] sm:$0xff] }
  0x40   : > { %4218 = vmatpush3.bf16.msra.mxu0 %v998_v11  ;;  %4221 = vmatprep.mubr.msk.bf16.mxu0 %vm4691_vm0, %v4690_v3 }
  0x41   : > { %4219 = vmatprep.subr.bf16.mxu0 %v4690_v3  ;;  %v4914_v42 = vrot.slane %v934_v40, %v1152_v41  ;;  %v1335_v40 = vpack.c.bf16 %v3921_v38, %v3920_v37  ;;  %v3919_v41 = vld [vmem:[%s4736_s3 + $0x28] sm:$0xff] }
  0x44   : > { %4220 = vmatpush3.bf16.msra.mxu0 %v997_v14 }
  0x45   : > { %4225 = vmatprep.subr.bf16.mxu0 %v4690_v3 }
  0x47   : > { %4222 = vmatmul.mubr.msk.bf16.vlgmr.msra.gmra.mxu0 %vm949_vm1, %v4880_v10 }
  0x48   : > { %4229 = vmatprep.mubr.msk.bf16.mxu0 %vm4691_vm0, %v4690_v3  ;;  %4226 = vmatpush3.bf16.msra.mxu0 %v1051_v33 }
  0x49   : > { %4227 = vmatprep.subr.bf16.mxu0 %v4690_v3 }
  0x4c   : > { %4228 = vmatpush3.bf16.msra.mxu0 %v1050_v35 }
  0x4d   : > { %4239 = vmatprep.subr.bf16.mxu0 %v4690_v3 }
  0x4f   : > { %4230 = vmatmul.mubr.msk.bf16.vlgmr.msra.gmra.mxu0 %vm949_vm1, %v4880_v10 }
  0x50   : > { %4241 = vmatprep.mubr.msk.bf16.mxu0 %vm4691_vm0, %v4690_v3 }
  0xff   : > { %v987_v15 = vpop.f32.mrf.mxu0 }
 0x100   : > { %v988_v28 = vadd.f32 %v3896_v24, %v987_v15  ;;  %v3911_v15 = vld [vmem:[%s4726_s25 + $0x20] sm:$0xff] }
 0x101   : > { %v4215_v16 = vpop.f32.mrf.mxu0 }
 0x102   : > { %v1099_v29 = vpack.c.bf16 %v988_v28, %v988_v28  ;;  %v3912_v16 = vld [vmem:[%s4726_s25 + $0x28] sm:$0xff] }
 0x103   : > { %v990_v17 = vpop.f32.mrf.mxu0 }
 0x104   : > { %v1279_v17 = vpack.c.bf16 %v3912_v16, %v3911_v15 }
 0x105   : > { %v4216_v18 = vpop.f32.mrf.mxu0 }
 0x107   : > { %v1040_v20 = vpop.f32.mrf.mxu0 }
 0x108   : > { %v1041_v21 = vadd.f32 %v3898_v19, %v1040_v20 }
 0x109   : > { %v4223_v22 = vpop.f32.mrf.mxu0 }
 0x10a   : > { %v1100_v23 = vpack.c.bf16 %v1041_v21, %v1041_v21 }
 0x10b   : > { %v1043_v25 = vpop.f32.mrf.mxu0 }
 0x10c   : > { %v1106_v26 = vsel %vm1101_vm2, %v1100_v23, 0 }
 0x10d   : > { %v4224_v27 = vpop.f32.mrf.mxu0  ;;  %4234 = vmatpush3.bf16.xpose.msra.mxu1 %v1106_v26  ;;  %v3916_v26 = vld [vmem:[%s4731_s29 + $0x1] ss:$0 sm:$0xff] }
 0x10e   : > { %4245 = vmatprep.subr.bf16.mxu1 %v4690_v3 }
 0x10f   : > { %v1093_v56 = vpop.f32.mrf.mxu0 }
 0x110   : > { %v1094_v57 = vadd.f32 %v3900_v55, %v1093_v56 }
 0x111   : > { %v4231_v58 = vpop.f32.mrf.mxu0 }
 0x112   : > { %v1168_v59 = vpack.c.bf16 %v1094_v57, %v1094_v57 }
 0x113   : > { %v1096_v60 = vpop.f32.mrf.mxu0 }
 0x114   : > { %4236 = vmatmul.mubr.msk.bf16.vlgmr.msra.gmra.mxu1 %vm1101_vm2, %v1099_v29  ;;  %v1174_v61 = vsel %vm1172_vm3, %v1168_v59, 0  ;;  %v3909_v29 = vld [vmem:[%s4721_s21 + $0x1] ss:$0 sm:$0xff] }
 0x115   : > { %4249 = vmatprep.mubr.msk.bf16.mxu1 %vm4691_vm0, %v4690_v3  ;;  %v4232_v62 = vpop.f32.mrf.mxu0  ;;  %4240 = vmatpush3.bf16.msra.mxu0 %v1174_v61 }
 0x116   : > { %4253 = vmatprep.subr.bf16.mxu0 %v4690_v3  ;;  %4246 = vmatpush3.bf16.msra.mxu1 %v1225_v1  ;;  %v1496_v1 = vpack.c.bf16 %v3927_v0, %v3927_v0 }
 0x117   : > { %4247 = vmatprep.subr.bf16.mxu1 %v4690_v3 }
 0x118   : > { %v1501_v2 = vsel %vm1172_vm3, %v1496_v1, 0 }
 0x11a   : > { %4248 = vmatpush3.bf16.msra.mxu1 %v1224_v5  ;;  %v1216_v5 = vld [vmem:[%s4746_s14] sm:$0xff] }
 0x11b   : > { %4261 = vmatprep.subr.bf16.mxu1 %v4690_v3 }
 0x11d   : > { %4250 = vmatmul.mubr.msk.bf16.vlgmr.msra.gmra.mxu1 %vm949_vm1, %v4880_v10 }
 0x11e   : > { %4265 = vmatprep.mubr.msk.bf16.mxu1 %vm4691_vm0, %v4690_v3  ;;  %4262 = vmatpush3.bf16.msra.mxu1 %v1335_v40 }
 0x11f   : > { %4263 = vmatprep.subr.bf16.mxu1 %v4690_v3 }
 0x1d4   : > { %v1142_v43 = vpop.f32.mrf.mxu1 }
 0x1d5   : > { %v1148_v44 = vmul.f32 0.35355338, %v1142_v43  ;;  %v1334_v43 = vpack.c.bf16 %v3919_v41, %v3918_v39 }
 0x1d6   : > { %v4237_v45 = vpop.f32.mrf.mxu1 }
 0x1d7   : > { %v1155_v46 = vadd.f32 %v4914_v42, %v1148_v44  ;;  %4264 = vmatpush3.bf16.msra.mxu1 %v1334_v43 }
 0x1d8   : > { %v1145_v47 = vpop.f32.mrf.mxu1  ;;  %4275 = vmatprep.subr.bf16.mxu1 %v4690_v3 }
 0x1d9   : > { %v1156_v48 = vsel %vm1101_vm2, %v1155_v46, -inf }
 0x1da   : > { %1157 = vmax.xlane.f32.xlu0 %v1156_v48  ;;  %v4238_v49 = vpop.f32.mrf.mxu1  ;;  %4266 = vmatmul.mubr.msk.bf16.vlgmr.msra.gmra.mxu1 %vm949_vm1, %v4880_v10 }
 0x1db   : > { %4277 = vmatprep.mubr.msk.bf16.mxu1 %vm4691_vm0, %v4690_v3 }
 0x1dd   : > { %v1268_v18 = vpop.f32.mrf.mxu1 }
 0x1de   : > { %v1269_v34 = vadd.f32 %v3909_v29, %v1268_v18  ;;  %v3938_v18 = vld [vmem:[%s4726_s25 + $0x48] sm:$0xff] }
 0x1df   : > { %v4251_v19 = vpop.f32.mrf.mxu1 }
 0x1e0   : > { %v1384_v36 = vpack.c.bf16 %v1269_v34, %v1269_v34 }
 0x1e1   : > { %v1271_v20 = vpop.f32.mrf.mxu1 }
 0x1e2   : > { %v3932_v20 = vld [vmem:[%s4716_s17 + $0x50] sm:$0xff] }
 0x1e3   : > { %v4252_v21 = vpop.f32.mrf.mxu1 }
 0x1e4   : > { %v3933_v21 = vld [vmem:[%s4716_s17 + $0x58] sm:$0xff] }
 0x263   : > { %v1158_v50 = vpop.xlane.xlu0 %1157 }
 0x264   : > { %v1159_v51 = vsub.f32 %v1155_v46, %v1158_v50 }
 0x266   : > { %v1160_v52 = vmul.f32 1.442695, %v1159_v51  ;;  %v3923_v51 = vld [vmem:[%s4741_s8 + $0x1] ss:$0 sm:$0xff] }
 0x268   : > { %4613 = vpow2.f32 %v1160_v52 }
 0x275   : > { %v4614_v53 = vpop.eup %4613 }
 0x276   : > { %v1162_v54 = vsel %vm1101_vm2, %v4614_v53, 0.0 }
 0x277   : > { %1163 = vadd.xlane.f32.xlu0 %v1162_v54 }
 0x29a   : > { %v1378_v52 = vpop.f32.mrf.mxu1 }
 0x29c   : > { %v4267_v54 = vpop.f32.mrf.mxu1 }
 0x29e   : > { %v1381_v56 = vpop.f32.mrf.mxu1 }
 0x29f   : > { %v3947_v56 = vld [vmem:[%s4736_s3 + $0x58] sm:$0xff] }
 0x2a0   : > { %v4268_v58 = vpop.f32.mrf.mxu1 }
 0x300   : > { %v1164_v6 = vpop.xlane.xlu0 %1163 }
 0x301   : > { %4615 = vrcp.f32 %v1164_v6  ;;  %v1218_v6 = vpack.c.bf16 %v1216_v5, %v1216_v5 }
 0x30e   : > { %v4616_v11 = vpop.eup %4615 }
 0x30f   : > { %v1166_v12 = vmul.f32 %v4616_v11, %v4614_v53  ;;  %v1379_v53 = vadd.f32 %v3923_v51, %v1378_v52 }
 0x311   : > { %v1167_v14 = vpack.c.bf16 %v1166_v12, %v1166_v12  ;;  %v1446_v55 = vpack.c.bf16 %v1379_v53, %v1379_v53  ;;  %v1547_v12 = vsel %vm1172_vm3, %v1218_v6, 0 }
 0x313   : > { %4242 = vmatmul.mubr.msk.bf16.vlgmr.msra.gmra.mxu0 %vm1101_vm2, %v1167_v14  ;;  %v1451_v57 = vsel %vm1172_vm3, %v1446_v55, 0  ;;  %v3940_v14 = vld [vmem:[%s4726_s25 + $0x58] sm:$0xff]  ;;  %v3946_v55 = vld [vmem:[%s4736_s3 + $0x50] sm:$0xff] }
 0x314   : > { %4254 = vmatpush3.bf16.msra.mxu0 %v1280_v13  ;;  %4257 = vmatprep.mubr.msk.bf16.mxu0 %vm4691_vm0, %v4690_v3  ;;  %v3939_v13 = vld [vmem:[%s4726_s25 + $0x50] sm:$0xff]  ;;  %v1705_v58 = vpack.c.bf16 %v3947_v56, %v3946_v55 }
 0x315   : > { %4255 = vmatprep.subr.bf16.mxu0 %v4690_v3  ;;  %4276 = vmatpush3.bf16.msra.mxu1 %v1451_v57  ;;  %v1650_v15 = vpack.c.bf16 %v3940_v14, %v3939_v13  ;;  %v3944_v57 = vld [vmem:[%s4736_s3 + $0x40] sm:$0xff] }
 0x316   : > { %4287 = vmatprep.subr.bf16.mxu1 %v4690_v3 }
 0x318   : > { %4256 = vmatpush3.bf16.msra.mxu0 %v1279_v17  ;;  %v3937_v17 = vld [vmem:[%s4726_s25 + $0x40] sm:$0xff] }
 0x319   : > { %4269 = vmatprep.subr.bf16.mxu0 %v4690_v3  ;;  %v1649_v19 = vpack.c.bf16 %v3938_v18, %v3937_v17 }
 0x31b   : > { %4258 = vmatmul.mubr.msk.bf16.vlgmr.msra.gmra.mxu0 %vm949_vm1, %v4880_v10 }
 0x31c   : > { %4271 = vmatprep.mubr.msk.bf16.mxu0 %vm4691_vm0, %v4690_v3 }
 0x3d3   : > { %v4945_v22 = vpop.f32.mrf.mxu0 }
 0x3d4   : > { %v1217_v16 = vpack.c.bf16 %v4945_v22, %v4945_v22 }
 0x3d5   : > { %v4243_v23 = vpop.f32.mrf.mxu0 }
 0x3d6   : > { %v1595_v23 = vpack.c.bf16 %v3933_v21, %v3932_v20  ;;  %v3953_v20 = vld [vmem:[%s4746_s14 + $0x10] sm:$0xff] }
 0x3d7   : > { %v1213_v24 = vpop.f32.mrf.mxu0  ;;  %v1866_v21 = vpack.c.bf16 %v3953_v20, %v3953_v20 }
 0x3d9   : > { %v4244_v25 = vpop.f32.mrf.mxu0 }
 0x3da   : > { %v3930_v25 = vld [vmem:[%s4716_s17 + $0x40] sm:$0xff] }
 0x3db   : > { %v1323_v27 = vpop.f32.mrf.mxu0 }
 0x3dc   : > { %v1324_v28 = vadd.f32 %v3916_v26, %v1323_v27  ;;  %v3931_v26 = vld [vmem:[%s4716_s17 + $0x48] sm:$0xff] }
 0x3dd   : > { %v4259_v30 = vpop.f32.mrf.mxu0  ;;  %v1594_v29 = vpack.c.bf16 %v3931_v26, %v3930_v25 }
 0x3de   : > { %v1385_v31 = vpack.c.bf16 %v1324_v28, %v1324_v28 }
 0x3df   : > { %v1326_v32 = vpop.f32.mrf.mxu0 }
 0x3e0   : > { %v1390_v33 = vsel %vm1101_vm2, %v1385_v31, 0 }
 0x3e1   : > { %v4260_v35 = vpop.f32.mrf.mxu0  ;;  %4270 = vmatpush3.bf16.xpose.msra.mxu0 %v1390_v33 }
 0x3e2   : > { %4281 = vmatprep.subr.bf16.mxu0 %v4690_v3  ;;  %v3942_v35 = vld [vmem:[%s4731_s29 + $0x2] ss:$0 sm:$0xff] }
 0x3e8   : > { %4272 = vmatmul.mubr.msk.bf16.vlgmr.msra.gmra.mxu0 %vm1101_vm2, %v1384_v36 }
 0x3e9   : > { %4283 = vmatprep.mubr.msk.bf16.mxu0 %vm4691_vm0, %v4690_v3  ;;  %4282 = vmatpush3.bf16.msra.mxu0 %v1501_v2 }
 0x3ea   : > { %4293 = vmatprep.subr.bf16.mxu0 %v4690_v3 }
 0x4a8   : > { %v1426_v44 = vpop.f32.mrf.mxu0 }
 0x4a9   : > { %v1432_v45 = vmul.f32 0.35355338, %v1426_v44 }
 0x4aa   : > { %v4273_v46 = vpop.f32.mrf.mxu0 }
 0x4ab   : > { %v1433_v47 = vadd.f32 %v1432_v45, %v4914_v42 }
 0x4ac   : > { %v1429_v48 = vpop.f32.mrf.mxu0 }
 0x4ad   : > { %v1434_v49 = vsel %vm1101_vm2, %v1433_v47, -inf  ;;  %v3935_v48 = vld [vmem:[%s4721_s21 + $0x2] ss:$0 sm:$0xff] }
 0x4ae   : > { %1435 = vmax.xlane.f32.xlu1 %v1434_v49  ;;  %v4274_v50 = vpop.f32.mrf.mxu0 }
 0x537   : > { %v1436_v59 = vpop.xlane.xlu1 %1435 }
 0x538   : > { %v1437_v60 = vsub.f32 %v1433_v47, %v1436_v59  ;;  %v3945_v59 = vld [vmem:[%s4736_s3 + $0x48] sm:$0xff] }
 0x53a   : > { %v1438_v61 = vmul.f32 1.442695, %v1437_v60  ;;  %v1704_v60 = vpack.c.bf16 %v3945_v59, %v3944_v57  ;;  %v3967_v57 = vld [vmem:[%s4731_s29 + $0x3] ss:$0 sm:$0xff] }
 0x53c   : > { %4617 = vpow2.f32 %v1438_v61 }
 0x549   : > { %v4618_v62 = vpop.eup %4617 }
 0x54a   : > { %v1440_v63 = vsel %vm1101_vm2, %v4618_v62, 0.0 }
 0x54b   : > { %1441 = vadd.xlane.f32.xlu1 %v1440_v63 }
 0x5d4   : > { %v1442_v4 = vpop.xlane.xlu1 %1441 }
 0x5d5   : > { %4619 = vrcp.f32 %v1442_v4 }
 0x5e2   : > { %v4620_v7 = vpop.eup %4619 }
 0x5e3   : > { %v1444_v8 = vmul.f32 %v4620_v7, %v4618_v62 }
 0x5e5   : > { %v1445_v11 = vpack.c.bf16 %v1444_v8, %v1444_v8 }
 0x5e7   : > { %4278 = vmatmul.mubr.msk.bf16.vlgmr.msra.gmra.mxu1 %vm1101_vm2, %v1445_v11 }
 0x5e8   : > { %4288 = vmatpush3.bf16.msra.mxu1 %v1547_v12  ;;  %4289 = vmatprep.mubr.msk.bf16.mxu1 %vm4691_vm0, %v4690_v3  ;;  %v3949_v12 = vld [vmem:[%s4741_s8 + $0x2] ss:$0 sm:$0xff] }
 0x5e9   : > { %4301 = vmatprep.subr.bf16.mxu1 %v4690_v3 }
 0x5ef   : > { %4290 = vmatmul.mubr.msk.bf16.vlgmr.msra.gmra.mxu1 %vm1101_vm2, %v1217_v16 }
 0x5f0   : > { %4302 = vmatpush3.bf16.msra.mxu1 %v1650_v15  ;;  %4305 = vmatprep.mubr.msk.bf16.mxu1 %vm4691_vm0, %v4690_v3 }
 0x5f1   : > { %4303 = vmatprep.subr.bf16.mxu1 %v4690_v3 }
 0x5f4   : > { %4304 = vmatpush3.bf16.msra.mxu1 %v1649_v19 }
 0x5f5   : > { %4317 = vmatprep.subr.bf16.mxu1 %v4690_v3 }
 0x5f7   : > { %4306 = vmatmul.mubr.msk.bf16.vlgmr.msra.gmra.mxu1 %vm949_vm1, %v4880_v10 }
 0x5f8   : > { %4319 = vmatprep.mubr.msk.bf16.mxu1 %vm4691_vm0, %v4690_v3 }
 0x6a7   : > { %v1487_v22 = vpop.f32.mrf.mxu1 }
 0x6a8   : > { %v1495_v24 = vpack.c.bf16 %v1487_v22, %v1487_v22  ;;  %v1871_v22 = vsel %vm1172_vm3, %v1866_v21, 0 }
 0x6a9   : > { %v4279_v27 = vpop.f32.mrf.mxu1 }
 0x6aa   : > { %4284 = vmatmul.mubr.msk.bf16.vlgmr.msra.gmra.mxu0 %vm1101_vm2, %v1495_v24  ;;  %v3957_v27 = vld [vmem:[%s4716_s17 + $0x70] sm:$0xff] }
 0x6ab   : > { %v1490_v28 = vpop.f32.mrf.mxu1  ;;  %4294 = vmatpush3.bf16.msra.mxu0 %v1595_v23  ;;  %4297 = vmatprep.mubr.msk.bf16.mxu0 %vm4691_vm0, %v4690_v3 }
 0x6ac   : > { %4295 = vmatprep.subr.bf16.mxu0 %v4690_v3  ;;  %v3958_v28 = vld [vmem:[%s4716_s17 + $0x78] sm:$0xff] }
 0x6ad   : > { %v4280_v30 = vpop.f32.mrf.mxu1 }
 0x6ae   : > { %v3955_v30 = vld [vmem:[%s4716_s17 + $0x60] sm:$0xff] }
 0x6af   : > { %v5002_v31 = vpop.f32.mrf.mxu1  ;;  %4296 = vmatpush3.bf16.msra.mxu0 %v1594_v29  ;;  %v1920_v29 = vpack.c.bf16 %v3958_v28, %v3957_v27 }
 0x6b0   : > { %4309 = vmatprep.subr.bf16.mxu0 %v4690_v3 }
 0x6b1   : > { %v4291_v32 = vpop.f32.mrf.mxu1 }
 0x6b2   : > { %4298 = vmatmul.mubr.msk.bf16.vlgmr.msra.gmra.mxu0 %vm949_vm1, %v4880_v10  ;;  %v3956_v32 = vld [vmem:[%s4716_s17 + $0x68] sm:$0xff] }
 0x6b3   : > { %v1586_v33 = vpop.f32.mrf.mxu1  ;;  %4313 = vmatprep.mubr.msk.bf16.mxu0 %vm4691_vm0, %v4690_v3  ;;  %4310 = vmatpush3.bf16.msra.mxu0 %v1705_v58 }
 0x6b4   : > { %4311 = vmatprep.subr.bf16.mxu0 %v4690_v3  ;;  %v1919_v33 = vpack.c.bf16 %v3956_v32, %v3955_v30 }
 0x6b5   : > { %v4292_v34 = vpop.f32.mrf.mxu1 }
 0x6b6   : > { %v3964_v34 = vld [vmem:[%s4726_s25 + $0x70] sm:$0xff] }
 0x6b7   : > { %v1693_v36 = vpop.f32.mrf.mxu1  ;;  %4312 = vmatpush3.bf16.msra.mxu0 %v1704_v60  ;;  %v3960_v60 = vld [vmem:[%s4721_s21 + $0x3] ss:$0 sm:$0xff] }
 0x6b8   : > { %v1694_v37 = vadd.f32 %v3942_v35, %v1693_v36  ;;  %4323 = vmatprep.subr.bf16.mxu0 %v4690_v3  ;;  %v3965_v35 = vld [vmem:[%s4726_s25 + $0x78] sm:$0xff] }
 0x6b9   : > { %v4307_v38 = vpop.f32.mrf.mxu1 }
 0x6ba   : > { %v1755_v39 = vpack.c.bf16 %v1694_v37, %v1694_v37  ;;  %4314 = vmatmul.mubr.msk.bf16.vlgmr.msra.gmra.mxu0 %vm949_vm1, %v4880_v10  ;;  %v1975_v37 = vpack.c.bf16 %v3965_v35, %v3964_v34 }
 0x6bb   : > { %v1696_v40 = vpop.f32.mrf.mxu1  ;;  %4325 = vmatprep.mubr.msk.bf16.mxu0 %vm4691_vm0, %v4690_v3 }
 0x6bc   : > { %v1760_v41 = vsel %vm1101_vm2, %v1755_v39, 0  ;;  %v3962_v39 = vld [vmem:[%s4726_s25 + $0x60] sm:$0xff]  ;;  %v3963_v40 = vld [vmem:[%s4726_s25 + $0x68] sm:$0xff] }
 0x6bd   : > { %v4308_v43 = vpop.f32.mrf.mxu1  ;;  %4318 = vmatpush3.bf16.xpose.msra.mxu1 %v1760_v41 }
 0x6be   : > { %4329 = vmatprep.subr.bf16.mxu1 %v4690_v3 }
 0x76a   : > { %v5012_v44 = vpop.f32.mrf.mxu0 }
 0x76c   : > { %v4285_v45 = vpop.f32.mrf.mxu0 }
 0x76d   : > { %v1974_v45 = vpack.c.bf16 %v3963_v40, %v3962_v39 }
 0x76e   : > { %v1540_v46 = vpop.f32.mrf.mxu0 }
 0x770   : > { %v4286_v47 = vpop.f32.mrf.mxu0 }
 0x772   : > { %v1638_v49 = vpop.f32.mrf.mxu0 }
 0x773   : > { %v1639_v50 = vadd.f32 %v3935_v48, %v1638_v49 }
 0x774   : > { %v4299_v51 = vpop.f32.mrf.mxu0 }
 0x775   : > { %v1754_v52 = vpack.c.bf16 %v1639_v50, %v1639_v50  ;;  %v1584_v51 = vadd.f32 %v5002_v31, %v5012_v44 }
 0x776   : > { %v1641_v53 = vpop.f32.mrf.mxu0 }
 0x777   : > { %4320 = vmatmul.mubr.msk.bf16.vlgmr.msra.gmra.mxu1 %vm1101_vm2, %v1754_v52 }
 0x778   : > { %v4300_v54 = vpop.f32.mrf.mxu0  ;;  %4331 = vmatprep.mubr.msk.bf16.mxu1 %vm4691_vm0, %v4690_v3  ;;  %4330 = vmatpush3.bf16.msra.mxu1 %v1871_v22  ;;  %v3974_v22 = vld [vmem:[%s4741_s8 + $0x3] ss:$0 sm:$0xff] }
 0x779   : > { %4343 = vmatprep.subr.bf16.mxu1 %v4690_v3 }
 0x77a   : > { %v1748_v13 = vpop.f32.mrf.mxu0 }
 0x77b   : > { %v1749_v14 = vadd.f32 %v3949_v12, %v1748_v13 }
 0x77c   : > { %v4315_v15 = vpop.f32.mrf.mxu0 }
 0x77d   : > { %v1816_v16 = vpack.c.bf16 %v1749_v14, %v1749_v14 }
 0x77e   : > { %v1751_v17 = vpop.f32.mrf.mxu0 }
 0x77f   : > { %v1821_v18 = vsel %vm1172_vm3, %v1816_v16, 0 }
 0x780   : > { %v4316_v19 = vpop.f32.mrf.mxu0  ;;  %4324 = vmatpush3.bf16.msra.mxu0 %v1821_v18 }
 0x781   : > { %4335 = vmatprep.subr.bf16.mxu0 %v4690_v3 }
 0x837   : > { %v1796_v61 = vpop.f32.mrf.mxu1 }
 0x838   : > { %v1802_v62 = vmul.f32 0.35355338, %v1796_v61 }
 0x839   : > { %v4321_v63 = vpop.f32.mrf.mxu1 }
 0x83a   : > { %v1803_v0 = vadd.f32 %v1802_v62, %v4914_v42 }
 0x83b   : > { %v1799_v1 = vpop.f32.mrf.mxu1 }
 0x83c   : > { %v1804_v2 = vsel %vm1101_vm2, %v1803_v0, -inf }
 0x83d   : > { %1805 = vmax.xlane.f32.xlu0 %v1804_v2  ;;  %v4322_v4 = vpop.f32.mrf.mxu1  ;;  %v3971_v2 = vld [vmem:[%s4736_s3 + $0x70] sm:$0xff] }
 0x83e   : > { %v3972_v4 = vld [vmem:[%s4736_s3 + $0x78] sm:$0xff] }
 0x8c6   : > { %v1806_v5 = vpop.xlane.xlu0 %1805 }
 0x8c7   : > { %v1807_v6 = vsub.f32 %v1803_v0, %v1806_v5  ;;  %v3969_v5 = vld [vmem:[%s4736_s3 + $0x60] sm:$0xff] }
 0x8c9   : > { %v1808_v7 = vmul.f32 1.442695, %v1807_v6  ;;  %v2030_v6 = vpack.c.bf16 %v3972_v4, %v3971_v2  ;;  %v2278_v2 = vld [vmem:[%s4766_s6] sm:$0xff]  ;;  %v2279_v4 = vld [vmem:[%s4766_s6 + $0x8] sm:$0xff] }
 0x8cb   : > { %4621 = vpow2.f32 %v1808_v7  ;;  %v3970_v7 = vld [vmem:[%s4736_s3 + $0x68] sm:$0xff] }
 0x8d8   : > { %v4622_v8 = vpop.eup %4621 }
 0x8d9   : > { %v1810_v11 = vsel %vm1101_vm2, %v4622_v8, 0.0 }
 0x8da   : > { %1811 = vadd.xlane.f32.xlu1 %v1810_v11 }
 0x963   : > { %v1812_v23 = vpop.xlane.xlu1 %1811 }
 0x964   : > { %4623 = vrcp.f32 %v1812_v23 }
 0x971   : > { %v4624_v24 = vpop.eup %4623 }
 0x972   : > { %v1814_v25 = vmul.f32 %v4624_v24, %v4622_v8  ;;  %v2029_v8 = vpack.c.bf16 %v3970_v7, %v3969_v5  ;;  %v2283_v5 = vpack.c.bf16 %v2279_v4, %v2278_v2 }
 0x974   : > { %v1815_v26 = vpack.c.bf16 %v1814_v25, %v1814_v25 }
 0x976   : > { %4326 = vmatmul.mubr.msk.bf16.vlgmr.msra.gmra.mxu0 %vm1101_vm2, %v1815_v26 }
 0x977   : > { %4339 = vmatprep.mubr.msk.bf16.mxu0 %vm4691_vm0, %v4690_v3  ;;  %4336 = vmatpush3.bf16.msra.mxu0 %v1920_v29  ;;  %v3978_v29 = vld [vmem:[%s4746_s14 + $0x18] sm:$0xff] }
 0x978   : > { %4337 = vmatprep.subr.bf16.mxu0 %v4690_v3  ;;  %v2191_v30 = vpack.c.bf16 %v3978_v29, %v3978_v29 }
 0x97a   : > { %v2196_v32 = vsel %vm1172_vm3, %v2191_v30, 0 }
 0x97b   : > { %4338 = vmatpush3.bf16.msra.mxu0 %v1919_v33 }
 0x97c   : > { %4351 = vmatprep.subr.bf16.mxu0 %v4690_v3 }
 0x97e   : > { %4340 = vmatmul.mubr.msk.bf16.vlgmr.msra.gmra.mxu0 %vm949_vm1, %v4880_v10 }
 0x97f   : > { %4355 = vmatprep.mubr.msk.bf16.mxu0 %vm4691_vm0, %v4690_v3  ;;  %4352 = vmatpush3.bf16.msra.mxu0 %v2030_v6 }
 0x980   : > { %4353 = vmatprep.subr.bf16.mxu0 %v4690_v3 }
 0x983   : > { %4354 = vmatpush3.bf16.msra.mxu0 %v2029_v8 }
 0x984   : > { %4365 = vmatprep.subr.bf16.mxu0 %v4690_v3 }
 0x986   : > { %4356 = vmatmul.mubr.msk.bf16.vlgmr.msra.gmra.mxu0 %vm949_vm1, %v4880_v10 }
 0x987   : > { %4367 = vmatprep.mubr.msk.bf16.mxu0 %vm4691_vm0, %v4690_v3 }
 0xa36   : > { %v1857_v36 = vpop.f32.mrf.mxu0 }
 0xa37   : > { %v1865_v38 = vpack.c.bf16 %v1857_v36, %v1857_v36 }
 0xa38   : > { %v4327_v41 = vpop.f32.mrf.mxu0 }
 0xa39   : > { %4332 = vmatmul.mubr.msk.bf16.vlgmr.msra.gmra.mxu1 %vm1101_vm2, %v1865_v38 }
 0xa3a   : > { %v1860_v43 = vpop.f32.mrf.mxu0  ;;  %4344 = vmatpush3.bf16.msra.mxu1 %v1975_v37  ;;  %4347 = vmatprep.mubr.msk.bf16.mxu1 %vm4691_vm0, %v4690_v3 }
 0xa3b   : > { %4345 = vmatprep.subr.bf16.mxu1 %v4690_v3 }
 0xa3c   : > { %v4328_v46 = vpop.f32.mrf.mxu0 }
 0xa3e   : > { %4346 = vmatpush3.bf16.msra.mxu1 %v1974_v45  ;;  %v1963_v47 = vpop.f32.mrf.mxu0  ;;  %v3980_v45 = vld [vmem:[%s4751_s19] ss:$0 sm:$0xff] }
 0xa3f   : > { %4359 = vmatprep.subr.bf16.mxu1 %v4690_v3  ;;  %v1964_v31 = vadd.f32 %v3960_v60, %v1963_v47 }
 0xa40   : > { %v4341_v48 = vpop.f32.mrf.mxu0 }
 0xa41   : > { %4348 = vmatmul.mubr.msk.bf16.vlgmr.msra.gmra.mxu1 %vm949_vm1, %v4880_v10  ;;  %v2079_v1 = vpack.c.bf16 %v1964_v31, %v1964_v31  ;;  %v2280_v31 = vld [vmem:[%s4766_s6 + $0x10] sm:$0xff] }
 0xa42   : > { %4361 = vmatprep.mubr.msk.bf16.mxu1 %vm4691_vm0, %v4690_v3  ;;  %v1966_v49 = vpop.f32.mrf.mxu0 }
 0xa44   : > { %v4342_v50 = vpop.f32.mrf.mxu0 }
 0xa46   : > { %v2073_v23 = vpop.f32.mrf.mxu0 }
 0xa47   : > { %v2074_v24 = vadd.f32 %v3974_v22, %v2073_v23 }
 0xa48   : > { %v4357_v25 = vpop.f32.mrf.mxu0 }
 0xa49   : > { %v2141_v26 = vpack.c.bf16 %v2074_v24, %v2074_v24  ;;  %v3983_v25 = vld [vmem:[%s5409_s23] ss:$0 sm:$0xff] }
 0xa4b   : > { %v2146_v27 = vsel %vm1172_vm3, %v2141_v26, 0  ;;  %v3993_v26 = vld [vmem:[%s4766_s6 + $0x30] sm:$0xff] }
 0xa4c   : > { %4366 = vmatpush3.bf16.msra.mxu0 %v2146_v27 }
 0xa4d   : > { %4377 = vmatprep.subr.bf16.mxu0 %v4690_v3 }
 0xaf9   : > { %v1907_v52 = vpop.f32.mrf.mxu1 }
 0xafa   : > { %v5065_v53 = vadd.f32 %v1907_v52, %v1584_v51 }
 0xafb   : > { %v4333_v54 = vpop.f32.mrf.mxu1 }
 0xafd   : > { %v1910_v55 = vpop.f32.mrf.mxu1 }
 0xaff   : > { %v4334_v56 = vpop.f32.mrf.mxu1 }
 0xb01   : > { %v2018_v58 = vpop.f32.mrf.mxu1 }
 0xb02   : > { %v2019_v59 = vadd.f32 %v3967_v57, %v2018_v58 }
 0xb03   : > { %v4349_v61 = vpop.f32.mrf.mxu1 }
 0xb04   : > { %v2080_v62 = vpack.c.bf16 %v2019_v59, %v2019_v59  ;;  %v2338_v59 = vld [vmem:[%s4776_s20 + $0x18] sm:$0xff]  ;;  %v2336_v61 = vld [vmem:[%s4776_s20 + $0x8] sm:$0xff] }
 0xb05   : > { %v2021_v63 = vpop.f32.mrf.mxu1 }
 0xb06   : > { %v2085_v0 = vsel %vm1101_vm2, %v2080_v62, 0  ;;  %v931_v63 = vld [vmem:[%s924_s16] sm:$0x1f]  ;;  %s5417_s16 = sld [smem:[#allocation13_spill]] }
 0xb07   : > { %v4350_v44 = vpop.f32.mrf.mxu1  ;;  %4360 = vmatpush3.bf16.xpose.msra.mxu1 %v2085_v0  ;;  %v5111_v0 = vpack.c.bf16 %v931_v63, %v931_v63 }
 0xb08   : > { %4371 = vmatprep.subr.bf16.mxu1 %v4690_v3  ;;  %v2281_v44 = vld [vmem:[%s4766_s6 + $0x18] sm:$0xff] }
 0xb0e   : > { %4362 = vmatmul.mubr.msk.bf16.vlgmr.msra.gmra.mxu1 %vm1101_vm2, %v2079_v1  ;;  %v2284_v1 = vpack.c.bf16 %v2281_v44, %v2280_v31 }
 0xb0f   : > { %4373 = vmatprep.mubr.msk.bf16.mxu1 %vm4691_vm0, %v4690_v3  ;;  %4372 = vmatpush3.bf16.msra.mxu1 %v2196_v32 }
 0xb10   : > { %4385 = vmatprep.subr.bf16.mxu1 %v4690_v3 }
 0xbce   : > { %v2121_v11 = vpop.f32.mrf.mxu1 }
 0xbcf   : > { %v2127_v12 = vmul.f32 0.35355338, %v2121_v11 }
 0xbd0   : > { %v4363_v13 = vpop.f32.mrf.mxu1 }
 0xbd1   : > { %v2128_v14 = vadd.f32 %v2127_v12, %v4914_v42  ;;  %v2076_v42 = vpop.f32.mrf.mxu0  ;;  %v3981_v12 = vld [vmem:[%s4756_s24] ss:$0 sm:$0xff] }
 0xbd2   : > { %v2124_v15 = vpop.f32.mrf.mxu1  ;;  %v3994_v42 = vld [vmem:[%s4766_s6 + $0x38] sm:$0xff] }
 0xbd3   : > { %v2129_v16 = vsel %vm1101_vm2, %v2128_v14, -inf  ;;  %v4358_v28 = vpop.f32.mrf.mxu0  ;;  %v2567_v30 = vpack.c.bf16 %v3994_v42, %v3993_v26 }
 0xbd4   : > { %2130 = vmax.xlane.f32.xlu0 %v2129_v16  ;;  %v4364_v17 = vpop.f32.mrf.mxu1 }
 0xc5d   : > { %v2131_v18 = vpop.xlane.xlu0 %2130 }
 0xc5e   : > { %v2132_v19 = vsub.f32 %v2128_v14, %v2131_v18  ;;  %v3982_v14 = vld [vmem:[%s5407_s18] ss:$0 sm:$0xff]  ;;  %s5418_s18 = sld [smem:[#allocation12_spill]] }
 0xc5f   : > { %v3985_v18 = vld [vmem:[%s5408_s22] ss:$0 sm:$0xff] }
 0xc60   : > { %v2133_v20 = vmul.f32 1.442695, %v2132_v19 }
 0xc62   : > { %4625 = vpow2.f32 %v2133_v20 }
 0xc6f   : > { %v4626_v10 = vpop.eup %4625 }
 0xc70   : > { %v2135_v21 = vsel %vm1101_vm2, %v4626_v10, 0.0 }
 0xc71   : > { %2136 = vadd.xlane.f32.xlu1 %v2135_v21 }
 0xcfa   : > { %v2137_v33 = vpop.xlane.xlu1 %2136 }
 0xcfb   : > { %4627 = vrcp.f32 %v2137_v33  ;;  %v3991_v33 = vld [vmem:[%s4766_s6 + $0x20] sm:$0xff] }
 0xd08   : > { %v4628_v34 = vpop.eup %4627 }
 0xd09   : > { %v2139_v35 = vmul.f32 %v4628_v34, %v4626_v10  ;;  %v3992_v34 = vld [vmem:[%s4766_s6 + $0x28] sm:$0xff] }
 0xd0b   : > { %v2140_v36 = vpack.c.bf16 %v2139_v35, %v2139_v35 }
 0xd0d   : > { %4368 = vmatmul.mubr.msk.bf16.vlgmr.msra.gmra.mxu0 %vm1101_vm2, %v2140_v36 }
 0xd0e   : > { %4381 = vmatprep.mubr.msk.bf16.mxu0 %vm4691_vm0, %v4690_v3  ;;  %4378 = vmatpush3.bf16.msra.mxu0 %v2284_v1 }
 0xd0f   : > { %4379 = vmatprep.subr.bf16.mxu0 %v4690_v3 }
 0xd12   : > { %4380 = vmatpush3.bf16.msra.mxu0 %v2283_v5 }
 0xd13   : > { %4393 = vmatprep.subr.bf16.mxu0 %v4690_v3 }
 0xdcd   : > { %v2182_v37 = vpop.f32.mrf.mxu0 }
 0xdce   : > { %v2190_v38 = vpack.c.bf16 %v2182_v37, %v2182_v37  ;;  %v2566_v37 = vpack.c.bf16 %v3992_v34, %v3991_v33 }
 0xdcf   : > { %v4369_v39 = vpop.f32.mrf.mxu0 }
 0xdd0   : > { %4374 = vmatmul.mubr.msk.bf16.vlgmr.msra.gmra.mxu1 %vm1101_vm2, %v2190_v38  ;;  %v2394_v38 = vld [vmem:[%s5410_s26 + $0x10] sm:$0xff]  ;;  %v2395_v39 = vld [vmem:[%s5410_s26 + $0x18] sm:$0xff] }
 0xdd1   : > { %v2185_v40 = vpop.f32.mrf.mxu0  ;;  %4389 = vmatprep.mubr.msk.bf16.mxu1 %vm4691_vm0, %v4690_v3 }
 0xdd2   : > { %v2392_v40 = vld [vmem:[%s5410_s26] sm:$0xff] }
 0xdd3   : > { %v4370_v41 = vpop.f32.mrf.mxu0 }
 0xdd4   : > { %v2397_v41 = vpack.c.bf16 %v2395_v39, %v2394_v38  ;;  %v4006_v39 = vld [vmem:[%s5410_s26 + $0x28] sm:$0xff] }
 0xe90   : > { %v2232_v43 = vpop.f32.mrf.mxu1 }
 0xe91   : > { %v2238_v46 = vadd.f32 %v2232_v43, %v5065_v53  ;;  %v2337_v53 = vld [vmem:[%s4776_s20 + $0x10] sm:$0xff]  ;;  %v2393_v43 = vld [vmem:[%s5410_s26 + $0x8] sm:$0xff] }
 0xe92   : > { %v4375_v47 = vpop.f32.mrf.mxu1  ;;  %v2341_v60 = vpack.c.bf16 %v2338_v59, %v2337_v53 }
 0xe93   : > { %v2246_v48 = vadd.f32 %v3980_v45, %v2238_v46  ;;  %v2396_v45 = vpack.c.bf16 %v2393_v43, %v2392_v40 }
 0xe94   : > { %v2235_v49 = vpop.f32.mrf.mxu1  ;;  %4386 = vmatpush3.bf16.msra.mxu1 %v2341_v60 }
 0xe95   : > { %v2247_v50 = vadd.f32 %v2246_v48, %v4876_v9  ;;  %4387 = vmatprep.subr.bf16.mxu1 %v4690_v3  ;;  %v2335_v9 = vld [vmem:[%s4776_s20] sm:$0xff] }
 0xe96   : > { %v4376_v51 = vpop.f32.mrf.mxu1  ;;  %v2340_v62 = vpack.c.bf16 %v2336_v61, %v2335_v9 }
 0xe97   : > { %v2250_v52 = vsel %vm949_vm1, %v2247_v50, 0.0 }
 0xe98   : > { %2251 = vadd.xlane.f32.xlu0 %v2250_v52  ;;  %4388 = vmatpush3.bf16.msra.mxu1 %v2340_v62 }
 0xe99   : > { %4401 = vmatprep.subr.bf16.mxu1 %v4690_v3 }
 0xe9b   : > { %4390 = vmatmul.mubr.msk.bf16.vlgmr.msra.gmra.mxu1 %vm949_vm1, %v5111_v0 }
 0xe9c   : > { %4403 = vmatprep.mubr.msk.bf16.mxu1 %vm4691_vm0, %v4690_v3 }
 0xf21   : > { %v2252_v54 = vpop.xlane.xlu0 %2251 }
 0xf22   : > { %v2254_v55 = vmul.f32 0.03125, %v2252_v54 }
 0xf24   : > { %v2255_v56 = vsub.f32 %v2247_v50, %v2254_v55 }
 0xf26   : > { %v2256_v57 = vmul.f32 %v2255_v56, %v2255_v56 }
 0xf28   : > { %v2257_v58 = vsel %vm949_vm1, %v2256_v57, 0.0  ;;  %v3987_v57 = vld [vmem:[%s5411_s28] ss:$0 sm:$0xff] }
 0xf29   : > { %2258 = vadd.xlane.f32.xlu1 %v2257_v58  ;;  %v4692_v58 = vmov 65535  }
 0xf2a   : > { %v2513_v53 = vsel %vm2511_vm5, 4294967295, %v4692_v58 }
 0xf2b   : > { %v5165_v9 = vsel %vm2512_vm6, %v2513_v53, 0 }
 0xf5b   : > { %v2386_v19 = vpop.f32.mrf.mxu1 }
 0xf5c   : > { %v2387_v20 = vadd.f32 %v3985_v18, %v2386_v19  ;;  %v3998_v18 = vld [vmem:[%s4776_s20 + $0x20] sm:$0xff]  ;;  %v3999_v19 = vld [vmem:[%s4776_s20 + $0x28] sm:$0xff] }
 0xf5d   : > { %v4391_v10 = vpop.f32.mrf.mxu1 }
 0xf5e   : > { %v2446_v21 = vpack.c.bf16 %v2387_v20, %v2387_v20  ;;  %v2621_v20 = vpack.c.bf16 %v3999_v19, %v3998_v18  ;;  %v4019_v19 = vld [vmem:[%s4766_s6 + $0x50] sm:$0xff] }
 0xf5f   : > { %v2389_v22 = vpop.f32.mrf.mxu1 }
 0xf60   : > { %v2451_v23 = vsel %vm1101_vm2, %v2446_v21, 0 }
 0xf61   : > { %v4392_v24 = vpop.f32.mrf.mxu1  ;;  %4402 = vmatpush3.bf16.xpose.msra.mxu1 %v2451_v23 }
 0xf62   : > { %4413 = vmatprep.subr.bf16.mxu1 %v4690_v3  ;;  %v4003_v24 = vld [vmem:[%s5408_s22 + $0x1] ss:$0 sm:$0xff] }
 0xfb2   : > { %v2259_v6 = vpop.xlane.xlu1 %2258 }
 0xfb3   : > { %v2260_v7 = vmul.f32 0.03125, %v2259_v6 }
 0xfb5   : > { %v2261_v8 = vadd.f32 1e-12, %v2260_v7 }
 0xfb7   : > { %4629 = vrsqrt.f32 %v2261_v8  ;;  %v4000_v8 = vld [vmem:[%s4776_s20 + $0x30] sm:$0xff] }
 0xfc4   : > { %v4630_v11 = vpop.eup %4629 }
 0xfc5   : > { %v2263_v13 = vmul.f32 %v4630_v11, %v2255_v56  ;;  %v4001_v11 = vld [vmem:[%s4776_s20 + $0x38] sm:$0xff] }
 0xfc7   : > { %v2270_v15 = vmul.f32 %v3981_v12, %v2263_v13 }
 0xfc9   : > { %v5126_v16 = vadd.f32 %v3982_v14, %v2270_v15  ;;  %v2622_v14 = vpack.c.bf16 %v4001_v11, %v4000_v8  ;;  %v4026_v8 = vld [vmem:[%s4776_s20 + $0x50] sm:$0xff]  ;;  %v4027_v11 = vld [vmem:[%s4776_s20 + $0x58] sm:$0xff] }
 0xfcb   : > { %v5130_v17 = vpack.c.bf16 %v5126_v16, %v5126_v16 }
 0xfcd   : > { %4382 = vmatmul.mubr.msk.bf16.vlgmr.msra.gmra.mxu0 %vm949_vm1, %v5130_v17 }
 0xfce   : > { %4397 = vmatprep.mubr.msk.bf16.mxu0 %vm4691_vm0, %v4690_v3  ;;  %4394 = vmatpush3.bf16.msra.mxu0 %v2397_v41 }
 0xfcf   : > { %4395 = vmatprep.subr.bf16.mxu0 %v4690_v3 }
 0xfd2   : > { %4396 = vmatpush3.bf16.msra.mxu0 %v2396_v45 }
 0xfd3   : > { %4407 = vmatprep.subr.bf16.mxu0 %v4690_v3 }
 0xfd5   : > { %4398 = vmatmul.mubr.msk.bf16.vlgmr.msra.gmra.mxu0 %vm949_vm1, %v5111_v0 }
 0xfd6   : > { %4409 = vmatprep.mubr.msk.bf16.mxu0 %vm4691_vm0, %v4690_v3 }
0x108d   : > { %v2329_v27 = vpop.f32.mrf.mxu0 }
0x108e   : > { %v2330_v28 = vadd.f32 %v3983_v25, %v2329_v27 }
0x108f   : > { %v4383_v29 = vpop.f32.mrf.mxu0 }
0x1090   : > { %v2445_v32 = vpack.c.bf16 %v2330_v28, %v2330_v28  ;;  %v3996_v28 = vld [vmem:[%s5409_s23 + $0x1] ss:$0 sm:$0xff] }
0x1091   : > { %v2332_v35 = vpop.f32.mrf.mxu0 }
0x1092   : > { %4404 = vmatmul.mubr.msk.bf16.vlgmr.msra.gmra.mxu1 %vm1101_vm2, %v2445_v32  ;;  %v4007_v35 = vld [vmem:[%s5410_s26 + $0x30] sm:$0xff] }
0x1093   : > { %v4384_v36 = vpop.f32.mrf.mxu0  ;;  %4414 = vmatpush3.bf16.msra.mxu1 %v2567_v30  ;;  %4417 = vmatprep.mubr.msk.bf16.mxu1 %vm4691_vm0, %v4690_v3 }
0x1094   : > { %4415 = vmatprep.subr.bf16.mxu1 %v4690_v3  ;;  %v4008_v36 = vld [vmem:[%s5410_s26 + $0x38] sm:$0xff] }
0x1095   : > { %v2439_v59 = vpop.f32.mrf.mxu0  ;;  %v2677_v38 = vpack.c.bf16 %v4008_v36, %v4007_v35 }
0x1096   : > { %v2440_v60 = vadd.f32 %v3987_v57, %v2439_v59 }
0x1097   : > { %4416 = vmatpush3.bf16.msra.mxu1 %v2566_v37  ;;  %v4399_v61 = vpop.f32.mrf.mxu0  ;;  %v4005_v37 = vld [vmem:[%s5410_s26 + $0x20] sm:$0xff] }
0x1098   : > { %4429 = vmatprep.subr.bf16.mxu1 %v4690_v3  ;;  %v2507_v62 = vpack.c.bf16 %v2440_v60, %v2440_v60  ;;  %v2676_v40 = vpack.c.bf16 %v4006_v39, %v4005_v37 }
0x1099   : > { %v2442_v63 = vpop.f32.mrf.mxu0 }
0x109a   : > { %4418 = vmatmul.mubr.msk.bf16.vlgmr.msra.gmra.mxu1 %vm949_vm1, %v5130_v17  ;;  %v2516_v31 = vand.u32 %v5165_v9, %v2507_v62  ;;  %v4014_v62 = vld [vmem:[%s5412_s1 + $0x8] sm:$0xff] }
0x109b   : > { %4433 = vmatprep.mubr.msk.bf16.mxu1 %vm4691_vm0, %v4690_v3  ;;  %v4400_v44 = vpop.f32.mrf.mxu0  ;;  %4430 = vmatpush3.bf16.msra.mxu1 %v2677_v38  ;;  %v2837_v63 = vpack.c.bf16 %v4014_v62, %v4014_v62 }
0x109c   : > { %4408 = vmatpush3.bf16.msra.mxu0 %v2516_v31  ;;  %4431 = vmatprep.subr.bf16.mxu1 %v4690_v3 }
0x109d   : > { %4421 = vmatprep.subr.bf16.mxu0 %v4690_v3  ;;  %v2842_v31 = vsel %vm1172_vm3, %v2837_v63, 0 }
0x109f   : > { %4432 = vmatpush3.bf16.msra.mxu1 %v2676_v40 }
0x10a0   : > { %4443 = vmatprep.subr.bf16.mxu1 %v4690_v3 }
0x10a2   : > { %4434 = vmatmul.mubr.msk.bf16.vlgmr.msra.gmra.mxu1 %vm949_vm1, %v5111_v0 }
0x10a3   : > { %4445 = vmatprep.mubr.msk.bf16.mxu1 %vm4691_vm0, %v4690_v3 }
0x1152   : > { %v2487_v46 = vpop.f32.mrf.mxu1 }
0x1153   : > { %v2493_v47 = vmul.f32 0.35355338, %v2487_v46 }
0x1154   : > { %v4405_v48 = vpop.f32.mrf.mxu1 }
0x1155   : > { %v2495_v49 = vsel %vm2494_vm4, %v2493_v47, -inf }
0x1156   : > { %2496 = vmax.xlane.f32.xlu0 %v2495_v49  ;;  %v2490_v50 = vpop.f32.mrf.mxu1  ;;  %v4010_v49 = vld [vmem:[%s5411_s28 + $0x1] ss:$0 sm:$0xff] }
0x1158   : > { %v4406_v51 = vpop.f32.mrf.mxu1 }
0x115a   : > { %v2610_v52 = vpop.f32.mrf.mxu1 }
0x115b   : > { %v2611_v33 = vadd.f32 %v3996_v28, %v2610_v52 }
0x115c   : > { %v4419_v54 = vpop.f32.mrf.mxu1 }
0x115d   : > { %v2726_v34 = vpack.c.bf16 %v2611_v33, %v2611_v33  ;;  %v4029_v33 = vld [vmem:[%s5408_s22 + $0x2] ss:$0 sm:$0xff] }
0x115e   : > { %v2613_v55 = vpop.f32.mrf.mxu1 }
0x1160   : > { %v4420_v56 = vpop.f32.mrf.mxu1 }
0x1162   : > { %v2720_v50 = vpop.f32.mrf.mxu1 }
0x1163   : > { %v2721_v51 = vadd.f32 %v4010_v49, %v2720_v50 }
0x1164   : > { %v4435_v52 = vpop.f32.mrf.mxu1 }
0x1165   : > { %v2787_v54 = vpack.c.bf16 %v2721_v51, %v2721_v51 }
0x1166   : > { %v2723_v55 = vpop.f32.mrf.mxu1 }
0x1167   : > { %v2792_v56 = vand.u32 %v2787_v54, %v5165_v9  ;;  %v4033_v55 = vld [vmem:[%s5410_s26 + $0x50] sm:$0xff] }
0x1168   : > { %v4436_v57 = vpop.f32.mrf.mxu1 }
0x1169   : > { %4444 = vmatpush3.bf16.msra.mxu1 %v2792_v56  ;;  %v4034_v56 = vld [vmem:[%s5410_s26 + $0x58] sm:$0xff]  ;;  %v4031_v57 = vld [vmem:[%s5410_s26 + $0x40] sm:$0xff] }
0x116a   : > { %4455 = vmatprep.subr.bf16.mxu1 %v4690_v3 }
0x11df   : > { %v2497_v1 = vpop.xlane.xlu0 %2496 }
0x11e0   : > { %v2498_v2 = vsub.f32 %v2493_v47, %v2497_v1  ;;  %v2558_v1 = vld [vmem:[%s5412_s1] sm:$0xff] }
0x11e2   : > { %v2499_v4 = vmul.f32 1.442695, %v2498_v2  ;;  %v2560_v2 = vpack.c.bf16 %v2558_v1, %v2558_v1  ;;  %v4036_v1 = vld [vmem:[%s5411_s28 + $0x2] ss:$0 sm:$0xff] }
0x11e4   : > { %4631 = vpow2.f32 %v2499_v4 }
0x11f1   : > { %v4632_v5 = vpop.eup %4631 }
0x11f2   : > { %v2501_v6 = vsel %vm2494_vm4, %v4632_v5, 0.0 }
0x11f3   : > { %2502 = vadd.xlane.f32.xlu1 %v2501_v6 }
0x127c   : > { %v2503_v7 = vpop.xlane.xlu1 %2502 }
0x127d   : > { %4633 = vrcp.f32 %v2503_v7  ;;  %v2888_v7 = vsel %vm1172_vm3, %v2560_v2, 0 }
0x128a   : > { %v4634_v12 = vpop.eup %4633 }
0x128b   : > { %v2505_v13 = vmul.f32 %v4634_v12, %v4632_v5  ;;  %v2991_v12 = vpack.c.bf16 %v4027_v11, %v4026_v8 }
0x128d   : > { %v2506_v15 = vpack.c.bf16 %v2505_v13, %v2505_v13 }
0x128f   : > { %4410 = vmatmul.mubr.msk.bf16.vlgmr.msra.gmra.mxu0 %vm2494_vm4, %v2506_v15  ;;  %v4025_v15 = vld [vmem:[%s4776_s20 + $0x48] sm:$0xff] }
0x1290   : > { %4422 = vmatpush3.bf16.msra.mxu0 %v2622_v14  ;;  %4425 = vmatprep.mubr.msk.bf16.mxu0 %vm4691_vm0, %v4690_v3  ;;  %v4024_v14 = vld [vmem:[%s4776_s20 + $0x40] sm:$0xff] }
0x1291   : > { %4423 = vmatprep.subr.bf16.mxu0 %v4690_v3  ;;  %v2990_v18 = vpack.c.bf16 %v4025_v15, %v4024_v14 }
0x1294   : > { %4424 = vmatpush3.bf16.msra.mxu0 %v2621_v20  ;;  %v4020_v20 = vld [vmem:[%s4766_s6 + $0x58] sm:$0xff] }
0x1295   : > { %4437 = vmatprep.subr.bf16.mxu0 %v4690_v3 }
0x1297   : > { %4426 = vmatmul.mubr.msk.bf16.vlgmr.msra.gmra.mxu0 %vm949_vm1, %v5111_v0 }
0x1298   : > { %4439 = vmatprep.mubr.msk.bf16.mxu0 %vm4691_vm0, %v4690_v3 }
0x134f   : > { %v5183_v10 = vpop.f32.mrf.mxu0 }
0x1350   : > { %v2559_v13 = vpack.c.bf16 %v5183_v10, %v5183_v10 }
0x1351   : > { %v4411_v21 = vpop.f32.mrf.mxu0 }
0x1352   : > { %v2936_v21 = vpack.c.bf16 %v4020_v20, %v4019_v19  ;;  %v4040_v19 = vld [vmem:[%s5412_s1 + $0x10] sm:$0xff] }
0x1353   : > { %v2555_v22 = vpop.f32.mrf.mxu0  ;;  %v3206_v20 = vpack.c.bf16 %v4040_v19, %v4040_v19 }
0x1355   : > { %v4412_v23 = vpop.f32.mrf.mxu0 }
0x1356   : > { %v4017_v23 = vld [vmem:[%s4766_s6 + $0x40] sm:$0xff] }
0x1357   : > { %v2665_v25 = vpop.f32.mrf.mxu0 }
0x1358   : > { %v2666_v26 = vadd.f32 %v4003_v24, %v2665_v25  ;;  %v4018_v24 = vld [vmem:[%s4766_s6 + $0x48] sm:$0xff] }
0x1359   : > { %v4427_v42 = vpop.f32.mrf.mxu0 }
0x135a   : > { %v2727_v27 = vpack.c.bf16 %v2666_v26, %v2666_v26  ;;  %v2935_v42 = vpack.c.bf16 %v4018_v24, %v4017_v23  ;;  %v4045_v23 = vld [vmem:[%s4766_s6 + $0x78] sm:$0xff] }
0x135b   : > { %v2668_v29 = vpop.f32.mrf.mxu0 }
0x135c   : > { %v2732_v30 = vsel %vm1101_vm2, %v2727_v27, 0 }
0x135d   : > { %v4428_v32 = vpop.f32.mrf.mxu0  ;;  %4438 = vmatpush3.bf16.xpose.msra.mxu0 %v2732_v30 }
0x135e   : > { %4449 = vmatprep.subr.bf16.mxu0 %v4690_v3 }
0x1364   : > { %4440 = vmatmul.mubr.msk.bf16.vlgmr.msra.gmra.mxu0 %vm1101_vm2, %v2726_v34 }
0x1365   : > { %4451 = vmatprep.mubr.msk.bf16.mxu0 %vm4691_vm0, %v4690_v3  ;;  %4450 = vmatpush3.bf16.msra.mxu0 %v2842_v31 }
0x1366   : > { %4461 = vmatprep.subr.bf16.mxu0 %v4690_v3 }
0x1424   : > { %v2768_v41 = vpop.f32.mrf.mxu0 }
0x1425   : > { %v2774_v43 = vmul.f32 0.35355338, %v2768_v41 }
0x1426   : > { %v4441_v45 = vpop.f32.mrf.mxu0 }
0x1427   : > { %v2775_v46 = vsel %vm2494_vm4, %v2774_v43, -inf }
0x1428   : > { %2776 = vmax.xlane.f32.xlu0 %v2775_v46  ;;  %v2771_v47 = vpop.f32.mrf.mxu0 }
0x1429   : > { %v4022_v47 = vld [vmem:[%s5409_s23 + $0x2] ss:$0 sm:$0xff] }
0x142a   : > { %v4442_v48 = vpop.f32.mrf.mxu0 }
0x14b1   : > { %v2777_v58 = vpop.xlane.xlu0 %2776 }
0x14b2   : > { %v2778_v53 = vsub.f32 %v2774_v43, %v2777_v58  ;;  %v3046_v58 = vpack.c.bf16 %v4034_v56, %v4033_v55  ;;  %v4054_v56 = vld [vmem:[%s5408_s22 + $0x3] ss:$0 sm:$0xff] }
0x14b4   : > { %v2779_v59 = vmul.f32 1.442695, %v2778_v53  ;;  %v4032_v53 = vld [vmem:[%s5410_s26 + $0x48] sm:$0xff] }
0x14b6   : > { %4635 = vpow2.f32 %v2779_v59  ;;  %v3045_v59 = vpack.c.bf16 %v4032_v53, %v4031_v57 }
0x14c3   : > { %v4636_v60 = vpop.eup %4635 }
0x14c4   : > { %v2781_v61 = vsel %vm2494_vm4, %v4636_v60, 0.0 }
0x14c5   : > { %2782 = vadd.xlane.f32.xlu1 %v2781_v61 }
0x154e   : > { %v2783_v44 = vpop.xlane.xlu1 %2782 }
0x154f   : > { %4637 = vrcp.f32 %v2783_v44 }
0x155c   : > { %v4638_v4 = vpop.eup %4637 }
0x155d   : > { %v2785_v5 = vmul.f32 %v4638_v4, %v4636_v60 }
0x155f   : > { %v2786_v6 = vpack.c.bf16 %v2785_v5, %v2785_v5 }
0x1561   : > { %4446 = vmatmul.mubr.msk.bf16.vlgmr.msra.gmra.mxu1 %vm2494_vm4, %v2786_v6 }
0x1562   : > { %4456 = vmatpush3.bf16.msra.mxu1 %v2888_v7  ;;  %4457 = vmatprep.mubr.msk.bf16.mxu1 %vm4691_vm0, %v4690_v3 }
0x1563   : > { %4469 = vmatprep.subr.bf16.mxu1 %v4690_v3 }
0x1569   : > { %4458 = vmatmul.mubr.msk.bf16.vlgmr.msra.gmra.mxu1 %vm1101_vm2, %v2559_v13 }
0x156a   : > { %4470 = vmatpush3.bf16.msra.mxu1 %v2991_v12  ;;  %4473 = vmatprep.mubr.msk.bf16.mxu1 %vm4691_vm0, %v4690_v3 }
0x156b   : > { %4471 = vmatprep.subr.bf16.mxu1 %v4690_v3 }
0x156e   : > { %4472 = vmatpush3.bf16.msra.mxu1 %v2990_v18 }
0x156f   : > { %4485 = vmatprep.subr.bf16.mxu1 %v4690_v3 }
0x1571   : > { %4474 = vmatmul.mubr.msk.bf16.vlgmr.msra.gmra.mxu1 %vm949_vm1, %v5111_v0 }
0x1572   : > { %4487 = vmatprep.mubr.msk.bf16.mxu1 %vm4691_vm0, %v4690_v3 }
0x1621   : > { %v2828_v10 = vpop.f32.mrf.mxu1 }
0x1622   : > { %v2836_v22 = vpack.c.bf16 %v2828_v10, %v2828_v10  ;;  %v3211_v10 = vsel %vm1172_vm3, %v3206_v20, 0 }
0x1623   : > { %v4447_v25 = vpop.f32.mrf.mxu1 }
0x1624   : > { %4452 = vmatmul.mubr.msk.bf16.vlgmr.msra.gmra.mxu0 %vm1101_vm2, %v2836_v22  ;;  %v4044_v22 = vld [vmem:[%s4766_s6 + $0x70] sm:$0xff] }
0x1625   : > { %v2831_v26 = vpop.f32.mrf.mxu1  ;;  %4462 = vmatpush3.bf16.msra.mxu0 %v2936_v21  ;;  %4465 = vmatprep.mubr.msk.bf16.mxu0 %vm4691_vm0, %v4690_v3 }
0x1626   : > { %4463 = vmatprep.subr.bf16.mxu0 %v4690_v3  ;;  %v3260_v26 = vpack.c.bf16 %v4045_v23, %v4044_v22 }
0x1627   : > { %v4448_v27 = vpop.f32.mrf.mxu1 }
0x1628   : > { %v4042_v27 = vld [vmem:[%s4766_s6 + $0x60] sm:$0xff] }
0x1629   : > { %v5239_v28 = vpop.f32.mrf.mxu1  ;;  %4464 = vmatpush3.bf16.msra.mxu0 %v2935_v42 }
0x162a   : > { %4477 = vmatprep.subr.bf16.mxu0 %v4690_v3 }
0x162b   : > { %v4459_v29 = vpop.f32.mrf.mxu1 }
0x162c   : > { %4466 = vmatmul.mubr.msk.bf16.vlgmr.msra.gmra.mxu0 %vm949_vm1, %v5130_v17  ;;  %v4043_v29 = vld [vmem:[%s4766_s6 + $0x68] sm:$0xff] }
0x162d   : > { %v2927_v30 = vpop.f32.mrf.mxu1  ;;  %4481 = vmatprep.mubr.msk.bf16.mxu0 %vm4691_vm0, %v4690_v3  ;;  %4478 = vmatpush3.bf16.msra.mxu0 %v3046_v58 }
0x162e   : > { %4479 = vmatprep.subr.bf16.mxu0 %v4690_v3  ;;  %v3259_v30 = vpack.c.bf16 %v4043_v29, %v4042_v27 }
0x162f   : > { %v4460_v32 = vpop.f32.mrf.mxu1 }
0x1630   : > { %v4051_v32 = vld [vmem:[%s4776_s20 + $0x70] sm:$0xff] }
0x1631   : > { %v3034_v34 = vpop.f32.mrf.mxu1  ;;  %4480 = vmatpush3.bf16.msra.mxu0 %v3045_v59 }
0x1632   : > { %v3035_v35 = vadd.f32 %v4029_v33, %v3034_v34  ;;  %4491 = vmatprep.subr.bf16.mxu0 %v4690_v3  ;;  %v4052_v33 = vld [vmem:[%s4776_s20 + $0x78] sm:$0xff] }
0x1633   : > { %v4475_v36 = vpop.f32.mrf.mxu1 }
0x1634   : > { %v3096_v37 = vpack.c.bf16 %v3035_v35, %v3035_v35  ;;  %4482 = vmatmul.mubr.msk.bf16.vlgmr.msra.gmra.mxu0 %vm949_vm1, %v5111_v0  ;;  %v3315_v35 = vpack.c.bf16 %v4052_v33, %v4051_v32 }
0x1635   : > { %v3037_v38 = vpop.f32.mrf.mxu1  ;;  %4493 = vmatprep.mubr.msk.bf16.mxu0 %vm4691_vm0, %v4690_v3 }
0x1636   : > { %v3101_v39 = vsel %vm1101_vm2, %v3096_v37, 0  ;;  %v4049_v37 = vld [vmem:[%s4776_s20 + $0x60] sm:$0xff]  ;;  %v4050_v38 = vld [vmem:[%s4776_s20 + $0x68] sm:$0xff] }
0x1637   : > { %v4476_v40 = vpop.f32.mrf.mxu1  ;;  %4486 = vmatpush3.bf16.xpose.msra.mxu1 %v3101_v39 }
0x1638   : > { %4497 = vmatprep.subr.bf16.mxu1 %v4690_v3 }
0x16e4   : > { %v5249_v41 = vpop.f32.mrf.mxu0 }
0x16e6   : > { %v4453_v43 = vpop.f32.mrf.mxu0 }
0x16e7   : > { %v3314_v43 = vpack.c.bf16 %v4050_v38, %v4049_v37 }
0x16e8   : > { %v2881_v45 = vpop.f32.mrf.mxu0 }
0x16ea   : > { %v4454_v46 = vpop.f32.mrf.mxu0 }
0x16ec   : > { %v2979_v48 = vpop.f32.mrf.mxu0 }
0x16ed   : > { %v2980_v49 = vadd.f32 %v4022_v47, %v2979_v48 }
0x16ee   : > { %v4467_v50 = vpop.f32.mrf.mxu0 }
0x16ef   : > { %v3095_v51 = vpack.c.bf16 %v2980_v49, %v2980_v49  ;;  %v2925_v49 = vadd.f32 %v5239_v28, %v5249_v41 }
0x16f0   : > { %v2982_v52 = vpop.f32.mrf.mxu0 }
0x16f1   : > { %4488 = vmatmul.mubr.msk.bf16.vlgmr.msra.gmra.mxu1 %vm1101_vm2, %v3095_v51 }
0x16f2   : > { %v4468_v54 = vpop.f32.mrf.mxu0  ;;  %4499 = vmatprep.mubr.msk.bf16.mxu1 %vm4691_vm0, %v4690_v3  ;;  %4498 = vmatpush3.bf16.msra.mxu1 %v3211_v10 }
0x16f3   : > { %4511 = vmatprep.subr.bf16.mxu1 %v4690_v3 }
0x16f4   : > { %v3089_v2 = vpop.f32.mrf.mxu0 }
0x16f5   : > { %v3090_v4 = vadd.f32 %v4036_v1, %v3089_v2  ;;  %v4056_v1 = vld [vmem:[%s5410_s26 + $0x60] sm:$0xff] }
0x16f6   : > { %v4483_v5 = vpop.f32.mrf.mxu0 }
0x16f7   : > { %v3156_v6 = vpack.c.bf16 %v3090_v4, %v3090_v4  ;;  %v4057_v4 = vld [vmem:[%s5410_s26 + $0x68] sm:$0xff] }
0x16f8   : > { %v3092_v7 = vpop.f32.mrf.mxu0  ;;  %v3369_v5 = vpack.c.bf16 %v4057_v4, %v4056_v1  ;;  %v3696_v4 = vld [vmem:[%s5417_s16 + $0x70] sm:$0xff] }
0x16f9   : > { %v3161_v8 = vand.u32 %v3156_v6, %v5165_v9 }
0x16fa   : > { %v4484_v11 = vpop.f32.mrf.mxu0 }
0x16fb   : > { %4492 = vmatpush3.bf16.msra.mxu0 %v3161_v8 }
0x16fc   : > { %4503 = vmatprep.subr.bf16.mxu0 %v4690_v3 }
0x17b1   : > { %v3137_v60 = vpop.f32.mrf.mxu1 }
0x17b2   : > { %v3143_v61 = vmul.f32 0.35355338, %v3137_v60  ;;  %v4047_v60 = vld [vmem:[%s5409_s23 + $0x3] ss:$0 sm:$0xff] }
0x17b3   : > { %v4489_v62 = vpop.f32.mrf.mxu1 }
0x17b4   : > { %v3144_v63 = vsel %vm2494_vm4, %v3143_v61, -inf }
0x17b5   : > { %3145 = vmax.xlane.f32.xlu0 %v3144_v63  ;;  %v3140_v31 = vpop.f32.mrf.mxu1 }
0x17b6   : > { %v4058_v31 = vld [vmem:[%s5410_s26 + $0x70] sm:$0xff] }
0x17b7   : > { %v4490_v44 = vpop.f32.mrf.mxu1 }
0x17b8   : > { %v4059_v44 = vld [vmem:[%s5410_s26 + $0x78] sm:$0xff] }
0x17b9   : > { %v3370_v2 = vpack.c.bf16 %v4059_v44, %v4058_v31  ;;  %v4069_v31 = vld [vmem:[%s5416_s15] ss:$0 sm:$0xff] }
0x183e   : > { %v3146_v12 = vpop.xlane.xlu0 %3145 }
0x183f   : > { %v3147_v13 = vsub.f32 %v3143_v61, %v3146_v12 }
0x1841   : > { %v3148_v14 = vmul.f32 1.442695, %v3147_v13 }
0x1843   : > { %4639 = vpow2.f32 %v3148_v14  ;;  %v4061_v14 = vld [vmem:[%s5411_s28 + $0x3] ss:$0 sm:$0xff] }
0x1850   : > { %v4640_v15 = vpop.eup %4639 }
0x1851   : > { %v3150_v18 = vsel %vm2494_vm4, %v4640_v15, 0.0 }
0x1852   : > { %3151 = vadd.xlane.f32.xlu1 %v3150_v18 }
0x18db   : > { %v3152_v21 = vpop.xlane.xlu1 %3151 }
0x18dc   : > { %4641 = vrcp.f32 %v3152_v21 }
0x18e9   : > { %v4642_v24 = vpop.eup %4641 }
0x18ea   : > { %v3154_v25 = vmul.f32 %v4642_v24, %v4640_v15 }
0x18ec   : > { %v3155_v42 = vpack.c.bf16 %v3154_v25, %v3154_v25 }
0x18ee   : > { %4494 = vmatmul.mubr.msk.bf16.vlgmr.msra.gmra.mxu0 %vm2494_vm4, %v3155_v42  ;;  %v4065_v42 = vld [vmem:[%s5412_s1 + $0x18] sm:$0xff] }
0x18ef   : > { %4504 = vmatpush3.bf16.msra.mxu0 %v3260_v26  ;;  %4507 = vmatprep.mubr.msk.bf16.mxu0 %vm4691_vm0, %v4690_v3  ;;  %v3530_v27 = vpack.c.bf16 %v4065_v42, %v4065_v42  ;;  %v3682_v42 = vld [vmem:[%s5417_s16] sm:$0xff] }
0x18f0   : > { %4505 = vmatprep.subr.bf16.mxu0 %v4690_v3 }
0x18f1   : > { %v3535_v29 = vsel %vm1172_vm3, %v3530_v27, 0  ;;  %v3683_v27 = vld [vmem:[%s5417_s16 + $0x8] sm:$0xff] }
0x18f3   : > { %4506 = vmatpush3.bf16.msra.mxu0 %v3259_v30 }
0x18f4   : > { %4519 = vmatprep.subr.bf16.mxu0 %v4690_v3 }
0x18f6   : > { %4508 = vmatmul.mubr.msk.bf16.vlgmr.msra.gmra.mxu0 %vm949_vm1, %v5130_v17 }
0x18f7   : > { %4523 = vmatprep.mubr.msk.bf16.mxu0 %vm4691_vm0, %v4690_v3  ;;  %4520 = vmatpush3.bf16.msra.mxu0 %v3370_v2 }
0x18f8   : > { %4521 = vmatprep.subr.bf16.mxu0 %v4690_v3 }
0x18fb   : > { %4522 = vmatpush3.bf16.msra.mxu0 %v3369_v5  ;;  %v3697_v5 = vld [vmem:[%s5417_s16 + $0x78] sm:$0xff] }
0x18fc   : > { %4533 = vmatprep.subr.bf16.mxu0 %v4690_v3 }
0x18fe   : > { %4524 = vmatmul.mubr.msk.bf16.vlgmr.msra.gmra.mxu0 %vm949_vm1, %v5111_v0 }
0x18ff   : > { %4535 = vmatprep.mubr.msk.bf16.mxu0 %vm4691_vm0, %v4690_v3 }
0x19ae   : > { %v3197_v34 = vpop.f32.mrf.mxu0 }
0x19af   : > { %v3205_v36 = vpack.c.bf16 %v3197_v34, %v3197_v34 }
0x19b0   : > { %v4495_v39 = vpop.f32.mrf.mxu0 }
0x19b1   : > { %4500 = vmatmul.mubr.msk.bf16.vlgmr.msra.gmra.mxu1 %vm1101_vm2, %v3205_v36 }
0x19b2   : > { %v3200_v40 = vpop.f32.mrf.mxu0  ;;  %4512 = vmatpush3.bf16.msra.mxu1 %v3315_v35  ;;  %4515 = vmatprep.mubr.msk.bf16.mxu1 %vm4691_vm0, %v4690_v3 }
0x19b3   : > { %4513 = vmatprep.subr.bf16.mxu1 %v4690_v3  ;;  %v4067_v40 = vld [vmem:[%s5413_s2] ss:$0 sm:$0xff]  ;;  %s928_s2 = scalar_lea.vmem %s4846_s4, %s4870_s0 }
0x19b4   : > { %v4496_v17 = vpop.f32.mrf.mxu0 }
0x19b6   : > { %v3303_v45 = vpop.f32.mrf.mxu0  ;;  %4514 = vmatpush3.bf16.msra.mxu1 %v3314_v43 }
0x19b7   : > { %4527 = vmatprep.subr.bf16.mxu1 %v4690_v3  ;;  %v3304_v41 = vadd.f32 %v4047_v60, %v3303_v45 }
0x19b8   : > { %v4509_v46 = vpop.f32.mrf.mxu0 }
0x19b9   : > { %4516 = vmatmul.mubr.msk.bf16.vlgmr.msra.gmra.mxu1 %vm949_vm1, %v5111_v0  ;;  %v3419_v63 = vpack.c.bf16 %v3304_v41, %v3304_v41  ;;  %v4068_v41 = vld [vmem:[%s5415_s11] ss:$0 sm:$0xff] }
0x19ba   : > { %v3306_v47 = vpop.f32.mrf.mxu0  ;;  %4529 = vmatprep.mubr.msk.bf16.mxu1 %vm4691_vm0, %v4690_v3 }
0x19bc   : > { %v4510_v48 = vpop.f32.mrf.mxu0 }
0x19be   : > { %v3413_v15 = vpop.f32.mrf.mxu0 }
0x19bf   : > { %v3414_v18 = vadd.f32 %v4061_v14, %v3413_v15  ;;  %v3690_v15 = vld [vmem:[%s5417_s16 + $0x40] sm:$0xff] }
0x19c0   : > { %v4525_v19 = vpop.f32.mrf.mxu0 }
0x19c1   : > { %v3480_v20 = vpack.c.bf16 %v3414_v18, %v3414_v18  ;;  %v3691_v18 = vld [vmem:[%s5417_s16 + $0x48] sm:$0xff]  ;;  %v3688_v19 = vld [vmem:[%s5417_s16 + $0x30] sm:$0xff] }
0x19c2   : > { %v3416_v10 = vpop.f32.mrf.mxu0 }
0x19c3   : > { %v3485_v0 = vand.u32 %v3480_v20, %v5165_v9  ;;  %v3703_v20 = vpack.c.bf16 %v3691_v18, %v3690_v15  ;;  %v3689_v10 = vld [vmem:[%s5417_s16 + $0x38] sm:$0xff] }
0x19c4   : > { %v4526_v21 = vpop.f32.mrf.mxu0 }
0x19c5   : > { %4534 = vmatpush3.bf16.msra.mxu0 %v3485_v0  ;;  %v3702_v0 = vpack.c.bf16 %v3689_v10, %v3688_v19  ;;  %v3686_v21 = vld [vmem:[%s5417_s16 + $0x20] sm:$0xff] }
0x19c6   : > { %4545 = vmatprep.subr.bf16.mxu0 %v4690_v3 }
0x1a71   : > { %v3247_v50 = vpop.f32.mrf.mxu1 }
0x1a72   : > { %v5301_v51 = vadd.f32 %v3247_v50, %v2925_v49 }
0x1a73   : > { %v4501_v52 = vpop.f32.mrf.mxu1 }
0x1a75   : > { %v3250_v54 = vpop.f32.mrf.mxu1 }
0x1a77   : > { %v4502_v55 = vpop.f32.mrf.mxu1 }
0x1a79   : > { %v3358_v57 = vpop.f32.mrf.mxu1 }
0x1a7a   : > { %v3359_v58 = vadd.f32 %v4054_v56, %v3358_v57  ;;  %v3619_v57 = vld [vmem:[%s5414_s10 + $0x18] sm:$0xff] }
0x1a7b   : > { %v4517_v53 = vpop.f32.mrf.mxu1 }
0x1a7c   : > { %v3420_v59 = vpack.c.bf16 %v3359_v58, %v3359_v58  ;;  %v3616_v53 = vld [vmem:[%s5414_s10] sm:$0xff] }
0x1a7d   : > { %v3361_v61 = vpop.f32.mrf.mxu1 }
0x1a7e   : > { %v3425_v62 = vsel %vm1101_vm2, %v3420_v59, 0  ;;  %v3617_v59 = vld [vmem:[%s5414_s10 + $0x8] sm:$0xff] }
0x1a7f   : > { %v4518_v28 = vpop.f32.mrf.mxu1  ;;  %4528 = vmatpush3.bf16.xpose.msra.mxu1 %v3425_v62 }
0x1a80   : > { %4539 = vmatprep.subr.bf16.mxu1 %v4690_v3 }
0x1a86   : > { %4530 = vmatmul.mubr.msk.bf16.vlgmr.msra.gmra.mxu1 %vm1101_vm2, %v3419_v63 }
0x1a87   : > { %4541 = vmatprep.mubr.msk.bf16.mxu1 %vm4691_vm0, %v4690_v3  ;;  %4540 = vmatpush3.bf16.msra.mxu1 %v3535_v29  ;;  %v3699_v29 = vpack.c.bf16 %v3683_v27, %v3682_v42 }
0x1a88   : > { %4553 = vmatprep.subr.bf16.mxu1 %v4690_v3 }
0x1b46   : > { %v3461_v6 = vpop.f32.mrf.mxu1 }
0x1b47   : > { %v3467_v7 = vmul.f32 0.35355338, %v3461_v6  ;;  %v3706_v6 = vpack.c.bf16 %v3697_v5, %v3696_v4 }
0x1b48   : > { %v4531_v8 = vpop.f32.mrf.mxu1 }
0x1b49   : > { %v3468_v11 = vsel %vm2494_vm4, %v3467_v7, -inf  ;;  %v3695_v8 = vld [vmem:[%s5417_s16 + $0x68] sm:$0xff] }
0x1b4a   : > { %3469 = vmax.xlane.f32.xlu0 %v3468_v11  ;;  %v3464_v12 = vpop.f32.mrf.mxu1 }
0x1b4b   : > { %v3692_v12 = vld [vmem:[%s5417_s16 + $0x50] sm:$0xff] }
0x1b4c   : > { %v4532_v13 = vpop.f32.mrf.mxu1 }
0x1b4d   : > { %v3693_v13 = vld [vmem:[%s5417_s16 + $0x58] sm:$0xff] }
0x1b4e   : > { %v3704_v14 = vpack.c.bf16 %v3693_v13, %v3692_v12 }
0x1bd3   : > { %v3470_v22 = vpop.xlane.xlu0 %3469 }
0x1bd4   : > { %v3471_v23 = vsub.f32 %v3467_v7, %v3470_v22  ;;  %v3694_v7 = vld [vmem:[%s5417_s16 + $0x60] sm:$0xff]  ;;  %v3687_v22 = vld [vmem:[%s5417_s16 + $0x28] sm:$0xff] }
0x1bd5   : > { %v3705_v11 = vpack.c.bf16 %v3695_v8, %v3694_v7 }
0x1bd6   : > { %v3472_v24 = vmul.f32 1.442695, %v3471_v23  ;;  %v3701_v23 = vpack.c.bf16 %v3687_v22, %v3686_v21 }
0x1bd8   : > { %4643 = vpow2.f32 %v3472_v24  ;;  %v3684_v24 = vld [vmem:[%s5417_s16 + $0x10] sm:$0xff] }
0x1be5   : > { %v4644_v25 = vpop.eup %4643 }
0x1be6   : > { %v3474_v26 = vsel %vm2494_vm4, %v4644_v25, 0.0 }
0x1be7   : > { %3475 = vadd.xlane.f32.xlu1 %v3474_v26 }
0x1c70   : > { %v3476_v9 = vpop.xlane.xlu1 %3475 }
0x1c71   : > { %4645 = vrcp.f32 %v3476_v9  ;;  %v4070_v9 = vld [vmem:[%s5418_s18] ss:$0 sm:$0xff] }
0x1c7e   : > { %v4646_v30 = vpop.eup %4645 }
0x1c7f   : > { %v3478_v32 = vmul.f32 %v4646_v30, %v4644_v25  ;;  %v3685_v25 = vld [vmem:[%s5417_s16 + $0x18] sm:$0xff] }
0x1c80   : > { %v3700_v26 = vpack.c.bf16 %v3685_v25, %v3684_v24 }
0x1c81   : > { %v3479_v33 = vpack.c.bf16 %v3478_v32, %v3478_v32 }
0x1c83   : > { %4536 = vmatmul.mubr.msk.bf16.vlgmr.msra.gmra.mxu0 %vm2494_vm4, %v3479_v33 }
0x1c84   : > { %4549 = vmatprep.mubr.msk.bf16.mxu0 %vm4691_vm0, %v4690_v3 }
0x1d43   : > { %v3521_v34 = vpop.f32.mrf.mxu0 }
0x1d44   : > { %v3529_v35 = vpack.c.bf16 %v3521_v34, %v3521_v34 }
0x1d45   : > { %v4537_v36 = vpop.f32.mrf.mxu0 }
0x1d46   : > { %4542 = vmatmul.mubr.msk.bf16.vlgmr.msra.gmra.mxu1 %vm1101_vm2, %v3529_v35 }
0x1d47   : > { %v3524_v37 = vpop.f32.mrf.mxu0  ;;  %4569 = vmatprep.mubr.msk.bf16.mxu1 %vm4691_vm0, %v4690_v3  ;;  %4554 = vmatpush3.bf16.msra.mxu1 %v3706_v6 }
0x1d48   : > { %4555 = vmatprep.subr.bf16.mxu1 %v4690_v3 }
0x1d49   : > { %v4538_v38 = vpop.f32.mrf.mxu0 }
0x1d4b   : > { %4556 = vmatpush3.bf16.msra.mxu1 %v3705_v11 }
0x1d4c   : > { %4557 = vmatprep.subr.bf16.mxu1 %v4690_v3 }
0x1d4f   : > { %4558 = vmatpush3.bf16.msra.mxu1 %v3704_v14 }
0x1d50   : > { %4559 = vmatprep.subr.bf16.mxu1 %v4690_v3 }
0x1d53   : > { %4560 = vmatpush3.bf16.msra.mxu1 %v3703_v20 }
0x1d54   : > { %4561 = vmatprep.subr.bf16.mxu1 %v4690_v3 }
0x1d57   : > { %4562 = vmatpush3.bf16.msra.mxu1 %v3702_v0 }
0x1d58   : > { %4563 = vmatprep.subr.bf16.mxu1 %v4690_v3 }
0x1d5b   : > { %4564 = vmatpush3.bf16.msra.mxu1 %v3701_v23 }
0x1d5c   : > { %4565 = vmatprep.subr.bf16.mxu1 %v4690_v3 }
0x1d5f   : > { %4566 = vmatpush3.bf16.msra.mxu1 %v3700_v26 }
0x1d60   : > { %4567 = vmatprep.subr.bf16.mxu1 %v4690_v3 }
0x1d63   : > { %4568 = vmatpush3.bf16.msra.mxu1 %v3699_v29 }
0x1e06   : > { %v3571_v39 = vpop.f32.mrf.mxu1 }
0x1e07   : > { %v3577_v43 = vadd.f32 %v3571_v39, %v5301_v51  ;;  %v3618_v51 = vld [vmem:[%s5414_s10 + $0x10] sm:$0xff] }
0x1e08   : > { %v4543_v17 = vpop.f32.mrf.mxu1  ;;  %v3622_v58 = vpack.c.bf16 %v3619_v57, %v3618_v51 }
0x1e09   : > { %v3585_v45 = vadd.f32 %v4067_v40, %v3577_v43 }
0x1e0a   : > { %v3574_v46 = vpop.f32.mrf.mxu1  ;;  %4546 = vmatpush3.bf16.msra.mxu0 %v3622_v58 }
0x1e0b   : > { %v3586_v47 = vadd.f32 %v3585_v45, %v5126_v16  ;;  %v3621_v16 = vpack.c.bf16 %v3617_v59, %v3616_v53  ;;  %4547 = vmatprep.subr.bf16.mxu0 %v4690_v3  ;;  %v4072_v3 = vld [vmem:[%s4831_s12] ss:$0 sm:$0xff] }
0x1e0c   : > { %v4544_v48 = vpop.f32.mrf.mxu1 }
0x1e0d   : > { %v3589_v49 = vsel %vm949_vm1, %v3586_v47, 0.0 }
0x1e0e   : > { %3590 = vadd.xlane.f32.xlu0 %v3589_v49  ;;  %4548 = vmatpush3.bf16.msra.mxu0 %v3621_v16 }
0x1e97   : > { %v3591_v50 = vpop.xlane.xlu0 %3590 }
0x1e98   : > { %v3592_v52 = vmul.f32 0.03125, %v3591_v50 }
0x1e9a   : > { %v3593_v54 = vsub.f32 %v3586_v47, %v3592_v52 }
0x1e9c   : > { %v3594_v55 = vmul.f32 %v3593_v54, %v3593_v54 }
0x1e9e   : > { %v3595_v56 = vsel %vm949_vm1, %v3594_v55, 0.0 }
0x1e9f   : > { %3596 = vadd.xlane.f32.xlu1 %v3595_v56 }
0x1f28   : > { %v3597_v60 = vpop.xlane.xlu1 %3596 }
0x1f29   : > { %v3598_v61 = vmul.f32 0.03125, %v3597_v60 }
0x1f2b   : > { %v3599_v62 = vadd.f32 1e-12, %v3598_v61 }
0x1f2d   : > { %4647 = vrsqrt.f32 %v3599_v62 }
0x1f3a   : > { %v4648_v28 = vpop.eup %4647 }
0x1f3b   : > { %v3601_v63 = vmul.f32 %v4648_v28, %v3593_v54  ;;  %v4073_v28 = vld [vmem:[%s4836_s30] ss:$0 sm:$0xff] }
0x1f3d   : > { %v3608_v44 = vmul.f32 %v4068_v41, %v3601_v63  ;;  %v4074_v63 = vld [vmem:[%s4841_s27] ss:$0 sm:$0xff] }
0x1f3f   : > { %v5346_v1 = vadd.f32 %v4069_v31, %v3608_v44 }
0x1f41   : > { %v3620_v2 = vpack.c.bf16 %v5346_v1, %v5346_v1 }
0x1f43   : > { %4550 = vmatmul.mubr.msk.bf16.vlgmr.msra.gmra.mxu0 %vm949_vm1, %v3620_v2 }
0x2003   : > { %v3667_v30 = vpop.f32.mrf.mxu0 }
0x2004   : > { %v3668_v32 = vadd.f32 %v4070_v9, %v3667_v30 }
0x2005   : > { %v4551_v33 = vpop.f32.mrf.mxu0 }
0x2006   : > { %v3673_v34 = vmul.f32 %v3668_v32, %v3668_v32 }
0x2007   : > { %v3670_v35 = vpop.f32.mrf.mxu0 }
0x2008   : > { %v3674_v36 = vmul.f32 %v3673_v34, %v3668_v32 }
0x2009   : > { %v4552_v37 = vpop.f32.mrf.mxu0 }
0x200a   : > { %v3675_v38 = vmul.f32 0.044715, %v3674_v36 }
0x200c   : > { %v3676_v39 = vadd.f32 %v3675_v38, %v3668_v32 }
0x200e   : > { %v3677_v40 = vmul.f32 0.7978846, %v3676_v39 }
0x2010   : > { %4649 = vtanh.f32 %v3677_v40 }
0x201d   : > { %v4650_v43 = vpop.eup %4649 }
0x201e   : > { %v3679_v17 = vadd.f32 1.0, %v4650_v43 }
0x2020   : > { %v3680_v45 = vmul.f32 0.5, %v3679_v17 }
0x2022   : > { %v3681_v46 = vmul.f32 %v3680_v45, %v3668_v32 }
0x2024   : > { %v3698_v47 = vpack.c.bf16 %v3681_v46, %v3681_v46 }
0x2026   : > { %4570 = vmatmul.mubr.bf16.vlgmr.msra.gmra.mxu1 %v3698_v47 }
0x20e6   : > { %v3748_v48 = vpop.f32.mrf.mxu1 }
0x20e7   : > { %v3749_v49 = vadd.f32 %v4072_v3, %v3748_v48 }
0x20e8   : > { %v4571_v50 = vpop.f32.mrf.mxu1 }
0x20e9   : > { %v3754_v52 = vadd.f32 %v3749_v49, %v5346_v1 }
0x20ea   : > { %v3751_v54 = vpop.f32.mrf.mxu1 }
0x20eb   : > { %v3757_v55 = vsel %vm949_vm1, %v3754_v52, 0.0 }
0x20ec   : > { %3758 = vadd.xlane.f32.xlu0 %v3757_v55  ;;  %v4572_v56 = vpop.f32.mrf.mxu1 }
0x2175   : > { %v3759_v51 = vpop.xlane.xlu0 %3758 }
0x2176   : > { %v3760_v57 = vmul.f32 0.03125, %v3759_v51 }
0x2178   : > { %v3761_v58 = vsub.f32 %v3754_v52, %v3760_v57 }
0x217a   : > { %v3762_v53 = vmul.f32 %v3761_v58, %v3761_v58 }
0x217c   : > { %v3763_v59 = vsel %vm949_vm1, %v3762_v53, 0.0 }
0x217d   : > { %3764 = vadd.xlane.f32.xlu1 %v3763_v59 }
0x2206   : > { %v3765_v16 = vpop.xlane.xlu1 %3764 }
0x2207   : > { %v3766_v60 = vmul.f32 0.03125, %v3765_v16 }
0x2209   : > { %v3767_v61 = vadd.f32 1e-12, %v3766_v60 }
0x220b   : > { %4651 = vrsqrt.f32 %v3767_v61 }
0x2218   : > { %v4652_v62 = vpop.eup %4651 }
0x2219   : > { %v3769_v41 = vmul.f32 %v4652_v62, %v3761_v58 }
0x221b   : > { %v3776_v31 = vmul.f32 %v4073_v28, %v3769_v41 }
0x221d   : > { %v3783_v44 = vadd.f32 %v4074_v63, %v3776_v31 }
0x221f   : > { %3784 = vst.msk [vmem:[%s928_s2] sm:$0xff] %vm949_vm1, %v3783_v44 }
0x2220 PF: > { %s69_s7 = sadd.s32 1, %s4659_s7  }
0x2221   : > { %p66_p4 = scmp.ge.s32.totalorder %s69_s7, 4  }
0x2223   :  { %68 = sbr.rel (!%p66_p4) target bundleno = 43 (0x2b), region = 243 }

</bundles_post_ra>
